<compile_context>
chip_gen: v7x
topology: tpu7x:2x2x1
jax: 0.10.0
libtpu: 0.0.40
codegen_flags: <defaults>
</compile_context>

<pallas_src>
import functools

import jax
import jax.numpy as jnp
from jax.experimental import pallas as pl
from jax.experimental.pallas import tpu as pltpu

_VMEM_LIMIT = 32 * 1024 * 1024  # safe on v5e/v6e/v7x; blocks are far smaller


# ----------------------------------------------------------------------------
# Pallas kernels
# ----------------------------------------------------------------------------
def _conv3x3_bias_leaky_kernel(x0_ref, x1_ref, x2_ref, w_ref, b_ref, o_ref):
    """3x3 conv (stride 1, pad 1) + folded-BN bias + LeakyReLU(0.1).

    x{0,1,2}_ref: (1, TH, W+2, Cin) bf16 -- dy-shifted row tiles (dy=0,1,2).
    w_ref:        (3, 3, Cin, Cout)  bf16 -- BN scale already folded in.
    b_ref:        (1, Cout)          f32.
    o_ref:        (1, TH, W, Cout)   bf16.
    """
    th = o_ref.shape[1]
    wout = o_ref.shape[2]
    cout = o_ref.shape[3]
    bias = b_ref[...]                                        # (1, Cout) f32
    wk = [[w_ref[dy, dx] for dx in range(3)] for dy in range(3)]
    for t in range(th):                                      # static unroll
        rows = (x0_ref[0, t], x1_ref[0, t], x2_ref[0, t])    # each (W+2, Cin)
        acc = jnp.zeros((wout, cout), jnp.float32)
        for dy in range(3):
            r = rows[dy]
            for dx in range(3):
                acc = acc + jnp.dot(r[dx:dx + wout, :], wk[dy][dx],
                                    preferred_element_type=jnp.float32)
        y = acc + bias
        o_ref[0, t] = jnp.where(y > 0, y, 0.1 * y).astype(o_ref.dtype)


def _dual_matmul_bias_leaky_kernel(a_ref, b_ref, wa_ref, wb_ref, bias_ref,
                                   o_ref):
    """1x1 conv over concat([a, b], channel) + bias + LeakyReLU (concat fused)."""
    acc = jnp.dot(a_ref[...], wa_ref[...], preferred_element_type=jnp.float32)
    acc = acc + jnp.dot(b_ref[...], wb_ref[...],
                        preferred_element_type=jnp.float32)
    y = acc + bias_ref[...]
    o_ref[...] = jnp.where(y > 0, y, 0.1 * y).astype(o_ref.dtype)


def _pool_concat_kernel(a_ref, b_ref, o_ref):
    """2x2/2 max-pool of channel-concat([a, b]); concat fused into the store.

    a_ref/b_ref: (1, 2, Wo, 2*C) bf16 -- two input rows, width pre-folded so
    lane block [0:C] = even column, [C:2C] = odd column of each pixel pair.
    o_ref:       (1, 1, Wo, Ca+Cb) f32 -- one pooled output row.
    """
    ca = a_ref.shape[3] // 2
    cb = b_ref.shape[3] // 2

    def pool(ref, c):
        rm = jnp.maximum(ref[0, 0], ref[0, 1])               # (Wo, 2c)
        return jnp.maximum(rm[:, :c], rm[:, c:])             # (Wo, c)

    pooled = jnp.concatenate([pool(a_ref, ca), pool(b_ref, cb)], axis=-1)
    o_ref[0, 0] = pooled.astype(o_ref.dtype)


# ----------------------------------------------------------------------------
# Wrappers (BN folding + layout plumbing; no heavy HBM glue)
# ----------------------------------------------------------------------------
def _fold_bn(w_hwio, bn_params):
    gamma, beta, mean, var = bn_params
    scale = gamma / jnp.sqrt(var + 1e-5)
    bias = (beta - mean * scale).astype(jnp.float32).reshape(1, -1)
    w_folded = (w_hwio * scale).astype(jnp.bfloat16)
    return w_folded, bias


def conv3x3_bn_leaky(x_nhwc, w_hwio, bn_params):
    """BasicConv(k=3, s=1, p=1) + BN + LeakyReLU(0.1), NHWC in/out (bf16)."""
    w, bias = _fold_bn(w_hwio, bn_params)                    # (3,3,Cin,Cout)
    N, H, W, Cin = x_nhwc.shape
    Cout = w.shape[-1]

    xb = x_nhwc.astype(jnp.bfloat16)
    xp = jnp.pad(xb, ((0, 0), (1, 1), (1, 1), (0, 0)))       # (N, H+2, W+2, Cin)
    views = [xp[:, d:d + H] for d in range(3)]               # dy-shifted views

    TH = next(t for t in (8, 4, 2, 1) if H % t == 0)
    grid = (N, H // TH)

    def row_map(n, yb):
        return (n, yb, 0, 0)

    out = pl.pallas_call(
        _conv3x3_bias_leaky_kernel,
        out_shape=jax.ShapeDtypeStruct((N, H, W, Cout), jnp.bfloat16),
        grid_spec=pltpu.PrefetchScalarGridSpec(
            num_scalar_prefetch=0,
            grid=grid,
            in_specs=[pl.BlockSpec((1, TH, W + 2, Cin), row_map)] * 3 + [
                pl.BlockSpec((3, 3, Cin, Cout), lambda n, yb: (0, 0, 0, 0)),
                pl.BlockSpec((1, Cout), lambda n, yb: (0, 0)),
            ],
            out_specs=pl.BlockSpec((1, TH, W, Cout), row_map),
        ),
        compiler_params=pltpu.CompilerParams(
            dimension_semantics=("parallel", "parallel"),
            vmem_limit_bytes=_VMEM_LIMIT),
    )(*views, w, bias)
    return out


def conv1x1_pair_bn_leaky(xa, xb, w_hwio, bn_params):
    """BasicConv(k=1) applied to concat([xa, xb], channel) -- concat fused."""
    wf, bias = _fold_bn(w_hwio, bn_params)                   # (1,1,Cin,Cout)
    wf = wf[0, 0]                                            # (Cin, Cout)
    N, H, W, Ca = xa.shape
    Cb = xb.shape[-1]
    Cout = wf.shape[-1]
    wa, wb = wf[:Ca], wf[Ca:]

    M = N * H * W
    TM = 256
    Mp = ((M + TM - 1) // TM) * TM                           # pad rows, no TM=M fallback
    am = xa.astype(jnp.bfloat16).reshape(M, Ca)
    bm = xb.astype(jnp.bfloat16).reshape(M, Cb)
    if Mp != M:
        am = jnp.pad(am, ((0, Mp - M), (0, 0)))
        bm = jnp.pad(bm, ((0, Mp - M), (0, 0)))

    out = pl.pallas_call(
        _dual_matmul_bias_leaky_kernel,
        out_shape=jax.ShapeDtypeStruct((Mp, Cout), jnp.bfloat16),
        grid_spec=pltpu.PrefetchScalarGridSpec(
            num_scalar_prefetch=0,
            grid=(Mp // TM,),
            in_specs=[
                pl.BlockSpec((TM, Ca), lambda i: (i, 0)),
                pl.BlockSpec((TM, Cb), lambda i: (i, 0)),
                pl.BlockSpec((Ca, Cout), lambda i: (0, 0)),
                pl.BlockSpec((Cb, Cout), lambda i: (0, 0)),
                pl.BlockSpec((1, Cout), lambda i: (0, 0)),
            ],
            out_specs=pl.BlockSpec((TM, Cout), lambda i: (i, 0)),
        ),
        compiler_params=pltpu.CompilerParams(
            dimension_semantics=("parallel",),
            vmem_limit_bytes=_VMEM_LIMIT),
    )(am, bm, wa, wb, bias)
    return out[:M].reshape(N, H, W, Cout)


def maxpool_concat(route, feat):
    """2x2/2 max-pool of concat([route, feat], channel), concat + pool fused."""
    N, H, W, Ca = route.shape
    Cb = feat.shape[-1]
    Ho, Wo = H // 2, W // 2
    # Contiguous (free) reshape: (H, W, C) -> (H, Wo, 2C); lane block [0:C] is
    # the even column, [C:2C] the odd column of each width pair.
    a = route.astype(jnp.bfloat16).reshape(N, H, Wo, 2 * Ca)
    b = feat.astype(jnp.bfloat16).reshape(N, H, Wo, 2 * Cb)

    out = pl.pallas_call(
        _pool_concat_kernel,
        out_shape=jax.ShapeDtypeStruct((N, Ho, Wo, Ca + Cb), jnp.float32),
        grid_spec=pltpu.PrefetchScalarGridSpec(
            num_scalar_prefetch=0,
            grid=(N, Ho),
            in_specs=[
                pl.BlockSpec((1, 2, Wo, 2 * Ca), lambda n, i: (n, i, 0, 0)),
                pl.BlockSpec((1, 2, Wo, 2 * Cb), lambda n, i: (n, i, 0, 0)),
            ],
            out_specs=pl.BlockSpec((1, 1, Wo, Ca + Cb),
                                   lambda n, i: (n, i, 0, 0)),
        ),
        compiler_params=pltpu.CompilerParams(
            dimension_semantics=("parallel", "parallel"),
            vmem_limit_bytes=_VMEM_LIMIT),
    )(a, b)
    return out


# ----------------------------------------------------------------------------
# Resblock_body
# ----------------------------------------------------------------------------
def init_basic_conv(key, cin, cout, ksize):
    kw, kg, kb, km, kv = jax.random.split(key, 5)
    w = 0.2 * jax.random.normal(kw, (ksize, ksize, cin, cout), jnp.float32)
    gamma = 1.0 + 0.1 * jax.random.normal(kg, (cout,), jnp.float32)
    beta = 0.1 * jax.random.normal(kb, (cout,), jnp.float32)
    mean = 0.1 * jax.random.normal(km, (cout,), jnp.float32)
    var = 0.5 + 0.5 * jnp.abs(jax.random.normal(kv, (cout,), jnp.float32))
    return dict(w=w, bn=(gamma, beta, mean, var), ksize=ksize)


def init_resblock_body(key, in_channels, out_channels):
    k1, k2, k3, k4 = jax.random.split(key, 4)
    return dict(
        conv1=init_basic_conv(k1, in_channels, out_channels, 3),
        conv2=init_basic_conv(k2, out_channels // 2, out_channels // 2, 3),
        conv3=init_basic_conv(k3, out_channels // 2, out_channels // 2, 3),
        conv4=init_basic_conv(k4, out_channels, out_channels, 1),
        out_channels=out_channels,
    )


def resblock_body_forward(params, x_nchw):
    """Returns (pooled, feat), both NCHW f32, matching the PyTorch forward."""
    c = params["out_channels"]
    x = jnp.transpose(x_nchw, (0, 2, 3, 1))                  # NCHW -> NHWC

    p1 = params["conv1"]
    route = conv3x3_bn_leaky(x, p1["w"], p1["bn"])           # (N,H,W,c) bf16

    x2_in = route[..., c // 2:]                              # split(.., dim=1)[1]
    p2 = params["conv2"]
    route1 = conv3x3_bn_leaky(x2_in, p2["w"], p2["bn"])      # (N,H,W,c/2)

    p3 = params["conv3"]
    x3 = conv3x3_bn_leaky(route1, p3["w"], p3["bn"])         # (N,H,W,c/2)

    # conv4 over cat([x3, route1], channel) -- concat fused in the kernel.
    p4 = params["conv4"]
    feat = conv1x1_pair_bn_leaky(x3, route1, p4["w"], p4["bn"])  # (N,H,W,c)

    # maxpool over cat([route, feat], channel) -- concat fused in the kernel.
    pooled = maxpool_concat(route, feat)                     # (N,Ho,Wo,2c) f32

    pooled_nchw = jnp.transpose(pooled, (0, 3, 1, 2)).astype(jnp.float32)
    feat_nchw = jnp.transpose(feat.astype(jnp.float32), (0, 3, 1, 2))
    return pooled_nchw, feat_nchw


# ----------------------------------------------------------------------------
# Pure-JAX f32 reference (structural sanity check)
# ----------------------------------------------------------------------------
def _ref_basic_conv(x, p):
    gamma, beta, mean, var = p["bn"]
    pad = p["ksize"] // 2
    y = jax.lax.conv_general_dilated(
        x, p["w"], (1, 1), ((pad, pad), (pad, pad)),
        dimension_numbers=("NHWC", "HWIO", "NHWC"))
    scale = gamma / jnp.sqrt(var + 1e-5)
    y = y * scale + (beta - mean * scale)
    return jnp.where(y > 0, y, 0.1 * y)


def _ref_forward(params, x_nchw):
    c = params["out_channels"]
    x = jnp.transpose(x_nchw, (0, 2, 3, 1))
    x = _ref_basic_conv(x, params["conv1"])
    route = x
    x = x[..., c // 2:]
    x = _ref_basic_conv(x, params["conv2"])
    route1 = x
    x = _ref_basic_conv(x, params["conv3"])
    x = jnp.concatenate([x, route1], axis=-1)
    x = _ref_basic_conv(x, params["conv4"])
    feat = x
    x = jnp.concatenate([route, x], axis=-1)
    N, H, W, C = x.shape
    x = x.reshape(N, H // 2, 2, W // 2, 2, C).max(axis=(2, 4))
    return jnp.transpose(x, (0, 3, 1, 2)), jnp.transpose(feat, (0, 3, 1, 2))


# ----------------------------------------------------------------------------
if __name__ == "__main__":
    key = jax.random.PRNGKey(0)
    kx, kp = jax.random.split(key)

    batch, in_channels, out_channels, spatial = 2, 4, 8, 16
    x = jax.random.normal(kx, (batch, in_channels, spatial, spatial),
                          jnp.float32)
    params = init_resblock_body(kp, in_channels, out_channels)

    fwd = jax.jit(functools.partial(resblock_body_forward, params))
    pooled, feat = fwd(x)
    jax.block_until_ready((pooled, feat))

    assert pooled.shape == (batch, 2 * out_channels, spatial // 2, spatial // 2)
    assert feat.shape == (batch, out_channels, spatial, spatial)

    # sanity check vs. pure-JAX f32 reference (kernels use bf16 MXU inputs)
    pooled_ref, feat_ref = _ref_forward(params, x)
    assert jnp.allclose(pooled, pooled_ref, atol=5e-2, rtol=5e-2)
    assert jnp.allclose(feat, feat_ref, atol=5e-2, rtol=5e-2)

    print("KERNEL_OK")
</pallas_src>

<mosaic_0001>
module attributes {stable_mosaic.version = 11 : i64} {
  func.func @_conv3x3_bias_leaky_kernel(%arg0: i32, %arg1: i32, %arg2: memref<1x8x18x4xbf16, #tpu.memory_space<vmem>>, %arg3: memref<1x8x18x4xbf16, #tpu.memory_space<vmem>>, %arg4: memref<1x8x18x4xbf16, #tpu.memory_space<vmem>>, %arg5: memref<3x3x4x8xbf16, #tpu.memory_space<vmem>>, %arg6: memref<1x8xf32, #tpu.memory_space<vmem>>, %arg7: memref<1x8x16x8xbf16, #tpu.memory_space<vmem>>) attributes {dimension_semantics = [#tpu.dimension_semantics<parallel>, #tpu.dimension_semantics<parallel>], iteration_bounds = array<i64: 2, 2>, scalar_prefetch = 0 : i64, scratch_operands = 0 : i64, tpu.core_type = #tpu.core_type<tc>, window_params = [{transform_indices = @transform_0, window_bounds = array<i64: 1, 8, 18, 4>}, {transform_indices = @transform_1, window_bounds = array<i64: 1, 8, 18, 4>}, {transform_indices = @transform_2, window_bounds = array<i64: 1, 8, 18, 4>}, {pipeline_mode = #tpu.pipeline_mode<synchronous>, transform_indices = @transform_3, window_bounds = array<i64: 3, 3, 4, 8>}, {pipeline_mode = #tpu.pipeline_mode<synchronous>, transform_indices = @transform_4, window_bounds = array<i64: 1, 8>}, {transform_indices = @transform_5, window_bounds = array<i64: 1, 8, 16, 8>}]} {
    %c0 = arith.constant 0 : index
    %c0_0 = arith.constant 0 : index
    %0 = vector.load %arg6[%c0, %c0_0] : memref<1x8xf32, #tpu.memory_space<vmem>>, vector<1x8xf32>
    %c0_1 = arith.constant 0 : index
    %c0_2 = arith.constant 0 : index
    %c0_3 = arith.constant 0 : index
    %c0_4 = arith.constant 0 : index
    %1 = vector.load %arg5[%c0_1, %c0_2, %c0_3, %c0_4] : memref<3x3x4x8xbf16, #tpu.memory_space<vmem>>, vector<1x1x4x8xbf16>
    %2 = vector.shape_cast %1 : vector<1x1x4x8xbf16> to vector<4x8xbf16>
    %c0_5 = arith.constant 0 : index
    %c1 = arith.constant 1 : index
    %c0_6 = arith.constant 0 : index
    %c0_7 = arith.constant 0 : index
    %3 = vector.load %arg5[%c0_5, %c1, %c0_6, %c0_7] : memref<3x3x4x8xbf16, #tpu.memory_space<vmem>>, vector<1x1x4x8xbf16>
    %4 = vector.shape_cast %3 : vector<1x1x4x8xbf16> to vector<4x8xbf16>
    %c0_8 = arith.constant 0 : index
    %c2 = arith.constant 2 : index
    %c0_9 = arith.constant 0 : index
    %c0_10 = arith.constant 0 : index
    %5 = vector.load %arg5[%c0_8, %c2, %c0_9, %c0_10] : memref<3x3x4x8xbf16, #tpu.memory_space<vmem>>, vector<1x1x4x8xbf16>
    %6 = vector.shape_cast %5 : vector<1x1x4x8xbf16> to vector<4x8xbf16>
    %c1_11 = arith.constant 1 : index
    %c0_12 = arith.constant 0 : index
    %c0_13 = arith.constant 0 : index
    %c0_14 = arith.constant 0 : index
    %7 = vector.load %arg5[%c1_11, %c0_12, %c0_13, %c0_14] : memref<3x3x4x8xbf16, #tpu.memory_space<vmem>>, vector<1x1x4x8xbf16>
    %8 = vector.shape_cast %7 : vector<1x1x4x8xbf16> to vector<4x8xbf16>
    %c1_15 = arith.constant 1 : index
    %c1_16 = arith.constant 1 : index
    %c0_17 = arith.constant 0 : index
    %c0_18 = arith.constant 0 : index
    %9 = vector.load %arg5[%c1_15, %c1_16, %c0_17, %c0_18] : memref<3x3x4x8xbf16, #tpu.memory_space<vmem>>, vector<1x1x4x8xbf16>
    %10 = vector.shape_cast %9 : vector<1x1x4x8xbf16> to vector<4x8xbf16>
    %c1_19 = arith.constant 1 : index
    %c2_20 = arith.constant 2 : index
    %c0_21 = arith.constant 0 : index
    %c0_22 = arith.constant 0 : index
    %11 = vector.load %arg5[%c1_19, %c2_20, %c0_21, %c0_22] : memref<3x3x4x8xbf16, #tpu.memory_space<vmem>>, vector<1x1x4x8xbf16>
    %12 = vector.shape_cast %11 : vector<1x1x4x8xbf16> to vector<4x8xbf16>
    %c2_23 = arith.constant 2 : index
    %c0_24 = arith.constant 0 : index
    %c0_25 = arith.constant 0 : index
    %c0_26 = arith.constant 0 : index
    %13 = vector.load %arg5[%c2_23, %c0_24, %c0_25, %c0_26] : memref<3x3x4x8xbf16, #tpu.memory_space<vmem>>, vector<1x1x4x8xbf16>
    %14 = vector.shape_cast %13 : vector<1x1x4x8xbf16> to vector<4x8xbf16>
    %c2_27 = arith.constant 2 : index
    %c1_28 = arith.constant 1 : index
    %c0_29 = arith.constant 0 : index
    %c0_30 = arith.constant 0 : index
    %15 = vector.load %arg5[%c2_27, %c1_28, %c0_29, %c0_30] : memref<3x3x4x8xbf16, #tpu.memory_space<vmem>>, vector<1x1x4x8xbf16>
    %16 = vector.shape_cast %15 : vector<1x1x4x8xbf16> to vector<4x8xbf16>
    %c2_31 = arith.constant 2 : index
    %c2_32 = arith.constant 2 : index
    %c0_33 = arith.constant 0 : index
    %c0_34 = arith.constant 0 : index
    %17 = vector.load %arg5[%c2_31, %c2_32, %c0_33, %c0_34] : memref<3x3x4x8xbf16, #tpu.memory_space<vmem>>, vector<1x1x4x8xbf16>
    %18 = vector.shape_cast %17 : vector<1x1x4x8xbf16> to vector<4x8xbf16>
    %c0_35 = arith.constant 0 : index
    %c0_36 = arith.constant 0 : index
    %c0_37 = arith.constant 0 : index
    %c0_38 = arith.constant 0 : index
    %19 = vector.load %arg2[%c0_35, %c0_36, %c0_37, %c0_38] : memref<1x8x18x4xbf16, #tpu.memory_space<vmem>>, vector<1x1x18x4xbf16>
    %20 = vector.shape_cast %19 : vector<1x1x18x4xbf16> to vector<18x4xbf16>
    %c0_39 = arith.constant 0 : index
    %c0_40 = arith.constant 0 : index
    %c0_41 = arith.constant 0 : index
    %c0_42 = arith.constant 0 : index
    %21 = vector.load %arg3[%c0_39, %c0_40, %c0_41, %c0_42] : memref<1x8x18x4xbf16, #tpu.memory_space<vmem>>, vector<1x1x18x4xbf16>
    %22 = vector.shape_cast %21 : vector<1x1x18x4xbf16> to vector<18x4xbf16>
    %c0_43 = arith.constant 0 : index
    %c0_44 = arith.constant 0 : index
    %c0_45 = arith.constant 0 : index
    %c0_46 = arith.constant 0 : index
    %23 = vector.load %arg4[%c0_43, %c0_44, %c0_45, %c0_46] : memref<1x8x18x4xbf16, #tpu.memory_space<vmem>>, vector<1x1x18x4xbf16>
    %24 = vector.shape_cast %23 : vector<1x1x18x4xbf16> to vector<18x4xbf16>
    %cst = arith.constant 0.000000e+00 : f32
    %25 = vector.broadcast %cst : f32 to vector<16x8xf32>
    %26 = vector.extract_strided_slice %20 {offsets = [0, 0], sizes = [16, 4], strides = [1, 1]} : vector<18x4xbf16> to vector<16x4xbf16>
    %cst_47 = arith.constant dense<0.000000e+00> : vector<16x8xf32>
    %27 = tpu.matmul %26, %2, %cst_47 {dimension_numbers = #tpu.dot_dimension_numbers<[1], [0], [0], [1], [0, 0, 1, 1], [], []>} : vector<16x4xbf16>, vector<4x8xbf16>, vector<16x8xf32> -> vector<16x8xf32>
    %28 = arith.addf %25, %27 : vector<16x8xf32>
    %29 = vector.extract_strided_slice %20 {offsets = [1, 0], sizes = [16, 4], strides = [1, 1]} : vector<18x4xbf16> to vector<16x4xbf16>
    %cst_48 = arith.constant dense<0.000000e+00> : vector<16x8xf32>
    %30 = tpu.matmul %29, %4, %cst_48 {dimension_numbers = #tpu.dot_dimension_numbers<[1], [0], [0], [1], [0, 0, 1, 1], [], []>} : vector<16x4xbf16>, vector<4x8xbf16>, vector<16x8xf32> -> vector<16x8xf32>
    %31 = arith.addf %28, %30 : vector<16x8xf32>
    %32 = vector.extract_strided_slice %20 {offsets = [2, 0], sizes = [16, 4], strides = [1, 1]} : vector<18x4xbf16> to vector<16x4xbf16>
    %cst_49 = arith.constant dense<0.000000e+00> : vector<16x8xf32>
    %33 = tpu.matmul %32, %6, %cst_49 {dimension_numbers = #tpu.dot_dimension_numbers<[1], [0], [0], [1], [0, 0, 1, 1], [], []>} : vector<16x4xbf16>, vector<4x8xbf16>, vector<16x8xf32> -> vector<16x8xf32>
    %34 = arith.addf %31, %33 : vector<16x8xf32>
    %35 = vector.extract_strided_slice %22 {offsets = [0, 0], sizes = [16, 4], strides = [1, 1]} : vector<18x4xbf16> to vector<16x4xbf16>
    %cst_50 = arith.constant dense<0.000000e+00> : vector<16x8xf32>
    %36 = tpu.matmul %35, %8, %cst_50 {dimension_numbers = #tpu.dot_dimension_numbers<[1], [0], [0], [1], [0, 0, 1, 1], [], []>} : vector<16x4xbf16>, vector<4x8xbf16>, vector<16x8xf32> -> vector<16x8xf32>
    %37 = arith.addf %34, %36 : vector<16x8xf32>
    %38 = vector.extract_strided_slice %22 {offsets = [1, 0], sizes = [16, 4], strides = [1, 1]} : vector<18x4xbf16> to vector<16x4xbf16>
    %cst_51 = arith.constant dense<0.000000e+00> : vector<16x8xf32>
    %39 = tpu.matmul %38, %10, %cst_51 {dimension_numbers = #tpu.dot_dimension_numbers<[1], [0], [0], [1], [0, 0, 1, 1], [], []>} : vector<16x4xbf16>, vector<4x8xbf16>, vector<16x8xf32> -> vector<16x8xf32>
    %40 = arith.addf %37, %39 : vector<16x8xf32>
    %41 = vector.extract_strided_slice %22 {offsets = [2, 0], sizes = [16, 4], strides = [1, 1]} : vector<18x4xbf16> to vector<16x4xbf16>
    %cst_52 = arith.constant dense<0.000000e+00> : vector<16x8xf32>
    %42 = tpu.matmul %41, %12, %cst_52 {dimension_numbers = #tpu.dot_dimension_numbers<[1], [0], [0], [1], [0, 0, 1, 1], [], []>} : vector<16x4xbf16>, vector<4x8xbf16>, vector<16x8xf32> -> vector<16x8xf32>
    %43 = arith.addf %40, %42 : vector<16x8xf32>
    %44 = vector.extract_strided_slice %24 {offsets = [0, 0], sizes = [16, 4], strides = [1, 1]} : vector<18x4xbf16> to vector<16x4xbf16>
    %cst_53 = arith.constant dense<0.000000e+00> : vector<16x8xf32>
    %45 = tpu.matmul %44, %14, %cst_53 {dimension_numbers = #tpu.dot_dimension_numbers<[1], [0], [0], [1], [0, 0, 1, 1], [], []>} : vector<16x4xbf16>, vector<4x8xbf16>, vector<16x8xf32> -> vector<16x8xf32>
    %46 = arith.addf %43, %45 : vector<16x8xf32>
    %47 = vector.extract_strided_slice %24 {offsets = [1, 0], sizes = [16, 4], strides = [1, 1]} : vector<18x4xbf16> to vector<16x4xbf16>
    %cst_54 = arith.constant dense<0.000000e+00> : vector<16x8xf32>
    %48 = tpu.matmul %47, %16, %cst_54 {dimension_numbers = #tpu.dot_dimension_numbers<[1], [0], [0], [1], [0, 0, 1, 1], [], []>} : vector<16x4xbf16>, vector<4x8xbf16>, vector<16x8xf32> -> vector<16x8xf32>
    %49 = arith.addf %46, %48 : vector<16x8xf32>
    %50 = vector.extract_strided_slice %24 {offsets = [2, 0], sizes = [16, 4], strides = [1, 1]} : vector<18x4xbf16> to vector<16x4xbf16>
    %cst_55 = arith.constant dense<0.000000e+00> : vector<16x8xf32>
    %51 = tpu.matmul %50, %18, %cst_55 {dimension_numbers = #tpu.dot_dimension_numbers<[1], [0], [0], [1], [0, 0, 1, 1], [], []>} : vector<16x4xbf16>, vector<4x8xbf16>, vector<16x8xf32> -> vector<16x8xf32>
    %52 = arith.addf %49, %51 : vector<16x8xf32>
    %53 = vector.broadcast %0 : vector<1x8xf32> to vector<16x8xf32>
    %54 = arith.addf %52, %53 : vector<16x8xf32>
    %cst_56 = arith.constant 0.000000e+00 : f32
    %55 = vector.broadcast %cst_56 : f32 to vector<16x8xf32>
    %56 = arith.cmpf ogt, %54, %55 : vector<16x8xf32>
    %cst_57 = arith.constant 1.000000e-01 : f32
    %57 = vector.broadcast %cst_57 : f32 to vector<16x8xf32>
    %58 = arith.mulf %57, %54 : vector<16x8xf32>
    %59 = arith.select %56, %54, %58 : vector<16x8xi1>, vector<16x8xf32>
    %60 = arith.truncf %59 : vector<16x8xf32> to vector<16x8xbf16>
    %c0_58 = arith.constant 0 : index
    %c0_59 = arith.constant 0 : index
    %c0_60 = arith.constant 0 : index
    %c0_61 = arith.constant 0 : index
    %61 = vector.load %arg7[%c0_58, %c0_59, %c0_60, %c0_61] : memref<1x8x16x8xbf16, #tpu.memory_space<vmem>>, vector<1x1x16x8xbf16>
    %62 = vector.shape_cast %61 : vector<1x1x16x8xbf16> to vector<16x8xbf16>
    %63 = vector.shape_cast %60 : vector<16x8xbf16> to vector<1x1x16x8xbf16>
    tpu.vector_store %arg7[%c0_58, %c0_59, %c0_60, %c0_61], %63 {strides = array<i32>} : memref<1x8x16x8xbf16, #tpu.memory_space<vmem>>, vector<1x1x16x8xbf16>,
    %c0_62 = arith.constant 0 : index
    %c1_63 = arith.constant 1 : index
    %c0_64 = arith.constant 0 : index
    %c0_65 = arith.constant 0 : index
    %64 = vector.load %arg2[%c0_62, %c1_63, %c0_64, %c0_65] : memref<1x8x18x4xbf16, #tpu.memory_space<vmem>>, vector<1x1x18x4xbf16>
    %65 = vector.shape_cast %64 : vector<1x1x18x4xbf16> to vector<18x4xbf16>
    %c0_66 = arith.constant 0 : index
    %c1_67 = arith.constant 1 : index
    %c0_68 = arith.constant 0 : index
    %c0_69 = arith.constant 0 : index
    %66 = vector.load %arg3[%c0_66, %c1_67, %c0_68, %c0_69] : memref<1x8x18x4xbf16, #tpu.memory_space<vmem>>, vector<1x1x18x4xbf16>
    %67 = vector.shape_cast %66 : vector<1x1x18x4xbf16> to vector<18x4xbf16>
    %c0_70 = arith.constant 0 : index
    %c1_71 = arith.constant 1 : index
    %c0_72 = arith.constant 0 : index
    %c0_73 = arith.constant 0 : index
    %68 = vector.load %arg4[%c0_70, %c1_71, %c0_72, %c0_73] : memref<1x8x18x4xbf16, #tpu.memory_space<vmem>>, vector<1x1x18x4xbf16>
    %69 = vector.shape_cast %68 : vector<1x1x18x4xbf16> to vector<18x4xbf16>
    %cst_74 = arith.constant 0.000000e+00 : f32
    %70 = vector.broadcast %cst_74 : f32 to vector<16x8xf32>
    %71 = vector.extract_strided_slice %65 {offsets = [0, 0], sizes = [16, 4], strides = [1, 1]} : vector<18x4xbf16> to vector<16x4xbf16>
    %cst_75 = arith.constant dense<0.000000e+00> : vector<16x8xf32>
    %72 = tpu.matmul %71, %2, %cst_75 {dimension_numbers = #tpu.dot_dimension_numbers<[1], [0], [0], [1], [0, 0, 1, 1], [], []>} : vector<16x4xbf16>, vector<4x8xbf16>, vector<16x8xf32> -> vector<16x8xf32>
    %73 = arith.addf %70, %72 : vector<16x8xf32>
    %74 = vector.extract_strided_slice %65 {offsets = [1, 0], sizes = [16, 4], strides = [1, 1]} : vector<18x4xbf16> to vector<16x4xbf16>
    %cst_76 = arith.constant dense<0.000000e+00> : vector<16x8xf32>
    %75 = tpu.matmul %74, %4, %cst_76 {dimension_numbers = #tpu.dot_dimension_numbers<[1], [0], [0], [1], [0, 0, 1, 1], [], []>} : vector<16x4xbf16>, vector<4x8xbf16>, vector<16x8xf32> -> vector<16x8xf32>
    %76 = arith.addf %73, %75 : vector<16x8xf32>
    %77 = vector.extract_strided_slice %65 {offsets = [2, 0], sizes = [16, 4], strides = [1, 1]} : vector<18x4xbf16> to vector<16x4xbf16>
    %cst_77 = arith.constant dense<0.000000e+00> : vector<16x8xf32>
    %78 = tpu.matmul %77, %6, %cst_77 {dimension_numbers = #tpu.dot_dimension_numbers<[1], [0], [0], [1], [0, 0, 1, 1], [], []>} : vector<16x4xbf16>, vector<4x8xbf16>, vector<16x8xf32> -> vector<16x8xf32>
    %79 = arith.addf %76, %78 : vector<16x8xf32>
    %80 = vector.extract_strided_slice %67 {offsets = [0, 0], sizes = [16, 4], strides = [1, 1]} : vector<18x4xbf16> to vector<16x4xbf16>
    %cst_78 = arith.constant dense<0.000000e+00> : vector<16x8xf32>
    %81 = tpu.matmul %80, %8, %cst_78 {dimension_numbers = #tpu.dot_dimension_numbers<[1], [0], [0], [1], [0, 0, 1, 1], [], []>} : vector<16x4xbf16>, vector<4x8xbf16>, vector<16x8xf32> -> vector<16x8xf32>
    %82 = arith.addf %79, %81 : vector<16x8xf32>
    %83 = vector.extract_strided_slice %67 {offsets = [1, 0], sizes = [16, 4], strides = [1, 1]} : vector<18x4xbf16> to vector<16x4xbf16>
    %cst_79 = arith.constant dense<0.000000e+00> : vector<16x8xf32>
    %84 = tpu.matmul %83, %10, %cst_79 {dimension_numbers = #tpu.dot_dimension_numbers<[1], [0], [0], [1], [0, 0, 1, 1], [], []>} : vector<16x4xbf16>, vector<4x8xbf16>, vector<16x8xf32> -> vector<16x8xf32>
    %85 = arith.addf %82, %84 : vector<16x8xf32>
    %86 = vector.extract_strided_slice %67 {offsets = [2, 0], sizes = [16, 4], strides = [1, 1]} : vector<18x4xbf16> to vector<16x4xbf16>
    %cst_80 = arith.constant dense<0.000000e+00> : vector<16x8xf32>
    %87 = tpu.matmul %86, %12, %cst_80 {dimension_numbers = #tpu.dot_dimension_numbers<[1], [0], [0], [1], [0, 0, 1, 1], [], []>} : vector<16x4xbf16>, vector<4x8xbf16>, vector<16x8xf32> -> vector<16x8xf32>
    %88 = arith.addf %85, %87 : vector<16x8xf32>
    %89 = vector.extract_strided_slice %69 {offsets = [0, 0], sizes = [16, 4], strides = [1, 1]} : vector<18x4xbf16> to vector<16x4xbf16>
    %cst_81 = arith.constant dense<0.000000e+00> : vector<16x8xf32>
    %90 = tpu.matmul %89, %14, %cst_81 {dimension_numbers = #tpu.dot_dimension_numbers<[1], [0], [0], [1], [0, 0, 1, 1], [], []>} : vector<16x4xbf16>, vector<4x8xbf16>, vector<16x8xf32> -> vector<16x8xf32>
    %91 = arith.addf %88, %90 : vector<16x8xf32>
    %92 = vector.extract_strided_slice %69 {offsets = [1, 0], sizes = [16, 4], strides = [1, 1]} : vector<18x4xbf16> to vector<16x4xbf16>
    %cst_82 = arith.constant dense<0.000000e+00> : vector<16x8xf32>
    %93 = tpu.matmul %92, %16, %cst_82 {dimension_numbers = #tpu.dot_dimension_numbers<[1], [0], [0], [1], [0, 0, 1, 1], [], []>} : vector<16x4xbf16>, vector<4x8xbf16>, vector<16x8xf32> -> vector<16x8xf32>
    %94 = arith.addf %91, %93 : vector<16x8xf32>
    %95 = vector.extract_strided_slice %69 {offsets = [2, 0], sizes = [16, 4], strides = [1, 1]} : vector<18x4xbf16> to vector<16x4xbf16>
    %cst_83 = arith.constant dense<0.000000e+00> : vector<16x8xf32>
    %96 = tpu.matmul %95, %18, %cst_83 {dimension_numbers = #tpu.dot_dimension_numbers<[1], [0], [0], [1], [0, 0, 1, 1], [], []>} : vector<16x4xbf16>, vector<4x8xbf16>, vector<16x8xf32> -> vector<16x8xf32>
    %97 = arith.addf %94, %96 : vector<16x8xf32>
    %98 = vector.broadcast %0 : vector<1x8xf32> to vector<16x8xf32>
    %99 = arith.addf %97, %98 : vector<16x8xf32>
    %cst_84 = arith.constant 0.000000e+00 : f32
    %100 = vector.broadcast %cst_84 : f32 to vector<16x8xf32>
    %101 = arith.cmpf ogt, %99, %100 : vector<16x8xf32>
    %cst_85 = arith.constant 1.000000e-01 : f32
    %102 = vector.broadcast %cst_85 : f32 to vector<16x8xf32>
    %103 = arith.mulf %102, %99 : vector<16x8xf32>
    %104 = arith.select %101, %99, %103 : vector<16x8xi1>, vector<16x8xf32>
    %105 = arith.truncf %104 : vector<16x8xf32> to vector<16x8xbf16>
    %c0_86 = arith.constant 0 : index
    %c1_87 = arith.constant 1 : index
    %c0_88 = arith.constant 0 : index
    %c0_89 = arith.constant 0 : index
    %106 = vector.load %arg7[%c0_86, %c1_87, %c0_88, %c0_89] : memref<1x8x16x8xbf16, #tpu.memory_space<vmem>>, vector<1x1x16x8xbf16>
    %107 = vector.shape_cast %106 : vector<1x1x16x8xbf16> to vector<16x8xbf16>
    %108 = vector.shape_cast %105 : vector<16x8xbf16> to vector<1x1x16x8xbf16>
    tpu.vector_store %arg7[%c0_86, %c1_87, %c0_88, %c0_89], %108 {strides = array<i32>} : memref<1x8x16x8xbf16, #tpu.memory_space<vmem>>, vector<1x1x16x8xbf16>,
    %c0_90 = arith.constant 0 : index
    %c2_91 = arith.constant 2 : index
    %c0_92 = arith.constant 0 : index
    %c0_93 = arith.constant 0 : index
    %109 = vector.load %arg2[%c0_90, %c2_91, %c0_92, %c0_93] : memref<1x8x18x4xbf16, #tpu.memory_space<vmem>>, vector<1x1x18x4xbf16>
    %110 = vector.shape_cast %109 : vector<1x1x18x4xbf16> to vector<18x4xbf16>
    %c0_94 = arith.constant 0 : index
    %c2_95 = arith.constant 2 : index
    %c0_96 = arith.constant 0 : index
    %c0_97 = arith.constant 0 : index
    %111 = vector.load %arg3[%c0_94, %c2_95, %c0_96, %c0_97] : memref<1x8x18x4xbf16, #tpu.memory_space<vmem>>, vector<1x1x18x4xbf16>
    %112 = vector.shape_cast %111 : vector<1x1x18x4xbf16> to vector<18x4xbf16>
    %c0_98 = arith.constant 0 : index
    %c2_99 = arith.constant 2 : index
    %c0_100 = arith.constant 0 : index
    %c0_101 = arith.constant 0 : index
    %113 = vector.load %arg4[%c0_98, %c2_99, %c0_100, %c0_101] : memref<1x8x18x4xbf16, #tpu.memory_space<vmem>>, vector<1x1x18x4xbf16>
    %114 = vector.shape_cast %113 : vector<1x1x18x4xbf16> to vector<18x4xbf16>
    %cst_102 = arith.constant 0.000000e+00 : f32
    %115 = vector.broadcast %cst_102 : f32 to vector<16x8xf32>
    %116 = vector.extract_strided_slice %110 {offsets = [0, 0], sizes = [16, 4], strides = [1, 1]} : vector<18x4xbf16> to vector<16x4xbf16>
    %cst_103 = arith.constant dense<0.000000e+00> : vector<16x8xf32>
    %117 = tpu.matmul %116, %2, %cst_103 {dimension_numbers = #tpu.dot_dimension_numbers<[1], [0], [0], [1], [0, 0, 1, 1], [], []>} : vector<16x4xbf16>, vector<4x8xbf16>, vector<16x8xf32> -> vector<16x8xf32>
    %118 = arith.addf %115, %117 : vector<16x8xf32>
    %119 = vector.extract_strided_slice %110 {offsets = [1, 0], sizes = [16, 4], strides = [1, 1]} : vector<18x4xbf16> to vector<16x4xbf16>
    %cst_104 = arith.constant dense<0.000000e+00> : vector<16x8xf32>
    %120 = tpu.matmul %119, %4, %cst_104 {dimension_numbers = #tpu.dot_dimension_numbers<[1], [0], [0], [1], [0, 0, 1, 1], [], []>} : vector<16x4xbf16>, vector<4x8xbf16>, vector<16x8xf32> -> vector<16x8xf32>
    %121 = arith.addf %118, %120 : vector<16x8xf32>
    %122 = vector.extract_strided_slice %110 {offsets = [2, 0], sizes = [16, 4], strides = [1, 1]} : vector<18x4xbf16> to vector<16x4xbf16>
    %cst_105 = arith.constant dense<0.000000e+00> : vector<16x8xf32>
    %123 = tpu.matmul %122, %6, %cst_105 {dimension_numbers = #tpu.dot_dimension_numbers<[1], [0], [0], [1], [0, 0, 1, 1], [], []>} : vector<16x4xbf16>, vector<4x8xbf16>, vector<16x8xf32> -> vector<16x8xf32>
    %124 = arith.addf %121, %123 : vector<16x8xf32>
    %125 = vector.extract_strided_slice %112 {offsets = [0, 0], sizes = [16, 4], strides = [1, 1]} : vector<18x4xbf16> to vector<16x4xbf16>
    %cst_106 = arith.constant dense<0.000000e+00> : vector<16x8xf32>
    %126 = tpu.matmul %125, %8, %cst_106 {dimension_numbers = #tpu.dot_dimension_numbers<[1], [0], [0], [1], [0, 0, 1, 1], [], []>} : vector<16x4xbf16>, vector<4x8xbf16>, vector<16x8xf32> -> vector<16x8xf32>
    %127 = arith.addf %124, %126 : vector<16x8xf32>
    %128 = vector.extract_strided_slice %112 {offsets = [1, 0], sizes = [16, 4], strides = [1, 1]} : vector<18x4xbf16> to vector<16x4xbf16>
    %cst_107 = arith.constant dense<0.000000e+00> : vector<16x8xf32>
    %129 = tpu.matmul %128, %10, %cst_107 {dimension_numbers = #tpu.dot_dimension_numbers<[1], [0], [0], [1], [0, 0, 1, 1], [], []>} : vector<16x4xbf16>, vector<4x8xbf16>, vector<16x8xf32> -> vector<16x8xf32>
    %130 = arith.addf %127, %129 : vector<16x8xf32>
    %131 = vector.extract_strided_slice %112 {offsets = [2, 0], sizes = [16, 4], strides = [1, 1]} : vector<18x4xbf16> to vector<16x4xbf16>
    %cst_108 = arith.constant dense<0.000000e+00> : vector<16x8xf32>
    %132 = tpu.matmul %131, %12, %cst_108 {dimension_numbers = #tpu.dot_dimension_numbers<[1], [0], [0], [1], [0, 0, 1, 1], [], []>} : vector<16x4xbf16>, vector<4x8xbf16>, vector<16x8xf32> -> vector<16x8xf32>
    %133 = arith.addf %130, %132 : vector<16x8xf32>
    %134 = vector.extract_strided_slice %114 {offsets = [0, 0], sizes = [16, 4], strides = [1, 1]} : vector<18x4xbf16> to vector<16x4xbf16>
    %cst_109 = arith.constant dense<0.000000e+00> : vector<16x8xf32>
    %135 = tpu.matmul %134, %14, %cst_109 {dimension_numbers = #tpu.dot_dimension_numbers<[1], [0], [0], [1], [0, 0, 1, 1], [], []>} : vector<16x4xbf16>, vector<4x8xbf16>, vector<16x8xf32> -> vector<16x8xf32>
    %136 = arith.addf %133, %135 : vector<16x8xf32>
    %137 = vector.extract_strided_slice %114 {offsets = [1, 0], sizes = [16, 4], strides = [1, 1]} : vector<18x4xbf16> to vector<16x4xbf16>
    %cst_110 = arith.constant dense<0.000000e+00> : vector<16x8xf32>
    %138 = tpu.matmul %137, %16, %cst_110 {dimension_numbers = #tpu.dot_dimension_numbers<[1], [0], [0], [1], [0, 0, 1, 1], [], []>} : vector<16x4xbf16>, vector<4x8xbf16>, vector<16x8xf32> -> vector<16x8xf32>
    %139 = arith.addf %136, %138 : vector<16x8xf32>
    %140 = vector.extract_strided_slice %114 {offsets = [2, 0], sizes = [16, 4], strides = [1, 1]} : vector<18x4xbf16> to vector<16x4xbf16>
    %cst_111 = arith.constant dense<0.000000e+00> : vector<16x8xf32>
    %141 = tpu.matmul %140, %18, %cst_111 {dimension_numbers = #tpu.dot_dimension_numbers<[1], [0], [0], [1], [0, 0, 1, 1], [], []>} : vector<16x4xbf16>, vector<4x8xbf16>, vector<16x8xf32> -> vector<16x8xf32>
    %142 = arith.addf %139, %141 : vector<16x8xf32>
    %143 = vector.broadcast %0 : vector<1x8xf32> to vector<16x8xf32>
    %144 = arith.addf %142, %143 : vector<16x8xf32>
    %cst_112 = arith.constant 0.000000e+00 : f32
    %145 = vector.broadcast %cst_112 : f32 to vector<16x8xf32>
    %146 = arith.cmpf ogt, %144, %145 : vector<16x8xf32>
    %cst_113 = arith.constant 1.000000e-01 : f32
    %147 = vector.broadcast %cst_113 : f32 to vector<16x8xf32>
    %148 = arith.mulf %147, %144 : vector<16x8xf32>
    %149 = arith.select %146, %144, %148 : vector<16x8xi1>, vector<16x8xf32>
    %150 = arith.truncf %149 : vector<16x8xf32> to vector<16x8xbf16>
    %c0_114 = arith.constant 0 : index
    %c2_115 = arith.constant 2 : index
    %c0_116 = arith.constant 0 : index
    %c0_117 = arith.constant 0 : index
    %151 = vector.load %arg7[%c0_114, %c2_115, %c0_116, %c0_117] : memref<1x8x16x8xbf16, #tpu.memory_space<vmem>>, vector<1x1x16x8xbf16>
    %152 = vector.shape_cast %151 : vector<1x1x16x8xbf16> to vector<16x8xbf16>
    %153 = vector.shape_cast %150 : vector<16x8xbf16> to vector<1x1x16x8xbf16>
    tpu.vector_store %arg7[%c0_114, %c2_115, %c0_116, %c0_117], %153 {strides = array<i32>} : memref<1x8x16x8xbf16, #tpu.memory_space<vmem>>, vector<1x1x16x8xbf16>,
    %c0_118 = arith.constant 0 : index
    %c3 = arith.constant 3 : index
    %c0_119 = arith.constant 0 : index
    %c0_120 = arith.constant 0 : index
    %154 = vector.load %arg2[%c0_118, %c3, %c0_119, %c0_120] : memref<1x8x18x4xbf16, #tpu.memory_space<vmem>>, vector<1x1x18x4xbf16>
    %155 = vector.shape_cast %154 : vector<1x1x18x4xbf16> to vector<18x4xbf16>
    %c0_121 = arith.constant 0 : index
    %c3_122 = arith.constant 3 : index
    %c0_123 = arith.constant 0 : index
    %c0_124 = arith.constant 0 : index
    %156 = vector.load %arg3[%c0_121, %c3_122, %c0_123, %c0_124] : memref<1x8x18x4xbf16, #tpu.memory_space<vmem>>, vector<1x1x18x4xbf16>
    %157 = vector.shape_cast %156 : vector<1x1x18x4xbf16> to vector<18x4xbf16>
    %c0_125 = arith.constant 0 : index
    %c3_126 = arith.constant 3 : index
    %c0_127 = arith.constant 0 : index
    %c0_128 = arith.constant 0 : index
    %158 = vector.load %arg4[%c0_125, %c3_126, %c0_127, %c0_128] : memref<1x8x18x4xbf16, #tpu.memory_space<vmem>>, vector<1x1x18x4xbf16>
    %159 = vector.shape_cast %158 : vector<1x1x18x4xbf16> to vector<18x4xbf16>
    %cst_129 = arith.constant 0.000000e+00 : f32
    %160 = vector.broadcast %cst_129 : f32 to vector<16x8xf32>
    %161 = vector.extract_strided_slice %155 {offsets = [0, 0], sizes = [16, 4], strides = [1, 1]} : vector<18x4xbf16> to vector<16x4xbf16>
    %cst_130 = arith.constant dense<0.000000e+00> : vector<16x8xf32>
    %162 = tpu.matmul %161, %2, %cst_130 {dimension_numbers = #tpu.dot_dimension_numbers<[1], [0], [0], [1], [0, 0, 1, 1], [], []>} : vector<16x4xbf16>, vector<4x8xbf16>, vector<16x8xf32> -> vector<16x8xf32>
    %163 = arith.addf %160, %162 : vector<16x8xf32>
    %164 = vector.extract_strided_slice %155 {offsets = [1, 0], sizes = [16, 4], strides = [1, 1]} : vector<18x4xbf16> to vector<16x4xbf16>
    %cst_131 = arith.constant dense<0.000000e+00> : vector<16x8xf32>
    %165 = tpu.matmul %164, %4, %cst_131 {dimension_numbers = #tpu.dot_dimension_numbers<[1], [0], [0], [1], [0, 0, 1, 1], [], []>} : vector<16x4xbf16>, vector<4x8xbf16>, vector<16x8xf32> -> vector<16x8xf32>
    %166 = arith.addf %163, %165 : vector<16x8xf32>
    %167 = vector.extract_strided_slice %155 {offsets = [2, 0], sizes = [16, 4], strides = [1, 1]} : vector<18x4xbf16> to vector<16x4xbf16>
    %cst_132 = arith.constant dense<0.000000e+00> : vector<16x8xf32>
    %168 = tpu.matmul %167, %6, %cst_132 {dimension_numbers = #tpu.dot_dimension_numbers<[1], [0], [0], [1], [0, 0, 1, 1], [], []>} : vector<16x4xbf16>, vector<4x8xbf16>, vector<16x8xf32> -> vector<16x8xf32>
    %169 = arith.addf %166, %168 : vector<16x8xf32>
    %170 = vector.extract_strided_slice %157 {offsets = [0, 0], sizes = [16, 4], strides = [1, 1]} : vector<18x4xbf16> to vector<16x4xbf16>
    %cst_133 = arith.constant dense<0.000000e+00> : vector<16x8xf32>
    %171 = tpu.matmul %170, %8, %cst_133 {dimension_numbers = #tpu.dot_dimension_numbers<[1], [0], [0], [1], [0, 0, 1, 1], [], []>} : vector<16x4xbf16>, vector<4x8xbf16>, vector<16x8xf32> -> vector<16x8xf32>
    %172 = arith.addf %169, %171 : vector<16x8xf32>
    %173 = vector.extract_strided_slice %157 {offsets = [1, 0], sizes = [16, 4], strides = [1, 1]} : vector<18x4xbf16> to vector<16x4xbf16>
    %cst_134 = arith.constant dense<0.000000e+00> : vector<16x8xf32>
    %174 = tpu.matmul %173, %10, %cst_134 {dimension_numbers = #tpu.dot_dimension_numbers<[1], [0], [0], [1], [0, 0, 1, 1], [], []>} : vector<16x4xbf16>, vector<4x8xbf16>, vector<16x8xf32> -> vector<16x8xf32>
    %175 = arith.addf %172, %174 : vector<16x8xf32>
    %176 = vector.extract_strided_slice %157 {offsets = [2, 0], sizes = [16, 4], strides = [1, 1]} : vector<18x4xbf16> to vector<16x4xbf16>
    %cst_135 = arith.constant dense<0.000000e+00> : vector<16x8xf32>
    %177 = tpu.matmul %176, %12, %cst_135 {dimension_numbers = #tpu.dot_dimension_numbers<[1], [0], [0], [1], [0, 0, 1, 1], [], []>} : vector<16x4xbf16>, vector<4x8xbf16>, vector<16x8xf32> -> vector<16x8xf32>
    %178 = arith.addf %175, %177 : vector<16x8xf32>
    %179 = vector.extract_strided_slice %159 {offsets = [0, 0], sizes = [16, 4], strides = [1, 1]} : vector<18x4xbf16> to vector<16x4xbf16>
    %cst_136 = arith.constant dense<0.000000e+00> : vector<16x8xf32>
    %180 = tpu.matmul %179, %14, %cst_136 {dimension_numbers = #tpu.dot_dimension_numbers<[1], [0], [0], [1], [0, 0, 1, 1], [], []>} : vector<16x4xbf16>, vector<4x8xbf16>, vector<16x8xf32> -> vector<16x8xf32>
    %181 = arith.addf %178, %180 : vector<16x8xf32>
    %182 = vector.extract_strided_slice %159 {offsets = [1, 0], sizes = [16, 4], strides = [1, 1]} : vector<18x4xbf16> to vector<16x4xbf16>
    %cst_137 = arith.constant dense<0.000000e+00> : vector<16x8xf32>
    %183 = tpu.matmul %182, %16, %cst_137 {dimension_numbers = #tpu.dot_dimension_numbers<[1], [0], [0], [1], [0, 0, 1, 1], [], []>} : vector<16x4xbf16>, vector<4x8xbf16>, vector<16x8xf32> -> vector<16x8xf32>
    %184 = arith.addf %181, %183 : vector<16x8xf32>
    %185 = vector.extract_strided_slice %159 {offsets = [2, 0], sizes = [16, 4], strides = [1, 1]} : vector<18x4xbf16> to vector<16x4xbf16>
    %cst_138 = arith.constant dense<0.000000e+00> : vector<16x8xf32>
    %186 = tpu.matmul %185, %18, %cst_138 {dimension_numbers = #tpu.dot_dimension_numbers<[1], [0], [0], [1], [0, 0, 1, 1], [], []>} : vector<16x4xbf16>, vector<4x8xbf16>, vector<16x8xf32> -> vector<16x8xf32>
    %187 = arith.addf %184, %186 : vector<16x8xf32>
    %188 = vector.broadcast %0 : vector<1x8xf32> to vector<16x8xf32>
    %189 = arith.addf %187, %188 : vector<16x8xf32>
    %cst_139 = arith.constant 0.000000e+00 : f32
    %190 = vector.broadcast %cst_139 : f32 to vector<16x8xf32>
    %191 = arith.cmpf ogt, %189, %190 : vector<16x8xf32>
    %cst_140 = arith.constant 1.000000e-01 : f32
    %192 = vector.broadcast %cst_140 : f32 to vector<16x8xf32>
    %193 = arith.mulf %192, %189 : vector<16x8xf32>
    %194 = arith.select %191, %189, %193 : vector<16x8xi1>, vector<16x8xf32>
    %195 = arith.truncf %194 : vector<16x8xf32> to vector<16x8xbf16>
    %c0_141 = arith.constant 0 : index
    %c3_142 = arith.constant 3 : index
    %c0_143 = arith.constant 0 : index
    %c0_144 = arith.constant 0 : index
    %196 = vector.load %arg7[%c0_141, %c3_142, %c0_143, %c0_144] : memref<1x8x16x8xbf16, #tpu.memory_space<vmem>>, vector<1x1x16x8xbf16>
    %197 = vector.shape_cast %196 : vector<1x1x16x8xbf16> to vector<16x8xbf16>
    %198 = vector.shape_cast %195 : vector<16x8xbf16> to vector<1x1x16x8xbf16>
    tpu.vector_store %arg7[%c0_141, %c3_142, %c0_143, %c0_144], %198 {strides = array<i32>} : memref<1x8x16x8xbf16, #tpu.memory_space<vmem>>, vector<1x1x16x8xbf16>,
    %c0_145 = arith.constant 0 : index
    %c4 = arith.constant 4 : index
    %c0_146 = arith.constant 0 : index
    %c0_147 = arith.constant 0 : index
    %199 = vector.load %arg2[%c0_145, %c4, %c0_146, %c0_147] : memref<1x8x18x4xbf16, #tpu.memory_space<vmem>>, vector<1x1x18x4xbf16>
    %200 = vector.shape_cast %199 : vector<1x1x18x4xbf16> to vector<18x4xbf16>
    %c0_148 = arith.constant 0 : index
    %c4_149 = arith.constant 4 : index
    %c0_150 = arith.constant 0 : index
    %c0_151 = arith.constant 0 : index
    %201 = vector.load %arg3[%c0_148, %c4_149, %c0_150, %c0_151] : memref<1x8x18x4xbf16, #tpu.memory_space<vmem>>, vector<1x1x18x4xbf16>
    %202 = vector.shape_cast %201 : vector<1x1x18x4xbf16> to vector<18x4xbf16>
    %c0_152 = arith.constant 0 : index
    %c4_153 = arith.constant 4 : index
    %c0_154 = arith.constant 0 : index
    %c0_155 = arith.constant 0 : index
    %203 = vector.load %arg4[%c0_152, %c4_153, %c0_154, %c0_155] : memref<1x8x18x4xbf16, #tpu.memory_space<vmem>>, vector<1x1x18x4xbf16>
    %204 = vector.shape_cast %203 : vector<1x1x18x4xbf16> to vector<18x4xbf16>
    %cst_156 = arith.constant 0.000000e+00 : f32
    %205 = vector.broadcast %cst_156 : f32 to vector<16x8xf32>
    %206 = vector.extract_strided_slice %200 {offsets = [0, 0], sizes = [16, 4], strides = [1, 1]} : vector<18x4xbf16> to vector<16x4xbf16>
    %cst_157 = arith.constant dense<0.000000e+00> : vector<16x8xf32>
    %207 = tpu.matmul %206, %2, %cst_157 {dimension_numbers = #tpu.dot_dimension_numbers<[1], [0], [0], [1], [0, 0, 1, 1], [], []>} : vector<16x4xbf16>, vector<4x8xbf16>, vector<16x8xf32> -> vector<16x8xf32>
    %208 = arith.addf %205, %207 : vector<16x8xf32>
    %209 = vector.extract_strided_slice %200 {offsets = [1, 0], sizes = [16, 4], strides = [1, 1]} : vector<18x4xbf16> to vector<16x4xbf16>
    %cst_158 = arith.constant dense<0.000000e+00> : vector<16x8xf32>
    %210 = tpu.matmul %209, %4, %cst_158 {dimension_numbers = #tpu.dot_dimension_numbers<[1], [0], [0], [1], [0, 0, 1, 1], [], []>} : vector<16x4xbf16>, vector<4x8xbf16>, vector<16x8xf32> -> vector<16x8xf32>
    %211 = arith.addf %208, %210 : vector<16x8xf32>
    %212 = vector.extract_strided_slice %200 {offsets = [2, 0], sizes = [16, 4], strides = [1, 1]} : vector<18x4xbf16> to vector<16x4xbf16>
    %cst_159 = arith.constant dense<0.000000e+00> : vector<16x8xf32>
    %213 = tpu.matmul %212, %6, %cst_159 {dimension_numbers = #tpu.dot_dimension_numbers<[1], [0], [0], [1], [0, 0, 1, 1], [], []>} : vector<16x4xbf16>, vector<4x8xbf16>, vector<16x8xf32> -> vector<16x8xf32>
    %214 = arith.addf %211, %213 : vector<16x8xf32>
    %215 = vector.extract_strided_slice %202 {offsets = [0, 0], sizes = [16, 4], strides = [1, 1]} : vector<18x4xbf16> to vector<16x4xbf16>
    %cst_160 = arith.constant dense<0.000000e+00> : vector<16x8xf32>
    %216 = tpu.matmul %215, %8, %cst_160 {dimension_numbers = #tpu.dot_dimension_numbers<[1], [0], [0], [1], [0, 0, 1, 1], [], []>} : vector<16x4xbf16>, vector<4x8xbf16>, vector<16x8xf32> -> vector<16x8xf32>
    %217 = arith.addf %214, %216 : vector<16x8xf32>
    %218 = vector.extract_strided_slice %202 {offsets = [1, 0], sizes = [16, 4], strides = [1, 1]} : vector<18x4xbf16> to vector<16x4xbf16>
    %cst_161 = arith.constant dense<0.000000e+00> : vector<16x8xf32>
    %219 = tpu.matmul %218, %10, %cst_161 {dimension_numbers = #tpu.dot_dimension_numbers<[1], [0], [0], [1], [0, 0, 1, 1], [], []>} : vector<16x4xbf16>, vector<4x8xbf16>, vector<16x8xf32> -> vector<16x8xf32>
    %220 = arith.addf %217, %219 : vector<16x8xf32>
    %221 = vector.extract_strided_slice %202 {offsets = [2, 0], sizes = [16, 4], strides = [1, 1]} : vector<18x4xbf16> to vector<16x4xbf16>
    %cst_162 = arith.constant dense<0.000000e+00> : vector<16x8xf32>
    %222 = tpu.matmul %221, %12, %cst_162 {dimension_numbers = #tpu.dot_dimension_numbers<[1], [0], [0], [1], [0, 0, 1, 1], [], []>} : vector<16x4xbf16>, vector<4x8xbf16>, vector<16x8xf32> -> vector<16x8xf32>
    %223 = arith.addf %220, %222 : vector<16x8xf32>
    %224 = vector.extract_strided_slice %204 {offsets = [0, 0], sizes = [16, 4], strides = [1, 1]} : vector<18x4xbf16> to vector<16x4xbf16>
    %cst_163 = arith.constant dense<0.000000e+00> : vector<16x8xf32>
    %225 = tpu.matmul %224, %14, %cst_163 {dimension_numbers = #tpu.dot_dimension_numbers<[1], [0], [0], [1], [0, 0, 1, 1], [], []>} : vector<16x4xbf16>, vector<4x8xbf16>, vector<16x8xf32> -> vector<16x8xf32>
    %226 = arith.addf %223, %225 : vector<16x8xf32>
    %227 = vector.extract_strided_slice %204 {offsets = [1, 0], sizes = [16, 4], strides = [1, 1]} : vector<18x4xbf16> to vector<16x4xbf16>
    %cst_164 = arith.constant dense<0.000000e+00> : vector<16x8xf32>
    %228 = tpu.matmul %227, %16, %cst_164 {dimension_numbers = #tpu.dot_dimension_numbers<[1], [0], [0], [1], [0, 0, 1, 1], [], []>} : vector<16x4xbf16>, vector<4x8xbf16>, vector<16x8xf32> -> vector<16x8xf32>
    %229 = arith.addf %226, %228 : vector<16x8xf32>
    %230 = vector.extract_strided_slice %204 {offsets = [2, 0], sizes = [16, 4], strides = [1, 1]} : vector<18x4xbf16> to vector<16x4xbf16>
    %cst_165 = arith.constant dense<0.000000e+00> : vector<16x8xf32>
    %231 = tpu.matmul %230, %18, %cst_165 {dimension_numbers = #tpu.dot_dimension_numbers<[1], [0], [0], [1], [0, 0, 1, 1], [], []>} : vector<16x4xbf16>, vector<4x8xbf16>, vector<16x8xf32> -> vector<16x8xf32>
    %232 = arith.addf %229, %231 : vector<16x8xf32>
    %233 = vector.broadcast %0 : vector<1x8xf32> to vector<16x8xf32>
    %234 = arith.addf %232, %233 : vector<16x8xf32>
    %cst_166 = arith.constant 0.000000e+00 : f32
    %235 = vector.broadcast %cst_166 : f32 to vector<16x8xf32>
    %236 = arith.cmpf ogt, %234, %235 : vector<16x8xf32>
    %cst_167 = arith.constant 1.000000e-01 : f32
    %237 = vector.broadcast %cst_167 : f32 to vector<16x8xf32>
    %238 = arith.mulf %237, %234 : vector<16x8xf32>
    %239 = arith.select %236, %234, %238 : vector<16x8xi1>, vector<16x8xf32>
    %240 = arith.truncf %239 : vector<16x8xf32> to vector<16x8xbf16>
    %c0_168 = arith.constant 0 : index
    %c4_169 = arith.constant 4 : index
    %c0_170 = arith.constant 0 : index
    %c0_171 = arith.constant 0 : index
    %241 = vector.load %arg7[%c0_168, %c4_169, %c0_170, %c0_171] : memref<1x8x16x8xbf16, #tpu.memory_space<vmem>>, vector<1x1x16x8xbf16>
    %242 = vector.shape_cast %241 : vector<1x1x16x8xbf16> to vector<16x8xbf16>
    %243 = vector.shape_cast %240 : vector<16x8xbf16> to vector<1x1x16x8xbf16>
    tpu.vector_store %arg7[%c0_168, %c4_169, %c0_170, %c0_171], %243 {strides = array<i32>} : memref<1x8x16x8xbf16, #tpu.memory_space<vmem>>, vector<1x1x16x8xbf16>,
    %c0_172 = arith.constant 0 : index
    %c5 = arith.constant 5 : index
    %c0_173 = arith.constant 0 : index
    %c0_174 = arith.constant 0 : index
    %244 = vector.load %arg2[%c0_172, %c5, %c0_173, %c0_174] : memref<1x8x18x4xbf16, #tpu.memory_space<vmem>>, vector<1x1x18x4xbf16>
    %245 = vector.shape_cast %244 : vector<1x1x18x4xbf16> to vector<18x4xbf16>
    %c0_175 = arith.constant 0 : index
    %c5_176 = arith.constant 5 : index
    %c0_177 = arith.constant 0 : index
    %c0_178 = arith.constant 0 : index
    %246 = vector.load %arg3[%c0_175, %c5_176, %c0_177, %c0_178] : memref<1x8x18x4xbf16, #tpu.memory_space<vmem>>, vector<1x1x18x4xbf16>
    %247 = vector.shape_cast %246 : vector<1x1x18x4xbf16> to vector<18x4xbf16>
    %c0_179 = arith.constant 0 : index
    %c5_180 = arith.constant 5 : index
    %c0_181 = arith.constant 0 : index
    %c0_182 = arith.constant 0 : index
    %248 = vector.load %arg4[%c0_179, %c5_180, %c0_181, %c0_182] : memref<1x8x18x4xbf16, #tpu.memory_space<vmem>>, vector<1x1x18x4xbf16>
    %249 = vector.shape_cast %248 : vector<1x1x18x4xbf16> to vector<18x4xbf16>
    %cst_183 = arith.constant 0.000000e+00 : f32
    %250 = vector.broadcast %cst_183 : f32 to vector<16x8xf32>
    %251 = vector.extract_strided_slice %245 {offsets = [0, 0], sizes = [16, 4], strides = [1, 1]} : vector<18x4xbf16> to vector<16x4xbf16>
    %cst_184 = arith.constant dense<0.000000e+00> : vector<16x8xf32>
    %252 = tpu.matmul %251, %2, %cst_184 {dimension_numbers = #tpu.dot_dimension_numbers<[1], [0], [0], [1], [0, 0, 1, 1], [], []>} : vector<16x4xbf16>, vector<4x8xbf16>, vector<16x8xf32> -> vector<16x8xf32>
    %253 = arith.addf %250, %252 : vector<16x8xf32>
    %254 = vector.extract_strided_slice %245 {offsets = [1, 0], sizes = [16, 4], strides = [1, 1]} : vector<18x4xbf16> to vector<16x4xbf16>
    %cst_185 = arith.constant dense<0.000000e+00> : vector<16x8xf32>
    %255 = tpu.matmul %254, %4, %cst_185 {dimension_numbers = #tpu.dot_dimension_numbers<[1], [0], [0], [1], [0, 0, 1, 1], [], []>} : vector<16x4xbf16>, vector<4x8xbf16>, vector<16x8xf32> -> vector<16x8xf32>
    %256 = arith.addf %253, %255 : vector<16x8xf32>
    %257 = vector.extract_strided_slice %245 {offsets = [2, 0], sizes = [16, 4], strides = [1, 1]} : vector<18x4xbf16> to vector<16x4xbf16>
    %cst_186 = arith.constant dense<0.000000e+00> : vector<16x8xf32>
    %258 = tpu.matmul %257, %6, %cst_186 {dimension_numbers = #tpu.dot_dimension_numbers<[1], [0], [0], [1], [0, 0, 1, 1], [], []>} : vector<16x4xbf16>, vector<4x8xbf16>, vector<16x8xf32> -> vector<16x8xf32>
    %259 = arith.addf %256, %258 : vector<16x8xf32>
    %260 = vector.extract_strided_slice %247 {offsets = [0, 0], sizes = [16, 4], strides = [1, 1]} : vector<18x4xbf16> to vector<16x4xbf16>
    %cst_187 = arith.constant dense<0.000000e+00> : vector<16x8xf32>
    %261 = tpu.matmul %260, %8, %cst_187 {dimension_numbers = #tpu.dot_dimension_numbers<[1], [0], [0], [1], [0, 0, 1, 1], [], []>} : vector<16x4xbf16>, vector<4x8xbf16>, vector<16x8xf32> -> vector<16x8xf32>
    %262 = arith.addf %259, %261 : vector<16x8xf32>
    %263 = vector.extract_strided_slice %247 {offsets = [1, 0], sizes = [16, 4], strides = [1, 1]} : vector<18x4xbf16> to vector<16x4xbf16>
    %cst_188 = arith.constant dense<0.000000e+00> : vector<16x8xf32>
    %264 = tpu.matmul %263, %10, %cst_188 {dimension_numbers = #tpu.dot_dimension_numbers<[1], [0], [0], [1], [0, 0, 1, 1], [], []>} : vector<16x4xbf16>, vector<4x8xbf16>, vector<16x8xf32> -> vector<16x8xf32>
    %265 = arith.addf %262, %264 : vector<16x8xf32>
    %266 = vector.extract_strided_slice %247 {offsets = [2, 0], sizes = [16, 4], strides = [1, 1]} : vector<18x4xbf16> to vector<16x4xbf16>
    %cst_189 = arith.constant dense<0.000000e+00> : vector<16x8xf32>
    %267 = tpu.matmul %266, %12, %cst_189 {dimension_numbers = #tpu.dot_dimension_numbers<[1], [0], [0], [1], [0, 0, 1, 1], [], []>} : vector<16x4xbf16>, vector<4x8xbf16>, vector<16x8xf32> -> vector<16x8xf32>
    %268 = arith.addf %265, %267 : vector<16x8xf32>
    %269 = vector.extract_strided_slice %249 {offsets = [0, 0], sizes = [16, 4], strides = [1, 1]} : vector<18x4xbf16> to vector<16x4xbf16>
    %cst_190 = arith.constant dense<0.000000e+00> : vector<16x8xf32>
    %270 = tpu.matmul %269, %14, %cst_190 {dimension_numbers = #tpu.dot_dimension_numbers<[1], [0], [0], [1], [0, 0, 1, 1], [], []>} : vector<16x4xbf16>, vector<4x8xbf16>, vector<16x8xf32> -> vector<16x8xf32>
    %271 = arith.addf %268, %270 : vector<16x8xf32>
    %272 = vector.extract_strided_slice %249 {offsets = [1, 0], sizes = [16, 4], strides = [1, 1]} : vector<18x4xbf16> to vector<16x4xbf16>
    %cst_191 = arith.constant dense<0.000000e+00> : vector<16x8xf32>
    %273 = tpu.matmul %272, %16, %cst_191 {dimension_numbers = #tpu.dot_dimension_numbers<[1], [0], [0], [1], [0, 0, 1, 1], [], []>} : vector<16x4xbf16>, vector<4x8xbf16>, vector<16x8xf32> -> vector<16x8xf32>
    %274 = arith.addf %271, %273 : vector<16x8xf32>
    %275 = vector.extract_strided_slice %249 {offsets = [2, 0], sizes = [16, 4], strides = [1, 1]} : vector<18x4xbf16> to vector<16x4xbf16>
    %cst_192 = arith.constant dense<0.000000e+00> : vector<16x8xf32>
    %276 = tpu.matmul %275, %18, %cst_192 {dimension_numbers = #tpu.dot_dimension_numbers<[1], [0], [0], [1], [0, 0, 1, 1], [], []>} : vector<16x4xbf16>, vector<4x8xbf16>, vector<16x8xf32> -> vector<16x8xf32>
    %277 = arith.addf %274, %276 : vector<16x8xf32>
    %278 = vector.broadcast %0 : vector<1x8xf32> to vector<16x8xf32>
    %279 = arith.addf %277, %278 : vector<16x8xf32>
    %cst_193 = arith.constant 0.000000e+00 : f32
    %280 = vector.broadcast %cst_193 : f32 to vector<16x8xf32>
    %281 = arith.cmpf ogt, %279, %280 : vector<16x8xf32>
    %cst_194 = arith.constant 1.000000e-01 : f32
    %282 = vector.broadcast %cst_194 : f32 to vector<16x8xf32>
    %283 = arith.mulf %282, %279 : vector<16x8xf32>
    %284 = arith.select %281, %279, %283 : vector<16x8xi1>, vector<16x8xf32>
    %285 = arith.truncf %284 : vector<16x8xf32> to vector<16x8xbf16>
    %c0_195 = arith.constant 0 : index
    %c5_196 = arith.constant 5 : index
    %c0_197 = arith.constant 0 : index
    %c0_198 = arith.constant 0 : index
    %286 = vector.load %arg7[%c0_195, %c5_196, %c0_197, %c0_198] : memref<1x8x16x8xbf16, #tpu.memory_space<vmem>>, vector<1x1x16x8xbf16>
    %287 = vector.shape_cast %286 : vector<1x1x16x8xbf16> to vector<16x8xbf16>
    %288 = vector.shape_cast %285 : vector<16x8xbf16> to vector<1x1x16x8xbf16>
    tpu.vector_store %arg7[%c0_195, %c5_196, %c0_197, %c0_198], %288 {strides = array<i32>} : memref<1x8x16x8xbf16, #tpu.memory_space<vmem>>, vector<1x1x16x8xbf16>,
    %c0_199 = arith.constant 0 : index
    %c6 = arith.constant 6 : index
    %c0_200 = arith.constant 0 : index
    %c0_201 = arith.constant 0 : index
    %289 = vector.load %arg2[%c0_199, %c6, %c0_200, %c0_201] : memref<1x8x18x4xbf16, #tpu.memory_space<vmem>>, vector<1x1x18x4xbf16>
    %290 = vector.shape_cast %289 : vector<1x1x18x4xbf16> to vector<18x4xbf16>
    %c0_202 = arith.constant 0 : index
    %c6_203 = arith.constant 6 : index
    %c0_204 = arith.constant 0 : index
    %c0_205 = arith.constant 0 : index
    %291 = vector.load %arg3[%c0_202, %c6_203, %c0_204, %c0_205] : memref<1x8x18x4xbf16, #tpu.memory_space<vmem>>, vector<1x1x18x4xbf16>
    %292 = vector.shape_cast %291 : vector<1x1x18x4xbf16> to vector<18x4xbf16>
    %c0_206 = arith.constant 0 : index
    %c6_207 = arith.constant 6 : index
    %c0_208 = arith.constant 0 : index
    %c0_209 = arith.constant 0 : index
    %293 = vector.load %arg4[%c0_206, %c6_207, %c0_208, %c0_209] : memref<1x8x18x4xbf16, #tpu.memory_space<vmem>>, vector<1x1x18x4xbf16>
    %294 = vector.shape_cast %293 : vector<1x1x18x4xbf16> to vector<18x4xbf16>
    %cst_210 = arith.constant 0.000000e+00 : f32
    %295 = vector.broadcast %cst_210 : f32 to vector<16x8xf32>
    %296 = vector.extract_strided_slice %290 {offsets = [0, 0], sizes = [16, 4], strides = [1, 1]} : vector<18x4xbf16> to vector<16x4xbf16>
    %cst_211 = arith.constant dense<0.000000e+00> : vector<16x8xf32>
    %297 = tpu.matmul %296, %2, %cst_211 {dimension_numbers = #tpu.dot_dimension_numbers<[1], [0], [0], [1], [0, 0, 1, 1], [], []>} : vector<16x4xbf16>, vector<4x8xbf16>, vector<16x8xf32> -> vector<16x8xf32>
    %298 = arith.addf %295, %297 : vector<16x8xf32>
    %299 = vector.extract_strided_slice %290 {offsets = [1, 0], sizes = [16, 4], strides = [1, 1]} : vector<18x4xbf16> to vector<16x4xbf16>
    %cst_212 = arith.constant dense<0.000000e+00> : vector<16x8xf32>
    %300 = tpu.matmul %299, %4, %cst_212 {dimension_numbers = #tpu.dot_dimension_numbers<[1], [0], [0], [1], [0, 0, 1, 1], [], []>} : vector<16x4xbf16>, vector<4x8xbf16>, vector<16x8xf32> -> vector<16x8xf32>
    %301 = arith.addf %298, %300 : vector<16x8xf32>
    %302 = vector.extract_strided_slice %290 {offsets = [2, 0], sizes = [16, 4], strides = [1, 1]} : vector<18x4xbf16> to vector<16x4xbf16>
    %cst_213 = arith.constant dense<0.000000e+00> : vector<16x8xf32>
    %303 = tpu.matmul %302, %6, %cst_213 {dimension_numbers = #tpu.dot_dimension_numbers<[1], [0], [0], [1], [0, 0, 1, 1], [], []>} : vector<16x4xbf16>, vector<4x8xbf16>, vector<16x8xf32> -> vector<16x8xf32>
    %304 = arith.addf %301, %303 : vector<16x8xf32>
    %305 = vector.extract_strided_slice %292 {offsets = [0, 0], sizes = [16, 4], strides = [1, 1]} : vector<18x4xbf16> to vector<16x4xbf16>
    %cst_214 = arith.constant dense<0.000000e+00> : vector<16x8xf32>
    %306 = tpu.matmul %305, %8, %cst_214 {dimension_numbers = #tpu.dot_dimension_numbers<[1], [0], [0], [1], [0, 0, 1, 1], [], []>} : vector<16x4xbf16>, vector<4x8xbf16>, vector<16x8xf32> -> vector<16x8xf32>
    %307 = arith.addf %304, %306 : vector<16x8xf32>
    %308 = vector.extract_strided_slice %292 {offsets = [1, 0], sizes = [16, 4], strides = [1, 1]} : vector<18x4xbf16> to vector<16x4xbf16>
    %cst_215 = arith.constant dense<0.000000e+00> : vector<16x8xf32>
    %309 = tpu.matmul %308, %10, %cst_215 {dimension_numbers = #tpu.dot_dimension_numbers<[1], [0], [0], [1], [0, 0, 1, 1], [], []>} : vector<16x4xbf16>, vector<4x8xbf16>, vector<16x8xf32> -> vector<16x8xf32>
    %310 = arith.addf %307, %309 : vector<16x8xf32>
    %311 = vector.extract_strided_slice %292 {offsets = [2, 0], sizes = [16, 4], strides = [1, 1]} : vector<18x4xbf16> to vector<16x4xbf16>
    %cst_216 = arith.constant dense<0.000000e+00> : vector<16x8xf32>
    %312 = tpu.matmul %311, %12, %cst_216 {dimension_numbers = #tpu.dot_dimension_numbers<[1], [0], [0], [1], [0, 0, 1, 1], [], []>} : vector<16x4xbf16>, vector<4x8xbf16>, vector<16x8xf32> -> vector<16x8xf32>
    %313 = arith.addf %310, %312 : vector<16x8xf32>
    %314 = vector.extract_strided_slice %294 {offsets = [0, 0], sizes = [16, 4], strides = [1, 1]} : vector<18x4xbf16> to vector<16x4xbf16>
    %cst_217 = arith.constant dense<0.000000e+00> : vector<16x8xf32>
    %315 = tpu.matmul %314, %14, %cst_217 {dimension_numbers = #tpu.dot_dimension_numbers<[1], [0], [0], [1], [0, 0, 1, 1], [], []>} : vector<16x4xbf16>, vector<4x8xbf16>, vector<16x8xf32> -> vector<16x8xf32>
    %316 = arith.addf %313, %315 : vector<16x8xf32>
    %317 = vector.extract_strided_slice %294 {offsets = [1, 0], sizes = [16, 4], strides = [1, 1]} : vector<18x4xbf16> to vector<16x4xbf16>
    %cst_218 = arith.constant dense<0.000000e+00> : vector<16x8xf32>
    %318 = tpu.matmul %317, %16, %cst_218 {dimension_numbers = #tpu.dot_dimension_numbers<[1], [0], [0], [1], [0, 0, 1, 1], [], []>} : vector<16x4xbf16>, vector<4x8xbf16>, vector<16x8xf32> -> vector<16x8xf32>
    %319 = arith.addf %316, %318 : vector<16x8xf32>
    %320 = vector.extract_strided_slice %294 {offsets = [2, 0], sizes = [16, 4], strides = [1, 1]} : vector<18x4xbf16> to vector<16x4xbf16>
    %cst_219 = arith.constant dense<0.000000e+00> : vector<16x8xf32>
    %321 = tpu.matmul %320, %18, %cst_219 {dimension_numbers = #tpu.dot_dimension_numbers<[1], [0], [0], [1], [0, 0, 1, 1], [], []>} : vector<16x4xbf16>, vector<4x8xbf16>, vector<16x8xf32> -> vector<16x8xf32>
    %322 = arith.addf %319, %321 : vector<16x8xf32>
    %323 = vector.broadcast %0 : vector<1x8xf32> to vector<16x8xf32>
    %324 = arith.addf %322, %323 : vector<16x8xf32>
    %cst_220 = arith.constant 0.000000e+00 : f32
    %325 = vector.broadcast %cst_220 : f32 to vector<16x8xf32>
    %326 = arith.cmpf ogt, %324, %325 : vector<16x8xf32>
    %cst_221 = arith.constant 1.000000e-01 : f32
    %327 = vector.broadcast %cst_221 : f32 to vector<16x8xf32>
    %328 = arith.mulf %327, %324 : vector<16x8xf32>
    %329 = arith.select %326, %324, %328 : vector<16x8xi1>, vector<16x8xf32>
    %330 = arith.truncf %329 : vector<16x8xf32> to vector<16x8xbf16>
    %c0_222 = arith.constant 0 : index
    %c6_223 = arith.constant 6 : index
    %c0_224 = arith.constant 0 : index
    %c0_225 = arith.constant 0 : index
    %331 = vector.load %arg7[%c0_222, %c6_223, %c0_224, %c0_225] : memref<1x8x16x8xbf16, #tpu.memory_space<vmem>>, vector<1x1x16x8xbf16>
    %332 = vector.shape_cast %331 : vector<1x1x16x8xbf16> to vector<16x8xbf16>
    %333 = vector.shape_cast %330 : vector<16x8xbf16> to vector<1x1x16x8xbf16>
    tpu.vector_store %arg7[%c0_222, %c6_223, %c0_224, %c0_225], %333 {strides = array<i32>} : memref<1x8x16x8xbf16, #tpu.memory_space<vmem>>, vector<1x1x16x8xbf16>,
    %c0_226 = arith.constant 0 : index
    %c7 = arith.constant 7 : index
    %c0_227 = arith.constant 0 : index
    %c0_228 = arith.constant 0 : index
    %334 = vector.load %arg2[%c0_226, %c7, %c0_227, %c0_228] : memref<1x8x18x4xbf16, #tpu.memory_space<vmem>>, vector<1x1x18x4xbf16>
    %335 = vector.shape_cast %334 : vector<1x1x18x4xbf16> to vector<18x4xbf16>
    %c0_229 = arith.constant 0 : index
    %c7_230 = arith.constant 7 : index
    %c0_231 = arith.constant 0 : index
    %c0_232 = arith.constant 0 : index
    %336 = vector.load %arg3[%c0_229, %c7_230, %c0_231, %c0_232] : memref<1x8x18x4xbf16, #tpu.memory_space<vmem>>, vector<1x1x18x4xbf16>
    %337 = vector.shape_cast %336 : vector<1x1x18x4xbf16> to vector<18x4xbf16>
    %c0_233 = arith.constant 0 : index
    %c7_234 = arith.constant 7 : index
    %c0_235 = arith.constant 0 : index
    %c0_236 = arith.constant 0 : index
    %338 = vector.load %arg4[%c0_233, %c7_234, %c0_235, %c0_236] : memref<1x8x18x4xbf16, #tpu.memory_space<vmem>>, vector<1x1x18x4xbf16>
    %339 = vector.shape_cast %338 : vector<1x1x18x4xbf16> to vector<18x4xbf16>
    %cst_237 = arith.constant 0.000000e+00 : f32
    %340 = vector.broadcast %cst_237 : f32 to vector<16x8xf32>
    %341 = vector.extract_strided_slice %335 {offsets = [0, 0], sizes = [16, 4], strides = [1, 1]} : vector<18x4xbf16> to vector<16x4xbf16>
    %cst_238 = arith.constant dense<0.000000e+00> : vector<16x8xf32>
    %342 = tpu.matmul %341, %2, %cst_238 {dimension_numbers = #tpu.dot_dimension_numbers<[1], [0], [0], [1], [0, 0, 1, 1], [], []>} : vector<16x4xbf16>, vector<4x8xbf16>, vector<16x8xf32> -> vector<16x8xf32>
    %343 = arith.addf %340, %342 : vector<16x8xf32>
    %344 = vector.extract_strided_slice %335 {offsets = [1, 0], sizes = [16, 4], strides = [1, 1]} : vector<18x4xbf16> to vector<16x4xbf16>
    %cst_239 = arith.constant dense<0.000000e+00> : vector<16x8xf32>
    %345 = tpu.matmul %344, %4, %cst_239 {dimension_numbers = #tpu.dot_dimension_numbers<[1], [0], [0], [1], [0, 0, 1, 1], [], []>} : vector<16x4xbf16>, vector<4x8xbf16>, vector<16x8xf32> -> vector<16x8xf32>
    %346 = arith.addf %343, %345 : vector<16x8xf32>
    %347 = vector.extract_strided_slice %335 {offsets = [2, 0], sizes = [16, 4], strides = [1, 1]} : vector<18x4xbf16> to vector<16x4xbf16>
    %cst_240 = arith.constant dense<0.000000e+00> : vector<16x8xf32>
    %348 = tpu.matmul %347, %6, %cst_240 {dimension_numbers = #tpu.dot_dimension_numbers<[1], [0], [0], [1], [0, 0, 1, 1], [], []>} : vector<16x4xbf16>, vector<4x8xbf16>, vector<16x8xf32> -> vector<16x8xf32>
    %349 = arith.addf %346, %348 : vector<16x8xf32>
    %350 = vector.extract_strided_slice %337 {offsets = [0, 0], sizes = [16, 4], strides = [1, 1]} : vector<18x4xbf16> to vector<16x4xbf16>
    %cst_241 = arith.constant dense<0.000000e+00> : vector<16x8xf32>
    %351 = tpu.matmul %350, %8, %cst_241 {dimension_numbers = #tpu.dot_dimension_numbers<[1], [0], [0], [1], [0, 0, 1, 1], [], []>} : vector<16x4xbf16>, vector<4x8xbf16>, vector<16x8xf32> -> vector<16x8xf32>
    %352 = arith.addf %349, %351 : vector<16x8xf32>
    %353 = vector.extract_strided_slice %337 {offsets = [1, 0], sizes = [16, 4], strides = [1, 1]} : vector<18x4xbf16> to vector<16x4xbf16>
    %cst_242 = arith.constant dense<0.000000e+00> : vector<16x8xf32>
    %354 = tpu.matmul %353, %10, %cst_242 {dimension_numbers = #tpu.dot_dimension_numbers<[1], [0], [0], [1], [0, 0, 1, 1], [], []>} : vector<16x4xbf16>, vector<4x8xbf16>, vector<16x8xf32> -> vector<16x8xf32>
    %355 = arith.addf %352, %354 : vector<16x8xf32>
    %356 = vector.extract_strided_slice %337 {offsets = [2, 0], sizes = [16, 4], strides = [1, 1]} : vector<18x4xbf16> to vector<16x4xbf16>
    %cst_243 = arith.constant dense<0.000000e+00> : vector<16x8xf32>
    %357 = tpu.matmul %356, %12, %cst_243 {dimension_numbers = #tpu.dot_dimension_numbers<[1], [0], [0], [1], [0, 0, 1, 1], [], []>} : vector<16x4xbf16>, vector<4x8xbf16>, vector<16x8xf32> -> vector<16x8xf32>
    %358 = arith.addf %355, %357 : vector<16x8xf32>
    %359 = vector.extract_strided_slice %339 {offsets = [0, 0], sizes = [16, 4], strides = [1, 1]} : vector<18x4xbf16> to vector<16x4xbf16>
    %cst_244 = arith.constant dense<0.000000e+00> : vector<16x8xf32>
    %360 = tpu.matmul %359, %14, %cst_244 {dimension_numbers = #tpu.dot_dimension_numbers<[1], [0], [0], [1], [0, 0, 1, 1], [], []>} : vector<16x4xbf16>, vector<4x8xbf16>, vector<16x8xf32> -> vector<16x8xf32>
    %361 = arith.addf %358, %360 : vector<16x8xf32>
    %362 = vector.extract_strided_slice %339 {offsets = [1, 0], sizes = [16, 4], strides = [1, 1]} : vector<18x4xbf16> to vector<16x4xbf16>
    %cst_245 = arith.constant dense<0.000000e+00> : vector<16x8xf32>
    %363 = tpu.matmul %362, %16, %cst_245 {dimension_numbers = #tpu.dot_dimension_numbers<[1], [0], [0], [1], [0, 0, 1, 1], [], []>} : vector<16x4xbf16>, vector<4x8xbf16>, vector<16x8xf32> -> vector<16x8xf32>
    %364 = arith.addf %361, %363 : vector<16x8xf32>
    %365 = vector.extract_strided_slice %339 {offsets = [2, 0], sizes = [16, 4], strides = [1, 1]} : vector<18x4xbf16> to vector<16x4xbf16>
    %cst_246 = arith.constant dense<0.000000e+00> : vector<16x8xf32>
    %366 = tpu.matmul %365, %18, %cst_246 {dimension_numbers = #tpu.dot_dimension_numbers<[1], [0], [0], [1], [0, 0, 1, 1], [], []>} : vector<16x4xbf16>, vector<4x8xbf16>, vector<16x8xf32> -> vector<16x8xf32>
    %367 = arith.addf %364, %366 : vector<16x8xf32>
    %368 = vector.broadcast %0 : vector<1x8xf32> to vector<16x8xf32>
    %369 = arith.addf %367, %368 : vector<16x8xf32>
    %cst_247 = arith.constant 0.000000e+00 : f32
    %370 = vector.broadcast %cst_247 : f32 to vector<16x8xf32>
    %371 = arith.cmpf ogt, %369, %370 : vector<16x8xf32>
    %cst_248 = arith.constant 1.000000e-01 : f32
    %372 = vector.broadcast %cst_248 : f32 to vector<16x8xf32>
    %373 = arith.mulf %372, %369 : vector<16x8xf32>
    %374 = arith.select %371, %369, %373 : vector<16x8xi1>, vector<16x8xf32>
    %375 = arith.truncf %374 : vector<16x8xf32> to vector<16x8xbf16>
    %c0_249 = arith.constant 0 : index
    %c7_250 = arith.constant 7 : index
    %c0_251 = arith.constant 0 : index
    %c0_252 = arith.constant 0 : index
    %376 = vector.load %arg7[%c0_249, %c7_250, %c0_251, %c0_252] : memref<1x8x16x8xbf16, #tpu.memory_space<vmem>>, vector<1x1x16x8xbf16>
    %377 = vector.shape_cast %376 : vector<1x1x16x8xbf16> to vector<16x8xbf16>
    %378 = vector.shape_cast %375 : vector<16x8xbf16> to vector<1x1x16x8xbf16>
    tpu.vector_store %arg7[%c0_249, %c7_250, %c0_251, %c0_252], %378 {strides = array<i32>} : memref<1x8x16x8xbf16, #tpu.memory_space<vmem>>, vector<1x1x16x8xbf16>,
    return
  }
  func.func @transform_0(%arg0: i32, %arg1: i32) -> (i32, i32, i32, i32) {
    %c0_i32 = arith.constant 0 : i32
    %c0_i32_0 = arith.constant 0 : i32
    %c0_i32_1 = arith.constant 0 : i32
    return %arg0, %arg1, %c0_i32, %c0_i32_0 : i32, i32, i32, i32
  }
  func.func @transform_1(%arg0: i32, %arg1: i32) -> (i32, i32, i32, i32) {
    %c0_i32 = arith.constant 0 : i32
    %c0_i32_0 = arith.constant 0 : i32
    %c0_i32_1 = arith.constant 0 : i32
    return %arg0, %arg1, %c0_i32, %c0_i32_0 : i32, i32, i32, i32
  }
  func.func @transform_2(%arg0: i32, %arg1: i32) -> (i32, i32, i32, i32) {
    %c0_i32 = arith.constant 0 : i32
    %c0_i32_0 = arith.constant 0 : i32
    %c0_i32_1 = arith.constant 0 : i32
    return %arg0, %arg1, %c0_i32, %c0_i32_0 : i32, i32, i32, i32
  }
  func.func @transform_3(%arg0: i32, %arg1: i32) -> (i32, i32, i32, i32) {
    %c0_i32 = arith.constant 0 : i32
    %c0_i32_0 = arith.constant 0 : i32
    %c0_i32_1 = arith.constant 0 : i32
    %c0_i32_2 = arith.constant 0 : i32
    %c0_i32_3 = arith.constant 0 : i32
    return %c0_i32, %c0_i32_0, %c0_i32_1, %c0_i32_2 : i32, i32, i32, i32
  }
  func.func @transform_4(%arg0: i32, %arg1: i32) -> (i32, i32) {
    %c0_i32 = arith.constant 0 : i32
    %c0_i32_0 = arith.constant 0 : i32
    %c0_i32_1 = arith.constant 0 : i32
    return %c0_i32, %c0_i32_0 : i32, i32
  }
  func.func @transform_5(%arg0: i32, %arg1: i32) -> (i32, i32, i32, i32) {
    %c0_i32 = arith.constant 0 : i32
    %c0_i32_0 = arith.constant 0 : i32
    %c0_i32_1 = arith.constant 0 : i32
    return %arg0, %arg1, %c0_i32, %c0_i32_0 : i32, i32, i32, i32
  }
}

module attributes {stable_mosaic.version = 11 : i64} {
  func.func @_dual_matmul_bias_leaky_kernel(%arg0: i32, %arg1: memref<256x4xbf16, #tpu.memory_space<vmem>>, %arg2: memref<256x4xbf16, #tpu.memory_space<vmem>>, %arg3: memref<4x8xbf16, #tpu.memory_space<vmem>>, %arg4: memref<4x8xbf16, #tpu.memory_space<vmem>>, %arg5: memref<1x8xf32, #tpu.memory_space<vmem>>, %arg6: memref<256x8xbf16, #tpu.memory_space<vmem>>) attributes {dimension_semantics = [#tpu.dimension_semantics<parallel>], iteration_bounds = array<i64: 2>, scalar_prefetch = 0 : i64, scratch_operands = 0 : i64, tpu.core_type = #tpu.core_type<tc>, window_params = [{transform_indices = @transform_0, window_bounds = array<i64: 256, 4>}, {transform_indices = @transform_1, window_bounds = array<i64: 256, 4>}, {pipeline_mode = #tpu.pipeline_mode<synchronous>, transform_indices = @transform_2, window_bounds = array<i64: 4, 8>}, {pipeline_mode = #tpu.pipeline_mode<synchronous>, transform_indices = @transform_3, window_bounds = array<i64: 4, 8>}, {pipeline_mode = #tpu.pipeline_mode<synchronous>, transform_indices = @transform_4, window_bounds = array<i64: 1, 8>}, {transform_indices = @transform_5, window_bounds = array<i64: 256, 8>}]} {
    %c0 = arith.constant 0 : index
    %c0_0 = arith.constant 0 : index
    %0 = vector.load %arg1[%c0, %c0_0] : memref<256x4xbf16, #tpu.memory_space<vmem>>, vector<256x4xbf16>
    %c0_1 = arith.constant 0 : index
    %c0_2 = arith.constant 0 : index
    %1 = vector.load %arg3[%c0_1, %c0_2] : memref<4x8xbf16, #tpu.memory_space<vmem>>, vector<4x8xbf16>
    %cst = arith.constant dense<0.000000e+00> : vector<256x8xf32>
    %2 = tpu.matmul %0, %1, %cst {dimension_numbers = #tpu.dot_dimension_numbers<[1], [0], [0], [1], [0, 0, 1, 1], [], []>} : vector<256x4xbf16>, vector<4x8xbf16>, vector<256x8xf32> -> vector<256x8xf32>
    %c0_3 = arith.constant 0 : index
    %c0_4 = arith.constant 0 : index
    %3 = vector.load %arg2[%c0_3, %c0_4] : memref<256x4xbf16, #tpu.memory_space<vmem>>, vector<256x4xbf16>
    %c0_5 = arith.constant 0 : index
    %c0_6 = arith.constant 0 : index
    %4 = vector.load %arg4[%c0_5, %c0_6] : memref<4x8xbf16, #tpu.memory_space<vmem>>, vector<4x8xbf16>
    %cst_7 = arith.constant dense<0.000000e+00> : vector<256x8xf32>
    %5 = tpu.matmul %3, %4, %cst_7 {dimension_numbers = #tpu.dot_dimension_numbers<[1], [0], [0], [1], [0, 0, 1, 1], [], []>} : vector<256x4xbf16>, vector<4x8xbf16>, vector<256x8xf32> -> vector<256x8xf32>
    %6 = arith.addf %2, %5 : vector<256x8xf32>
    %c0_8 = arith.constant 0 : index
    %c0_9 = arith.constant 0 : index
    %7 = vector.load %arg5[%c0_8, %c0_9] : memref<1x8xf32, #tpu.memory_space<vmem>>, vector<1x8xf32>
    %8 = vector.broadcast %7 : vector<1x8xf32> to vector<256x8xf32>
    %9 = arith.addf %6, %8 : vector<256x8xf32>
    %cst_10 = arith.constant 0.000000e+00 : f32
    %10 = vector.broadcast %cst_10 : f32 to vector<256x8xf32>
    %11 = arith.cmpf ogt, %9, %10 : vector<256x8xf32>
    %cst_11 = arith.constant 1.000000e-01 : f32
    %12 = vector.broadcast %cst_11 : f32 to vector<256x8xf32>
    %13 = arith.mulf %12, %9 : vector<256x8xf32>
    %14 = arith.select %11, %9, %13 : vector<256x8xi1>, vector<256x8xf32>
    %15 = arith.truncf %14 : vector<256x8xf32> to vector<256x8xbf16>
    %c0_12 = arith.constant 0 : index
    %c0_13 = arith.constant 0 : index
    %16 = vector.load %arg6[%c0_12, %c0_13] : memref<256x8xbf16, #tpu.memory_space<vmem>>, vector<256x8xbf16>
    tpu.vector_store %arg6[%c0_12, %c0_13], %15 {strides = array<i32>} : memref<256x8xbf16, #tpu.memory_space<vmem>>, vector<256x8xbf16>,
    return
  }
  func.func @transform_0(%arg0: i32) -> (i32, i32) {
    %c0_i32 = arith.constant 0 : i32
    %c0_i32_0 = arith.constant 0 : i32
    return %arg0, %c0_i32 : i32, i32
  }
  func.func @transform_1(%arg0: i32) -> (i32, i32) {
    %c0_i32 = arith.constant 0 : i32
    %c0_i32_0 = arith.constant 0 : i32
    return %arg0, %c0_i32 : i32, i32
  }
  func.func @transform_2(%arg0: i32) -> (i32, i32) {
    %c0_i32 = arith.constant 0 : i32
    %c0_i32_0 = arith.constant 0 : i32
    %c0_i32_1 = arith.constant 0 : i32
    return %c0_i32, %c0_i32_0 : i32, i32
  }
  func.func @transform_3(%arg0: i32) -> (i32, i32) {
    %c0_i32 = arith.constant 0 : i32
    %c0_i32_0 = arith.constant 0 : i32
    %c0_i32_1 = arith.constant 0 : i32
    return %c0_i32, %c0_i32_0 : i32, i32
  }
  func.func @transform_4(%arg0: i32) -> (i32, i32) {
    %c0_i32 = arith.constant 0 : i32
    %c0_i32_0 = arith.constant 0 : i32
    %c0_i32_1 = arith.constant 0 : i32
    return %c0_i32, %c0_i32_0 : i32, i32
  }
  func.func @transform_5(%arg0: i32) -> (i32, i32) {
    %c0_i32 = arith.constant 0 : i32
    %c0_i32_0 = arith.constant 0 : i32
    return %arg0, %c0_i32 : i32, i32
  }
}

module attributes {stable_mosaic.version = 11 : i64} {
  func.func @_conv3x3_bias_leaky_kernel(%arg0: i32, %arg1: i32, %arg2: memref<1x8x18x4xbf16, #tpu.memory_space<vmem>>, %arg3: memref<1x8x18x4xbf16, #tpu.memory_space<vmem>>, %arg4: memref<1x8x18x4xbf16, #tpu.memory_space<vmem>>, %arg5: memref<3x3x4x4xbf16, #tpu.memory_space<vmem>>, %arg6: memref<1x4xf32, #tpu.memory_space<vmem>>, %arg7: memref<1x8x16x4xbf16, #tpu.memory_space<vmem>>) attributes {dimension_semantics = [#tpu.dimension_semantics<parallel>, #tpu.dimension_semantics<parallel>], iteration_bounds = array<i64: 2, 2>, scalar_prefetch = 0 : i64, scratch_operands = 0 : i64, tpu.core_type = #tpu.core_type<tc>, window_params = [{transform_indices = @transform_0, window_bounds = array<i64: 1, 8, 18, 4>}, {transform_indices = @transform_1, window_bounds = array<i64: 1, 8, 18, 4>}, {transform_indices = @transform_2, window_bounds = array<i64: 1, 8, 18, 4>}, {pipeline_mode = #tpu.pipeline_mode<synchronous>, transform_indices = @transform_3, window_bounds = array<i64: 3, 3, 4, 4>}, {pipeline_mode = #tpu.pipeline_mode<synchronous>, transform_indices = @transform_4, window_bounds = array<i64: 1, 4>}, {transform_indices = @transform_5, window_bounds = array<i64: 1, 8, 16, 4>}]} {
    %c0 = arith.constant 0 : index
    %c0_0 = arith.constant 0 : index
    %0 = vector.load %arg6[%c0, %c0_0] : memref<1x4xf32, #tpu.memory_space<vmem>>, vector<1x4xf32>
    %c0_1 = arith.constant 0 : index
    %c0_2 = arith.constant 0 : index
    %c0_3 = arith.constant 0 : index
    %c0_4 = arith.constant 0 : index
    %1 = vector.load %arg5[%c0_1, %c0_2, %c0_3, %c0_4] : memref<3x3x4x4xbf16, #tpu.memory_space<vmem>>, vector<1x1x4x4xbf16>
    %2 = vector.shape_cast %1 : vector<1x1x4x4xbf16> to vector<4x4xbf16>
    %c0_5 = arith.constant 0 : index
    %c1 = arith.constant 1 : index
    %c0_6 = arith.constant 0 : index
    %c0_7 = arith.constant 0 : index
    %3 = vector.load %arg5[%c0_5, %c1, %c0_6, %c0_7] : memref<3x3x4x4xbf16, #tpu.memory_space<vmem>>, vector<1x1x4x4xbf16>
    %4 = vector.shape_cast %3 : vector<1x1x4x4xbf16> to vector<4x4xbf16>
    %c0_8 = arith.constant 0 : index
    %c2 = arith.constant 2 : index
    %c0_9 = arith.constant 0 : index
    %c0_10 = arith.constant 0 : index
    %5 = vector.load %arg5[%c0_8, %c2, %c0_9, %c0_10] : memref<3x3x4x4xbf16, #tpu.memory_space<vmem>>, vector<1x1x4x4xbf16>
    %6 = vector.shape_cast %5 : vector<1x1x4x4xbf16> to vector<4x4xbf16>
    %c1_11 = arith.constant 1 : index
    %c0_12 = arith.constant 0 : index
    %c0_13 = arith.constant 0 : index
    %c0_14 = arith.constant 0 : index
    %7 = vector.load %arg5[%c1_11, %c0_12, %c0_13, %c0_14] : memref<3x3x4x4xbf16, #tpu.memory_space<vmem>>, vector<1x1x4x4xbf16>
    %8 = vector.shape_cast %7 : vector<1x1x4x4xbf16> to vector<4x4xbf16>
    %c1_15 = arith.constant 1 : index
    %c1_16 = arith.constant 1 : index
    %c0_17 = arith.constant 0 : index
    %c0_18 = arith.constant 0 : index
    %9 = vector.load %arg5[%c1_15, %c1_16, %c0_17, %c0_18] : memref<3x3x4x4xbf16, #tpu.memory_space<vmem>>, vector<1x1x4x4xbf16>
    %10 = vector.shape_cast %9 : vector<1x1x4x4xbf16> to vector<4x4xbf16>
    %c1_19 = arith.constant 1 : index
    %c2_20 = arith.constant 2 : index
    %c0_21 = arith.constant 0 : index
    %c0_22 = arith.constant 0 : index
    %11 = vector.load %arg5[%c1_19, %c2_20, %c0_21, %c0_22] : memref<3x3x4x4xbf16, #tpu.memory_space<vmem>>, vector<1x1x4x4xbf16>
    %12 = vector.shape_cast %11 : vector<1x1x4x4xbf16> to vector<4x4xbf16>
    %c2_23 = arith.constant 2 : index
    %c0_24 = arith.constant 0 : index
    %c0_25 = arith.constant 0 : index
    %c0_26 = arith.constant 0 : index
    %13 = vector.load %arg5[%c2_23, %c0_24, %c0_25, %c0_26] : memref<3x3x4x4xbf16, #tpu.memory_space<vmem>>, vector<1x1x4x4xbf16>
    %14 = vector.shape_cast %13 : vector<1x1x4x4xbf16> to vector<4x4xbf16>
    %c2_27 = arith.constant 2 : index
    %c1_28 = arith.constant 1 : index
    %c0_29 = arith.constant 0 : index
    %c0_30 = arith.constant 0 : index
    %15 = vector.load %arg5[%c2_27, %c1_28, %c0_29, %c0_30] : memref<3x3x4x4xbf16, #tpu.memory_space<vmem>>, vector<1x1x4x4xbf16>
    %16 = vector.shape_cast %15 : vector<1x1x4x4xbf16> to vector<4x4xbf16>
    %c2_31 = arith.constant 2 : index
    %c2_32 = arith.constant 2 : index
    %c0_33 = arith.constant 0 : index
    %c0_34 = arith.constant 0 : index
    %17 = vector.load %arg5[%c2_31, %c2_32, %c0_33, %c0_34] : memref<3x3x4x4xbf16, #tpu.memory_space<vmem>>, vector<1x1x4x4xbf16>
    %18 = vector.shape_cast %17 : vector<1x1x4x4xbf16> to vector<4x4xbf16>
    %c0_35 = arith.constant 0 : index
    %c0_36 = arith.constant 0 : index
    %c0_37 = arith.constant 0 : index
    %c0_38 = arith.constant 0 : index
    %19 = vector.load %arg2[%c0_35, %c0_36, %c0_37, %c0_38] : memref<1x8x18x4xbf16, #tpu.memory_space<vmem>>, vector<1x1x18x4xbf16>
    %20 = vector.shape_cast %19 : vector<1x1x18x4xbf16> to vector<18x4xbf16>
    %c0_39 = arith.constant 0 : index
    %c0_40 = arith.constant 0 : index
    %c0_41 = arith.constant 0 : index
    %c0_42 = arith.constant 0 : index
    %21 = vector.load %arg3[%c0_39, %c0_40, %c0_41, %c0_42] : memref<1x8x18x4xbf16, #tpu.memory_space<vmem>>, vector<1x1x18x4xbf16>
    %22 = vector.shape_cast %21 : vector<1x1x18x4xbf16> to vector<18x4xbf16>
    %c0_43 = arith.constant 0 : index
    %c0_44 = arith.constant 0 : index
    %c0_45 = arith.constant 0 : index
    %c0_46 = arith.constant 0 : index
    %23 = vector.load %arg4[%c0_43, %c0_44, %c0_45, %c0_46] : memref<1x8x18x4xbf16, #tpu.memory_space<vmem>>, vector<1x1x18x4xbf16>
    %24 = vector.shape_cast %23 : vector<1x1x18x4xbf16> to vector<18x4xbf16>
    %cst = arith.constant 0.000000e+00 : f32
    %25 = vector.broadcast %cst : f32 to vector<16x4xf32>
    %26 = vector.extract_strided_slice %20 {offsets = [0, 0], sizes = [16, 4], strides = [1, 1]} : vector<18x4xbf16> to vector<16x4xbf16>
    %cst_47 = arith.constant dense<0.000000e+00> : vector<16x4xf32>
    %27 = tpu.matmul %26, %2, %cst_47 {dimension_numbers = #tpu.dot_dimension_numbers<[1], [0], [0], [1], [0, 0, 1, 1], [], []>} : vector<16x4xbf16>, vector<4x4xbf16>, vector<16x4xf32> -> vector<16x4xf32>
    %28 = arith.addf %25, %27 : vector<16x4xf32>
    %29 = vector.extract_strided_slice %20 {offsets = [1, 0], sizes = [16, 4], strides = [1, 1]} : vector<18x4xbf16> to vector<16x4xbf16>
    %cst_48 = arith.constant dense<0.000000e+00> : vector<16x4xf32>
    %30 = tpu.matmul %29, %4, %cst_48 {dimension_numbers = #tpu.dot_dimension_numbers<[1], [0], [0], [1], [0, 0, 1, 1], [], []>} : vector<16x4xbf16>, vector<4x4xbf16>, vector<16x4xf32> -> vector<16x4xf32>
    %31 = arith.addf %28, %30 : vector<16x4xf32>
    %32 = vector.extract_strided_slice %20 {offsets = [2, 0], sizes = [16, 4], strides = [1, 1]} : vector<18x4xbf16> to vector<16x4xbf16>
    %cst_49 = arith.constant dense<0.000000e+00> : vector<16x4xf32>
    %33 = tpu.matmul %32, %6, %cst_49 {dimension_numbers = #tpu.dot_dimension_numbers<[1], [0], [0], [1], [0, 0, 1, 1], [], []>} : vector<16x4xbf16>, vector<4x4xbf16>, vector<16x4xf32> -> vector<16x4xf32>
    %34 = arith.addf %31, %33 : vector<16x4xf32>
    %35 = vector.extract_strided_slice %22 {offsets = [0, 0], sizes = [16, 4], strides = [1, 1]} : vector<18x4xbf16> to vector<16x4xbf16>
    %cst_50 = arith.constant dense<0.000000e+00> : vector<16x4xf32>
    %36 = tpu.matmul %35, %8, %cst_50 {dimension_numbers = #tpu.dot_dimension_numbers<[1], [0], [0], [1], [0, 0, 1, 1], [], []>} : vector<16x4xbf16>, vector<4x4xbf16>, vector<16x4xf32> -> vector<16x4xf32>
    %37 = arith.addf %34, %36 : vector<16x4xf32>
    %38 = vector.extract_strided_slice %22 {offsets = [1, 0], sizes = [16, 4], strides = [1, 1]} : vector<18x4xbf16> to vector<16x4xbf16>
    %cst_51 = arith.constant dense<0.000000e+00> : vector<16x4xf32>
    %39 = tpu.matmul %38, %10, %cst_51 {dimension_numbers = #tpu.dot_dimension_numbers<[1], [0], [0], [1], [0, 0, 1, 1], [], []>} : vector<16x4xbf16>, vector<4x4xbf16>, vector<16x4xf32> -> vector<16x4xf32>
    %40 = arith.addf %37, %39 : vector<16x4xf32>
    %41 = vector.extract_strided_slice %22 {offsets = [2, 0], sizes = [16, 4], strides = [1, 1]} : vector<18x4xbf16> to vector<16x4xbf16>
    %cst_52 = arith.constant dense<0.000000e+00> : vector<16x4xf32>
    %42 = tpu.matmul %41, %12, %cst_52 {dimension_numbers = #tpu.dot_dimension_numbers<[1], [0], [0], [1], [0, 0, 1, 1], [], []>} : vector<16x4xbf16>, vector<4x4xbf16>, vector<16x4xf32> -> vector<16x4xf32>
    %43 = arith.addf %40, %42 : vector<16x4xf32>
    %44 = vector.extract_strided_slice %24 {offsets = [0, 0], sizes = [16, 4], strides = [1, 1]} : vector<18x4xbf16> to vector<16x4xbf16>
    %cst_53 = arith.constant dense<0.000000e+00> : vector<16x4xf32>
    %45 = tpu.matmul %44, %14, %cst_53 {dimension_numbers = #tpu.dot_dimension_numbers<[1], [0], [0], [1], [0, 0, 1, 1], [], []>} : vector<16x4xbf16>, vector<4x4xbf16>, vector<16x4xf32> -> vector<16x4xf32>
    %46 = arith.addf %43, %45 : vector<16x4xf32>
    %47 = vector.extract_strided_slice %24 {offsets = [1, 0], sizes = [16, 4], strides = [1, 1]} : vector<18x4xbf16> to vector<16x4xbf16>
    %cst_54 = arith.constant dense<0.000000e+00> : vector<16x4xf32>
    %48 = tpu.matmul %47, %16, %cst_54 {dimension_numbers = #tpu.dot_dimension_numbers<[1], [0], [0], [1], [0, 0, 1, 1], [], []>} : vector<16x4xbf16>, vector<4x4xbf16>, vector<16x4xf32> -> vector<16x4xf32>
    %49 = arith.addf %46, %48 : vector<16x4xf32>
    %50 = vector.extract_strided_slice %24 {offsets = [2, 0], sizes = [16, 4], strides = [1, 1]} : vector<18x4xbf16> to vector<16x4xbf16>
    %cst_55 = arith.constant dense<0.000000e+00> : vector<16x4xf32>
    %51 = tpu.matmul %50, %18, %cst_55 {dimension_numbers = #tpu.dot_dimension_numbers<[1], [0], [0], [1], [0, 0, 1, 1], [], []>} : vector<16x4xbf16>, vector<4x4xbf16>, vector<16x4xf32> -> vector<16x4xf32>
    %52 = arith.addf %49, %51 : vector<16x4xf32>
    %53 = vector.broadcast %0 : vector<1x4xf32> to vector<16x4xf32>
    %54 = arith.addf %52, %53 : vector<16x4xf32>
    %cst_56 = arith.constant 0.000000e+00 : f32
    %55 = vector.broadcast %cst_56 : f32 to vector<16x4xf32>
    %56 = arith.cmpf ogt, %54, %55 : vector<16x4xf32>
    %cst_57 = arith.constant 1.000000e-01 : f32
    %57 = vector.broadcast %cst_57 : f32 to vector<16x4xf32>
    %58 = arith.mulf %57, %54 : vector<16x4xf32>
    %59 = arith.select %56, %54, %58 : vector<16x4xi1>, vector<16x4xf32>
    %60 = arith.truncf %59 : vector<16x4xf32> to vector<16x4xbf16>
    %c0_58 = arith.constant 0 : index
    %c0_59 = arith.constant 0 : index
    %c0_60 = arith.constant 0 : index
    %c0_61 = arith.constant 0 : index
    %61 = vector.load %arg7[%c0_58, %c0_59, %c0_60, %c0_61] : memref<1x8x16x4xbf16, #tpu.memory_space<vmem>>, vector<1x1x16x4xbf16>
    %62 = vector.shape_cast %61 : vector<1x1x16x4xbf16> to vector<16x4xbf16>
    %63 = vector.shape_cast %60 : vector<16x4xbf16> to vector<1x1x16x4xbf16>
    tpu.vector_store %arg7[%c0_58, %c0_59, %c0_60, %c0_61], %63 {strides = array<i32>} : memref<1x8x16x4xbf16, #tpu.memory_space<vmem>>, vector<1x1x16x4xbf16>,
    %c0_62 = arith.constant 0 : index
    %c1_63 = arith.constant 1 : index
    %c0_64 = arith.constant 0 : index
    %c0_65 = arith.constant 0 : index
    %64 = vector.load %arg2[%c0_62, %c1_63, %c0_64, %c0_65] : memref<1x8x18x4xbf16, #tpu.memory_space<vmem>>, vector<1x1x18x4xbf16>
    %65 = vector.shape_cast %64 : vector<1x1x18x4xbf16> to vector<18x4xbf16>
    %c0_66 = arith.constant 0 : index
    %c1_67 = arith.constant 1 : index
    %c0_68 = arith.constant 0 : index
    %c0_69 = arith.constant 0 : index
    %66 = vector.load %arg3[%c0_66, %c1_67, %c0_68, %c0_69] : memref<1x8x18x4xbf16, #tpu.memory_space<vmem>>, vector<1x1x18x4xbf16>
    %67 = vector.shape_cast %66 : vector<1x1x18x4xbf16> to vector<18x4xbf16>
    %c0_70 = arith.constant 0 : index
    %c1_71 = arith.constant 1 : index
    %c0_72 = arith.constant 0 : index
    %c0_73 = arith.constant 0 : index
    %68 = vector.load %arg4[%c0_70, %c1_71, %c0_72, %c0_73] : memref<1x8x18x4xbf16, #tpu.memory_space<vmem>>, vector<1x1x18x4xbf16>
    %69 = vector.shape_cast %68 : vector<1x1x18x4xbf16> to vector<18x4xbf16>
    %cst_74 = arith.constant 0.000000e+00 : f32
    %70 = vector.broadcast %cst_74 : f32 to vector<16x4xf32>
    %71 = vector.extract_strided_slice %65 {offsets = [0, 0], sizes = [16, 4], strides = [1, 1]} : vector<18x4xbf16> to vector<16x4xbf16>
    %cst_75 = arith.constant dense<0.000000e+00> : vector<16x4xf32>
    %72 = tpu.matmul %71, %2, %cst_75 {dimension_numbers = #tpu.dot_dimension_numbers<[1], [0], [0], [1], [0, 0, 1, 1], [], []>} : vector<16x4xbf16>, vector<4x4xbf16>, vector<16x4xf32> -> vector<16x4xf32>
    %73 = arith.addf %70, %72 : vector<16x4xf32>
    %74 = vector.extract_strided_slice %65 {offsets = [1, 0], sizes = [16, 4], strides = [1, 1]} : vector<18x4xbf16> to vector<16x4xbf16>
    %cst_76 = arith.constant dense<0.000000e+00> : vector<16x4xf32>
    %75 = tpu.matmul %74, %4, %cst_76 {dimension_numbers = #tpu.dot_dimension_numbers<[1], [0], [0], [1], [0, 0, 1, 1], [], []>} : vector<16x4xbf16>, vector<4x4xbf16>, vector<16x4xf32> -> vector<16x4xf32>
    %76 = arith.addf %73, %75 : vector<16x4xf32>
    %77 = vector.extract_strided_slice %65 {offsets = [2, 0], sizes = [16, 4], strides = [1, 1]} : vector<18x4xbf16> to vector<16x4xbf16>
    %cst_77 = arith.constant dense<0.000000e+00> : vector<16x4xf32>
    %78 = tpu.matmul %77, %6, %cst_77 {dimension_numbers = #tpu.dot_dimension_numbers<[1], [0], [0], [1], [0, 0, 1, 1], [], []>} : vector<16x4xbf16>, vector<4x4xbf16>, vector<16x4xf32> -> vector<16x4xf32>
    %79 = arith.addf %76, %78 : vector<16x4xf32>
    %80 = vector.extract_strided_slice %67 {offsets = [0, 0], sizes = [16, 4], strides = [1, 1]} : vector<18x4xbf16> to vector<16x4xbf16>
    %cst_78 = arith.constant dense<0.000000e+00> : vector<16x4xf32>
    %81 = tpu.matmul %80, %8, %cst_78 {dimension_numbers = #tpu.dot_dimension_numbers<[1], [0], [0], [1], [0, 0, 1, 1], [], []>} : vector<16x4xbf16>, vector<4x4xbf16>, vector<16x4xf32> -> vector<16x4xf32>
    %82 = arith.addf %79, %81 : vector<16x4xf32>
    %83 = vector.extract_strided_slice %67 {offsets = [1, 0], sizes = [16, 4], strides = [1, 1]} : vector<18x4xbf16> to vector<16x4xbf16>
    %cst_79 = arith.constant dense<0.000000e+00> : vector<16x4xf32>
    %84 = tpu.matmul %83, %10, %cst_79 {dimension_numbers = #tpu.dot_dimension_numbers<[1], [0], [0], [1], [0, 0, 1, 1], [], []>} : vector<16x4xbf16>, vector<4x4xbf16>, vector<16x4xf32> -> vector<16x4xf32>
    %85 = arith.addf %82, %84 : vector<16x4xf32>
    %86 = vector.extract_strided_slice %67 {offsets = [2, 0], sizes = [16, 4], strides = [1, 1]} : vector<18x4xbf16> to vector<16x4xbf16>
    %cst_80 = arith.constant dense<0.000000e+00> : vector<16x4xf32>
    %87 = tpu.matmul %86, %12, %cst_80 {dimension_numbers = #tpu.dot_dimension_numbers<[1], [0], [0], [1], [0, 0, 1, 1], [], []>} : vector<16x4xbf16>, vector<4x4xbf16>, vector<16x4xf32> -> vector<16x4xf32>
    %88 = arith.addf %85, %87 : vector<16x4xf32>
    %89 = vector.extract_strided_slice %69 {offsets = [0, 0], sizes = [16, 4], strides = [1, 1]} : vector<18x4xbf16> to vector<16x4xbf16>
    %cst_81 = arith.constant dense<0.000000e+00> : vector<16x4xf32>
    %90 = tpu.matmul %89, %14, %cst_81 {dimension_numbers = #tpu.dot_dimension_numbers<[1], [0], [0], [1], [0, 0, 1, 1], [], []>} : vector<16x4xbf16>, vector<4x4xbf16>, vector<16x4xf32> -> vector<16x4xf32>
    %91 = arith.addf %88, %90 : vector<16x4xf32>
    %92 = vector.extract_strided_slice %69 {offsets = [1, 0], sizes = [16, 4], strides = [1, 1]} : vector<18x4xbf16> to vector<16x4xbf16>
    %cst_82 = arith.constant dense<0.000000e+00> : vector<16x4xf32>
    %93 = tpu.matmul %92, %16, %cst_82 {dimension_numbers = #tpu.dot_dimension_numbers<[1], [0], [0], [1], [0, 0, 1, 1], [], []>} : vector<16x4xbf16>, vector<4x4xbf16>, vector<16x4xf32> -> vector<16x4xf32>
    %94 = arith.addf %91, %93 : vector<16x4xf32>
    %95 = vector.extract_strided_slice %69 {offsets = [2, 0], sizes = [16, 4], strides = [1, 1]} : vector<18x4xbf16> to vector<16x4xbf16>
    %cst_83 = arith.constant dense<0.000000e+00> : vector<16x4xf32>
    %96 = tpu.matmul %95, %18, %cst_83 {dimension_numbers = #tpu.dot_dimension_numbers<[1], [0], [0], [1], [0, 0, 1, 1], [], []>} : vector<16x4xbf16>, vector<4x4xbf16>, vector<16x4xf32> -> vector<16x4xf32>
    %97 = arith.addf %94, %96 : vector<16x4xf32>
    %98 = vector.broadcast %0 : vector<1x4xf32> to vector<16x4xf32>
    %99 = arith.addf %97, %98 : vector<16x4xf32>
    %cst_84 = arith.constant 0.000000e+00 : f32
    %100 = vector.broadcast %cst_84 : f32 to vector<16x4xf32>
    %101 = arith.cmpf ogt, %99, %100 : vector<16x4xf32>
    %cst_85 = arith.constant 1.000000e-01 : f32
    %102 = vector.broadcast %cst_85 : f32 to vector<16x4xf32>
    %103 = arith.mulf %102, %99 : vector<16x4xf32>
    %104 = arith.select %101, %99, %103 : vector<16x4xi1>, vector<16x4xf32>
    %105 = arith.truncf %104 : vector<16x4xf32> to vector<16x4xbf16>
    %c0_86 = arith.constant 0 : index
    %c1_87 = arith.constant 1 : index
    %c0_88 = arith.constant 0 : index
    %c0_89 = arith.constant 0 : index
    %106 = vector.load %arg7[%c0_86, %c1_87, %c0_88, %c0_89] : memref<1x8x16x4xbf16, #tpu.memory_space<vmem>>, vector<1x1x16x4xbf16>
    %107 = vector.shape_cast %106 : vector<1x1x16x4xbf16> to vector<16x4xbf16>
    %108 = vector.shape_cast %105 : vector<16x4xbf16> to vector<1x1x16x4xbf16>
    tpu.vector_store %arg7[%c0_86, %c1_87, %c0_88, %c0_89], %108 {strides = array<i32>} : memref<1x8x16x4xbf16, #tpu.memory_space<vmem>>, vector<1x1x16x4xbf16>,
    %c0_90 = arith.constant 0 : index
    %c2_91 = arith.constant 2 : index
    %c0_92 = arith.constant 0 : index
    %c0_93 = arith.constant 0 : index
    %109 = vector.load %arg2[%c0_90, %c2_91, %c0_92, %c0_93] : memref<1x8x18x4xbf16, #tpu.memory_space<vmem>>, vector<1x1x18x4xbf16>
    %110 = vector.shape_cast %109 : vector<1x1x18x4xbf16> to vector<18x4xbf16>
    %c0_94 = arith.constant 0 : index
    %c2_95 = arith.constant 2 : index
    %c0_96 = arith.constant 0 : index
    %c0_97 = arith.constant 0 : index
    %111 = vector.load %arg3[%c0_94, %c2_95, %c0_96, %c0_97] : memref<1x8x18x4xbf16, #tpu.memory_space<vmem>>, vector<1x1x18x4xbf16>
    %112 = vector.shape_cast %111 : vector<1x1x18x4xbf16> to vector<18x4xbf16>
    %c0_98 = arith.constant 0 : index
    %c2_99 = arith.constant 2 : index
    %c0_100 = arith.constant 0 : index
    %c0_101 = arith.constant 0 : index
    %113 = vector.load %arg4[%c0_98, %c2_99, %c0_100, %c0_101] : memref<1x8x18x4xbf16, #tpu.memory_space<vmem>>, vector<1x1x18x4xbf16>
    %114 = vector.shape_cast %113 : vector<1x1x18x4xbf16> to vector<18x4xbf16>
    %cst_102 = arith.constant 0.000000e+00 : f32
    %115 = vector.broadcast %cst_102 : f32 to vector<16x4xf32>
    %116 = vector.extract_strided_slice %110 {offsets = [0, 0], sizes = [16, 4], strides = [1, 1]} : vector<18x4xbf16> to vector<16x4xbf16>
    %cst_103 = arith.constant dense<0.000000e+00> : vector<16x4xf32>
    %117 = tpu.matmul %116, %2, %cst_103 {dimension_numbers = #tpu.dot_dimension_numbers<[1], [0], [0], [1], [0, 0, 1, 1], [], []>} : vector<16x4xbf16>, vector<4x4xbf16>, vector<16x4xf32> -> vector<16x4xf32>
    %118 = arith.addf %115, %117 : vector<16x4xf32>
    %119 = vector.extract_strided_slice %110 {offsets = [1, 0], sizes = [16, 4], strides = [1, 1]} : vector<18x4xbf16> to vector<16x4xbf16>
    %cst_104 = arith.constant dense<0.000000e+00> : vector<16x4xf32>
    %120 = tpu.matmul %119, %4, %cst_104 {dimension_numbers = #tpu.dot_dimension_numbers<[1], [0], [0], [1], [0, 0, 1, 1], [], []>} : vector<16x4xbf16>, vector<4x4xbf16>, vector<16x4xf32> -> vector<16x4xf32>
    %121 = arith.addf %118, %120 : vector<16x4xf32>
    %122 = vector.extract_strided_slice %110 {offsets = [2, 0], sizes = [16, 4], strides = [1, 1]} : vector<18x4xbf16> to vector<16x4xbf16>
    %cst_105 = arith.constant dense<0.000000e+00> : vector<16x4xf32>
    %123 = tpu.matmul %122, %6, %cst_105 {dimension_numbers = #tpu.dot_dimension_numbers<[1], [0], [0], [1], [0, 0, 1, 1], [], []>} : vector<16x4xbf16>, vector<4x4xbf16>, vector<16x4xf32> -> vector<16x4xf32>
    %124 = arith.addf %121, %123 : vector<16x4xf32>
    %125 = vector.extract_strided_slice %112 {offsets = [0, 0], sizes = [16, 4], strides = [1, 1]} : vector<18x4xbf16> to vector<16x4xbf16>
    %cst_106 = arith.constant dense<0.000000e+00> : vector<16x4xf32>
    %126 = tpu.matmul %125, %8, %cst_106 {dimension_numbers = #tpu.dot_dimension_numbers<[1], [0], [0], [1], [0, 0, 1, 1], [], []>} : vector<16x4xbf16>, vector<4x4xbf16>, vector<16x4xf32> -> vector<16x4xf32>
    %127 = arith.addf %124, %126 : vector<16x4xf32>
    %128 = vector.extract_strided_slice %112 {offsets = [1, 0], sizes = [16, 4], strides = [1, 1]} : vector<18x4xbf16> to vector<16x4xbf16>
    %cst_107 = arith.constant dense<0.000000e+00> : vector<16x4xf32>
    %129 = tpu.matmul %128, %10, %cst_107 {dimension_numbers = #tpu.dot_dimension_numbers<[1], [0], [0], [1], [0, 0, 1, 1], [], []>} : vector<16x4xbf16>, vector<4x4xbf16>, vector<16x4xf32> -> vector<16x4xf32>
    %130 = arith.addf %127, %129 : vector<16x4xf32>
    %131 = vector.extract_strided_slice %112 {offsets = [2, 0], sizes = [16, 4], strides = [1, 1]} : vector<18x4xbf16> to vector<16x4xbf16>
    %cst_108 = arith.constant dense<0.000000e+00> : vector<16x4xf32>
    %132 = tpu.matmul %131, %12, %cst_108 {dimension_numbers = #tpu.dot_dimension_numbers<[1], [0], [0], [1], [0, 0, 1, 1], [], []>} : vector<16x4xbf16>, vector<4x4xbf16>, vector<16x4xf32> -> vector<16x4xf32>
    %133 = arith.addf %130, %132 : vector<16x4xf32>
    %134 = vector.extract_strided_slice %114 {offsets = [0, 0], sizes = [16, 4], strides = [1, 1]} : vector<18x4xbf16> to vector<16x4xbf16>
    %cst_109 = arith.constant dense<0.000000e+00> : vector<16x4xf32>
    %135 = tpu.matmul %134, %14, %cst_109 {dimension_numbers = #tpu.dot_dimension_numbers<[1], [0], [0], [1], [0, 0, 1, 1], [], []>} : vector<16x4xbf16>, vector<4x4xbf16>, vector<16x4xf32> -> vector<16x4xf32>
    %136 = arith.addf %133, %135 : vector<16x4xf32>
    %137 = vector.extract_strided_slice %114 {offsets = [1, 0], sizes = [16, 4], strides = [1, 1]} : vector<18x4xbf16> to vector<16x4xbf16>
    %cst_110 = arith.constant dense<0.000000e+00> : vector<16x4xf32>
    %138 = tpu.matmul %137, %16, %cst_110 {dimension_numbers = #tpu.dot_dimension_numbers<[1], [0], [0], [1], [0, 0, 1, 1], [], []>} : vector<16x4xbf16>, vector<4x4xbf16>, vector<16x4xf32> -> vector<16x4xf32>
    %139 = arith.addf %136, %138 : vector<16x4xf32>
    %140 = vector.extract_strided_slice %114 {offsets = [2, 0], sizes = [16, 4], strides = [1, 1]} : vector<18x4xbf16> to vector<16x4xbf16>
    %cst_111 = arith.constant dense<0.000000e+00> : vector<16x4xf32>
    %141 = tpu.matmul %140, %18, %cst_111 {dimension_numbers = #tpu.dot_dimension_numbers<[1], [0], [0], [1], [0, 0, 1, 1], [], []>} : vector<16x4xbf16>, vector<4x4xbf16>, vector<16x4xf32> -> vector<16x4xf32>
    %142 = arith.addf %139, %141 : vector<16x4xf32>
    %143 = vector.broadcast %0 : vector<1x4xf32> to vector<16x4xf32>
    %144 = arith.addf %142, %143 : vector<16x4xf32>
    %cst_112 = arith.constant 0.000000e+00 : f32
    %145 = vector.broadcast %cst_112 : f32 to vector<16x4xf32>
    %146 = arith.cmpf ogt, %144, %145 : vector<16x4xf32>
    %cst_113 = arith.constant 1.000000e-01 : f32
    %147 = vector.broadcast %cst_113 : f32 to vector<16x4xf32>
    %148 = arith.mulf %147, %144 : vector<16x4xf32>
    %149 = arith.select %146, %144, %148 : vector<16x4xi1>, vector<16x4xf32>
    %150 = arith.truncf %149 : vector<16x4xf32> to vector<16x4xbf16>
    %c0_114 = arith.constant 0 : index
    %c2_115 = arith.constant 2 : index
    %c0_116 = arith.constant 0 : index
    %c0_117 = arith.constant 0 : index
    %151 = vector.load %arg7[%c0_114, %c2_115, %c0_116, %c0_117] : memref<1x8x16x4xbf16, #tpu.memory_space<vmem>>, vector<1x1x16x4xbf16>
    %152 = vector.shape_cast %151 : vector<1x1x16x4xbf16> to vector<16x4xbf16>
    %153 = vector.shape_cast %150 : vector<16x4xbf16> to vector<1x1x16x4xbf16>
    tpu.vector_store %arg7[%c0_114, %c2_115, %c0_116, %c0_117], %153 {strides = array<i32>} : memref<1x8x16x4xbf16, #tpu.memory_space<vmem>>, vector<1x1x16x4xbf16>,
    %c0_118 = arith.constant 0 : index
    %c3 = arith.constant 3 : index
    %c0_119 = arith.constant 0 : index
    %c0_120 = arith.constant 0 : index
    %154 = vector.load %arg2[%c0_118, %c3, %c0_119, %c0_120] : memref<1x8x18x4xbf16, #tpu.memory_space<vmem>>, vector<1x1x18x4xbf16>
    %155 = vector.shape_cast %154 : vector<1x1x18x4xbf16> to vector<18x4xbf16>
    %c0_121 = arith.constant 0 : index
    %c3_122 = arith.constant 3 : index
    %c0_123 = arith.constant 0 : index
    %c0_124 = arith.constant 0 : index
    %156 = vector.load %arg3[%c0_121, %c3_122, %c0_123, %c0_124] : memref<1x8x18x4xbf16, #tpu.memory_space<vmem>>, vector<1x1x18x4xbf16>
    %157 = vector.shape_cast %156 : vector<1x1x18x4xbf16> to vector<18x4xbf16>
    %c0_125 = arith.constant 0 : index
    %c3_126 = arith.constant 3 : index
    %c0_127 = arith.constant 0 : index
    %c0_128 = arith.constant 0 : index
    %158 = vector.load %arg4[%c0_125, %c3_126, %c0_127, %c0_128] : memref<1x8x18x4xbf16, #tpu.memory_space<vmem>>, vector<1x1x18x4xbf16>
    %159 = vector.shape_cast %158 : vector<1x1x18x4xbf16> to vector<18x4xbf16>
    %cst_129 = arith.constant 0.000000e+00 : f32
    %160 = vector.broadcast %cst_129 : f32 to vector<16x4xf32>
    %161 = vector.extract_strided_slice %155 {offsets = [0, 0], sizes = [16, 4], strides = [1, 1]} : vector<18x4xbf16> to vector<16x4xbf16>
    %cst_130 = arith.constant dense<0.000000e+00> : vector<16x4xf32>
    %162 = tpu.matmul %161, %2, %cst_130 {dimension_numbers = #tpu.dot_dimension_numbers<[1], [0], [0], [1], [0, 0, 1, 1], [], []>} : vector<16x4xbf16>, vector<4x4xbf16>, vector<16x4xf32> -> vector<16x4xf32>
    %163 = arith.addf %160, %162 : vector<16x4xf32>
    %164 = vector.extract_strided_slice %155 {offsets = [1, 0], sizes = [16, 4], strides = [1, 1]} : vector<18x4xbf16> to vector<16x4xbf16>
    %cst_131 = arith.constant dense<0.000000e+00> : vector<16x4xf32>
    %165 = tpu.matmul %164, %4, %cst_131 {dimension_numbers = #tpu.dot_dimension_numbers<[1], [0], [0], [1], [0, 0, 1, 1], [], []>} : vector<16x4xbf16>, vector<4x4xbf16>, vector<16x4xf32> -> vector<16x4xf32>
    %166 = arith.addf %163, %165 : vector<16x4xf32>
    %167 = vector.extract_strided_slice %155 {offsets = [2, 0], sizes = [16, 4], strides = [1, 1]} : vector<18x4xbf16> to vector<16x4xbf16>
    %cst_132 = arith.constant dense<0.000000e+00> : vector<16x4xf32>
    %168 = tpu.matmul %167, %6, %cst_132 {dimension_numbers = #tpu.dot_dimension_numbers<[1], [0], [0], [1], [0, 0, 1, 1], [], []>} : vector<16x4xbf16>, vector<4x4xbf16>, vector<16x4xf32> -> vector<16x4xf32>
    %169 = arith.addf %166, %168 : vector<16x4xf32>
    %170 = vector.extract_strided_slice %157 {offsets = [0, 0], sizes = [16, 4], strides = [1, 1]} : vector<18x4xbf16> to vector<16x4xbf16>
    %cst_133 = arith.constant dense<0.000000e+00> : vector<16x4xf32>
    %171 = tpu.matmul %170, %8, %cst_133 {dimension_numbers = #tpu.dot_dimension_numbers<[1], [0], [0], [1], [0, 0, 1, 1], [], []>} : vector<16x4xbf16>, vector<4x4xbf16>, vector<16x4xf32> -> vector<16x4xf32>
    %172 = arith.addf %169, %171 : vector<16x4xf32>
    %173 = vector.extract_strided_slice %157 {offsets = [1, 0], sizes = [16, 4], strides = [1, 1]} : vector<18x4xbf16> to vector<16x4xbf16>
    %cst_134 = arith.constant dense<0.000000e+00> : vector<16x4xf32>
    %174 = tpu.matmul %173, %10, %cst_134 {dimension_numbers = #tpu.dot_dimension_numbers<[1], [0], [0], [1], [0, 0, 1, 1], [], []>} : vector<16x4xbf16>, vector<4x4xbf16>, vector<16x4xf32> -> vector<16x4xf32>
    %175 = arith.addf %172, %174 : vector<16x4xf32>
    %176 = vector.extract_strided_slice %157 {offsets = [2, 0], sizes = [16, 4], strides = [1, 1]} : vector<18x4xbf16> to vector<16x4xbf16>
    %cst_135 = arith.constant dense<0.000000e+00> : vector<16x4xf32>
    %177 = tpu.matmul %176, %12, %cst_135 {dimension_numbers = #tpu.dot_dimension_numbers<[1], [0], [0], [1], [0, 0, 1, 1], [], []>} : vector<16x4xbf16>, vector<4x4xbf16>, vector<16x4xf32> -> vector<16x4xf32>
    %178 = arith.addf %175, %177 : vector<16x4xf32>
    %179 = vector.extract_strided_slice %159 {offsets = [0, 0], sizes = [16, 4], strides = [1, 1]} : vector<18x4xbf16> to vector<16x4xbf16>
    %cst_136 = arith.constant dense<0.000000e+00> : vector<16x4xf32>
    %180 = tpu.matmul %179, %14, %cst_136 {dimension_numbers = #tpu.dot_dimension_numbers<[1], [0], [0], [1], [0, 0, 1, 1], [], []>} : vector<16x4xbf16>, vector<4x4xbf16>, vector<16x4xf32> -> vector<16x4xf32>
    %181 = arith.addf %178, %180 : vector<16x4xf32>
    %182 = vector.extract_strided_slice %159 {offsets = [1, 0], sizes = [16, 4], strides = [1, 1]} : vector<18x4xbf16> to vector<16x4xbf16>
    %cst_137 = arith.constant dense<0.000000e+00> : vector<16x4xf32>
    %183 = tpu.matmul %182, %16, %cst_137 {dimension_numbers = #tpu.dot_dimension_numbers<[1], [0], [0], [1], [0, 0, 1, 1], [], []>} : vector<16x4xbf16>, vector<4x4xbf16>, vector<16x4xf32> -> vector<16x4xf32>
    %184 = arith.addf %181, %183 : vector<16x4xf32>
    %185 = vector.extract_strided_slice %159 {offsets = [2, 0], sizes = [16, 4], strides = [1, 1]} : vector<18x4xbf16> to vector<16x4xbf16>
    %cst_138 = arith.constant dense<0.000000e+00> : vector<16x4xf32>
    %186 = tpu.matmul %185, %18, %cst_138 {dimension_numbers = #tpu.dot_dimension_numbers<[1], [0], [0], [1], [0, 0, 1, 1], [], []>} : vector<16x4xbf16>, vector<4x4xbf16>, vector<16x4xf32> -> vector<16x4xf32>
    %187 = arith.addf %184, %186 : vector<16x4xf32>
    %188 = vector.broadcast %0 : vector<1x4xf32> to vector<16x4xf32>
    %189 = arith.addf %187, %188 : vector<16x4xf32>
    %cst_139 = arith.constant 0.000000e+00 : f32
    %190 = vector.broadcast %cst_139 : f32 to vector<16x4xf32>
    %191 = arith.cmpf ogt, %189, %190 : vector<16x4xf32>
    %cst_140 = arith.constant 1.000000e-01 : f32
    %192 = vector.broadcast %cst_140 : f32 to vector<16x4xf32>
    %193 = arith.mulf %192, %189 : vector<16x4xf32>
    %194 = arith.select %191, %189, %193 : vector<16x4xi1>, vector<16x4xf32>
    %195 = arith.truncf %194 : vector<16x4xf32> to vector<16x4xbf16>
    %c0_141 = arith.constant 0 : index
    %c3_142 = arith.constant 3 : index
    %c0_143 = arith.constant 0 : index
    %c0_144 = arith.constant 0 : index
    %196 = vector.load %arg7[%c0_141, %c3_142, %c0_143, %c0_144] : memref<1x8x16x4xbf16, #tpu.memory_space<vmem>>, vector<1x1x16x4xbf16>
    %197 = vector.shape_cast %196 : vector<1x1x16x4xbf16> to vector<16x4xbf16>
    %198 = vector.shape_cast %195 : vector<16x4xbf16> to vector<1x1x16x4xbf16>
    tpu.vector_store %arg7[%c0_141, %c3_142, %c0_143, %c0_144], %198 {strides = array<i32>} : memref<1x8x16x4xbf16, #tpu.memory_space<vmem>>, vector<1x1x16x4xbf16>,
    %c0_145 = arith.constant 0 : index
    %c4 = arith.constant 4 : index
    %c0_146 = arith.constant 0 : index
    %c0_147 = arith.constant 0 : index
    %199 = vector.load %arg2[%c0_145, %c4, %c0_146, %c0_147] : memref<1x8x18x4xbf16, #tpu.memory_space<vmem>>, vector<1x1x18x4xbf16>
    %200 = vector.shape_cast %199 : vector<1x1x18x4xbf16> to vector<18x4xbf16>
    %c0_148 = arith.constant 0 : index
    %c4_149 = arith.constant 4 : index
    %c0_150 = arith.constant 0 : index
    %c0_151 = arith.constant 0 : index
    %201 = vector.load %arg3[%c0_148, %c4_149, %c0_150, %c0_151] : memref<1x8x18x4xbf16, #tpu.memory_space<vmem>>, vector<1x1x18x4xbf16>
    %202 = vector.shape_cast %201 : vector<1x1x18x4xbf16> to vector<18x4xbf16>
    %c0_152 = arith.constant 0 : index
    %c4_153 = arith.constant 4 : index
    %c0_154 = arith.constant 0 : index
    %c0_155 = arith.constant 0 : index
    %203 = vector.load %arg4[%c0_152, %c4_153, %c0_154, %c0_155] : memref<1x8x18x4xbf16, #tpu.memory_space<vmem>>, vector<1x1x18x4xbf16>
    %204 = vector.shape_cast %203 : vector<1x1x18x4xbf16> to vector<18x4xbf16>
    %cst_156 = arith.constant 0.000000e+00 : f32
    %205 = vector.broadcast %cst_156 : f32 to vector<16x4xf32>
    %206 = vector.extract_strided_slice %200 {offsets = [0, 0], sizes = [16, 4], strides = [1, 1]} : vector<18x4xbf16> to vector<16x4xbf16>
    %cst_157 = arith.constant dense<0.000000e+00> : vector<16x4xf32>
    %207 = tpu.matmul %206, %2, %cst_157 {dimension_numbers = #tpu.dot_dimension_numbers<[1], [0], [0], [1], [0, 0, 1, 1], [], []>} : vector<16x4xbf16>, vector<4x4xbf16>, vector<16x4xf32> -> vector<16x4xf32>
    %208 = arith.addf %205, %207 : vector<16x4xf32>
    %209 = vector.extract_strided_slice %200 {offsets = [1, 0], sizes = [16, 4], strides = [1, 1]} : vector<18x4xbf16> to vector<16x4xbf16>
    %cst_158 = arith.constant dense<0.000000e+00> : vector<16x4xf32>
    %210 = tpu.matmul %209, %4, %cst_158 {dimension_numbers = #tpu.dot_dimension_numbers<[1], [0], [0], [1], [0, 0, 1, 1], [], []>} : vector<16x4xbf16>, vector<4x4xbf16>, vector<16x4xf32> -> vector<16x4xf32>
    %211 = arith.addf %208, %210 : vector<16x4xf32>
    %212 = vector.extract_strided_slice %200 {offsets = [2, 0], sizes = [16, 4], strides = [1, 1]} : vector<18x4xbf16> to vector<16x4xbf16>
    %cst_159 = arith.constant dense<0.000000e+00> : vector<16x4xf32>
    %213 = tpu.matmul %212, %6, %cst_159 {dimension_numbers = #tpu.dot_dimension_numbers<[1], [0], [0], [1], [0, 0, 1, 1], [], []>} : vector<16x4xbf16>, vector<4x4xbf16>, vector<16x4xf32> -> vector<16x4xf32>
    %214 = arith.addf %211, %213 : vector<16x4xf32>
    %215 = vector.extract_strided_slice %202 {offsets = [0, 0], sizes = [16, 4], strides = [1, 1]} : vector<18x4xbf16> to vector<16x4xbf16>
    %cst_160 = arith.constant dense<0.000000e+00> : vector<16x4xf32>
    %216 = tpu.matmul %215, %8, %cst_160 {dimension_numbers = #tpu.dot_dimension_numbers<[1], [0], [0], [1], [0, 0, 1, 1], [], []>} : vector<16x4xbf16>, vector<4x4xbf16>, vector<16x4xf32> -> vector<16x4xf32>
    %217 = arith.addf %214, %216 : vector<16x4xf32>
    %218 = vector.extract_strided_slice %202 {offsets = [1, 0], sizes = [16, 4], strides = [1, 1]} : vector<18x4xbf16> to vector<16x4xbf16>
    %cst_161 = arith.constant dense<0.000000e+00> : vector<16x4xf32>
    %219 = tpu.matmul %218, %10, %cst_161 {dimension_numbers = #tpu.dot_dimension_numbers<[1], [0], [0], [1], [0, 0, 1, 1], [], []>} : vector<16x4xbf16>, vector<4x4xbf16>, vector<16x4xf32> -> vector<16x4xf32>
    %220 = arith.addf %217, %219 : vector<16x4xf32>
    %221 = vector.extract_strided_slice %202 {offsets = [2, 0], sizes = [16, 4], strides = [1, 1]} : vector<18x4xbf16> to vector<16x4xbf16>
    %cst_162 = arith.constant dense<0.000000e+00> : vector<16x4xf32>
    %222 = tpu.matmul %221, %12, %cst_162 {dimension_numbers = #tpu.dot_dimension_numbers<[1], [0], [0], [1], [0, 0, 1, 1], [], []>} : vector<16x4xbf16>, vector<4x4xbf16>, vector<16x4xf32> -> vector<16x4xf32>
    %223 = arith.addf %220, %222 : vector<16x4xf32>
    %224 = vector.extract_strided_slice %204 {offsets = [0, 0], sizes = [16, 4], strides = [1, 1]} : vector<18x4xbf16> to vector<16x4xbf16>
    %cst_163 = arith.constant dense<0.000000e+00> : vector<16x4xf32>
    %225 = tpu.matmul %224, %14, %cst_163 {dimension_numbers = #tpu.dot_dimension_numbers<[1], [0], [0], [1], [0, 0, 1, 1], [], []>} : vector<16x4xbf16>, vector<4x4xbf16>, vector<16x4xf32> -> vector<16x4xf32>
    %226 = arith.addf %223, %225 : vector<16x4xf32>
    %227 = vector.extract_strided_slice %204 {offsets = [1, 0], sizes = [16, 4], strides = [1, 1]} : vector<18x4xbf16> to vector<16x4xbf16>
    %cst_164 = arith.constant dense<0.000000e+00> : vector<16x4xf32>
    %228 = tpu.matmul %227, %16, %cst_164 {dimension_numbers = #tpu.dot_dimension_numbers<[1], [0], [0], [1], [0, 0, 1, 1], [], []>} : vector<16x4xbf16>, vector<4x4xbf16>, vector<16x4xf32> -> vector<16x4xf32>
    %229 = arith.addf %226, %228 : vector<16x4xf32>
    %230 = vector.extract_strided_slice %204 {offsets = [2, 0], sizes = [16, 4], strides = [1, 1]} : vector<18x4xbf16> to vector<16x4xbf16>
    %cst_165 = arith.constant dense<0.000000e+00> : vector<16x4xf32>
    %231 = tpu.matmul %230, %18, %cst_165 {dimension_numbers = #tpu.dot_dimension_numbers<[1], [0], [0], [1], [0, 0, 1, 1], [], []>} : vector<16x4xbf16>, vector<4x4xbf16>, vector<16x4xf32> -> vector<16x4xf32>
    %232 = arith.addf %229, %231 : vector<16x4xf32>
    %233 = vector.broadcast %0 : vector<1x4xf32> to vector<16x4xf32>
    %234 = arith.addf %232, %233 : vector<16x4xf32>
    %cst_166 = arith.constant 0.000000e+00 : f32
    %235 = vector.broadcast %cst_166 : f32 to vector<16x4xf32>
    %236 = arith.cmpf ogt, %234, %235 : vector<16x4xf32>
    %cst_167 = arith.constant 1.000000e-01 : f32
    %237 = vector.broadcast %cst_167 : f32 to vector<16x4xf32>
    %238 = arith.mulf %237, %234 : vector<16x4xf32>
    %239 = arith.select %236, %234, %238 : vector<16x4xi1>, vector<16x4xf32>
    %240 = arith.truncf %239 : vector<16x4xf32> to vector<16x4xbf16>
    %c0_168 = arith.constant 0 : index
    %c4_169 = arith.constant 4 : index
    %c0_170 = arith.constant 0 : index
    %c0_171 = arith.constant 0 : index
    %241 = vector.load %arg7[%c0_168, %c4_169, %c0_170, %c0_171] : memref<1x8x16x4xbf16, #tpu.memory_space<vmem>>, vector<1x1x16x4xbf16>
    %242 = vector.shape_cast %241 : vector<1x1x16x4xbf16> to vector<16x4xbf16>
    %243 = vector.shape_cast %240 : vector<16x4xbf16> to vector<1x1x16x4xbf16>
    tpu.vector_store %arg7[%c0_168, %c4_169, %c0_170, %c0_171], %243 {strides = array<i32>} : memref<1x8x16x4xbf16, #tpu.memory_space<vmem>>, vector<1x1x16x4xbf16>,
    %c0_172 = arith.constant 0 : index
    %c5 = arith.constant 5 : index
    %c0_173 = arith.constant 0 : index
    %c0_174 = arith.constant 0 : index
    %244 = vector.load %arg2[%c0_172, %c5, %c0_173, %c0_174] : memref<1x8x18x4xbf16, #tpu.memory_space<vmem>>, vector<1x1x18x4xbf16>
    %245 = vector.shape_cast %244 : vector<1x1x18x4xbf16> to vector<18x4xbf16>
    %c0_175 = arith.constant 0 : index
    %c5_176 = arith.constant 5 : index
    %c0_177 = arith.constant 0 : index
    %c0_178 = arith.constant 0 : index
    %246 = vector.load %arg3[%c0_175, %c5_176, %c0_177, %c0_178] : memref<1x8x18x4xbf16, #tpu.memory_space<vmem>>, vector<1x1x18x4xbf16>
    %247 = vector.shape_cast %246 : vector<1x1x18x4xbf16> to vector<18x4xbf16>
    %c0_179 = arith.constant 0 : index
    %c5_180 = arith.constant 5 : index
    %c0_181 = arith.constant 0 : index
    %c0_182 = arith.constant 0 : index
    %248 = vector.load %arg4[%c0_179, %c5_180, %c0_181, %c0_182] : memref<1x8x18x4xbf16, #tpu.memory_space<vmem>>, vector<1x1x18x4xbf16>
    %249 = vector.shape_cast %248 : vector<1x1x18x4xbf16> to vector<18x4xbf16>
    %cst_183 = arith.constant 0.000000e+00 : f32
    %250 = vector.broadcast %cst_183 : f32 to vector<16x4xf32>
    %251 = vector.extract_strided_slice %245 {offsets = [0, 0], sizes = [16, 4], strides = [1, 1]} : vector<18x4xbf16> to vector<16x4xbf16>
    %cst_184 = arith.constant dense<0.000000e+00> : vector<16x4xf32>
    %252 = tpu.matmul %251, %2, %cst_184 {dimension_numbers = #tpu.dot_dimension_numbers<[1], [0], [0], [1], [0, 0, 1, 1], [], []>} : vector<16x4xbf16>, vector<4x4xbf16>, vector<16x4xf32> -> vector<16x4xf32>
    %253 = arith.addf %250, %252 : vector<16x4xf32>
    %254 = vector.extract_strided_slice %245 {offsets = [1, 0], sizes = [16, 4], strides = [1, 1]} : vector<18x4xbf16> to vector<16x4xbf16>
    %cst_185 = arith.constant dense<0.000000e+00> : vector<16x4xf32>
    %255 = tpu.matmul %254, %4, %cst_185 {dimension_numbers = #tpu.dot_dimension_numbers<[1], [0], [0], [1], [0, 0, 1, 1], [], []>} : vector<16x4xbf16>, vector<4x4xbf16>, vector<16x4xf32> -> vector<16x4xf32>
    %256 = arith.addf %253, %255 : vector<16x4xf32>
    %257 = vector.extract_strided_slice %245 {offsets = [2, 0], sizes = [16, 4], strides = [1, 1]} : vector<18x4xbf16> to vector<16x4xbf16>
    %cst_186 = arith.constant dense<0.000000e+00> : vector<16x4xf32>
    %258 = tpu.matmul %257, %6, %cst_186 {dimension_numbers = #tpu.dot_dimension_numbers<[1], [0], [0], [1], [0, 0, 1, 1], [], []>} : vector<16x4xbf16>, vector<4x4xbf16>, vector<16x4xf32> -> vector<16x4xf32>
    %259 = arith.addf %256, %258 : vector<16x4xf32>
    %260 = vector.extract_strided_slice %247 {offsets = [0, 0], sizes = [16, 4], strides = [1, 1]} : vector<18x4xbf16> to vector<16x4xbf16>
    %cst_187 = arith.constant dense<0.000000e+00> : vector<16x4xf32>
    %261 = tpu.matmul %260, %8, %cst_187 {dimension_numbers = #tpu.dot_dimension_numbers<[1], [0], [0], [1], [0, 0, 1, 1], [], []>} : vector<16x4xbf16>, vector<4x4xbf16>, vector<16x4xf32> -> vector<16x4xf32>
    %262 = arith.addf %259, %261 : vector<16x4xf32>
    %263 = vector.extract_strided_slice %247 {offsets = [1, 0], sizes = [16, 4], strides = [1, 1]} : vector<18x4xbf16> to vector<16x4xbf16>
    %cst_188 = arith.constant dense<0.000000e+00> : vector<16x4xf32>
    %264 = tpu.matmul %263, %10, %cst_188 {dimension_numbers = #tpu.dot_dimension_numbers<[1], [0], [0], [1], [0, 0, 1, 1], [], []>} : vector<16x4xbf16>, vector<4x4xbf16>, vector<16x4xf32> -> vector<16x4xf32>
    %265 = arith.addf %262, %264 : vector<16x4xf32>
    %266 = vector.extract_strided_slice %247 {offsets = [2, 0], sizes = [16, 4], strides = [1, 1]} : vector<18x4xbf16> to vector<16x4xbf16>
    %cst_189 = arith.constant dense<0.000000e+00> : vector<16x4xf32>
    %267 = tpu.matmul %266, %12, %cst_189 {dimension_numbers = #tpu.dot_dimension_numbers<[1], [0], [0], [1], [0, 0, 1, 1], [], []>} : vector<16x4xbf16>, vector<4x4xbf16>, vector<16x4xf32> -> vector<16x4xf32>
    %268 = arith.addf %265, %267 : vector<16x4xf32>
    %269 = vector.extract_strided_slice %249 {offsets = [0, 0], sizes = [16, 4], strides = [1, 1]} : vector<18x4xbf16> to vector<16x4xbf16>
    %cst_190 = arith.constant dense<0.000000e+00> : vector<16x4xf32>
    %270 = tpu.matmul %269, %14, %cst_190 {dimension_numbers = #tpu.dot_dimension_numbers<[1], [0], [0], [1], [0, 0, 1, 1], [], []>} : vector<16x4xbf16>, vector<4x4xbf16>, vector<16x4xf32> -> vector<16x4xf32>
    %271 = arith.addf %268, %270 : vector<16x4xf32>
    %272 = vector.extract_strided_slice %249 {offsets = [1, 0], sizes = [16, 4], strides = [1, 1]} : vector<18x4xbf16> to vector<16x4xbf16>
    %cst_191 = arith.constant dense<0.000000e+00> : vector<16x4xf32>
    %273 = tpu.matmul %272, %16, %cst_191 {dimension_numbers = #tpu.dot_dimension_numbers<[1], [0], [0], [1], [0, 0, 1, 1], [], []>} : vector<16x4xbf16>, vector<4x4xbf16>, vector<16x4xf32> -> vector<16x4xf32>
    %274 = arith.addf %271, %273 : vector<16x4xf32>
    %275 = vector.extract_strided_slice %249 {offsets = [2, 0], sizes = [16, 4], strides = [1, 1]} : vector<18x4xbf16> to vector<16x4xbf16>
    %cst_192 = arith.constant dense<0.000000e+00> : vector<16x4xf32>
    %276 = tpu.matmul %275, %18, %cst_192 {dimension_numbers = #tpu.dot_dimension_numbers<[1], [0], [0], [1], [0, 0, 1, 1], [], []>} : vector<16x4xbf16>, vector<4x4xbf16>, vector<16x4xf32> -> vector<16x4xf32>
    %277 = arith.addf %274, %276 : vector<16x4xf32>
    %278 = vector.broadcast %0 : vector<1x4xf32> to vector<16x4xf32>
    %279 = arith.addf %277, %278 : vector<16x4xf32>
    %cst_193 = arith.constant 0.000000e+00 : f32
    %280 = vector.broadcast %cst_193 : f32 to vector<16x4xf32>
    %281 = arith.cmpf ogt, %279, %280 : vector<16x4xf32>
    %cst_194 = arith.constant 1.000000e-01 : f32
    %282 = vector.broadcast %cst_194 : f32 to vector<16x4xf32>
    %283 = arith.mulf %282, %279 : vector<16x4xf32>
    %284 = arith.select %281, %279, %283 : vector<16x4xi1>, vector<16x4xf32>
    %285 = arith.truncf %284 : vector<16x4xf32> to vector<16x4xbf16>
    %c0_195 = arith.constant 0 : index
    %c5_196 = arith.constant 5 : index
    %c0_197 = arith.constant 0 : index
    %c0_198 = arith.constant 0 : index
    %286 = vector.load %arg7[%c0_195, %c5_196, %c0_197, %c0_198] : memref<1x8x16x4xbf16, #tpu.memory_space<vmem>>, vector<1x1x16x4xbf16>
    %287 = vector.shape_cast %286 : vector<1x1x16x4xbf16> to vector<16x4xbf16>
    %288 = vector.shape_cast %285 : vector<16x4xbf16> to vector<1x1x16x4xbf16>
    tpu.vector_store %arg7[%c0_195, %c5_196, %c0_197, %c0_198], %288 {strides = array<i32>} : memref<1x8x16x4xbf16, #tpu.memory_space<vmem>>, vector<1x1x16x4xbf16>,
    %c0_199 = arith.constant 0 : index
    %c6 = arith.constant 6 : index
    %c0_200 = arith.constant 0 : index
    %c0_201 = arith.constant 0 : index
    %289 = vector.load %arg2[%c0_199, %c6, %c0_200, %c0_201] : memref<1x8x18x4xbf16, #tpu.memory_space<vmem>>, vector<1x1x18x4xbf16>
    %290 = vector.shape_cast %289 : vector<1x1x18x4xbf16> to vector<18x4xbf16>
    %c0_202 = arith.constant 0 : index
    %c6_203 = arith.constant 6 : index
    %c0_204 = arith.constant 0 : index
    %c0_205 = arith.constant 0 : index
    %291 = vector.load %arg3[%c0_202, %c6_203, %c0_204, %c0_205] : memref<1x8x18x4xbf16, #tpu.memory_space<vmem>>, vector<1x1x18x4xbf16>
    %292 = vector.shape_cast %291 : vector<1x1x18x4xbf16> to vector<18x4xbf16>
    %c0_206 = arith.constant 0 : index
    %c6_207 = arith.constant 6 : index
    %c0_208 = arith.constant 0 : index
    %c0_209 = arith.constant 0 : index
    %293 = vector.load %arg4[%c0_206, %c6_207, %c0_208, %c0_209] : memref<1x8x18x4xbf16, #tpu.memory_space<vmem>>, vector<1x1x18x4xbf16>
    %294 = vector.shape_cast %293 : vector<1x1x18x4xbf16> to vector<18x4xbf16>
    %cst_210 = arith.constant 0.000000e+00 : f32
    %295 = vector.broadcast %cst_210 : f32 to vector<16x4xf32>
    %296 = vector.extract_strided_slice %290 {offsets = [0, 0], sizes = [16, 4], strides = [1, 1]} : vector<18x4xbf16> to vector<16x4xbf16>
    %cst_211 = arith.constant dense<0.000000e+00> : vector<16x4xf32>
    %297 = tpu.matmul %296, %2, %cst_211 {dimension_numbers = #tpu.dot_dimension_numbers<[1], [0], [0], [1], [0, 0, 1, 1], [], []>} : vector<16x4xbf16>, vector<4x4xbf16>, vector<16x4xf32> -> vector<16x4xf32>
    %298 = arith.addf %295, %297 : vector<16x4xf32>
    %299 = vector.extract_strided_slice %290 {offsets = [1, 0], sizes = [16, 4], strides = [1, 1]} : vector<18x4xbf16> to vector<16x4xbf16>
    %cst_212 = arith.constant dense<0.000000e+00> : vector<16x4xf32>
    %300 = tpu.matmul %299, %4, %cst_212 {dimension_numbers = #tpu.dot_dimension_numbers<[1], [0], [0], [1], [0, 0, 1, 1], [], []>} : vector<16x4xbf16>, vector<4x4xbf16>, vector<16x4xf32> -> vector<16x4xf32>
    %301 = arith.addf %298, %300 : vector<16x4xf32>
    %302 = vector.extract_strided_slice %290 {offsets = [2, 0], sizes = [16, 4], strides = [1, 1]} : vector<18x4xbf16> to vector<16x4xbf16>
    %cst_213 = arith.constant dense<0.000000e+00> : vector<16x4xf32>
    %303 = tpu.matmul %302, %6, %cst_213 {dimension_numbers = #tpu.dot_dimension_numbers<[1], [0], [0], [1], [0, 0, 1, 1], [], []>} : vector<16x4xbf16>, vector<4x4xbf16>, vector<16x4xf32> -> vector<16x4xf32>
    %304 = arith.addf %301, %303 : vector<16x4xf32>
    %305 = vector.extract_strided_slice %292 {offsets = [0, 0], sizes = [16, 4], strides = [1, 1]} : vector<18x4xbf16> to vector<16x4xbf16>
    %cst_214 = arith.constant dense<0.000000e+00> : vector<16x4xf32>
    %306 = tpu.matmul %305, %8, %cst_214 {dimension_numbers = #tpu.dot_dimension_numbers<[1], [0], [0], [1], [0, 0, 1, 1], [], []>} : vector<16x4xbf16>, vector<4x4xbf16>, vector<16x4xf32> -> vector<16x4xf32>
    %307 = arith.addf %304, %306 : vector<16x4xf32>
    %308 = vector.extract_strided_slice %292 {offsets = [1, 0], sizes = [16, 4], strides = [1, 1]} : vector<18x4xbf16> to vector<16x4xbf16>
    %cst_215 = arith.constant dense<0.000000e+00> : vector<16x4xf32>
    %309 = tpu.matmul %308, %10, %cst_215 {dimension_numbers = #tpu.dot_dimension_numbers<[1], [0], [0], [1], [0, 0, 1, 1], [], []>} : vector<16x4xbf16>, vector<4x4xbf16>, vector<16x4xf32> -> vector<16x4xf32>
    %310 = arith.addf %307, %309 : vector<16x4xf32>
    %311 = vector.extract_strided_slice %292 {offsets = [2, 0], sizes = [16, 4], strides = [1, 1]} : vector<18x4xbf16> to vector<16x4xbf16>
    %cst_216 = arith.constant dense<0.000000e+00> : vector<16x4xf32>
    %312 = tpu.matmul %311, %12, %cst_216 {dimension_numbers = #tpu.dot_dimension_numbers<[1], [0], [0], [1], [0, 0, 1, 1], [], []>} : vector<16x4xbf16>, vector<4x4xbf16>, vector<16x4xf32> -> vector<16x4xf32>
    %313 = arith.addf %310, %312 : vector<16x4xf32>
    %314 = vector.extract_strided_slice %294 {offsets = [0, 0], sizes = [16, 4], strides = [1, 1]} : vector<18x4xbf16> to vector<16x4xbf16>
    %cst_217 = arith.constant dense<0.000000e+00> : vector<16x4xf32>
    %315 = tpu.matmul %314, %14, %cst_217 {dimension_numbers = #tpu.dot_dimension_numbers<[1], [0], [0], [1], [0, 0, 1, 1], [], []>} : vector<16x4xbf16>, vector<4x4xbf16>, vector<16x4xf32> -> vector<16x4xf32>
    %316 = arith.addf %313, %315 : vector<16x4xf32>
    %317 = vector.extract_strided_slice %294 {offsets = [1, 0], sizes = [16, 4], strides = [1, 1]} : vector<18x4xbf16> to vector<16x4xbf16>
    %cst_218 = arith.constant dense<0.000000e+00> : vector<16x4xf32>
    %318 = tpu.matmul %317, %16, %cst_218 {dimension_numbers = #tpu.dot_dimension_numbers<[1], [0], [0], [1], [0, 0, 1, 1], [], []>} : vector<16x4xbf16>, vector<4x4xbf16>, vector<16x4xf32> -> vector<16x4xf32>
    %319 = arith.addf %316, %318 : vector<16x4xf32>
    %320 = vector.extract_strided_slice %294 {offsets = [2, 0], sizes = [16, 4], strides = [1, 1]} : vector<18x4xbf16> to vector<16x4xbf16>
    %cst_219 = arith.constant dense<0.000000e+00> : vector<16x4xf32>
    %321 = tpu.matmul %320, %18, %cst_219 {dimension_numbers = #tpu.dot_dimension_numbers<[1], [0], [0], [1], [0, 0, 1, 1], [], []>} : vector<16x4xbf16>, vector<4x4xbf16>, vector<16x4xf32> -> vector<16x4xf32>
    %322 = arith.addf %319, %321 : vector<16x4xf32>
    %323 = vector.broadcast %0 : vector<1x4xf32> to vector<16x4xf32>
    %324 = arith.addf %322, %323 : vector<16x4xf32>
    %cst_220 = arith.constant 0.000000e+00 : f32
    %325 = vector.broadcast %cst_220 : f32 to vector<16x4xf32>
    %326 = arith.cmpf ogt, %324, %325 : vector<16x4xf32>
    %cst_221 = arith.constant 1.000000e-01 : f32
    %327 = vector.broadcast %cst_221 : f32 to vector<16x4xf32>
    %328 = arith.mulf %327, %324 : vector<16x4xf32>
    %329 = arith.select %326, %324, %328 : vector<16x4xi1>, vector<16x4xf32>
    %330 = arith.truncf %329 : vector<16x4xf32> to vector<16x4xbf16>
    %c0_222 = arith.constant 0 : index
    %c6_223 = arith.constant 6 : index
    %c0_224 = arith.constant 0 : index
    %c0_225 = arith.constant 0 : index
    %331 = vector.load %arg7[%c0_222, %c6_223, %c0_224, %c0_225] : memref<1x8x16x4xbf16, #tpu.memory_space<vmem>>, vector<1x1x16x4xbf16>
    %332 = vector.shape_cast %331 : vector<1x1x16x4xbf16> to vector<16x4xbf16>
    %333 = vector.shape_cast %330 : vector<16x4xbf16> to vector<1x1x16x4xbf16>
    tpu.vector_store %arg7[%c0_222, %c6_223, %c0_224, %c0_225], %333 {strides = array<i32>} : memref<1x8x16x4xbf16, #tpu.memory_space<vmem>>, vector<1x1x16x4xbf16>,
    %c0_226 = arith.constant 0 : index
    %c7 = arith.constant 7 : index
    %c0_227 = arith.constant 0 : index
    %c0_228 = arith.constant 0 : index
    %334 = vector.load %arg2[%c0_226, %c7, %c0_227, %c0_228] : memref<1x8x18x4xbf16, #tpu.memory_space<vmem>>, vector<1x1x18x4xbf16>
    %335 = vector.shape_cast %334 : vector<1x1x18x4xbf16> to vector<18x4xbf16>
    %c0_229 = arith.constant 0 : index
    %c7_230 = arith.constant 7 : index
    %c0_231 = arith.constant 0 : index
    %c0_232 = arith.constant 0 : index
    %336 = vector.load %arg3[%c0_229, %c7_230, %c0_231, %c0_232] : memref<1x8x18x4xbf16, #tpu.memory_space<vmem>>, vector<1x1x18x4xbf16>
    %337 = vector.shape_cast %336 : vector<1x1x18x4xbf16> to vector<18x4xbf16>
    %c0_233 = arith.constant 0 : index
    %c7_234 = arith.constant 7 : index
    %c0_235 = arith.constant 0 : index
    %c0_236 = arith.constant 0 : index
    %338 = vector.load %arg4[%c0_233, %c7_234, %c0_235, %c0_236] : memref<1x8x18x4xbf16, #tpu.memory_space<vmem>>, vector<1x1x18x4xbf16>
    %339 = vector.shape_cast %338 : vector<1x1x18x4xbf16> to vector<18x4xbf16>
    %cst_237 = arith.constant 0.000000e+00 : f32
    %340 = vector.broadcast %cst_237 : f32 to vector<16x4xf32>
    %341 = vector.extract_strided_slice %335 {offsets = [0, 0], sizes = [16, 4], strides = [1, 1]} : vector<18x4xbf16> to vector<16x4xbf16>
    %cst_238 = arith.constant dense<0.000000e+00> : vector<16x4xf32>
    %342 = tpu.matmul %341, %2, %cst_238 {dimension_numbers = #tpu.dot_dimension_numbers<[1], [0], [0], [1], [0, 0, 1, 1], [], []>} : vector<16x4xbf16>, vector<4x4xbf16>, vector<16x4xf32> -> vector<16x4xf32>
    %343 = arith.addf %340, %342 : vector<16x4xf32>
    %344 = vector.extract_strided_slice %335 {offsets = [1, 0], sizes = [16, 4], strides = [1, 1]} : vector<18x4xbf16> to vector<16x4xbf16>
    %cst_239 = arith.constant dense<0.000000e+00> : vector<16x4xf32>
    %345 = tpu.matmul %344, %4, %cst_239 {dimension_numbers = #tpu.dot_dimension_numbers<[1], [0], [0], [1], [0, 0, 1, 1], [], []>} : vector<16x4xbf16>, vector<4x4xbf16>, vector<16x4xf32> -> vector<16x4xf32>
    %346 = arith.addf %343, %345 : vector<16x4xf32>
    %347 = vector.extract_strided_slice %335 {offsets = [2, 0], sizes = [16, 4], strides = [1, 1]} : vector<18x4xbf16> to vector<16x4xbf16>
    %cst_240 = arith.constant dense<0.000000e+00> : vector<16x4xf32>
    %348 = tpu.matmul %347, %6, %cst_240 {dimension_numbers = #tpu.dot_dimension_numbers<[1], [0], [0], [1], [0, 0, 1, 1], [], []>} : vector<16x4xbf16>, vector<4x4xbf16>, vector<16x4xf32> -> vector<16x4xf32>
    %349 = arith.addf %346, %348 : vector<16x4xf32>
    %350 = vector.extract_strided_slice %337 {offsets = [0, 0], sizes = [16, 4], strides = [1, 1]} : vector<18x4xbf16> to vector<16x4xbf16>
    %cst_241 = arith.constant dense<0.000000e+00> : vector<16x4xf32>
    %351 = tpu.matmul %350, %8, %cst_241 {dimension_numbers = #tpu.dot_dimension_numbers<[1], [0], [0], [1], [0, 0, 1, 1], [], []>} : vector<16x4xbf16>, vector<4x4xbf16>, vector<16x4xf32> -> vector<16x4xf32>
    %352 = arith.addf %349, %351 : vector<16x4xf32>
    %353 = vector.extract_strided_slice %337 {offsets = [1, 0], sizes = [16, 4], strides = [1, 1]} : vector<18x4xbf16> to vector<16x4xbf16>
    %cst_242 = arith.constant dense<0.000000e+00> : vector<16x4xf32>
    %354 = tpu.matmul %353, %10, %cst_242 {dimension_numbers = #tpu.dot_dimension_numbers<[1], [0], [0], [1], [0, 0, 1, 1], [], []>} : vector<16x4xbf16>, vector<4x4xbf16>, vector<16x4xf32> -> vector<16x4xf32>
    %355 = arith.addf %352, %354 : vector<16x4xf32>
    %356 = vector.extract_strided_slice %337 {offsets = [2, 0], sizes = [16, 4], strides = [1, 1]} : vector<18x4xbf16> to vector<16x4xbf16>
    %cst_243 = arith.constant dense<0.000000e+00> : vector<16x4xf32>
    %357 = tpu.matmul %356, %12, %cst_243 {dimension_numbers = #tpu.dot_dimension_numbers<[1], [0], [0], [1], [0, 0, 1, 1], [], []>} : vector<16x4xbf16>, vector<4x4xbf16>, vector<16x4xf32> -> vector<16x4xf32>
    %358 = arith.addf %355, %357 : vector<16x4xf32>
    %359 = vector.extract_strided_slice %339 {offsets = [0, 0], sizes = [16, 4], strides = [1, 1]} : vector<18x4xbf16> to vector<16x4xbf16>
    %cst_244 = arith.constant dense<0.000000e+00> : vector<16x4xf32>
    %360 = tpu.matmul %359, %14, %cst_244 {dimension_numbers = #tpu.dot_dimension_numbers<[1], [0], [0], [1], [0, 0, 1, 1], [], []>} : vector<16x4xbf16>, vector<4x4xbf16>, vector<16x4xf32> -> vector<16x4xf32>
    %361 = arith.addf %358, %360 : vector<16x4xf32>
    %362 = vector.extract_strided_slice %339 {offsets = [1, 0], sizes = [16, 4], strides = [1, 1]} : vector<18x4xbf16> to vector<16x4xbf16>
    %cst_245 = arith.constant dense<0.000000e+00> : vector<16x4xf32>
    %363 = tpu.matmul %362, %16, %cst_245 {dimension_numbers = #tpu.dot_dimension_numbers<[1], [0], [0], [1], [0, 0, 1, 1], [], []>} : vector<16x4xbf16>, vector<4x4xbf16>, vector<16x4xf32> -> vector<16x4xf32>
    %364 = arith.addf %361, %363 : vector<16x4xf32>
    %365 = vector.extract_strided_slice %339 {offsets = [2, 0], sizes = [16, 4], strides = [1, 1]} : vector<18x4xbf16> to vector<16x4xbf16>
    %cst_246 = arith.constant dense<0.000000e+00> : vector<16x4xf32>
    %366 = tpu.matmul %365, %18, %cst_246 {dimension_numbers = #tpu.dot_dimension_numbers<[1], [0], [0], [1], [0, 0, 1, 1], [], []>} : vector<16x4xbf16>, vector<4x4xbf16>, vector<16x4xf32> -> vector<16x4xf32>
    %367 = arith.addf %364, %366 : vector<16x4xf32>
    %368 = vector.broadcast %0 : vector<1x4xf32> to vector<16x4xf32>
    %369 = arith.addf %367, %368 : vector<16x4xf32>
    %cst_247 = arith.constant 0.000000e+00 : f32
    %370 = vector.broadcast %cst_247 : f32 to vector<16x4xf32>
    %371 = arith.cmpf ogt, %369, %370 : vector<16x4xf32>
    %cst_248 = arith.constant 1.000000e-01 : f32
    %372 = vector.broadcast %cst_248 : f32 to vector<16x4xf32>
    %373 = arith.mulf %372, %369 : vector<16x4xf32>
    %374 = arith.select %371, %369, %373 : vector<16x4xi1>, vector<16x4xf32>
    %375 = arith.truncf %374 : vector<16x4xf32> to vector<16x4xbf16>
    %c0_249 = arith.constant 0 : index
    %c7_250 = arith.constant 7 : index
    %c0_251 = arith.constant 0 : index
    %c0_252 = arith.constant 0 : index
    %376 = vector.load %arg7[%c0_249, %c7_250, %c0_251, %c0_252] : memref<1x8x16x4xbf16, #tpu.memory_space<vmem>>, vector<1x1x16x4xbf16>
    %377 = vector.shape_cast %376 : vector<1x1x16x4xbf16> to vector<16x4xbf16>
    %378 = vector.shape_cast %375 : vector<16x4xbf16> to vector<1x1x16x4xbf16>
    tpu.vector_store %arg7[%c0_249, %c7_250, %c0_251, %c0_252], %378 {strides = array<i32>} : memref<1x8x16x4xbf16, #tpu.memory_space<vmem>>, vector<1x1x16x4xbf16>,
    return
  }
  func.func @transform_0(%arg0: i32, %arg1: i32) -> (i32, i32, i32, i32) {
    %c0_i32 = arith.constant 0 : i32
    %c0_i32_0 = arith.constant 0 : i32
    %c0_i32_1 = arith.constant 0 : i32
    return %arg0, %arg1, %c0_i32, %c0_i32_0 : i32, i32, i32, i32
  }
  func.func @transform_1(%arg0: i32, %arg1: i32) -> (i32, i32, i32, i32) {
    %c0_i32 = arith.constant 0 : i32
    %c0_i32_0 = arith.constant 0 : i32
    %c0_i32_1 = arith.constant 0 : i32
    return %arg0, %arg1, %c0_i32, %c0_i32_0 : i32, i32, i32, i32
  }
  func.func @transform_2(%arg0: i32, %arg1: i32) -> (i32, i32, i32, i32) {
    %c0_i32 = arith.constant 0 : i32
    %c0_i32_0 = arith.constant 0 : i32
    %c0_i32_1 = arith.constant 0 : i32
    return %arg0, %arg1, %c0_i32, %c0_i32_0 : i32, i32, i32, i32
  }
  func.func @transform_3(%arg0: i32, %arg1: i32) -> (i32, i32, i32, i32) {
    %c0_i32 = arith.constant 0 : i32
    %c0_i32_0 = arith.constant 0 : i32
    %c0_i32_1 = arith.constant 0 : i32
    %c0_i32_2 = arith.constant 0 : i32
    %c0_i32_3 = arith.constant 0 : i32
    return %c0_i32, %c0_i32_0, %c0_i32_1, %c0_i32_2 : i32, i32, i32, i32
  }
  func.func @transform_4(%arg0: i32, %arg1: i32) -> (i32, i32) {
    %c0_i32 = arith.constant 0 : i32
    %c0_i32_0 = arith.constant 0 : i32
    %c0_i32_1 = arith.constant 0 : i32
    return %c0_i32, %c0_i32_0 : i32, i32
  }
  func.func @transform_5(%arg0: i32, %arg1: i32) -> (i32, i32, i32, i32) {
    %c0_i32 = arith.constant 0 : i32
    %c0_i32_0 = arith.constant 0 : i32
    %c0_i32_1 = arith.constant 0 : i32
    return %arg0, %arg1, %c0_i32, %c0_i32_0 : i32, i32, i32, i32
  }
}

module attributes {stable_mosaic.version = 11 : i64} {
  func.func @_pool_concat_kernel(%arg0: i32, %arg1: i32, %arg2: memref<1x2x8x16xbf16, #tpu.memory_space<vmem>>, %arg3: memref<1x2x8x16xbf16, #tpu.memory_space<vmem>>, %arg4: memref<1x1x8x16xf32, #tpu.memory_space<vmem>>) attributes {dimension_semantics = [#tpu.dimension_semantics<parallel>, #tpu.dimension_semantics<parallel>], iteration_bounds = array<i64: 2, 8>, scalar_prefetch = 0 : i64, scratch_operands = 0 : i64, tpu.core_type = #tpu.core_type<tc>, window_params = [{transform_indices = @transform_0, window_bounds = array<i64: 1, 2, 8, 16>}, {transform_indices = @transform_1, window_bounds = array<i64: 1, 2, 8, 16>}, {transform_indices = @transform_2, window_bounds = array<i64: 1, 1, 8, 16>}]} {
    %c0 = arith.constant 0 : index
    %c0_0 = arith.constant 0 : index
    %c0_1 = arith.constant 0 : index
    %c0_2 = arith.constant 0 : index
    %0 = vector.load %arg2[%c0, %c0_0, %c0_1, %c0_2] : memref<1x2x8x16xbf16, #tpu.memory_space<vmem>>, vector<1x1x8x16xbf16>
    %1 = vector.shape_cast %0 : vector<1x1x8x16xbf16> to vector<8x16xbf16>
    %c0_3 = arith.constant 0 : index
    %c1 = arith.constant 1 : index
    %c0_4 = arith.constant 0 : index
    %c0_5 = arith.constant 0 : index
    %2 = vector.load %arg2[%c0_3, %c1, %c0_4, %c0_5] : memref<1x2x8x16xbf16, #tpu.memory_space<vmem>>, vector<1x1x8x16xbf16>
    %3 = vector.shape_cast %2 : vector<1x1x8x16xbf16> to vector<8x16xbf16>
    %4 = arith.maximumf %1, %3 : vector<8x16xbf16>
    %5 = vector.extract_strided_slice %4 {offsets = [0, 0], sizes = [8, 8], strides = [1, 1]} : vector<8x16xbf16> to vector<8x8xbf16>
    %6 = vector.extract_strided_slice %4 {offsets = [0, 8], sizes = [8, 8], strides = [1, 1]} : vector<8x16xbf16> to vector<8x8xbf16>
    %7 = arith.maximumf %5, %6 : vector<8x8xbf16>
    %c0_6 = arith.constant 0 : index
    %c0_7 = arith.constant 0 : index
    %c0_8 = arith.constant 0 : index
    %c0_9 = arith.constant 0 : index
    %8 = vector.load %arg3[%c0_6, %c0_7, %c0_8, %c0_9] : memref<1x2x8x16xbf16, #tpu.memory_space<vmem>>, vector<1x1x8x16xbf16>
    %9 = vector.shape_cast %8 : vector<1x1x8x16xbf16> to vector<8x16xbf16>
    %c0_10 = arith.constant 0 : index
    %c1_11 = arith.constant 1 : index
    %c0_12 = arith.constant 0 : index
    %c0_13 = arith.constant 0 : index
    %10 = vector.load %arg3[%c0_10, %c1_11, %c0_12, %c0_13] : memref<1x2x8x16xbf16, #tpu.memory_space<vmem>>, vector<1x1x8x16xbf16>
    %11 = vector.shape_cast %10 : vector<1x1x8x16xbf16> to vector<8x16xbf16>
    %12 = arith.maximumf %9, %11 : vector<8x16xbf16>
    %13 = vector.extract_strided_slice %12 {offsets = [0, 0], sizes = [8, 8], strides = [1, 1]} : vector<8x16xbf16> to vector<8x8xbf16>
    %14 = vector.extract_strided_slice %12 {offsets = [0, 8], sizes = [8, 8], strides = [1, 1]} : vector<8x16xbf16> to vector<8x8xbf16>
    %15 = arith.maximumf %13, %14 : vector<8x8xbf16>
    %16 = tpu.concatenate %7, %15 in 1 : vector<8x8xbf16>, vector<8x8xbf16> -> vector<8x16xbf16>
    %17 = arith.extf %16 : vector<8x16xbf16> to vector<8x16xf32>
    %c0_14 = arith.constant 0 : index
    %c0_15 = arith.constant 0 : index
    %c0_16 = arith.constant 0 : index
    %c0_17 = arith.constant 0 : index
    %18 = vector.load %arg4[%c0_14, %c0_15, %c0_16, %c0_17] : memref<1x1x8x16xf32, #tpu.memory_space<vmem>>, vector<1x1x8x16xf32>
    %19 = vector.shape_cast %18 : vector<1x1x8x16xf32> to vector<8x16xf32>
    %20 = vector.shape_cast %17 : vector<8x16xf32> to vector<1x1x8x16xf32>
    tpu.vector_store %arg4[%c0_14, %c0_15, %c0_16, %c0_17], %20 {strides = array<i32>} : memref<1x1x8x16xf32, #tpu.memory_space<vmem>>, vector<1x1x8x16xf32>,
    return
  }
  func.func @transform_0(%arg0: i32, %arg1: i32) -> (i32, i32, i32, i32) {
    %c0_i32 = arith.constant 0 : i32
    %c0_i32_0 = arith.constant 0 : i32
    %c0_i32_1 = arith.constant 0 : i32
    return %arg0, %arg1, %c0_i32, %c0_i32_0 : i32, i32, i32, i32
  }
  func.func @transform_1(%arg0: i32, %arg1: i32) -> (i32, i32, i32, i32) {
    %c0_i32 = arith.constant 0 : i32
    %c0_i32_0 = arith.constant 0 : i32
    %c0_i32_1 = arith.constant 0 : i32
    return %arg0, %arg1, %c0_i32, %c0_i32_0 : i32, i32, i32, i32
  }
  func.func @transform_2(%arg0: i32, %arg1: i32) -> (i32, i32, i32, i32) {
    %c0_i32 = arith.constant 0 : i32
    %c0_i32_0 = arith.constant 0 : i32
    %c0_i32_1 = arith.constant 0 : i32
    return %arg0, %arg1, %c0_i32, %c0_i32_0 : i32, i32, i32, i32
  }
}

</mosaic_0001>

<bundles_post_ra>
// kernel: resblock_body_forward.9
= control target key start
LH: loop header
LB: loop body
LE: loop exit
PB: predicated region body
PF: predicated region fallthrough
CT: control target
= control target key end

     0   :  { %7 = vsyncpa [#allocation3], 0  ;;  %s697_s0 = inlined_call_operand.vmem [shape: bf16[2,16,8,16], index: 0, kind: input, shape index: {}]   ;;  %s698_s1 = inlined_call_operand.vmem [shape: bf16[2,16,8,16], index: 1, kind: input, shape index: {}]   ;;  %s699_s2 = inlined_call_operand.hbm [shape: f32[2,8,8,16], index: 2, kind: output, shape index: {}]  }
   0x1   :  { %9 = vsyncpa [#allocation3 + $0x1], 0  ;;  %s558_s9 = smov 0   ;;  %s560_s10 = smov 0  }
   0x2   :  { %s562_s11 = smov 0   ;;  %s564_s12 = smov 0  }
   0x3   :  { %s566_s13 = smov 0   ;;  %s568_s14 = smov 0  }
   0x4   :  { %s570_s15 = smov 0   ;;  %s572_s16 = smov 0  }
   0x5 LB: > { %s351_s17 = sadd.s32 4294967295, %s538_s16   ;;  %s352_s18 = sadd.s32 4294967294, %s538_s16   ;;  %s538_s16 = sphi %s572_s16, %s15_s16   ;;  %s534_s15 = sphi %s570_s15, %s708_s15   ;;  %s530_s14 = sphi %s568_s14, %s707_s14   ;;  %s526_s13 = sphi %s566_s13, %s706_s13   ;;  %s522_s12 = sphi %s564_s12, %s705_s12   ;;  %s518_s11 = sphi %s562_s11, %s704_s11   ;;  %s514_s10 = sphi %s560_s10, %s703_s10   ;;  %s510_s9 = sphi %s558_s9, %s702_s9  }
   0x6   : > { %s24_s19 = sadd.s32 1, %s530_s14  ;;  %s27_s20 = sadd.s32 1, %s534_s15 }
   0x7   : > { %p25_p0 = scmp.ge.s32.totalorder %s24_s19, 8  ;;  %p102_p1 = scmp.ne.s32.totalorder %s518_s11, %s514_s10 }
   0x8   : > { %p103_p2 = scmp.eq.s32.totalorder %s351_s17, 15  ;;  %p108_p5 = scmp.ne.s32.totalorder %s514_s10, %s510_s9 }
   0x9   : > { %s710_s19 = smov (%p25_p0, %s24_s19), 0  ;;  %s712_s20 = smov (!%p25_p0, %s27_s20), %s534_s15 }
   0xa   : > { %s88_s21 = ssub.s32 %s530_s14, %s710_s19  ;;  %p609_p3 = por %p103_p2, %p102_p1 }
   0xb   : > { %p29_p4 = scmp.ge.s32.totalorder %s712_s20, 2  ;;  %p109_p6 = scmp.eq.s32.totalorder %s352_s18, 15 }
   0xc   : > { %p355_p7 = scmp.ge.s32.totalorder %s538_s16, 1  ;;  %p153_p9 = scmp.lt.s32.totalorder %s538_s16, 17 }
   0xd   : > { %s714_s20 = smov (%p29_p4, %s712_s20), 0  ;;  %p618_p8 = por %p109_p6, %p108_p5 }
   0xe   : > { %s87_s24 = ssub.s32 %s534_s15, %s714_s20  ;;  %s92_s25 = sadd.s32 1, %s518_s11 }
   0xf   : > { %s89_s26 = sor.u32 %s88_s21, %s87_s24  ;;  %p154_p10 = pnand %p355_p7, %p153_p9 }
  0x10   : > { %p90_p11 = scmp.eq.s32.totalorder %s89_s26, 0  ;;  %s357_s28 = sshll.u32 (!%p154_p10), %s522_s12, 1  ;;  %vm231_vm0 = vcmask (!%p154_p10), 64512   ;;  %vm237_vm1 = vcmask (!%p154_p10), 130048  }
  0x11   : > { %157 = sbr.rel (%p154_p10) target bundleno = 284 (0x11c), region = 28  ;;  %p189_p12 = scmp.lt.s32.totalorder (!%p154_p10), %s526_s13, 1 }
  0x12   : > { %s627_s27 = scalar_select %p90_p11, %s518_s11, %s92_s25  }
  0x13   : > { %p191_p13 = scmp.lt.s32.totalorder (!%p154_p10), %s357_s28, 15  ;;  %s540_s21 = smov (!%p154_p10), 120  }
  0x14   : > { %s541_s24 = smov (!%p154_p10), 8   ;;  %s185_s25 = sand.u32 (!%p154_p10), 1, %s514_s10  }
  0x15   : > { %s356_s26 = sshll.u32 (!%p154_p10), %s185_s25, 3  ;;  %s542_s8 = smov (!%p154_p10), [#allocation2]  }
  0x16   : > { %s448_s17 = sshll.u32 (!%p154_p10), %s542_s8, 4  ;;  %s449_s17 = int_to_ptr.vmem [resolvable:$false] %s448_s17 }
  0x18   : > { %s190_s29 = scalar_select %p189_p12, %s526_s13, 1 }
  0x19   : > { %s716_s28 = smov (!%p191_p13, %s357_s28), 15 }
  0x1a   : > { %s358_s30 = sshll.u32 %s190_s29, 4 }
  0x1b   : > { %s194_s3 = sadd.s32 %s358_s30, %s716_s28  ;;  %s367_s28 = sshll.u32 %s526_s13, 3 }
  0x1c   : > { %s359_s4 = sshll.u32 %s194_s3, 2  ;;  %s251_s29 = sadd.s32 %s522_s12, %s367_s28 }
  0x1d   : > { %s206_s7 = scalar_lea.vmem %s698_s1, %s359_s4  ;;  %s196_s18 = scalar_lea.vmem %s697_s0, %s359_s4 }
  0x1e   : > { %v217_v0 = vld [vmem:[%s206_s7] sm:$0xf]  ;;  %v364_v1 = vld [vmem:[%s206_s7 + $0x4] sm:$0xf]  ;;  %s368_s30 = sshll.u32 %s251_s29, 7  ;;  %s187_s3 = scalar_lea.vmem [#allocation2], %s356_s26 }
  0x1f   : > { %v208_v2 = vld [vmem:[%s196_s18] sm:$0xf]  ;;  %v220_v3 = vmax.bf16 %v364_v1, %v217_v0  ;;  %v363_v4 = vld [vmem:[%s196_s18 + $0x4] sm:$0xf]  ;;  %s255_s4 = sshll.u32 %s187_s3, 4  ;;  %s644_s7 = scalar_lea.hbm %s699_s2, %s368_s30  ;;  %s646_s4 = int_to_ptr.vmem [resolvable:$true] %s255_s4 }
  0x20   : > { %v211_v5 = vmax.bf16 %v363_v4, %v208_v2  ;;  %s240_s12 = scalar_lea.sflag [#allocation3], %s185_s25  ;;  %s444_s13 = scalar_lea.vmem %s646_s4, 128 }
  0x21   : > { %222 = vrot.lane.b32.xlu0 %v220_v3, %s540_s21  ;;  %p445_p0 = scmp.ne.s32.totalorder %s646_s4, %s444_s13  ;;  %s450_s18 = scalar_lea.vmem %s449_s17, 256 }
  0x22   : > { %p451_p4 = scmp.lt.s32.totalorder %s646_s4, %s449_s17  ;;  %p452_p5 = scmp.lt.s32.totalorder %s450_s18, %s444_s13 }
  0x23   : > { %p446_p1 = pnand %p445_p0, %p609_p3 }
  0x24   : > { %p453_p6 = por %p452_p5, %p451_p4 }
  0x25   : > { %213 = vrot.lane.b32.xlu0 %v211_v5, %s540_s21  ;;  %p447_p2 = pneg %p446_p1 }
  0x27   : > { %p454_p7 = pnand %p453_p6, %p447_p2 }
  0x93   : > { %v223_v6 = vpop.permute.xlu0 %222 }
  0x94   : > { %v225_v7 = vmax.bf16 %v223_v6, %v220_v3 }
  0x96   : > { %v365_v8 = vcombine.low %v225_v7, %v225_v7 }
  0x97   : > { %v214_v9 = vpop.permute.xlu0 %213 }
  0x98   : > { %229 = vrot.lane.b32.xlu1 %v365_v8, %s541_s24  ;;  %v216_v10 = vmax.bf16 %v214_v9, %v211_v5 }
 0x10a   : > { %v230_v11 = vpop.permute.xlu1 %229 }
 0x10b   : > { %v234_v12 = vsel %vm231_vm0, %v216_v10, %v230_v11 }
 0x10c   : > { %v236_v13 = vunpack.c.l.bf16 %v234_v12 }
 0x10e   : > { %238 = vst.msk [vmem:[%s187_s3] sm:$0xff] %vm237_vm1, %v236_v13 }
 0x10f   : > { %457 = shalt.err (!%p454_p7)
}
 0x110   : > { %s458_s21 = scalar_lea.hbm %s644_s7, 128  ;;  %s462_s26 = scalar_lea.hbm %s699_s2, 2048 }
 0x111   : > { %p459_p9 = scmp.ne.s32.totalorder %s644_s7, %s458_s21  ;;  %p463_p12 = scmp.lt.u32.totalorder %s644_s7, %s699_s2 }
 0x112   : > { %p464_p13 = scmp.lt.u32.totalorder %s462_s26, %s458_s21  ;;  %p466_p1 = scmp.lt.u32.totalorder %s458_s21, %s644_s7 }
 0x113   : > { %p460_p10 = pnand %p459_p9, %p609_p3 }
 0x114   : > { %p465_p0 = por %p464_p13, %p463_p12 }
 0x115   : > { %p461_p11 = pneg %p460_p10 }
 0x116   : > { %p467_p2 = por %p466_p1, %p465_p0 }
 0x118   : > { %p468_p4 = pnand %p467_p2, %p461_p11 }
 0x11a   : > { %471 = shalt.err (!%p468_p4)
}
 0x11b   : > { %371 = dma.vmem_to_hbm [thread:$0]  (%p609_p3), %s646_s4, 128, %s644_s7, %s240_s12  }
 0x11c PF: > { %p377_p5 = scmp.ge.s32.totalorder %s538_s16, 2  ;;  %s267_s30 = sand.u32 1, %s510_s9  }
 0x11d   : > { %s268_s3 = scalar_lea.sflag [#allocation3], %s267_s30 }
 0x11e   : > { %p374_p6 = pnand %p377_p5, %p618_p8 }
 0x120   : > { %505 = dma.done.wait (!%p374_p6), %s268_s3, 128  }
 0x121   : > { %507 = vsyncadd (!%p374_p6), %s268_s3, 4294967168  ;;  %s15_s16 = sadd.s32 1, %s538_s16   ;;  %s702_s9 = smov %s514_s10 }
 0x122   : > { %p12_p7 = scmp.ge.s32.totalorder %s15_s16, 18   ;;  %s703_s10 = smov %s518_s11 }
 0x123   : > { %s704_s11 = smov %s627_s27  ;;  %s705_s12 = smov %s530_s14 }
 0x124   : > { %s706_s13 = smov %s534_s15  ;;  %s707_s14 = smov %s710_s19 }
 0x125   : > { %s708_s15 = smov %s714_s20  ;;  %14 = sbr.rel (!%p12_p7) target bundleno = 5 (0x5), region = 68 }
 0x12c   :  { %273 = vsyncpa [#allocation3], 1 }
 0x12d   :  { %275 = vsyncpa [#allocation3 + $0x1], 1 }

// kernel: resblock_body_forward.8
= control target key start
LH: loop header
LB: loop body
LE: loop exit
PB: predicated region body
PF: predicated region fallthrough
CT: control target
= control target key end

     0   :  { %s1623_s18 = smov 0   ;;  %s1825_s0 = inlined_call_operand.vmem [shape: bf16[512,4], index: 0, kind: input, shape index: {}]   ;;  %s1826_s1 = inlined_call_operand.vmem [shape: bf16[512,4], index: 1, kind: input, shape index: {}]   ;;  %s1827_s2 = inlined_call_operand.vmem [shape: bf16[4,8], index: 2, kind: input, shape index: {}]   ;;  %s1828_s3 = inlined_call_operand.vmem [shape: bf16[4,8], index: 3, kind: input, shape index: {}]   ;;  %s1829_s4 = inlined_call_operand.vmem [shape: f32[1,8], index: 4, kind: input, shape index: {}]   ;;  %s1830_s5 = inlined_call_operand.vmem [shape: bf16[512,8], index: 5, kind: output, shape index: {}]  }
   0x1 LB: > { %s1267_s19 = sadd.s32 4294967295, %s1591_s18   ;;  %p1271_p0 = scmp.ge.s32.totalorder %s1591_s18, 1  ;;  %s1591_s18 = sphi %s1623_s18, %s15_s18  }
   0x2   : > { %p199_p1 = scmp.lt.s32.totalorder %s1591_s18, 3 }
   0x4   : > { %p200_p2 = pnand %p1271_p0, %p199_p1 }
   0x5   : > { %v316_v0 = vld [vmem:[%s1828_s3] sm:$0x3] (!%p200_p2)  ;;  %vm446_vm0 = vcmask (!%p200_p2), 1041408   ;;  %s1272_s24 = sshll.u32 (!%p200_p2), %s1267_s19, 5  ;;  %vm397_vm1 = vcmask (!%p200_p2), 31744   ;;  %vm1166_vm4 = vcmask (!%p200_p2), 60416  }
   0x6   : > { %203 = sbr.rel (%p200_p2) target bundleno = 300 (0x12c), region = 40  ;;  %v283_v1 = vld [vmem:[%s1827_s2] sm:$0x3] (!%p200_p2)  ;;  %1543 = vmatprep.subr.msk.bf16.mxu1 (!%p200_p2), %vm446_vm0, %v316_v0  ;;  %v448_v2 = vsel (!%p200_p2), %vm446_vm0, %v316_v0, 0  ;;  %p233_p3 = scmp.lt.s32.totalorder (!%p200_p2), %s1272_s24, 63 }
   0x7   : > { %1544 = vmatprep.subr.msk.bf16.mxu0 (!%p200_p2), %vm446_vm0, %v283_v1  ;;  %v740_v3 = vsel (!%p200_p2), %vm446_vm0, %v283_v1, 0  ;;  %1444 = vmatpush3.bf16.msra.mxu1 (!%p200_p2), %v448_v2  ;;  %v1718_v38 = vld [vmem:[%s1829_s4] ss:$0 sm:$0xff] (!%p200_p2) }
   0x8   : > { %1478 = vmatpush3.bf16.msra.mxu0 (!%p200_p2), %v740_v3 }
   0xd   : > { %s1832_s24 = smov (!%p233_p3, %s1272_s24), 63 }
   0xe   : > { %s1637_s25 = sshll.u32 %s1832_s24, 2 }
   0xf   : > { %s1643_s28 = scalar_lea.vmem %s1826_s1, %s1637_s25  ;;  %s1650_s6 = scalar_lea.vmem %s1825_s0, %s1637_s25 }
  0x10   : > { %v1553_v4 = vld [vmem:[%s1643_s28] sm:$0xff]   ;;  %v1555_v6 = vld [vmem:[%s1643_s28 + $0x8] sm:$0xff]   ;;  %v1557_v8 = vld [vmem:[%s1643_s28 + $0x10] sm:$0xff]   ;;  %s1728_s11 = scalar_lea.vmem %s1830_s5, %s1637_s25 }
  0x11   : > { %v1554_v5 = vld [vmem:[%s1650_s6] sm:$0xff]   ;;  %1445 = vmatprep.mubr.msk.bf16.mxu1 %vm397_vm1, %v1553_v4  ;;  %v1556_v7 = vld [vmem:[%s1650_s6 + $0x8] sm:$0xff]   ;;  %v1558_v9 = vld [vmem:[%s1650_s6 + $0x10] sm:$0xff]  }
  0x12   : > { %1479 = vmatprep.mubr.msk.bf16.mxu0 %vm397_vm1, %v1554_v5  ;;  %1446 = vmatmul.mubr.msk.bf16.vlgmr.msra.gmra.mrb[0].mxu1 %vm397_vm1, %v1555_v6  ;;  %v1559_v10 = vld [vmem:[%s1643_s28 + $0x18] sm:$0xff]   ;;  %v1561_v12 = vld [vmem:[%s1643_s28 + $0x20] sm:$0xff]   ;;  %v1563_v14 = vld [vmem:[%s1643_s28 + $0x28] sm:$0xff]  }
  0x13   : > { %1480 = vmatmul.mubr.msk.bf16.vlgmr.msra.gmra.mrb[0].mxu0 %vm397_vm1, %v1556_v7  ;;  %1449 = vmatprep.mubr.msk.bf16.mxu1 %vm397_vm1, %v1557_v8  ;;  %v1560_v11 = vld [vmem:[%s1650_s6 + $0x18] sm:$0xff]   ;;  %v1562_v13 = vld [vmem:[%s1650_s6 + $0x20] sm:$0xff]   ;;  %v1564_v15 = vld [vmem:[%s1650_s6 + $0x28] sm:$0xff]  }
  0x14   : > { %1483 = vmatprep.mubr.msk.bf16.mxu0 %vm397_vm1, %v1558_v9  ;;  %v1565_v16 = vld [vmem:[%s1643_s28 + $0x30] sm:$0xff]   ;;  %v1567_v18 = vld [vmem:[%s1643_s28 + $0x38] sm:$0xff]   ;;  %v1569_v20 = vld [vmem:[%s1643_s28 + $0x40] sm:$0xff]  }
  0x15   : > { %v1566_v17 = vld [vmem:[%s1650_s6 + $0x30] sm:$0xff]   ;;  %v1568_v19 = vld [vmem:[%s1650_s6 + $0x38] sm:$0xff]   ;;  %v1570_v21 = vld [vmem:[%s1650_s6 + $0x40] sm:$0xff]  }
  0x16   : > { %v1571_v22 = vld [vmem:[%s1643_s28 + $0x48] sm:$0xff]   ;;  %v1573_v24 = vld [vmem:[%s1643_s28 + $0x50] sm:$0xff]   ;;  %v1575_v26 = vld [vmem:[%s1643_s28 + $0x58] sm:$0xff]  }
  0x17   : > { %v1572_v23 = vld [vmem:[%s1650_s6 + $0x48] sm:$0xff]   ;;  %v1574_v25 = vld [vmem:[%s1650_s6 + $0x50] sm:$0xff]   ;;  %v1576_v27 = vld [vmem:[%s1650_s6 + $0x58] sm:$0xff]  }
  0x18   : > { %v1577_v28 = vld [vmem:[%s1643_s28 + $0x60] sm:$0xff]   ;;  %v1579_v30 = vld [vmem:[%s1643_s28 + $0x68] sm:$0xff]   ;;  %v1581_v32 = vld [vmem:[%s1643_s28 + $0x70] sm:$0xff]  }
  0x19   : > { %v1578_v29 = vld [vmem:[%s1650_s6 + $0x60] sm:$0xff]   ;;  %v1580_v31 = vld [vmem:[%s1650_s6 + $0x68] sm:$0xff]   ;;  %v1582_v33 = vld [vmem:[%s1650_s6 + $0x70] sm:$0xff]  }
  0x1a   : > { %1450 = vmatmul.mubr.msk.bf16.gmra.mrb[4].mxu1 %vm397_vm1, %v1559_v10  ;;  %v1583_v34 = vld [vmem:[%s1643_s28 + $0x78] sm:$0xff]  }
  0x1b   : > { %1484 = vmatmul.mubr.msk.bf16.gmra.mrb[4].mxu0 %vm397_vm1, %v1560_v11  ;;  %1453 = vmatprep.mubr.msk.bf16.mxu1 %vm397_vm1, %v1561_v12  ;;  %v1584_v35 = vld [vmem:[%s1650_s6 + $0x78] sm:$0xff]  }
  0x1c   : > { %1487 = vmatprep.mubr.msk.bf16.mxu0 %vm397_vm1, %v1562_v13 }
  0x22   : > { %1454 = vmatmul.mubr.msk.bf16.gmra.mrb[8].mxu1 %vm397_vm1, %v1563_v14 }
  0x23   : > { %1488 = vmatmul.mubr.msk.bf16.gmra.mrb[8].mxu0 %vm397_vm1, %v1564_v15  ;;  %1457 = vmatprep.mubr.msk.bf16.mxu1 %vm397_vm1, %v1565_v16 }
  0x24   : > { %1491 = vmatprep.mubr.msk.bf16.mxu0 %vm397_vm1, %v1566_v17 }
  0x2a   : > { %1458 = vmatmul.mubr.msk.bf16.gmra.mrb[12].mxu1 %vm397_vm1, %v1567_v18 }
  0x2b   : > { %1492 = vmatmul.mubr.msk.bf16.gmra.mrb[12].mxu0 %vm397_vm1, %v1568_v19  ;;  %1461 = vmatprep.mubr.msk.bf16.mxu1 %vm397_vm1, %v1569_v20 }
  0x2c   : > { %1495 = vmatprep.mubr.msk.bf16.mxu0 %vm397_vm1, %v1570_v21 }
  0x32   : > { %1462 = vmatmul.mubr.msk.bf16.gmra.mrb[16].mxu1 %vm397_vm1, %v1571_v22 }
  0x33   : > { %1496 = vmatmul.mubr.msk.bf16.gmra.mrb[16].mxu0 %vm397_vm1, %v1572_v23  ;;  %1465 = vmatprep.mubr.msk.bf16.mxu1 %vm397_vm1, %v1573_v24 }
  0x34   : > { %1499 = vmatprep.mubr.msk.bf16.mxu0 %vm397_vm1, %v1574_v25 }
  0x3a   : > { %1466 = vmatmul.mubr.msk.bf16.gmra.mrb[20].mxu1 %vm397_vm1, %v1575_v26 }
  0x3b   : > { %1500 = vmatmul.mubr.msk.bf16.gmra.mrb[20].mxu0 %vm397_vm1, %v1576_v27  ;;  %1469 = vmatprep.mubr.msk.bf16.mxu1 %vm397_vm1, %v1577_v28 }
  0x3c   : > { %1503 = vmatprep.mubr.msk.bf16.mxu0 %vm397_vm1, %v1578_v29 }
  0x42   : > { %1470 = vmatmul.mubr.msk.bf16.gmra.mrb[24].mxu1 %vm397_vm1, %v1579_v30 }
  0x43   : > { %1504 = vmatmul.mubr.msk.bf16.gmra.mrb[24].mxu0 %vm397_vm1, %v1580_v31  ;;  %1473 = vmatprep.mubr.msk.bf16.mxu1 %vm397_vm1, %v1581_v32 }
  0x44   : > { %1507 = vmatprep.mubr.msk.bf16.mxu0 %vm397_vm1, %v1582_v33 }
  0x4a   : > { %1474 = vmatmul.mubr.msk.bf16.gmra.mrb[28].mxu1 %vm397_vm1, %v1583_v34 }
  0x4b   : > { %1508 = vmatmul.mubr.msk.bf16.gmra.mrb[28].mxu0 %vm397_vm1, %v1584_v35 }
  0xe5   : > { %v1447_v36 = vpop.f32.mrb[0].mxu1 }
  0xe6   : > { %v1481_v37 = vpop.f32.mrb[0].mxu0  ;;  %v484_v39 = vpop.f32.mrb[1].mxu1 }
  0xe7   : > { %v785_v40 = vadd.f32 %v1481_v37, %v1447_v36  ;;  %v776_v41 = vpop.f32.mrb[1].mxu0  ;;  %v1448_v42 = vpop.f32.mrb[2].mxu1 }
  0xe8   : > { %v777_v43 = vadd.f32 %v776_v41, %v484_v39  ;;  %v1482_v44 = vpop.f32.mrb[2].mxu0  ;;  %v487_v45 = vpop.f32.mrb[3].mxu1 }
  0xe9   : > { %v912_v46 = vadd.f32 %v1718_v38, %v785_v40  ;;  %v788_v47 = vadd.f32 %v1482_v44, %v1448_v42  ;;  %v779_v48 = vpop.f32.mrb[3].mxu0 }
  0xea   : > { %v910_v49 = vadd.f32 %v1718_v38, %v777_v43  ;;  %v780_v50 = vadd.f32 %v779_v48, %v487_v45 }
  0xeb   : > { %vm944_vm2 = vcmp.gt.f32.partialorder %v912_v46, 0.0  ;;  %v976_v51 = vmul.f32 0.1, %v912_v46  ;;  %v913_v52 = vadd.f32 %v1718_v38, %v788_v47 }
  0xec   : > { %vm942_vm3 = vcmp.gt.f32.partialorder %v910_v49, 0.0  ;;  %v974_v53 = vmul.f32 0.1, %v910_v49  ;;  %v911_v54 = vadd.f32 %v1718_v38, %v780_v50 }
  0xed   : > { %v1008_v55 = vsel %vm944_vm2, %v912_v46, %v976_v51  ;;  %vm945_vm5 = vcmp.gt.f32.partialorder %v913_v52, 0.0  ;;  %v977_v56 = vmul.f32 0.1, %v913_v52  ;;  %v1451_v57 = vpop.f32.mrb[4].mxu1 }
  0xee   : > { %v1379_v58 = vpack.c.bf16 %v1008_v55, %v1008_v55  ;;  %v1006_v59 = vsel %vm942_vm3, %v910_v49, %v974_v53  ;;  %vm943_vm6 = vcmp.gt.f32.partialorder %v911_v54, 0.0  ;;  %v975_v60 = vmul.f32 0.1, %v911_v54  ;;  %v1485_v61 = vpop.f32.mrb[4].mxu0  ;;  %v500_v62 = vpop.f32.mrb[5].mxu1 }
  0xef   : > { %v1377_v63 = vpack.c.bf16 %v1006_v59, %v1006_v59  ;;  %v1009_v0 = vsel %vm945_vm5, %v913_v52, %v977_v56  ;;  %v801_v1 = vadd.f32 %v1485_v61, %v1451_v57  ;;  %v792_v2 = vpop.f32.mrb[5].mxu0  ;;  %v1452_v3 = vpop.f32.mrb[6].mxu1 }
  0xf0   : > { %1169 = vst.msk [vmem:[%s1728_s11 + $0x8] sm:$0xf] %vm1166_vm4, %v1379_v58  ;;  %v1380_v4 = vpack.c.bf16 %v1009_v0, %v1009_v0  ;;  %v1007_v5 = vsel %vm943_vm6, %v911_v54, %v975_v60  ;;  %v793_v6 = vadd.f32 %v792_v2, %v500_v62  ;;  %v1486_v7 = vpop.f32.mrb[6].mxu0  ;;  %v503_v8 = vpop.f32.mrb[7].mxu1 }
  0xf1   : > { %1167 = vst.msk [vmem:[%s1728_s11] sm:$0xf] %vm1166_vm4, %v1377_v63  ;;  %v1378_v9 = vpack.c.bf16 %v1007_v5, %v1007_v5  ;;  %v916_v10 = vadd.f32 %v1718_v38, %v801_v1  ;;  %v804_v11 = vadd.f32 %v1486_v7, %v1452_v3  ;;  %v795_v12 = vpop.f32.mrb[7].mxu0 }
  0xf2   : > { %1170 = vst.msk [vmem:[%s1728_s11 + $0xc] sm:$0xf] %vm1166_vm4, %v1380_v4  ;;  %v914_v13 = vadd.f32 %v1718_v38, %v793_v6  ;;  %v796_v14 = vadd.f32 %v795_v12, %v503_v8 }
  0xf3   : > { %1168 = vst.msk [vmem:[%s1728_s11 + $0x4] sm:$0xf] %vm1166_vm4, %v1378_v9  ;;  %vm948_vm7 = vcmp.gt.f32.partialorder %v916_v10, 0.0  ;;  %v980_v15 = vmul.f32 0.1, %v916_v10  ;;  %v917_v16 = vadd.f32 %v1718_v38, %v804_v11 }
  0xf4   : > { %vm946_vm8 = vcmp.gt.f32.partialorder %v914_v13, 0.0  ;;  %v978_v17 = vmul.f32 0.1, %v914_v13  ;;  %v915_v18 = vadd.f32 %v1718_v38, %v796_v14 }
  0xf5   : > { %v1012_v19 = vsel %vm948_vm7, %v916_v10, %v980_v15  ;;  %vm949_vm9 = vcmp.gt.f32.partialorder %v917_v16, 0.0  ;;  %v981_v20 = vmul.f32 0.1, %v917_v16  ;;  %v1455_v21 = vpop.f32.mrb[8].mxu1 }
  0xf6   : > { %v1383_v22 = vpack.c.bf16 %v1012_v19, %v1012_v19  ;;  %v1010_v23 = vsel %vm946_vm8, %v914_v13, %v978_v17  ;;  %vm947_vm10 = vcmp.gt.f32.partialorder %v915_v18, 0.0  ;;  %v979_v24 = vmul.f32 0.1, %v915_v18  ;;  %v1489_v25 = vpop.f32.mrb[8].mxu0  ;;  %v516_v26 = vpop.f32.mrb[9].mxu1 }
  0xf7   : > { %v1381_v27 = vpack.c.bf16 %v1010_v23, %v1010_v23  ;;  %v1013_v28 = vsel %vm949_vm9, %v917_v16, %v981_v20  ;;  %v817_v29 = vadd.f32 %v1489_v25, %v1455_v21  ;;  %v808_v30 = vpop.f32.mrb[9].mxu0  ;;  %v1456_v31 = vpop.f32.mrb[10].mxu1 }
  0xf8   : > { %1173 = vst.msk [vmem:[%s1728_s11 + $0x18] sm:$0xf] %vm1166_vm4, %v1383_v22  ;;  %v1384_v32 = vpack.c.bf16 %v1013_v28, %v1013_v28  ;;  %v1011_v33 = vsel %vm947_vm10, %v915_v18, %v979_v24  ;;  %v809_v34 = vadd.f32 %v808_v30, %v516_v26  ;;  %v1490_v35 = vpop.f32.mrb[10].mxu0  ;;  %v519_v36 = vpop.f32.mrb[11].mxu1 }
  0xf9   : > { %1171 = vst.msk [vmem:[%s1728_s11 + $0x10] sm:$0xf] %vm1166_vm4, %v1381_v27  ;;  %v1382_v37 = vpack.c.bf16 %v1011_v33, %v1011_v33  ;;  %v920_v39 = vadd.f32 %v1718_v38, %v817_v29  ;;  %v820_v40 = vadd.f32 %v1490_v35, %v1456_v31  ;;  %v811_v41 = vpop.f32.mrb[11].mxu0 }
  0xfa   : > { %1174 = vst.msk [vmem:[%s1728_s11 + $0x1c] sm:$0xf] %vm1166_vm4, %v1384_v32  ;;  %v918_v42 = vadd.f32 %v1718_v38, %v809_v34  ;;  %v812_v43 = vadd.f32 %v811_v41, %v519_v36 }
  0xfb   : > { %1172 = vst.msk [vmem:[%s1728_s11 + $0x14] sm:$0xf] %vm1166_vm4, %v1382_v37  ;;  %vm952_vm11 = vcmp.gt.f32.partialorder %v920_v39, 0.0  ;;  %v984_v44 = vmul.f32 0.1, %v920_v39  ;;  %v921_v45 = vadd.f32 %v1718_v38, %v820_v40 }
  0xfc   : > { %vm950_vm12 = vcmp.gt.f32.partialorder %v918_v42, 0.0  ;;  %v982_v46 = vmul.f32 0.1, %v918_v42  ;;  %v919_v47 = vadd.f32 %v1718_v38, %v812_v43 }
  0xfd   : > { %v1016_v48 = vsel %vm952_vm11, %v920_v39, %v984_v44  ;;  %vm953_vm13 = vcmp.gt.f32.partialorder %v921_v45, 0.0  ;;  %v985_v49 = vmul.f32 0.1, %v921_v45  ;;  %v1459_v50 = vpop.f32.mrb[12].mxu1 }
  0xfe   : > { %v1387_v51 = vpack.c.bf16 %v1016_v48, %v1016_v48  ;;  %v1014_v52 = vsel %vm950_vm12, %v918_v42, %v982_v46  ;;  %vm951_vm14 = vcmp.gt.f32.partialorder %v919_v47, 0.0  ;;  %v983_v53 = vmul.f32 0.1, %v919_v47  ;;  %v1493_v54 = vpop.f32.mrb[12].mxu0  ;;  %v532_v55 = vpop.f32.mrb[13].mxu1 }
  0xff   : > { %v1385_v56 = vpack.c.bf16 %v1014_v52, %v1014_v52  ;;  %v1017_v57 = vsel %vm953_vm13, %v921_v45, %v985_v49  ;;  %v833_v58 = vadd.f32 %v1493_v54, %v1459_v50  ;;  %v824_v59 = vpop.f32.mrb[13].mxu0  ;;  %v1460_v60 = vpop.f32.mrb[14].mxu1 }
 0x100   : > { %1177 = vst.msk [vmem:[%s1728_s11 + $0x28] sm:$0xf] %vm1166_vm4, %v1387_v51  ;;  %v1388_v61 = vpack.c.bf16 %v1017_v57, %v1017_v57  ;;  %v1015_v62 = vsel %vm951_vm14, %v919_v47, %v983_v53  ;;  %v825_v63 = vadd.f32 %v824_v59, %v532_v55  ;;  %v1494_v0 = vpop.f32.mrb[14].mxu0  ;;  %v535_v1 = vpop.f32.mrb[15].mxu1 }
 0x101   : > { %1175 = vst.msk [vmem:[%s1728_s11 + $0x20] sm:$0xf] %vm1166_vm4, %v1385_v56  ;;  %v1386_v2 = vpack.c.bf16 %v1015_v62, %v1015_v62  ;;  %v924_v3 = vadd.f32 %v1718_v38, %v833_v58  ;;  %v836_v4 = vadd.f32 %v1494_v0, %v1460_v60  ;;  %v827_v5 = vpop.f32.mrb[15].mxu0 }
 0x102   : > { %1178 = vst.msk [vmem:[%s1728_s11 + $0x2c] sm:$0xf] %vm1166_vm4, %v1388_v61  ;;  %v922_v6 = vadd.f32 %v1718_v38, %v825_v63  ;;  %v828_v7 = vadd.f32 %v827_v5, %v535_v1 }
 0x103   : > { %1176 = vst.msk [vmem:[%s1728_s11 + $0x24] sm:$0xf] %vm1166_vm4, %v1386_v2  ;;  %vm956_vm15 = vcmp.gt.f32.partialorder %v924_v3, 0.0  ;;  %v988_v8 = vmul.f32 0.1, %v924_v3  ;;  %v925_v9 = vadd.f32 %v1718_v38, %v836_v4 }
 0x104   : > { %vm954_vm0 = vcmp.gt.f32.partialorder %v922_v6, 0.0  ;;  %v986_v10 = vmul.f32 0.1, %v922_v6  ;;  %v923_v11 = vadd.f32 %v1718_v38, %v828_v7 }
 0x105   : > { %v1020_v12 = vsel %vm956_vm15, %v924_v3, %v988_v8  ;;  %vm957_vm1 = vcmp.gt.f32.partialorder %v925_v9, 0.0  ;;  %v989_v13 = vmul.f32 0.1, %v925_v9  ;;  %v1463_v14 = vpop.f32.mrb[16].mxu1 }
 0x106   : > { %v1391_v15 = vpack.c.bf16 %v1020_v12, %v1020_v12  ;;  %v1018_v16 = vsel %vm954_vm0, %v922_v6, %v986_v10  ;;  %vm955_vm2 = vcmp.gt.f32.partialorder %v923_v11, 0.0  ;;  %v987_v17 = vmul.f32 0.1, %v923_v11  ;;  %v1497_v18 = vpop.f32.mrb[16].mxu0  ;;  %v548_v19 = vpop.f32.mrb[17].mxu1 }
 0x107   : > { %v1389_v20 = vpack.c.bf16 %v1018_v16, %v1018_v16  ;;  %v1021_v21 = vsel %vm957_vm1, %v925_v9, %v989_v13  ;;  %v849_v22 = vadd.f32 %v1497_v18, %v1463_v14  ;;  %v840_v23 = vpop.f32.mrb[17].mxu0  ;;  %v1464_v24 = vpop.f32.mrb[18].mxu1 }
 0x108   : > { %1181 = vst.msk [vmem:[%s1728_s11 + $0x38] sm:$0xf] %vm1166_vm4, %v1391_v15  ;;  %v1392_v25 = vpack.c.bf16 %v1021_v21, %v1021_v21  ;;  %v1019_v26 = vsel %vm955_vm2, %v923_v11, %v987_v17  ;;  %v841_v27 = vadd.f32 %v840_v23, %v548_v19  ;;  %v1498_v28 = vpop.f32.mrb[18].mxu0  ;;  %v551_v29 = vpop.f32.mrb[19].mxu1 }
 0x109   : > { %1179 = vst.msk [vmem:[%s1728_s11 + $0x30] sm:$0xf] %vm1166_vm4, %v1389_v20  ;;  %v1390_v30 = vpack.c.bf16 %v1019_v26, %v1019_v26  ;;  %v928_v31 = vadd.f32 %v1718_v38, %v849_v22  ;;  %v852_v32 = vadd.f32 %v1498_v28, %v1464_v24  ;;  %v843_v33 = vpop.f32.mrb[19].mxu0 }
 0x10a   : > { %1182 = vst.msk [vmem:[%s1728_s11 + $0x3c] sm:$0xf] %vm1166_vm4, %v1392_v25  ;;  %v926_v34 = vadd.f32 %v1718_v38, %v841_v27  ;;  %v844_v35 = vadd.f32 %v843_v33, %v551_v29 }
 0x10b   : > { %1180 = vst.msk [vmem:[%s1728_s11 + $0x34] sm:$0xf] %vm1166_vm4, %v1390_v30  ;;  %vm960_vm3 = vcmp.gt.f32.partialorder %v928_v31, 0.0  ;;  %v992_v36 = vmul.f32 0.1, %v928_v31  ;;  %v929_v37 = vadd.f32 %v1718_v38, %v852_v32 }
 0x10c   : > { %vm958_vm5 = vcmp.gt.f32.partialorder %v926_v34, 0.0  ;;  %v990_v39 = vmul.f32 0.1, %v926_v34  ;;  %v927_v40 = vadd.f32 %v1718_v38, %v844_v35 }
 0x10d   : > { %v1024_v41 = vsel %vm960_vm3, %v928_v31, %v992_v36  ;;  %vm961_vm6 = vcmp.gt.f32.partialorder %v929_v37, 0.0  ;;  %v993_v42 = vmul.f32 0.1, %v929_v37  ;;  %v1467_v43 = vpop.f32.mrb[20].mxu1 }
 0x10e   : > { %v1395_v44 = vpack.c.bf16 %v1024_v41, %v1024_v41  ;;  %v1022_v45 = vsel %vm958_vm5, %v926_v34, %v990_v39  ;;  %vm959_vm7 = vcmp.gt.f32.partialorder %v927_v40, 0.0  ;;  %v991_v46 = vmul.f32 0.1, %v927_v40  ;;  %v1501_v47 = vpop.f32.mrb[20].mxu0  ;;  %v564_v48 = vpop.f32.mrb[21].mxu1 }
 0x10f   : > { %v1393_v49 = vpack.c.bf16 %v1022_v45, %v1022_v45  ;;  %v1025_v50 = vsel %vm961_vm6, %v929_v37, %v993_v42  ;;  %v865_v51 = vadd.f32 %v1501_v47, %v1467_v43  ;;  %v856_v52 = vpop.f32.mrb[21].mxu0  ;;  %v1468_v53 = vpop.f32.mrb[22].mxu1 }
 0x110   : > { %1185 = vst.msk [vmem:[%s1728_s11 + $0x48] sm:$0xf] %vm1166_vm4, %v1395_v44  ;;  %v1396_v54 = vpack.c.bf16 %v1025_v50, %v1025_v50  ;;  %v1023_v55 = vsel %vm959_vm7, %v927_v40, %v991_v46  ;;  %v857_v56 = vadd.f32 %v856_v52, %v564_v48  ;;  %v1502_v57 = vpop.f32.mrb[22].mxu0  ;;  %v567_v58 = vpop.f32.mrb[23].mxu1 }
 0x111   : > { %1183 = vst.msk [vmem:[%s1728_s11 + $0x40] sm:$0xf] %vm1166_vm4, %v1393_v49  ;;  %v1394_v59 = vpack.c.bf16 %v1023_v55, %v1023_v55  ;;  %v932_v60 = vadd.f32 %v1718_v38, %v865_v51  ;;  %v868_v61 = vadd.f32 %v1502_v57, %v1468_v53  ;;  %v859_v62 = vpop.f32.mrb[23].mxu0 }
 0x112   : > { %1186 = vst.msk [vmem:[%s1728_s11 + $0x4c] sm:$0xf] %vm1166_vm4, %v1396_v54  ;;  %v930_v63 = vadd.f32 %v1718_v38, %v857_v56  ;;  %v860_v0 = vadd.f32 %v859_v62, %v567_v58 }
 0x113   : > { %1184 = vst.msk [vmem:[%s1728_s11 + $0x44] sm:$0xf] %vm1166_vm4, %v1394_v59  ;;  %vm964_vm8 = vcmp.gt.f32.partialorder %v932_v60, 0.0  ;;  %v996_v1 = vmul.f32 0.1, %v932_v60  ;;  %v933_v2 = vadd.f32 %v1718_v38, %v868_v61 }
 0x114   : > { %vm962_vm9 = vcmp.gt.f32.partialorder %v930_v63, 0.0  ;;  %v994_v3 = vmul.f32 0.1, %v930_v63  ;;  %v931_v4 = vadd.f32 %v1718_v38, %v860_v0 }
 0x115   : > { %v1028_v5 = vsel %vm964_vm8, %v932_v60, %v996_v1  ;;  %vm965_vm10 = vcmp.gt.f32.partialorder %v933_v2, 0.0  ;;  %v997_v6 = vmul.f32 0.1, %v933_v2  ;;  %v1471_v7 = vpop.f32.mrb[24].mxu1 }
 0x116   : > { %v1399_v8 = vpack.c.bf16 %v1028_v5, %v1028_v5  ;;  %v1026_v9 = vsel %vm962_vm9, %v930_v63, %v994_v3  ;;  %vm963_vm11 = vcmp.gt.f32.partialorder %v931_v4, 0.0  ;;  %v995_v10 = vmul.f32 0.1, %v931_v4  ;;  %v1505_v11 = vpop.f32.mrb[24].mxu0  ;;  %v580_v12 = vpop.f32.mrb[25].mxu1 }
 0x117   : > { %v1397_v13 = vpack.c.bf16 %v1026_v9, %v1026_v9  ;;  %v1029_v14 = vsel %vm965_vm10, %v933_v2, %v997_v6  ;;  %v881_v15 = vadd.f32 %v1505_v11, %v1471_v7  ;;  %v872_v16 = vpop.f32.mrb[25].mxu0  ;;  %v1472_v17 = vpop.f32.mrb[26].mxu1 }
 0x118   : > { %1189 = vst.msk [vmem:[%s1728_s11 + $0x58] sm:$0xf] %vm1166_vm4, %v1399_v8  ;;  %v1400_v18 = vpack.c.bf16 %v1029_v14, %v1029_v14  ;;  %v1027_v19 = vsel %vm963_vm11, %v931_v4, %v995_v10  ;;  %v873_v20 = vadd.f32 %v872_v16, %v580_v12  ;;  %v1506_v21 = vpop.f32.mrb[26].mxu0  ;;  %v583_v22 = vpop.f32.mrb[27].mxu1 }
 0x119   : > { %1187 = vst.msk [vmem:[%s1728_s11 + $0x50] sm:$0xf] %vm1166_vm4, %v1397_v13  ;;  %v1398_v23 = vpack.c.bf16 %v1027_v19, %v1027_v19  ;;  %v936_v24 = vadd.f32 %v1718_v38, %v881_v15  ;;  %v884_v25 = vadd.f32 %v1506_v21, %v1472_v17  ;;  %v875_v26 = vpop.f32.mrb[27].mxu0 }
 0x11a   : > { %1190 = vst.msk [vmem:[%s1728_s11 + $0x5c] sm:$0xf] %vm1166_vm4, %v1400_v18  ;;  %v934_v27 = vadd.f32 %v1718_v38, %v873_v20  ;;  %v876_v28 = vadd.f32 %v875_v26, %v583_v22 }
 0x11b   : > { %1188 = vst.msk [vmem:[%s1728_s11 + $0x54] sm:$0xf] %vm1166_vm4, %v1398_v23  ;;  %vm968_vm12 = vcmp.gt.f32.partialorder %v936_v24, 0.0  ;;  %v1000_v29 = vmul.f32 0.1, %v936_v24  ;;  %v937_v30 = vadd.f32 %v1718_v38, %v884_v25 }
 0x11c   : > { %vm966_vm13 = vcmp.gt.f32.partialorder %v934_v27, 0.0  ;;  %v998_v31 = vmul.f32 0.1, %v934_v27  ;;  %v935_v32 = vadd.f32 %v1718_v38, %v876_v28 }
 0x11d   : > { %v1032_v33 = vsel %vm968_vm12, %v936_v24, %v1000_v29  ;;  %vm969_vm14 = vcmp.gt.f32.partialorder %v937_v30, 0.0  ;;  %v1001_v34 = vmul.f32 0.1, %v937_v30  ;;  %v1475_v35 = vpop.f32.mrb[28].mxu1 }
 0x11e   : > { %v1403_v36 = vpack.c.bf16 %v1032_v33, %v1032_v33  ;;  %v1030_v37 = vsel %vm966_vm13, %v934_v27, %v998_v31  ;;  %vm967_vm15 = vcmp.gt.f32.partialorder %v935_v32, 0.0  ;;  %v999_v39 = vmul.f32 0.1, %v935_v32  ;;  %v1509_v40 = vpop.f32.mrb[28].mxu0  ;;  %v596_v41 = vpop.f32.mrb[29].mxu1 }
 0x11f   : > { %v1401_v42 = vpack.c.bf16 %v1030_v37, %v1030_v37  ;;  %v1033_v43 = vsel %vm969_vm14, %v937_v30, %v1001_v34  ;;  %v897_v44 = vadd.f32 %v1509_v40, %v1475_v35  ;;  %v888_v45 = vpop.f32.mrb[29].mxu0  ;;  %v1476_v46 = vpop.f32.mrb[30].mxu1 }
 0x120   : > { %1193 = vst.msk [vmem:[%s1728_s11 + $0x68] sm:$0xf] %vm1166_vm4, %v1403_v36  ;;  %v1404_v47 = vpack.c.bf16 %v1033_v43, %v1033_v43  ;;  %v1031_v48 = vsel %vm967_vm15, %v935_v32, %v999_v39  ;;  %v889_v49 = vadd.f32 %v888_v45, %v596_v41  ;;  %v1510_v50 = vpop.f32.mrb[30].mxu0  ;;  %v599_v51 = vpop.f32.mrb[31].mxu1 }
 0x121   : > { %1191 = vst.msk [vmem:[%s1728_s11 + $0x60] sm:$0xf] %vm1166_vm4, %v1401_v42  ;;  %v1402_v52 = vpack.c.bf16 %v1031_v48, %v1031_v48  ;;  %v940_v53 = vadd.f32 %v1718_v38, %v897_v44  ;;  %v900_v54 = vadd.f32 %v1510_v50, %v1476_v46  ;;  %v891_v55 = vpop.f32.mrb[31].mxu0 }
 0x122   : > { %1194 = vst.msk [vmem:[%s1728_s11 + $0x6c] sm:$0xf] %vm1166_vm4, %v1404_v47  ;;  %v938_v56 = vadd.f32 %v1718_v38, %v889_v49  ;;  %v892_v57 = vadd.f32 %v891_v55, %v599_v51 }
 0x123   : > { %1192 = vst.msk [vmem:[%s1728_s11 + $0x64] sm:$0xf] %vm1166_vm4, %v1402_v52  ;;  %vm972_vm0 = vcmp.gt.f32.partialorder %v940_v53, 0.0  ;;  %v1004_v58 = vmul.f32 0.1, %v940_v53  ;;  %v941_v59 = vadd.f32 %v1718_v38, %v900_v54 }
 0x124   : > { %vm970_vm1 = vcmp.gt.f32.partialorder %v938_v56, 0.0  ;;  %v1002_v60 = vmul.f32 0.1, %v938_v56  ;;  %v939_v61 = vadd.f32 %v1718_v38, %v892_v57 }
 0x125   : > { %v1036_v62 = vsel %vm972_vm0, %v940_v53, %v1004_v58  ;;  %vm973_vm2 = vcmp.gt.f32.partialorder %v941_v59, 0.0  ;;  %v1005_v63 = vmul.f32 0.1, %v941_v59 }
 0x126   : > { %v1407_v0 = vpack.c.bf16 %v1036_v62, %v1036_v62  ;;  %v1034_v1 = vsel %vm970_vm1, %v938_v56, %v1002_v60  ;;  %vm971_vm3 = vcmp.gt.f32.partialorder %v939_v61, 0.0  ;;  %v1003_v2 = vmul.f32 0.1, %v939_v61 }
 0x127   : > { %v1405_v3 = vpack.c.bf16 %v1034_v1, %v1034_v1  ;;  %v1037_v4 = vsel %vm973_vm2, %v941_v59, %v1005_v63 }
 0x128   : > { %1197 = vst.msk [vmem:[%s1728_s11 + $0x78] sm:$0xf] %vm1166_vm4, %v1407_v0  ;;  %v1408_v5 = vpack.c.bf16 %v1037_v4, %v1037_v4  ;;  %v1035_v6 = vsel %vm971_vm3, %v939_v61, %v1003_v2 }
 0x129   : > { %1195 = vst.msk [vmem:[%s1728_s11 + $0x70] sm:$0xf] %vm1166_vm4, %v1405_v3  ;;  %v1406_v7 = vpack.c.bf16 %v1035_v6, %v1035_v6 }
 0x12a   : > { %1198 = vst.msk [vmem:[%s1728_s11 + $0x7c] sm:$0xf] %vm1166_vm4, %v1408_v5 }
 0x12b   : > { %1196 = vst.msk [vmem:[%s1728_s11 + $0x74] sm:$0xf] %vm1166_vm4, %v1406_v7 }
 0x12c PF: > { %s15_s18 = sadd.s32 1, %s1591_s18  }
 0x12d   : > { %p12_p4 = scmp.ge.s32.totalorder %s15_s18, 4  }
 0x12f   :  { %14 = sbr.rel (!%p12_p4) target bundleno = 1 (0x1), region = 73 }

// kernel: resblock_body_forward.5
= control target key start
LH: loop header
LB: loop body
LE: loop exit
PB: predicated region body
PF: predicated region fallthrough
CT: control target
= control target key end

     0   :  { %s5593_s18 = smov 0   ;;  %s5595_s19 = smov 0   ;;  %s6319_s0 = inlined_call_operand.vmem [shape: bf16[2,16,18,4], index: 0, kind: input, shape index: {}]   ;;  %s6320_s1 = inlined_call_operand.vmem [shape: bf16[2,16,18,4], index: 1, kind: input, shape index: {}]   ;;  %s6321_s2 = inlined_call_operand.vmem [shape: bf16[2,16,18,4], index: 2, kind: input, shape index: {}]   ;;  %s6322_s3 = inlined_call_operand.vmem [shape: bf16[3,3,4,8], index: 3, kind: input, shape index: {}]   ;;  %s6323_s4 = inlined_call_operand.vmem [shape: f32[1,8], index: 4, kind: input, shape index: {}]   ;;  %s6324_s5 = inlined_call_operand.vmem [shape: bf16[2,16,16,8], index: 5, kind: output, shape index: {}]  }
   0x1   :  { %s5597_s20 = smov 0   ;;  %s5599_s21 = smov 0  }
   0x2   :  { %s5601_s22 = smov 0  }
   0x3 LB: > { %s24_s23 = sadd.s32 1, %s5551_s20  ;;  %s27_s24 = sadd.s32 1, %s5555_s21  ;;  %s5559_s22 = sphi %s5601_s22, %s15_s22   ;;  %s5555_s21 = sphi %s5599_s21, %s6328_s21   ;;  %s5551_s20 = sphi %s5597_s20, %s6327_s20   ;;  %s5547_s19 = sphi %s5595_s19, %s6326_s19   ;;  %s5543_s18 = sphi %s5593_s18, %s6325_s18  }
   0x4   : > { %p25_p0 = scmp.ge.s32.totalorder %s24_s23, 2  ;;  %p4601_p1 = scmp.ge.s32.totalorder %s5559_s22, 1 }
   0x5   : > { %p245_p2 = scmp.lt.s32.totalorder %s5559_s22, 5 }
   0x6   : > { %s6330_s23 = smov (%p25_p0, %s24_s23), 0  ;;  %s6332_s24 = smov (!%p25_p0, %s27_s24), %s5555_s21 }
   0x7   : > { %p246_p3 = pnand %p4601_p1, %p245_p2  ;;  %p29_p4 = scmp.ge.s32.totalorder %s6332_s24, 2 }
   0x8   : > { %v4612_v0 = vld [vmem:[%s6322_s3 + $0x2] sm:$0x3] (!%p246_p3)  ;;  %vm400_vm0 = vcmask (!%p246_p3), 1041408   ;;  %v349_v1 = vld [vmem:[%s6322_s3] sm:$0x3] (!%p246_p3)  ;;  %v5561_v2 = vmov (!%p246_p3), 0.0  }
   0x9   : > { %s6334_s24 = smov (%p29_p4, %s6332_s24), 0  ;;  %249 = sbr.rel (%p246_p3) target bundleno = 537 (0x219), region = 40 }
   0xa   : > { %4996 = vmatprep.subr.bf16.mxu0 (!%p246_p3), %v5561_v2  ;;  %5002 = vmatprep.subr.bf16.mxu1 (!%p246_p3), %v5561_v2  ;;  %v5636_v3 = vsel (!%p246_p3), %vm400_vm0, %v4612_v0, 0  ;;  %v5639_v4 = vsel (!%p246_p3), %vm400_vm0, %v349_v1, 0  ;;  %s4602_s29 = sshll.u32 (!%p246_p3), %s5543_s18, 3  ;;  %p304_p5 = scmp.lt.s32.totalorder (!%p246_p3), %s5547_s19, 1  ;;  %vm5562_vm1 = vmmov (!%p246_p3), 0   ;;  %vm396_vm2 = vcmask (!%p246_p3), 31744  }
   0xb   : > { %4997 = vmatpush3.bf16.msra.mxu0 (!%p246_p3), %v5636_v3  ;;  %5003 = vmatpush3.bf16.msra.mxu1 (!%p246_p3), %v5639_v4  ;;  %p306_p6 = scmp.lt.s32.totalorder (!%p246_p3), %s4602_s29, 15  ;;  %v4614_v5 = vld [vmem:[%s6322_s3 + $0x6] sm:$0x3] (!%p246_p3)  ;;  %vm383_vm3 = vsmask.f32 (!%p246_p3), 7424  ;;  %vm491_vm4 = vcmask (!%p246_p3), 1046528  }
   0xc   : > { %5004 = vmatprep.mubr.msk.bf16.mxu1 (!%p246_p3), %vm5562_vm1, %v5561_v2  ;;  %4998 = vmatprep.mubr.msk.bf16.mxu0 (!%p246_p3), %vm5562_vm1, %v5561_v2  ;;  %v5668_v7 = vsel (!%p246_p3), %vm400_vm0, %v4614_v5, 0  ;;  %v4613_v13 = vld [vmem:[%s6322_s3 + $0x4] sm:$0x3] (!%p246_p3)  ;;  %v4616_v16 = vld [vmem:[%s6322_s3 + $0xa] sm:$0x3] (!%p246_p3)  ;;  %vm904_vm6 = vcmask (!%p246_p3), 60416  }
   0xd   : > { %5008 = vmatprep.subr.bf16.mxu0 (!%p246_p3), %v5561_v2  ;;  %5014 = vmatprep.subr.bf16.mxu1 (!%p246_p3), %v5561_v2  ;;  %v5693_v17 = vsel (!%p246_p3), %vm400_vm0, %v4613_v13, 0  ;;  %v5703_v22 = vsel (!%p246_p3), %vm400_vm0, %v4616_v16, 0  ;;  %v4615_v25 = vld [vmem:[%s6322_s3 + $0x8] sm:$0x3] (!%p246_p3)  ;;  %v4618_v32 = vld [vmem:[%s6322_s3 + $0xe] sm:$0x3] (!%p246_p3) }
   0xe   : > { %v5726_v36 = vsel (!%p246_p3), %vm400_vm0, %v4615_v25, 0  ;;  %v5736_v42 = vsel (!%p246_p3), %vm400_vm0, %v4618_v32, 0  ;;  %v4617_v45 = vld [vmem:[%s6322_s3 + $0xc] sm:$0x3] (!%p246_p3)  ;;  %v4619_v56 = vld [vmem:[%s6322_s3 + $0x10] sm:$0x3] (!%p246_p3) }
   0xf   : > { %v5754_v51 = vsel (!%p246_p3), %vm400_vm0, %v4617_v45, 0  ;;  %v5772_v59 = vsel (!%p246_p3), %vm400_vm0, %v4619_v56, 0 }
  0x10   : > { %s6336_s19 = smov (!%p304_p5, %s5547_s19), 1  ;;  %s6338_s29 = smov (!%p306_p6, %s4602_s29), 15 }
  0x11   : > { %s5429_s30 = smul.u32 48, %s6336_s19  ;;  %s4610_s15 = sshll.u32 %s6336_s19, 5 }
  0x12   : > { %s5428_s6 = smul.u32 3, %s6338_s29 }
  0x14   : > { %s310_s7 = sadd.s32 %s5429_s30, %s5428_s6 }
  0x15   : > { %s4603_s10 = sshll.u32 %s310_s7, 2 }
  0x16   : > { %s5664_s13 = scalar_lea.vmem %s6319_s0, %s4603_s10  ;;  %s5674_s16 = scalar_lea.vmem %s6320_s1, %s4603_s10 }
  0x17   : > { %v5472_v6 = vld [vmem:[%s5664_s13] sm:$0xff]   ;;  %v5473_v8 = vld [vmem:[%s5664_s13 + $0x8] ss:$0 sps:$4 sm:$0x11]   ;;  %s5687_s27 = scalar_lea.vmem %s6321_s2, %s4603_s10  ;;  %v5730_v38 = vld [vmem:[%s5664_s13 + $0xc] sm:$0xff]  }
  0x18   : > { %5005 = vmatmul.mubr.msk.bf16.vlgmr.msra.gmra.mrb[0].mxu1 %vm396_vm2, %v5472_v6  ;;  %v385_v9 = vshrl.u32 %v5472_v6, 16  ;;  %v387_v10 = vshll.u32 %v5472_v6, 16  ;;  %v392_v11 = vshll.u32 %v5473_v8, 16  ;;  %v5474_v18 = vld [vmem:[%s5674_s16] sm:$0xff]   ;;  %v492_v23 = vrot.slane %v5472_v6, 1  ;;  %v5480_v61 = vld [vmem:[%s5674_s16 + $0xc] sm:$0xff]  }
  0x19   : > { %5015 = vmatpush3.bf16.msra.mxu1 %v5668_v7  ;;  %5016 = vmatprep.mubr.msk.bf16.mxu1 %vm5562_vm1, %v5561_v2  ;;  %v5475_v19 = vld [vmem:[%s5674_s16 + $0x8] ss:$0 sps:$4 sm:$0x11]   ;;  %v5699_v21 = vld [vmem:[%s5687_s27] sm:$0xff]   ;;  %v493_v24 = vrot.slane %v5473_v8, 1  ;;  %v603_v26 = vshll.u32 %v5474_v18, 16 }
  0x1a   : > { %v389_v12 = vrot.slane %v387_v10, 1  ;;  %5026 = vmatprep.subr.bf16.mxu1 %v5561_v2  ;;  %v394_v14 = vrot.slane %v392_v11, 1  ;;  %v661_v27 = vrot.slane %v5474_v18, 1  ;;  %v662_v28 = vrot.slane %v5475_v19, 1  ;;  %v5482_v16 = vld [vmem:[%s5687_s27 + $0xc] sm:$0xff]  }
  0x1b   : > { %v5717_v29 = vld [vmem:[%s5687_s27 + $0x8] ss:$0 sps:$4 sm:$0x11]   ;;  %v772_v30 = vshll.u32 %v5699_v21, 16  ;;  %v601_v31 = vshrl.u32 %v5474_v18, 16  ;;  %v494_v33 = vsel %vm491_vm4, %v492_v23, %v493_v24  ;;  %v605_v34 = vrot.slane %v603_v26, 1 }
  0x1c   : > { %v390_v15 = vor.u32 %v389_v12, %v385_v9  ;;  %v608_v35 = vshll.u32 %v5475_v19, 16  ;;  %v770_v37 = vshrl.u32 %v5699_v21, 16  ;;  %v663_v39 = vsel %vm491_vm4, %v661_v27, %v662_v28  ;;  %v5479_v49 = vld [vmem:[%s5664_s13 + $0x14] ss:$0 sps:$4 sm:$0x11]  }
  0x1d   : > { %v774_v40 = vrot.slane %v772_v30, 1  ;;  %v777_v41 = vshll.u32 %v5717_v29, 16  ;;  %v606_v43 = vor.u32 %v605_v34, %v601_v31  ;;  %v930_v46 = vshll.u32 %v5730_v38, 16  ;;  %v5481_v1 = vld [vmem:[%s5674_s16 + $0x14] ss:$0 sps:$4 sm:$0x11]  }
  0x1e   : > { %v395_v20 = vsel %vm383_vm3, %v390_v15, %v394_v14  ;;  %v610_v44 = vrot.slane %v608_v35, 1  ;;  %v928_v53 = vshrl.u32 %v5730_v38, 16  ;;  %v935_v55 = vshll.u32 %v5479_v49, 16  ;;  %v5487_v45 = vld [vmem:[%s5674_s16 + $0x20] ss:$0 sps:$4 sm:$0x11]  }
  0x1f   : > { %4999 = vmatmul.mubr.msk.bf16.vlgmr.msra.gmra.mrb[0].mxu0 %vm396_vm2, %v395_v20  ;;  %v775_v47 = vor.u32 %v774_v40, %v770_v37  ;;  %v779_v48 = vrot.slane %v777_v41, 1  ;;  %v932_v54 = vrot.slane %v930_v46, 1  ;;  %v830_v62 = vrot.slane %v5699_v21, 1  ;;  %v5856_v46 = vld [vmem:[%s5687_s27 + $0x18] sm:$0xff]  }
  0x20   : > { %5009 = vmatpush3.bf16.msra.mxu0 %v5693_v17  ;;  %5010 = vmatprep.mubr.msk.bf16.mxu0 %vm5562_vm1, %v5561_v2  ;;  %v611_v50 = vsel %vm383_vm3, %v606_v43, %v610_v44  ;;  %v937_v58 = vrot.slane %v935_v55, 1  ;;  %v831_v63 = vrot.slane %v5717_v29, 1  ;;  %v1026_v0 = vrot.slane %v5730_v38, 1  ;;  %v5484_v29 = vld [vmem:[%s5664_s13 + $0x18] sm:$0xff]  }
  0x21   : > { %5017 = vmatmul.mubr.msk.bf16.vlgmr.msra.gmra.mrb[4].mxu1 %vm396_vm2, %v5474_v18  ;;  %5020 = vmatprep.subr.bf16.mxu0 %v5561_v2  ;;  %v780_v52 = vsel %vm383_vm3, %v775_v47, %v779_v48  ;;  %v933_v57 = vor.u32 %v932_v54, %v928_v53  ;;  %v1027_v5 = vrot.slane %v5479_v49, 1  ;;  %v1131_v6 = vshll.u32 %v5480_v61, 16  ;;  %v5483_v18 = vld [vmem:[%s5687_s27 + $0x14] ss:$0 sps:$4 sm:$0x11]   ;;  %v5486_v44 = vld [vmem:[%s5674_s16 + $0x18] sm:$0xff]  }
  0x22   : > { %5027 = vmatpush3.bf16.msra.mxu1 %v5703_v22  ;;  %5028 = vmatprep.mubr.msk.bf16.mxu1 %vm5562_vm1, %v5561_v2  ;;  %v832_v8 = vsel %vm491_vm4, %v830_v62, %v831_v63  ;;  %v1136_v9 = vshll.u32 %v5481_v1, 16  ;;  %v1129_v11 = vshrl.u32 %v5480_v61, 16  ;;  %v1186_v19 = vrot.slane %v5480_v61, 1  ;;  %v5489_v53 = vld [vmem:[%s5687_s27 + $0x20] ss:$0 sps:$4 sm:$0x11]  }
  0x23   : > { %5038 = vmatprep.subr.bf16.mxu1 %v5561_v2  ;;  %v938_v60 = vsel %vm383_vm3, %v933_v57, %v937_v58  ;;  %v1028_v10 = vsel %vm491_vm4, %v1026_v0, %v1027_v5  ;;  %v1133_v12 = vrot.slane %v1131_v6, 1  ;;  %v1187_v20 = vrot.slane %v5481_v1, 1  ;;  %v5874_v0 = vld [vmem:[%s5664_s13 + $0x24] sm:$0xff]  }
  0x24   : > { %v1138_v13 = vrot.slane %v1136_v9, 1  ;;  %v1346_v23 = vrot.slane %v5482_v16, 1  ;;  %v1347_v24 = vrot.slane %v5483_v18, 1  ;;  %v1289_v26 = vshrl.u32 %v5482_v16, 16 }
  0x25   : > { %v1134_v14 = vor.u32 %v1133_v12, %v1129_v11  ;;  %v1188_v25 = vsel %vm491_vm4, %v1186_v19, %v1187_v20  ;;  %v1296_v28 = vshll.u32 %v5483_v18, 16  ;;  %v1437_v34 = vshll.u32 %v5484_v29, 16  ;;  %v5491_v9 = vld [vmem:[%s5664_s13 + $0x2c] ss:$0 sps:$4 sm:$0x11]   ;;  %v5492_v20 = vld [vmem:[%s5674_s16 + $0x24] sm:$0xff]  }
  0x26   : > { %v1348_v30 = vsel %vm491_vm4, %v1346_v23, %v1347_v24  ;;  %v1435_v37 = vshrl.u32 %v5484_v29, 16  ;;  %v1533_v47 = vrot.slane %v5484_v29, 1  ;;  %v1638_v49 = vshll.u32 %v5486_v44, 16 }
  0x27   : > { %5011 = vmatmul.mubr.msk.bf16.vlgmr.msra.gmra.mrb[4].mxu0 %vm396_vm2, %v494_v33  ;;  %v1139_v15 = vsel %vm383_vm3, %v1134_v14, %v1138_v13  ;;  %v1298_v32 = vrot.slane %v1296_v28, 1  ;;  %v5485_v33 = vld [vmem:[%s5664_s13 + $0x20] ss:$0 sps:$4 sm:$0x11]   ;;  %v1798_v54 = vshll.u32 %v5856_v46, 16  ;;  %v1636_v56 = vshrl.u32 %v5486_v44, 16 }
  0x28   : > { %5021 = vmatpush3.bf16.msra.mxu0 %v5726_v36  ;;  %5022 = vmatprep.mubr.msk.bf16.mxu0 %vm5562_vm1, %v5561_v2  ;;  %v1534_v48 = vrot.slane %v5485_v33, 1  ;;  %v1640_v57 = vrot.slane %v1638_v49, 1  ;;  %v1643_v58 = vshll.u32 %v5487_v45, 16  ;;  %v1803_v63 = vshll.u32 %v5489_v53, 16  ;;  %v5496_v49 = vld [vmem:[%s5664_s13 + $0x30] sm:$0xff]  }
  0x29   : > { %5029 = vmatmul.mubr.msk.bf16.vlgmr.msra.gmra.mrb[8].mxu1 %vm396_vm2, %v663_v39  ;;  %5032 = vmatprep.subr.bf16.mxu0 %v5561_v2  ;;  %v1442_v39 = vshll.u32 %v5485_v33, 16  ;;  %v1800_v62 = vrot.slane %v1798_v54, 1  ;;  %v1942_v13 = vshrl.u32 %v5874_v0, 16  ;;  %v1854_v23 = vrot.slane %v5489_v53, 1 }
  0x2a   : > { %5039 = vmatpush3.bf16.msra.mxu1 %v5736_v42  ;;  %5040 = vmatprep.mubr.msk.bf16.mxu1 %vm5562_vm1, %v5561_v2  ;;  %v1535_v55 = vsel %vm491_vm4, %v1533_v47, %v1534_v48  ;;  %v1641_v1 = vor.u32 %v1640_v57, %v1636_v56  ;;  %v1645_v5 = vrot.slane %v1643_v58, 1  ;;  %v2040_v24 = vrot.slane %v5874_v0, 1  ;;  %v5497_v54 = vld [vmem:[%s5664_s13 + $0x38] ss:$0 sps:$4 sm:$0x11]  }
  0x2b   : > { %5050 = vmatprep.subr.bf16.mxu1 %v5561_v2  ;;  %v1444_v41 = vrot.slane %v1442_v39, 1  ;;  %v2200_v39 = vrot.slane %v5492_v20, 1  ;;  %v2449_v57 = vshrl.u32 %v5496_v49, 16 }
  0x2c   : > { %v1646_v11 = vsel %vm383_vm3, %v1641_v1, %v1645_v5  ;;  %v5499_v1 = vld [vmem:[%s5674_s16 + $0x38] ss:$0 sps:$4 sm:$0x11]   ;;  %v5982_v5 = vld [vmem:[%s5687_s27 + $0x30] sm:$0xff]  }
  0x2f   : > { %5023 = vmatmul.mubr.msk.bf16.vlgmr.msra.gmra.mrb[8].mxu0 %vm396_vm2, %v611_v50  ;;  %v1693_v50 = vrot.slane %v5486_v44, 1 }
  0x30   : > { %5033 = vmatpush3.bf16.msra.mxu0 %v5754_v51  ;;  %5034 = vmatprep.mubr.msk.bf16.mxu0 %vm5562_vm1, %v5561_v2 }
  0x31   : > { %5041 = vmatmul.mubr.msk.bf16.vlgmr.msra.gmra.mrb[12].mxu1 %vm396_vm2, %v780_v52  ;;  %5044 = vmatprep.subr.bf16.mxu0 %v5561_v2  ;;  %v1694_v52 = vrot.slane %v5487_v45, 1 }
  0x32   : > { %5051 = vmatpush3.bf16.msra.mxu1 %v5636_v3  ;;  %5052 = vmatprep.mubr.msk.bf16.mxu1 %vm5562_vm1, %v5561_v2 }
  0x33   : > { %5062 = vmatprep.subr.bf16.mxu1 %v5561_v2 }
  0x37   : > { %5035 = vmatmul.mubr.msk.bf16.vlgmr.msra.gmra.mrb[12].mxu0 %vm396_vm2, %v5699_v21  ;;  %v1291_v21 = vshll.u32 %v5482_v16, 16 }
  0x38   : > { %5045 = vmatpush3.bf16.msra.mxu0 %v5772_v59  ;;  %5046 = vmatprep.mubr.msk.bf16.mxu0 %vm5562_vm1, %v5561_v2 }
  0x39   : > { %5053 = vmatmul.mubr.msk.bf16.vlgmr.msra.gmra.mrb[16].mxu1 %vm396_vm2, %v938_v60  ;;  %5056 = vmatprep.subr.bf16.mxu0 %v5561_v2  ;;  %v1293_v27 = vrot.slane %v1291_v21, 1  ;;  %v1695_v60 = vsel %vm491_vm4, %v1693_v50, %v1694_v52  ;;  %v1853_v21 = vrot.slane %v5856_v46, 1 }
  0x3a   : > { %5063 = vmatpush3.bf16.msra.mxu1 %v5693_v17  ;;  %5064 = vmatprep.mubr.msk.bf16.mxu1 %vm5562_vm1, %v5561_v2 }
  0x3b   : > { %5074 = vmatprep.subr.bf16.mxu1 %v5561_v2  ;;  %v1294_v31 = vor.u32 %v1293_v27, %v1289_v26  ;;  %v5493_v26 = vld [vmem:[%s5674_s16 + $0x2c] ss:$0 sps:$4 sm:$0x11]   ;;  %v2145_v27 = vshll.u32 %v5492_v20, 16  ;;  %v1855_v28 = vsel %vm491_vm4, %v1853_v21, %v1854_v23 }
  0x3d   : > { %v1299_v35 = vsel %vm383_vm3, %v1294_v31, %v1298_v32  ;;  %v2147_v31 = vrot.slane %v2145_v27, 1  ;;  %v2150_v32 = vshll.u32 %v5493_v26, 16 }
  0x3f   : > { %5047 = vmatmul.mubr.msk.bf16.vlgmr.msra.gmra.mrb[16].mxu0 %vm396_vm2, %v832_v8  ;;  %v1805_v8 = vrot.slane %v1803_v63, 1 }
  0x40   : > { %5057 = vmatpush3.bf16.msra.mxu0 %v5639_v4  ;;  %5058 = vmatprep.mubr.msk.bf16.mxu0 %vm5562_vm1, %v5561_v2 }
  0x41   : > { %5065 = vmatmul.mubr.msk.bf16.vlgmr.msra.gmra.mrb[20].mxu1 %vm396_vm2, %v1028_v10  ;;  %5068 = vmatprep.subr.bf16.mxu0 %v5561_v2  ;;  %v1944_v10 = vshll.u32 %v5874_v0, 16 }
  0x42   : > { %5075 = vmatpush3.bf16.msra.mxu1 %v5726_v36  ;;  %5076 = vmatprep.mubr.msk.bf16.mxu1 %vm5562_vm1, %v5561_v2 }
  0x43   : > { %5086 = vmatprep.subr.bf16.mxu1 %v5561_v2  ;;  %v1946_v14 = vrot.slane %v1944_v10, 1 }
  0x47   : > { %5059 = vmatmul.mubr.msk.bf16.vlgmr.msra.gmra.mrb[20].mxu0 %vm396_vm2, %v5730_v38  ;;  %v1439_v38 = vrot.slane %v1437_v34, 1  ;;  %v2152_v34 = vrot.slane %v2150_v32, 1 }
  0x48   : > { %5069 = vmatpush3.bf16.msra.mxu0 %v5668_v7  ;;  %5070 = vmatprep.mubr.msk.bf16.mxu0 %vm5562_vm1, %v5561_v2 }
  0x49   : > { %5077 = vmatmul.mubr.msk.bf16.vlgmr.msra.gmra.mrb[24].mxu1 %vm396_vm2, %v1139_v15  ;;  %5080 = vmatprep.subr.bf16.mxu0 %v5561_v2  ;;  %v1440_v40 = vor.u32 %v1439_v38, %v1435_v37  ;;  %v1949_v15 = vshll.u32 %v5491_v9, 16  ;;  %v5494_v37 = vld [vmem:[%s5687_s27 + $0x24] sm:$0xff]   ;;  %v5495_v38 = vld [vmem:[%s5687_s27 + $0x2c] ss:$0 sps:$4 sm:$0x11]  }
  0x4a   : > { %5087 = vmatpush3.bf16.msra.mxu1 %v5754_v51  ;;  %5088 = vmatprep.mubr.msk.bf16.mxu1 %vm5562_vm1, %v5561_v2  ;;  %v2310_v48 = vshll.u32 %v5495_v38, 16 }
  0x4b   : > { %5098 = vmatprep.subr.bf16.mxu1 %v5561_v2  ;;  %v1445_v43 = vsel %vm383_vm3, %v1440_v40, %v1444_v41  ;;  %v1951_v18 = vrot.slane %v1949_v15, 1  ;;  %v2201_v40 = vrot.slane %v5493_v26, 1  ;;  %v2305_v41 = vshll.u32 %v5494_v37, 16 }
  0x4c   : > { %v2312_v53 = vrot.slane %v2310_v48, 1 }
  0x4d   : > { %v2202_v45 = vsel %vm491_vm4, %v2200_v39, %v2201_v40  ;;  %v2307_v47 = vrot.slane %v2305_v41, 1  ;;  %v5504_v40 = vld [vmem:[%s5674_s16 + $0x3c] sm:$0xff]   ;;  %v2867_v41 = vrot.slane %v5982_v5, 1 }
  0x4f   : > { %5071 = vmatmul.mubr.msk.bf16.vlgmr.msra.gmra.mrb[24].mxu0 %vm396_vm2, %v5480_v61  ;;  %v1796_v61 = vshrl.u32 %v5856_v46, 16 }
  0x50   : > { %5081 = vmatpush3.bf16.msra.mxu0 %v5703_v22  ;;  %5082 = vmatprep.mubr.msk.bf16.mxu0 %vm5562_vm1, %v5561_v2 }
  0x51   : > { %5089 = vmatmul.mubr.msk.bf16.vlgmr.msra.gmra.mrb[28].mxu1 %vm396_vm2, %v5482_v16  ;;  %5092 = vmatprep.subr.bf16.mxu0 %v5561_v2  ;;  %v1801_v6 = vor.u32 %v1800_v62, %v1796_v61  ;;  %v1947_v16 = vor.u32 %v1946_v14, %v1942_v13  ;;  %v2812_v13 = vshll.u32 %v5982_v5, 16 }
  0x52   : > { %5099 = vmatpush3.bf16.msra.mxu1 %v5772_v59  ;;  %5100 = vmatprep.mubr.msk.bf16.mxu1 %vm5562_vm1, %v5561_v2 }
  0x53   : > { %5110 = vmatprep.subr.bf16.mxu1 %v5561_v2  ;;  %v1806_v12 = vsel %vm383_vm3, %v1801_v6, %v1805_v8  ;;  %v1952_v19 = vsel %vm383_vm3, %v1947_v16, %v1951_v18  ;;  %v2547_v6 = vrot.slane %v5496_v49, 1  ;;  %v2548_v8 = vrot.slane %v5497_v54, 1 }
  0x54   : > { %v2657_v18 = vshll.u32 %v5499_v1, 16  ;;  %v2814_v21 = vrot.slane %v2812_v13, 1  ;;  %v5509_v13 = vld [vmem:[%s5664_s13 + $0x50] ss:$0 sps:$4 sm:$0x11]  }
  0x55   : > { %v2549_v14 = vsel %vm491_vm4, %v2547_v6, %v2548_v8 }
  0x56   : > { %v2659_v26 = vrot.slane %v2657_v18, 1 }
  0x57   : > { %5083 = vmatmul.mubr.msk.bf16.vlgmr.msra.gmra.mrb[28].mxu0 %vm396_vm2, %v1188_v25  ;;  %v2041_v25 = vrot.slane %v5491_v9, 1 }
  0x58   : > { %5093 = vmatpush3.bf16.msra.mxu0 %v5736_v42  ;;  %5094 = vmatprep.mubr.msk.bf16.mxu0 %vm5562_vm1, %v5561_v2 }
  0x59   : > { %5101 = vmatmul.mubr.msk.bf16.vlgmr.msra.gmra.mrb[32].mxu1 %vm396_vm2, %v1348_v30  ;;  %5104 = vmatprep.subr.bf16.mxu0 %v5561_v2  ;;  %v2143_v30 = vshrl.u32 %v5492_v20, 16 }
  0x5a   : > { %5111 = vmatpush3.bf16.msra.mxu1 %v5639_v4  ;;  %5112 = vmatprep.mubr.msk.bf16.mxu1 %vm5562_vm1, %v5561_v2 }
  0x5b   : > { %5122 = vmatprep.subr.bf16.mxu1 %v5561_v2  ;;  %v2148_v33 = vor.u32 %v2147_v31, %v2143_v30 }
  0x5f   : > { %5095 = vmatmul.mubr.msk.bf16.vlgmr.msra.gmra.mrb[32].mxu0 %vm396_vm2, %v1299_v35  ;;  %v2153_v35 = vsel %vm383_vm3, %v2148_v33, %v2152_v34 }
  0x60   : > { %5105 = vmatpush3.bf16.msra.mxu0 %v5636_v3  ;;  %5106 = vmatprep.mubr.msk.bf16.mxu0 %vm5562_vm1, %v5561_v2 }
  0x61   : > { %5113 = vmatmul.mubr.msk.bf16.vlgmr.msra.gmra.mrb[36].mxu1 %vm396_vm2, %v5484_v29  ;;  %5116 = vmatprep.subr.bf16.mxu0 %v5561_v2  ;;  %v2042_v29 = vsel %vm491_vm4, %v2040_v24, %v2041_v25  ;;  %v6000_v24 = vld [vmem:[%s5664_s13 + $0x3c] sm:$0xff]  }
  0x62   : > { %5123 = vmatpush3.bf16.msra.mxu1 %v5668_v7  ;;  %5124 = vmatprep.mubr.msk.bf16.mxu1 %vm5562_vm1, %v5561_v2  ;;  %v2958_v30 = vshll.u32 %v6000_v24, 16  ;;  %v2956_v33 = vshrl.u32 %v6000_v24, 16 }
  0x63   : > { %5134 = vmatprep.subr.bf16.mxu1 %v5561_v2 }
  0x64   : > { %v2960_v34 = vrot.slane %v2958_v30, 1 }
  0x67   : > { %5107 = vmatmul.mubr.msk.bf16.vlgmr.msra.gmra.mrb[36].mxu0 %vm396_vm2, %v1445_v43  ;;  %v2360_v43 = vrot.slane %v5494_v37, 1 }
  0x68   : > { %5117 = vmatpush3.bf16.msra.mxu0 %v5693_v17  ;;  %5118 = vmatprep.mubr.msk.bf16.mxu0 %vm5562_vm1, %v5561_v2 }
  0x69   : > { %5125 = vmatmul.mubr.msk.bf16.vlgmr.msra.gmra.mrb[40].mxu1 %vm396_vm2, %v5486_v44  ;;  %5128 = vmatprep.subr.bf16.mxu0 %v5561_v2  ;;  %v2361_v44 = vrot.slane %v5495_v38, 1 }
  0x6a   : > { %5135 = vmatpush3.bf16.msra.mxu1 %v5703_v22  ;;  %5136 = vmatprep.mubr.msk.bf16.mxu1 %vm5562_vm1, %v5561_v2 }
  0x6b   : > { %5146 = vmatprep.subr.bf16.mxu1 %v5561_v2  ;;  %v2362_v50 = vsel %vm491_vm4, %v2360_v43, %v2361_v44  ;;  %v3054_v44 = vrot.slane %v6000_v24, 1 }
  0x6f   : > { %5119 = vmatmul.mubr.msk.bf16.vlgmr.msra.gmra.mrb[40].mxu0 %vm396_vm2, %v1535_v55  ;;  %v2451_v55 = vshll.u32 %v5496_v49, 16 }
  0x70   : > { %5129 = vmatpush3.bf16.msra.mxu0 %v5726_v36  ;;  %5130 = vmatprep.mubr.msk.bf16.mxu0 %vm5562_vm1, %v5561_v2 }
  0x71   : > { %5137 = vmatmul.mubr.msk.bf16.vlgmr.msra.gmra.mrb[44].mxu1 %vm396_vm2, %v1695_v60  ;;  %5140 = vmatprep.subr.bf16.mxu0 %v5561_v2  ;;  %v2453_v58 = vrot.slane %v2451_v55, 1  ;;  %v2456_v60 = vshll.u32 %v5497_v54, 16 }
  0x72   : > { %5147 = vmatpush3.bf16.msra.mxu1 %v5736_v42  ;;  %5148 = vmatprep.mubr.msk.bf16.mxu1 %vm5562_vm1, %v5561_v2 }
  0x73   : > { %5158 = vmatprep.subr.bf16.mxu1 %v5561_v2  ;;  %v2454_v61 = vor.u32 %v2453_v58, %v2449_v57  ;;  %v2458_v62 = vrot.slane %v2456_v60, 1  ;;  %v5506_v57 = vld [vmem:[%s5687_s27 + $0x3c] sm:$0xff]   ;;  %v5507_v58 = vld [vmem:[%s5687_s27 + $0x44] ss:$0 sps:$4 sm:$0x11]   ;;  %v3214_v60 = vrot.slane %v5504_v40, 1 }
  0x74   : > { %v3324_v8 = vshll.u32 %v5507_v58, 16 }
  0x75   : > { %v2459_v63 = vsel %vm383_vm3, %v2454_v61, %v2458_v62  ;;  %v3319_v62 = vshll.u32 %v5506_v57, 16 }
  0x77   : > { %5131 = vmatmul.mubr.msk.bf16.vlgmr.msra.gmra.mrb[44].mxu0 %vm396_vm2, %v1646_v11  ;;  %v2708_v11 = vrot.slane %v5499_v1, 1  ;;  %v3321_v6 = vrot.slane %v3319_v62, 1 }
  0x78   : > { %5141 = vmatpush3.bf16.msra.mxu0 %v5754_v51  ;;  %5142 = vmatprep.mubr.msk.bf16.mxu0 %vm5562_vm1, %v5561_v2 }
  0x79   : > { %5149 = vmatmul.mubr.msk.bf16.vlgmr.msra.gmra.mrb[48].mxu1 %vm396_vm2, %v1806_v12  ;;  %5152 = vmatprep.subr.bf16.mxu0 %v5561_v2  ;;  %v5501_v12 = vld [vmem:[%s5687_s27 + $0x38] ss:$0 sps:$4 sm:$0x11]  }
  0x7a   : > { %5159 = vmatpush3.bf16.msra.mxu1 %v5636_v3  ;;  %5160 = vmatprep.mubr.msk.bf16.mxu1 %vm5562_vm1, %v5561_v2  ;;  %v2817_v23 = vshll.u32 %v5501_v12, 16  ;;  %v2868_v43 = vrot.slane %v5501_v12, 1  ;;  %v3326_v12 = vrot.slane %v3324_v8, 1 }
  0x7b   : > { %5170 = vmatprep.subr.bf16.mxu1 %v5561_v2 }
  0x7c   : > { %v2869_v48 = vsel %vm491_vm4, %v2867_v41, %v2868_v43 }
  0x7f   : > { %5143 = vmatmul.mubr.msk.bf16.vlgmr.msra.gmra.mrb[48].mxu0 %vm396_vm2, %v5856_v46  ;;  %v2303_v46 = vshrl.u32 %v5494_v37, 16 }
  0x80   : > { %5153 = vmatpush3.bf16.msra.mxu0 %v5772_v59  ;;  %5154 = vmatprep.mubr.msk.bf16.mxu0 %vm5562_vm1, %v5561_v2 }
  0x81   : > { %5161 = vmatmul.mubr.msk.bf16.vlgmr.msra.gmra.mrb[52].mxu1 %vm396_vm2, %v1952_v19  ;;  %5164 = vmatprep.subr.bf16.mxu0 %v5561_v2  ;;  %v2308_v52 = vor.u32 %v2307_v47, %v2303_v46  ;;  %v5505_v46 = vld [vmem:[%s5674_s16 + $0x44] ss:$0 sps:$4 sm:$0x11]   ;;  %v3159_v47 = vshll.u32 %v5504_v40, 16 }
  0x82   : > { %5171 = vmatpush3.bf16.msra.mxu1 %v5693_v17  ;;  %5172 = vmatprep.mubr.msk.bf16.mxu1 %vm5562_vm1, %v5561_v2  ;;  %v3215_v61 = vrot.slane %v5505_v46, 1 }
  0x83   : > { %5182 = vmatprep.subr.bf16.mxu1 %v5561_v2  ;;  %v2313_v56 = vsel %vm383_vm3, %v2308_v52, %v2312_v53  ;;  %v3161_v52 = vrot.slane %v3159_v47, 1  ;;  %v3164_v53 = vshll.u32 %v5505_v46, 16 }
  0x84   : > { %v3216_v1 = vsel %vm491_vm4, %v3214_v60, %v3215_v61 }
  0x85   : > { %v3166_v55 = vrot.slane %v3164_v53, 1 }
  0x87   : > { %5155 = vmatmul.mubr.msk.bf16.vlgmr.msra.gmra.mrb[52].mxu0 %vm396_vm2, %v1855_v28  ;;  %v2819_v28 = vrot.slane %v2817_v23, 1 }
  0x88   : > { %5165 = vmatpush3.bf16.msra.mxu0 %v5639_v4  ;;  %5166 = vmatprep.mubr.msk.bf16.mxu0 %vm5562_vm1, %v5561_v2 }
  0x89   : > { %5173 = vmatmul.mubr.msk.bf16.vlgmr.msra.gmra.mrb[56].mxu1 %vm396_vm2, %v2042_v29  ;;  %5176 = vmatprep.subr.bf16.mxu0 %v5561_v2  ;;  %v5503_v29 = vld [vmem:[%s5664_s13 + $0x44] ss:$0 sps:$4 sm:$0x11]  }
  0x8a   : > { %5183 = vmatpush3.bf16.msra.mxu1 %v5726_v36  ;;  %5184 = vmatprep.mubr.msk.bf16.mxu1 %vm5562_vm1, %v5561_v2 }
  0x8b   : > { %5194 = vmatprep.subr.bf16.mxu1 %v5561_v2 }
  0x8f   : > { %5167 = vmatmul.mubr.msk.bf16.vlgmr.msra.gmra.mrb[56].mxu0 %vm396_vm2, %v5874_v0  ;;  %v5498_v0 = vld [vmem:[%s5674_s16 + $0x30] sm:$0xff]  }
  0x90   : > { %5177 = vmatpush3.bf16.msra.mxu0 %v5668_v7  ;;  %5178 = vmatprep.mubr.msk.bf16.mxu0 %vm5562_vm1, %v5561_v2  ;;  %v2652_v9 = vshll.u32 %v5498_v0, 16  ;;  %v2707_v10 = vrot.slane %v5498_v0, 1  ;;  %v2650_v15 = vshrl.u32 %v5498_v0, 16 }
  0x91   : > { %5185 = vmatmul.mubr.msk.bf16.vlgmr.msra.gmra.mrb[60].mxu1 %vm396_vm2, %v2153_v35  ;;  %5188 = vmatprep.subr.bf16.mxu0 %v5561_v2  ;;  %v2963_v35 = vshll.u32 %v5503_v29, 16 }
  0x92   : > { %5195 = vmatpush3.bf16.msra.mxu1 %v5754_v51  ;;  %5196 = vmatprep.mubr.msk.bf16.mxu1 %vm5562_vm1, %v5561_v2  ;;  %v2654_v16 = vrot.slane %v2652_v9, 1  ;;  %v2709_v19 = vsel %vm491_vm4, %v2707_v10, %v2708_v11  ;;  %v6081_v9 = vld [vmem:[%s5664_s13 + $0x48] sm:$0xff]  }
  0x93   : > { %5206 = vmatprep.subr.bf16.mxu1 %v5561_v2  ;;  %v2965_v38 = vrot.slane %v2963_v35, 1  ;;  %v3561_v43 = vrot.slane %v6081_v9, 1 }
  0x94   : > { %v2655_v25 = vor.u32 %v2654_v16, %v2650_v15 }
  0x96   : > { %v2660_v31 = vsel %vm383_vm3, %v2655_v25, %v2659_v26 }
  0x97   : > { %5179 = vmatmul.mubr.msk.bf16.vlgmr.msra.gmra.mrb[60].mxu0 %vm396_vm2, %v5492_v20  ;;  %v2810_v20 = vshrl.u32 %v5982_v5, 16 }
  0x98   : > { %5189 = vmatpush3.bf16.msra.mxu0 %v5703_v22  ;;  %5190 = vmatprep.mubr.msk.bf16.mxu0 %vm5562_vm1, %v5561_v2 }
  0x99   : > { %5197 = vmatmul.mubr.msk.bf16.vlgmr.msra.gmra.mrb[64].mxu1 %vm396_vm2, %v5494_v37  ;;  %5200 = vmatprep.subr.bf16.mxu0 %v5561_v2  ;;  %v2815_v27 = vor.u32 %v2814_v21, %v2810_v20  ;;  %v2961_v37 = vor.u32 %v2960_v34, %v2956_v33  ;;  %v3470_v21 = vshll.u32 %v5509_v13, 16 }
  0x9a   : > { %5207 = vmatpush3.bf16.msra.mxu1 %v5772_v59  ;;  %5208 = vmatprep.mubr.msk.bf16.mxu1 %vm5562_vm1, %v5561_v2 }
  0x9b   : > { %5218 = vmatprep.subr.bf16.mxu1 %v5561_v2  ;;  %v2820_v32 = vsel %vm383_vm3, %v2815_v27, %v2819_v28  ;;  %v2966_v39 = vsel %vm383_vm3, %v2961_v37, %v2965_v38  ;;  %v3472_v26 = vrot.slane %v3470_v21, 1  ;;  %v5510_v37 = vld [vmem:[%s5674_s16 + $0x48] sm:$0xff]  }
  0x9c   : > { %v3721_v46 = vrot.slane %v5510_v37, 1 }
  0x9f   : > { %5191 = vmatmul.mubr.msk.bf16.vlgmr.msra.gmra.mrb[64].mxu0 %vm396_vm2, %v2202_v45  ;;  %v3055_v45 = vrot.slane %v5503_v29, 1 }
  0xa0   : > { %5201 = vmatpush3.bf16.msra.mxu0 %v5736_v42  ;;  %5202 = vmatprep.mubr.msk.bf16.mxu0 %vm5562_vm1, %v5561_v2 }
  0xa1   : > { %5209 = vmatmul.mubr.msk.bf16.vlgmr.msra.gmra.mrb[68].mxu1 %vm396_vm2, %v2362_v50  ;;  %5212 = vmatprep.subr.bf16.mxu0 %v5561_v2  ;;  %v3157_v50 = vshrl.u32 %v5504_v40, 16 }
  0xa2   : > { %5219 = vmatpush3.bf16.msra.mxu1 %v5639_v4  ;;  %5220 = vmatprep.mubr.msk.bf16.mxu1 %vm5562_vm1, %v5561_v2 }
  0xa3   : > { %5230 = vmatprep.subr.bf16.mxu1 %v5561_v2  ;;  %v3162_v54 = vor.u32 %v3161_v52, %v3157_v50 }
  0xa7   : > { %5203 = vmatmul.mubr.msk.bf16.vlgmr.msra.gmra.mrb[68].mxu0 %vm396_vm2, %v2313_v56  ;;  %v3167_v56 = vsel %vm383_vm3, %v3162_v54, %v3166_v55 }
  0xa8   : > { %5213 = vmatpush3.bf16.msra.mxu0 %v5636_v3  ;;  %5214 = vmatprep.mubr.msk.bf16.mxu0 %vm5562_vm1, %v5561_v2 }
  0xa9   : > { %5221 = vmatmul.mubr.msk.bf16.vlgmr.msra.gmra.mrb[72].mxu1 %vm396_vm2, %v5496_v49  ;;  %5224 = vmatprep.subr.bf16.mxu0 %v5561_v2  ;;  %v3056_v49 = vsel %vm491_vm4, %v3054_v44, %v3055_v45  ;;  %v3562_v44 = vrot.slane %v5509_v13, 1  ;;  %v3666_v45 = vshll.u32 %v5510_v37, 16 }
  0xaa   : > { %5231 = vmatpush3.bf16.msra.mxu1 %v5668_v7  ;;  %5232 = vmatprep.mubr.msk.bf16.mxu1 %vm5562_vm1, %v5561_v2 }
  0xab   : > { %5242 = vmatprep.subr.bf16.mxu1 %v5561_v2  ;;  %v3563_v55 = vsel %vm491_vm4, %v3561_v43, %v3562_v44 }
  0xaf   : > { %5215 = vmatmul.mubr.msk.bf16.vlgmr.msra.gmra.mrb[72].mxu0 %vm396_vm2, %v2459_v63  ;;  %v3374_v63 = vrot.slane %v5506_v57, 1 }
  0xb0   : > { %5225 = vmatpush3.bf16.msra.mxu0 %v5693_v17  ;;  %5226 = vmatprep.mubr.msk.bf16.mxu0 %vm5562_vm1, %v5561_v2 }
  0xb1   : > { %5233 = vmatmul.mubr.msk.bf16.vlgmr.msra.gmra.mrb[76].mxu1 %vm396_vm2, %v5498_v0  ;;  %5236 = vmatprep.subr.bf16.mxu0 %v5561_v2  ;;  %v3375_v0 = vrot.slane %v5507_v58, 1  ;;  %v3668_v58 = vrot.slane %v3666_v45, 1 }
  0xb2   : > { %5243 = vmatpush3.bf16.msra.mxu1 %v5703_v22  ;;  %5244 = vmatprep.mubr.msk.bf16.mxu1 %vm5562_vm1, %v5561_v2 }
  0xb3   : > { %5254 = vmatprep.subr.bf16.mxu1 %v5561_v2  ;;  %v3376_v10 = vsel %vm491_vm4, %v3374_v63, %v3375_v0 }
  0xb7   : > { %5227 = vmatmul.mubr.msk.bf16.vlgmr.msra.gmra.mrb[76].mxu0 %vm396_vm2, %v2549_v14  ;;  %v3465_v14 = vshll.u32 %v6081_v9, 16 }
  0xb8   : > { %5237 = vmatpush3.bf16.msra.mxu0 %v5726_v36  ;;  %5238 = vmatprep.mubr.msk.bf16.mxu0 %vm5562_vm1, %v5561_v2 }
  0xb9   : > { %5245 = vmatmul.mubr.msk.bf16.vlgmr.msra.gmra.mrb[80].mxu1 %vm396_vm2, %v2709_v19  ;;  %5248 = vmatprep.subr.bf16.mxu0 %v5561_v2  ;;  %v3463_v19 = vshrl.u32 %v6081_v9, 16  ;;  %v3467_v20 = vrot.slane %v3465_v14, 1 }
  0xba   : > { %5255 = vmatpush3.bf16.msra.mxu1 %v5736_v42  ;;  %5256 = vmatprep.mubr.msk.bf16.mxu1 %vm5562_vm1, %v5561_v2 }
  0xbb   : > { %5266 = vmatprep.subr.bf16.mxu1 %v5561_v2  ;;  %v3468_v25 = vor.u32 %v3467_v20, %v3463_v19  ;;  %v6147_v19 = vld [vmem:[%s5664_s13 + $0x5c] ss:$0 sps:$4 sm:$0x11]  }
  0xbf   : > { %5239 = vmatmul.mubr.msk.bf16.vlgmr.msra.gmra.mrb[80].mxu0 %vm396_vm2, %v2660_v31  ;;  %v3473_v31 = vsel %vm383_vm3, %v3468_v25, %v3472_v26 }
  0xc0   : > { %5249 = vmatpush3.bf16.msra.mxu0 %v5754_v51  ;;  %5250 = vmatprep.mubr.msk.bf16.mxu0 %vm5562_vm1, %v5561_v2 }
  0xc1   : > { %5257 = vmatmul.mubr.msk.bf16.vlgmr.msra.gmra.mrb[84].mxu1 %vm396_vm2, %v2820_v32  ;;  %5260 = vmatprep.subr.bf16.mxu0 %v5561_v2 }
  0xc2   : > { %5267 = vmatpush3.bf16.msra.mxu1 %v5636_v3  ;;  %5268 = vmatprep.mubr.msk.bf16.mxu1 %vm5562_vm1, %v5561_v2 }
  0xc3   : > { %5278 = vmatprep.subr.bf16.mxu1 %v5561_v2 }
  0xc7   : > { %5251 = vmatmul.mubr.msk.bf16.vlgmr.msra.gmra.mrb[84].mxu0 %vm396_vm2, %v5982_v5  ;;  %v3317_v5 = vshrl.u32 %v5506_v57, 16 }
  0xc8   : > { %5261 = vmatpush3.bf16.msra.mxu0 %v5772_v59  ;;  %5262 = vmatprep.mubr.msk.bf16.mxu0 %vm5562_vm1, %v5561_v2 }
  0xc9   : > { %5269 = vmatmul.mubr.msk.bf16.vlgmr.msra.gmra.mrb[88].mxu1 %vm396_vm2, %v2966_v39  ;;  %5272 = vmatprep.subr.bf16.mxu0 %v5561_v2  ;;  %v3322_v11 = vor.u32 %v3321_v6, %v3317_v5  ;;  %v5511_v39 = vld [vmem:[%s5674_s16 + $0x50] ss:$0 sps:$4 sm:$0x11]  }
  0xca   : > { %5279 = vmatpush3.bf16.msra.mxu1 %v5693_v17  ;;  %5280 = vmatprep.mubr.msk.bf16.mxu1 %vm5562_vm1, %v5561_v2  ;;  %v3671_v60 = vshll.u32 %v5511_v39, 16 }
  0xcb   : > { %5290 = vmatprep.subr.bf16.mxu1 %v5561_v2  ;;  %v3327_v16 = vsel %vm383_vm3, %v3322_v11, %v3326_v12 }
  0xcc   : > { %v3673_v14 = vrot.slane %v3671_v60, 1 }
  0xcf   : > { %5263 = vmatmul.mubr.msk.bf16.vlgmr.msra.gmra.mrb[88].mxu0 %vm396_vm2, %v2869_v48  ;;  %v3722_v48 = vrot.slane %v5511_v39, 1 }
  0xd0   : > { %5273 = vmatpush3.bf16.msra.mxu0 %v5639_v4  ;;  %5274 = vmatprep.mubr.msk.bf16.mxu0 %vm5562_vm1, %v5561_v2 }
  0xd1   : > { %5281 = vmatmul.mubr.msk.bf16.vlgmr.msra.gmra.mrb[92].mxu1 %vm396_vm2, %v3056_v49  ;;  %5284 = vmatprep.subr.bf16.mxu0 %v5561_v2  ;;  %v6126_v49 = vld [vmem:[%s5687_s27 + $0x50] ss:$0 sps:$4 sm:$0x11]   ;;  %v3723_v5 = vsel %vm491_vm4, %v3721_v46, %v3722_v48 }
  0xd2   : > { %5291 = vmatpush3.bf16.msra.mxu1 %v5726_v36  ;;  %5292 = vmatprep.mubr.msk.bf16.mxu1 %vm5562_vm1, %v5561_v2  ;;  %v3882_v60 = vrot.slane %v6126_v49, 1 }
  0xd3   : > { %5302 = vmatprep.subr.bf16.mxu1 %v5561_v2 }
  0xd7   : > { %5275 = vmatmul.mubr.msk.bf16.vlgmr.msra.gmra.mrb[92].mxu0 %vm396_vm2, %v6000_v24 }
  0xd8   : > { %5285 = vmatpush3.bf16.msra.mxu0 %v5668_v7  ;;  %5286 = vmatprep.mubr.msk.bf16.mxu0 %vm5562_vm1, %v5561_v2 }
  0xd9   : > { %5293 = vmatmul.mubr.msk.bf16.vlgmr.msra.gmra.mrb[96].mxu1 %vm396_vm2, %v3167_v56  ;;  %5296 = vmatprep.subr.bf16.mxu0 %v5561_v2 }
  0xda   : > { %5303 = vmatpush3.bf16.msra.mxu1 %v5754_v51  ;;  %5304 = vmatprep.mubr.msk.bf16.mxu1 %vm5562_vm1, %v5561_v2 }
  0xdb   : > { %5314 = vmatprep.subr.bf16.mxu1 %v5561_v2 }
  0xdf   : > { %5287 = vmatmul.mubr.msk.bf16.vlgmr.msra.gmra.mrb[96].mxu0 %vm396_vm2, %v5504_v40  ;;  %v6113_v40 = vld [vmem:[%s5687_s27 + $0x48] sm:$0xff]  }
  0xe0   : > { %5297 = vmatpush3.bf16.msra.mxu0 %v5703_v22  ;;  %5298 = vmatprep.mubr.msk.bf16.mxu0 %vm5562_vm1, %v5561_v2  ;;  %v3826_v50 = vshll.u32 %v6113_v40, 16  ;;  %v3824_v6 = vshrl.u32 %v6113_v40, 16 }
  0xe1   : > { %5305 = vmatmul.mubr.msk.bf16.vlgmr.msra.gmra.mrb[100].mxu1 %vm396_vm2, %v5506_v57  ;;  %5308 = vmatprep.subr.bf16.mxu0 %v5561_v2  ;;  %v3664_v57 = vshrl.u32 %v5510_v37, 16 }
  0xe2   : > { %5315 = vmatpush3.bf16.msra.mxu1 %v5772_v59  ;;  %5316 = vmatprep.mubr.msk.bf16.mxu1 %vm5562_vm1, %v5561_v2  ;;  %v3828_v8 = vrot.slane %v3826_v50, 1 }
  0xe3   : > { %5326 = vmatprep.subr.bf16.mxu1 %v5561_v2  ;;  %v3669_v13 = vor.u32 %v3668_v58, %v3664_v57  ;;  %v3881_v58 = vrot.slane %v6113_v40, 1 }
  0xe5   : > { %v3674_v25 = vsel %vm383_vm3, %v3669_v13, %v3673_v14 }
  0xe7   : > { %5299 = vmatmul.mubr.msk.bf16.vlgmr.msra.gmra.mrb[100].mxu0 %vm396_vm2, %v3216_v1 }
  0xe8   : > { %5309 = vmatpush3.bf16.msra.mxu0 %v5736_v42  ;;  %5310 = vmatprep.mubr.msk.bf16.mxu0 %vm5562_vm1, %v5561_v2 }
  0xe9   : > { %5317 = vmatmul.mubr.msk.bf16.vlgmr.msra.gmra.mrb[104].mxu1 %vm396_vm2, %v3376_v10  ;;  %5320 = vmatprep.subr.bf16.mxu0 %v5561_v2  ;;  %v6135_v10 = vld [vmem:[%s5664_s13 + $0x54] sm:$0xff]   ;;  %s4609_s13 = sshll.u32 %s6338_s29, 1 }
  0xea   : > { %5327 = vmatpush3.bf16.msra.mxu1 %v5639_v4  ;;  %5328 = vmatprep.mubr.msk.bf16.mxu1 %vm5562_vm1, %v5561_v2  ;;  %v3972_v20 = vshll.u32 %v6135_v10, 16  ;;  %s343_s19 = sadd.s32 %s4610_s15, %s4609_s13 }
  0xeb   : > { %v484_v15 = vpop.f32.mrb[0].mxu1  ;;  %5338 = vmatprep.subr.bf16.mxu1 %v5561_v2  ;;  %s4611_s29 = sshll.u32 %s343_s19, 2 }
  0xec   : > { %v5006_v18 = vpop.f32.mrb[1].mxu1  ;;  %s6212_s26 = scalar_lea.vmem %s6324_s5, %s4611_s29 }
  0xed   : > { %v487_v23 = vpop.f32.mrb[2].mxu1 }
  0xee   : > { %v5007_v24 = vpop.f32.mrb[3].mxu1 }
  0xef   : > { %5311 = vmatmul.mubr.msk.bf16.vlgmr.msra.gmra.mrb[104].mxu0 %vm396_vm2, %v3327_v16  ;;  %v3829_v16 = vor.u32 %v3828_v8, %v3824_v6  ;;  %v3883_v8 = vsel %vm491_vm4, %v3881_v58, %v3882_v60 }
  0xf0   : > { %5321 = vmatpush3.bf16.msra.mxu0 %v5636_v3  ;;  %5322 = vmatprep.mubr.msk.bf16.mxu0 %vm5562_vm1, %v5561_v2 }
  0xf1   : > { %5329 = vmatmul.mubr.msk.bf16.vlgmr.msra.gmra.mrb[108].mxu1 %vm396_vm2, %v6081_v9  ;;  %5332 = vmatprep.subr.bf16.mxu0 %v5561_v2  ;;  %v3831_v9 = vshll.u32 %v6126_v49, 16  ;;  %v6195_v49 = vld [vmem:[%s5674_s16 + $0x5c] ss:$0 sps:$4 sm:$0x11]  }
  0xf2   : > { %v438_v27 = vpop.f32.mrb[0].mxu0  ;;  %5339 = vmatpush3.bf16.msra.mxu1 %v5668_v7  ;;  %5340 = vmatprep.mubr.msk.bf16.mxu1 %vm5562_vm1, %v5561_v2  ;;  %v4229_v60 = vrot.slane %v6195_v49, 1 }
  0xf3   : > { %v485_v28 = vadd.f32 %v484_v15, %v438_v27  ;;  %v5000_v29 = vpop.f32.mrb[1].mxu0  ;;  %5350 = vmatprep.subr.bf16.mxu1 %v5561_v2  ;;  %v3833_v18 = vrot.slane %v3831_v9, 1 }
  0xf4   : > { %v441_v30 = vpop.f32.mrb[2].mxu0  ;;  %v589_v32 = vpop.f32.mrb[4].mxu1 }
  0xf5   : > { %v488_v33 = vadd.f32 %v487_v23, %v441_v30  ;;  %v5001_v34 = vpop.f32.mrb[3].mxu0  ;;  %v5018_v35 = vpop.f32.mrb[5].mxu1 }
  0xf6   : > { %v592_v38 = vpop.f32.mrb[6].mxu1  ;;  %v3974_v34 = vrot.slane %v3972_v20, 1  ;;  %v3977_v35 = vshll.u32 %v6147_v19, 16 }
  0xf7   : > { %5323 = vmatmul.mubr.msk.bf16.vlgmr.msra.gmra.mrb[108].mxu0 %vm396_vm2, %v3473_v31  ;;  %v5019_v41 = vpop.f32.mrb[7].mxu1 }
  0xf8   : > { %5333 = vmatpush3.bf16.msra.mxu0 %v5693_v17  ;;  %5334 = vmatprep.mubr.msk.bf16.mxu0 %vm5562_vm1, %v5561_v2  ;;  %v3979_v43 = vrot.slane %v3977_v35, 1 }
  0xf9   : > { %5341 = vmatmul.mubr.msk.bf16.vlgmr.msra.gmra.mrb[112].mxu1 %vm396_vm2, %v5510_v37  ;;  %5344 = vmatprep.subr.bf16.mxu0 %v5561_v2 }
  0xfa   : > { %v535_v47 = vpop.f32.mrb[4].mxu0  ;;  %5351 = vmatpush3.bf16.msra.mxu1 %v5703_v22  ;;  %5352 = vmatprep.mubr.msk.bf16.mxu1 %vm5562_vm1, %v5561_v2 }
  0xfb   : > { %v542_v52 = vadd.f32 %v535_v47, %v485_v28  ;;  %v5012_v53 = vpop.f32.mrb[5].mxu0  ;;  %5362 = vmatprep.subr.bf16.mxu1 %v5561_v2 }
  0xfc   : > { %v538_v54 = vpop.f32.mrb[6].mxu0  ;;  %v704_v56 = vpop.f32.mrb[8].mxu1 }
  0xfd   : > { %v543_v61 = vadd.f32 %v538_v54, %v488_v33  ;;  %v5013_v62 = vpop.f32.mrb[7].mxu0  ;;  %v596_v63 = vadd.f32 %v589_v32, %v542_v52  ;;  %v5030_v0 = vpop.f32.mrb[9].mxu1  ;;  %v3834_v32 = vsel %vm383_vm3, %v3829_v16, %v3833_v18  ;;  %v3970_v33 = vshrl.u32 %v6135_v10, 16 }
  0xfe   : > { %v707_v1 = vpop.f32.mrb[10].mxu1  ;;  %v4068_v62 = vrot.slane %v6135_v10, 1 }
  0xff   : > { %5335 = vmatmul.mubr.msk.bf16.vlgmr.msra.gmra.mrb[112].mxu0 %vm396_vm2, %v3563_v55  ;;  %v597_v11 = vadd.f32 %v592_v38, %v543_v61  ;;  %v5031_v12 = vpop.f32.mrb[11].mxu1  ;;  %v3975_v41 = vor.u32 %v3974_v34, %v3970_v33  ;;  %v6171_v55 = vld [vmem:[%s5674_s16 + $0x54] sm:$0xff]   ;;  %v6185_v61 = vld [vmem:[%s6323_s4] ss:$0 sm:$0xff] }
 0x100   : > { %5345 = vmatpush3.bf16.msra.mxu0 %v5726_v36  ;;  %5346 = vmatprep.mubr.msk.bf16.mxu0 %vm5562_vm1, %v5561_v2  ;;  %v4173_v0 = vshll.u32 %v6171_v55, 16  ;;  %v4171_v16 = vshrl.u32 %v6171_v55, 16  ;;  %v4228_v58 = vrot.slane %v6171_v55, 1 }
 0x101   : > { %5353 = vmatmul.mubr.msk.bf16.vlgmr.msra.gmra.mrb[116].mxu1 %vm396_vm2, %v3723_v5  ;;  %5356 = vmatprep.subr.bf16.mxu0 %v5561_v2 }
 0x102   : > { %v652_v15 = vpop.f32.mrb[8].mxu0  ;;  %5363 = vmatpush3.bf16.msra.mxu1 %v5736_v42  ;;  %5364 = vmatprep.mubr.msk.bf16.mxu1 %vm5562_vm1, %v5561_v2  ;;  %v4175_v18 = vrot.slane %v4173_v0, 1 }
 0x103   : > { %v659_v21 = vadd.f32 %v652_v15, %v596_v63  ;;  %v5024_v23 = vpop.f32.mrb[9].mxu0  ;;  %5374 = vmatprep.subr.bf16.mxu1 %v5561_v2 }
 0x104   : > { %v655_v24 = vpop.f32.mrb[10].mxu0  ;;  %v821_v26 = vpop.f32.mrb[12].mxu1 }
 0x105   : > { %v660_v27 = vadd.f32 %v655_v24, %v597_v11  ;;  %v5025_v28 = vpop.f32.mrb[11].mxu0  ;;  %v711_v29 = vadd.f32 %v704_v56, %v659_v21  ;;  %v5042_v30 = vpop.f32.mrb[13].mxu1 }
 0x106   : > { %v824_v31 = vpop.f32.mrb[14].mxu1 }
 0x107   : > { %5347 = vmatmul.mubr.msk.bf16.vlgmr.msra.gmra.mrb[116].mxu0 %vm396_vm2, %v3674_v25  ;;  %v712_v37 = vadd.f32 %v707_v1, %v660_v27  ;;  %v5043_v38 = vpop.f32.mrb[15].mxu1 }
 0x108   : > { %5357 = vmatpush3.bf16.msra.mxu0 %v5754_v51  ;;  %5358 = vmatprep.mubr.msk.bf16.mxu0 %vm5562_vm1, %v5561_v2 }
 0x109   : > { %5365 = vmatmul.mubr.msk.bf16.vlgmr.msra.gmra.mrb[120].mxu1 %vm396_vm2, %v3834_v32  ;;  %5368 = vmatprep.subr.bf16.mxu0 %v5561_v2 }
 0x10a   : > { %v758_v39 = vpop.f32.mrb[12].mxu0  ;;  %5375 = vmatpush3.bf16.msra.mxu1 %v5636_v3  ;;  %5376 = vmatprep.mubr.msk.bf16.mxu1 %vm5562_vm1, %v5561_v2  ;;  %v3980_v3 = vsel %vm383_vm3, %v3975_v41, %v3979_v43 }
 0x10b   : > { %v765_v44 = vadd.f32 %v758_v39, %v711_v29  ;;  %v5036_v45 = vpop.f32.mrb[13].mxu0  ;;  %5386 = vmatprep.subr.bf16.mxu1 %v5561_v2 }
 0x10c   : > { %v761_v46 = vpop.f32.mrb[14].mxu0  ;;  %v6165_v47 = vpop.f32.mrb[16].mxu1 }
 0x10d   : > { %v766_v48 = vadd.f32 %v761_v46, %v712_v37  ;;  %v5037_v50 = vpop.f32.mrb[15].mxu0  ;;  %v828_v52 = vadd.f32 %v821_v26, %v765_v44  ;;  %v5054_v53 = vpop.f32.mrb[17].mxu1 }
 0x10e   : > { %v6167_v54 = vpop.f32.mrb[18].mxu1 }
 0x10f   : > { %5359 = vmatmul.mubr.msk.bf16.vlgmr.msra.gmra.mrb[120].mxu0 %vm396_vm2, %v6113_v40  ;;  %v829_v56 = vadd.f32 %v824_v31, %v766_v48  ;;  %v5055_v57 = vpop.f32.mrb[19].mxu1  ;;  %v4069_v40 = vrot.slane %v6147_v19, 1  ;;  %v4178_v19 = vshll.u32 %v6195_v49, 16 }
 0x110   : > { %5369 = vmatpush3.bf16.msra.mxu0 %v5772_v59  ;;  %5370 = vmatprep.mubr.msk.bf16.mxu0 %vm5562_vm1, %v5561_v2 }
 0x111   : > { %5377 = vmatmul.mubr.msk.bf16.vlgmr.msra.gmra.mrb[124].mxu1 %vm396_vm2, %v3980_v3  ;;  %5380 = vmatprep.subr.bf16.mxu0 %v5561_v2  ;;  %v4070_v15 = vsel %vm491_vm4, %v4068_v62, %v4069_v40  ;;  %v4180_v28 = vrot.slane %v4178_v19, 1 }
 0x112   : > { %v873_v63 = vpop.f32.mrb[16].mxu0  ;;  %5387 = vmatpush3.bf16.msra.mxu1 %v5693_v17  ;;  %5388 = vmatprep.mubr.msk.bf16.mxu1 %vm5562_vm1, %v5561_v2 }
 0x113   : > { %v880_v1 = vadd.f32 %v873_v63, %v828_v52  ;;  %v5048_v5 = vpop.f32.mrb[17].mxu0  ;;  %5398 = vmatprep.subr.bf16.mxu1 %v5561_v2 }
 0x114   : > { %v876_v6 = vpop.f32.mrb[18].mxu0  ;;  %v1066_v9 = vpop.f32.mrb[20].mxu1 }
 0x115   : > { %v888_v17 = vadd.f32 %v6185_v61, %v880_v1  ;;  %v881_v11 = vadd.f32 %v876_v6, %v829_v56  ;;  %v5049_v12 = vpop.f32.mrb[19].mxu0  ;;  %v5066_v13 = vpop.f32.mrb[21].mxu1  ;;  %v5519_v56 = vld [vmem:[%s5687_s27 + $0x5c] ss:$0 sps:$4 sm:$0x11]  }
 0x116   : > { %v1069_v14 = vpop.f32.mrb[22].mxu1 }
 0x117   : > { %vm890_vm5 = vcmp.gt.f32.partialorder %v888_v17, 0.0  ;;  %v892_v20 = vmul.f32 0.1, %v888_v17  ;;  %v889_v21 = vadd.f32 %v6185_v61, %v881_v11  ;;  %5371 = vmatmul.mubr.msk.bf16.vlgmr.msra.gmra.mrb[124].mxu0 %vm396_vm2, %v3883_v8  ;;  %v5067_v23 = vpop.f32.mrb[23].mxu1 }
 0x118   : > { %5381 = vmatpush3.bf16.msra.mxu0 %v5639_v4  ;;  %5382 = vmatprep.mubr.msk.bf16.mxu0 %vm5562_vm1, %v5561_v2  ;;  %v4176_v4 = vor.u32 %v4175_v18, %v4171_v16 }
 0x119   : > { %v894_v24 = vsel %vm890_vm5, %v888_v17, %v892_v20  ;;  %vm891_vm7 = vcmp.gt.f32.partialorder %v889_v21, 0.0  ;;  %v893_v25 = vmul.f32 0.1, %v889_v21  ;;  %5389 = vmatmul.mubr.msk.bf16.vlgmr.msra.gmra.mrb[128].mxu1 %vm396_vm2, %v4070_v15  ;;  %5392 = vmatprep.subr.bf16.mxu0 %v5561_v2 }
 0x11a   : > { %v4836_v26 = vpack.c.bf16 %v894_v24, %v894_v24  ;;  %v1019_v27 = vpop.f32.mrb[20].mxu0  ;;  %5399 = vmatpush3.bf16.msra.mxu1 %v5726_v36  ;;  %5400 = vmatprep.mubr.msk.bf16.mxu1 %vm5562_vm1, %v5561_v2  ;;  %v4181_v41 = vsel %vm383_vm3, %v4176_v4, %v4180_v28 }
 0x11b   : > { %v895_v29 = vsel %vm891_vm7, %v889_v21, %v893_v25  ;;  %v1020_v30 = vadd.f32 %v1019_v27, %v6165_v47  ;;  %v5060_v31 = vpop.f32.mrb[21].mxu0  ;;  %5410 = vmatprep.subr.bf16.mxu1 %v5561_v2 }
 0x11c   : > { %905 = vst.msk [vmem:[%s6212_s26] sm:$0xf] %vm904_vm6, %v4836_v26  ;;  %v4837_v32 = vpack.c.bf16 %v895_v29, %v895_v29  ;;  %v1022_v33 = vpop.f32.mrb[22].mxu0  ;;  %v1177_v34 = vpop.f32.mrb[24].mxu1 }
 0x11d   : > { %v1023_v35 = vadd.f32 %v1022_v33, %v6167_v54  ;;  %v5061_v36 = vpop.f32.mrb[23].mxu0  ;;  %v1073_v37 = vadd.f32 %v1066_v9, %v1020_v30  ;;  %v5078_v38 = vpop.f32.mrb[25].mxu1  ;;  %v5518_v54 = vld [vmem:[%s5687_s27 + $0x54] sm:$0xff]   ;;  %v4338_v9 = vshll.u32 %v5519_v56, 16 }
 0x11e   : > { %906 = vst.msk [vmem:[%s6212_s26 + $0x4] sm:$0xf] %vm904_vm6, %v4837_v32  ;;  %v1180_v39 = vpop.f32.mrb[26].mxu1  ;;  %v4333_v62 = vshll.u32 %v5518_v54, 16  ;;  %v4388_v40 = vrot.slane %v5518_v54, 1  ;;  %v4331_v49 = vshrl.u32 %v5518_v54, 16 }
 0x11f   : > { %5383 = vmatmul.mubr.msk.bf16.vlgmr.msra.gmra.mrb[128].mxu0 %vm396_vm2, %v6135_v10  ;;  %v1074_v43 = vadd.f32 %v1069_v14, %v1023_v35  ;;  %v5079_v44 = vpop.f32.mrb[27].mxu1  ;;  %v4340_v19 = vrot.slane %v4338_v9, 1 }
 0x120   : > { %5393 = vmatpush3.bf16.msra.mxu0 %v5668_v7  ;;  %5394 = vmatprep.mubr.msk.bf16.mxu0 %vm5562_vm1, %v5561_v2  ;;  %v4335_v8 = vrot.slane %v4333_v62, 1 }
 0x121   : > { %5401 = vmatmul.mubr.msk.bf16.vlgmr.msra.gmra.mrb[132].mxu1 %vm396_vm2, %v4181_v41  ;;  %5404 = vmatprep.subr.bf16.mxu0 %v5561_v2 }
 0x122   : > { %v1117_v45 = vpop.f32.mrb[24].mxu0  ;;  %5411 = vmatpush3.bf16.msra.mxu1 %v5754_v51  ;;  %5412 = vmatprep.mubr.msk.bf16.mxu1 %vm5562_vm1, %v5561_v2  ;;  %v4336_v18 = vor.u32 %v4335_v8, %v4331_v49 }
 0x123   : > { %v1124_v10 = vadd.f32 %v1117_v45, %v1073_v37  ;;  %v5072_v46 = vpop.f32.mrb[25].mxu0  ;;  %5422 = vmatprep.subr.bf16.mxu1 %v5561_v2 }
 0x124   : > { %v1120_v7 = vpop.f32.mrb[26].mxu0  ;;  %v1277_v47 = vpop.f32.mrb[28].mxu1  ;;  %v4341_v25 = vsel %vm383_vm3, %v4336_v18, %v4340_v19 }
 0x125   : > { %v1125_v48 = vadd.f32 %v1120_v7, %v1074_v43  ;;  %v5073_v50 = vpop.f32.mrb[27].mxu0  ;;  %v1184_v52 = vadd.f32 %v1177_v34, %v1124_v10  ;;  %v5090_v53 = vpop.f32.mrb[29].mxu1 }
 0x126   : > { %v1280_v3 = vpop.f32.mrb[30].mxu1 }
 0x127   : > { %5395 = vmatmul.mubr.msk.bf16.vlgmr.msra.gmra.mrb[132].mxu0 %vm396_vm2, %v6171_v55  ;;  %v1185_v51 = vadd.f32 %v1180_v39, %v1125_v48  ;;  %v5091_v57 = vpop.f32.mrb[31].mxu1  ;;  %v4230_v55 = vsel %vm491_vm4, %v4228_v58, %v4229_v60 }
 0x128   : > { %5405 = vmatpush3.bf16.msra.mxu0 %v5703_v22  ;;  %5406 = vmatprep.mubr.msk.bf16.mxu0 %vm5562_vm1, %v5561_v2  ;;  %v4389_v22 = vrot.slane %v5519_v56, 1 }
 0x129   : > { %5413 = vmatmul.mubr.msk.bf16.vlgmr.msra.gmra.mrb[136].mxu1 %vm396_vm2, %v5518_v54  ;;  %5416 = vmatprep.subr.bf16.mxu0 %v5561_v2 }
 0x12a   : > { %v1226_v63 = vpop.f32.mrb[28].mxu0  ;;  %5423 = vmatpush3.bf16.msra.mxu1 %v5772_v59  ;;  %5424 = vmatprep.mubr.msk.bf16.mxu1 %vm5562_vm1, %v5561_v2  ;;  %v4390_v59 = vsel %vm491_vm4, %v4388_v40, %v4389_v22 }
 0x12b   : > { %v1233_v0 = vadd.f32 %v1226_v63, %v1184_v52  ;;  %v5084_v1 = vpop.f32.mrb[29].mxu0 }
 0x12c   : > { %v1229_v5 = vpop.f32.mrb[30].mxu0  ;;  %v1386_v6 = vpop.f32.mrb[32].mxu1 }
 0x12d   : > { %v1234_v17 = vadd.f32 %v1229_v5, %v1185_v51  ;;  %v5085_v11 = vpop.f32.mrb[31].mxu0  ;;  %v1284_v12 = vadd.f32 %v1277_v47, %v1233_v0  ;;  %v5102_v13 = vpop.f32.mrb[33].mxu1 }
 0x12e   : > { %v1389_v14 = vpop.f32.mrb[34].mxu1 }
 0x12f   : > { %5407 = vmatmul.mubr.msk.bf16.vlgmr.msra.gmra.mrb[136].mxu0 %vm396_vm2, %v4230_v55  ;;  %v1285_v15 = vadd.f32 %v1280_v3, %v1234_v17  ;;  %v5103_v16 = vpop.f32.mrb[35].mxu1 }
 0x130   : > { %5417 = vmatpush3.bf16.msra.mxu0 %v5736_v42  ;;  %5418 = vmatprep.mubr.msk.bf16.mxu0 %vm5562_vm1, %v5561_v2 }
 0x131   : > { %5425 = vmatmul.mubr.msk.bf16.vlgmr.msra.gmra.mrb[140].mxu1 %vm396_vm2, %v4390_v59 }
 0x132   : > { %v1337_v20 = vpop.f32.mrb[32].mxu0 }
 0x133   : > { %v1344_v21 = vadd.f32 %v1337_v20, %v1284_v12  ;;  %v5096_v23 = vpop.f32.mrb[33].mxu0 }
 0x134   : > { %v1340_v24 = vpop.f32.mrb[34].mxu0  ;;  %v1526_v26 = vpop.f32.mrb[36].mxu1 }
 0x135   : > { %v1393_v27 = vadd.f32 %v1386_v6, %v1344_v21  ;;  %v1345_v4 = vadd.f32 %v1340_v24, %v1285_v15  ;;  %v5097_v28 = vpop.f32.mrb[35].mxu0  ;;  %v5114_v29 = vpop.f32.mrb[37].mxu1 }
 0x136   : > { %v1529_v30 = vpop.f32.mrb[38].mxu1 }
 0x137   : > { %v1395_v42 = vadd.f32 %v6185_v61, %v1393_v27  ;;  %v1394_v31 = vadd.f32 %v1389_v14, %v1345_v4  ;;  %5419 = vmatmul.mubr.msk.bf16.vlgmr.msra.gmra.mrb[140].mxu0 %vm396_vm2, %v4341_v25  ;;  %v5115_v2 = vpop.f32.mrb[39].mxu1 }
 0x139   : > { %vm1397_vm8 = vcmp.gt.f32.partialorder %v1395_v42, 0.0  ;;  %v1399_v32 = vmul.f32 0.1, %v1395_v42  ;;  %v1396_v33 = vadd.f32 %v6185_v61, %v1394_v31 }
 0x13a   : > { %v1483_v34 = vpop.f32.mrb[36].mxu0 }
 0x13b   : > { %v1401_v35 = vsel %vm1397_vm8, %v1395_v42, %v1399_v32  ;;  %vm1398_vm9 = vcmp.gt.f32.partialorder %v1396_v33, 0.0  ;;  %v1400_v36 = vmul.f32 0.1, %v1396_v33  ;;  %v1527_v37 = vadd.f32 %v1526_v26, %v1483_v34  ;;  %v5108_v38 = vpop.f32.mrb[37].mxu0 }
 0x13c   : > { %v4838_v39 = vpack.c.bf16 %v1401_v35, %v1401_v35  ;;  %v1486_v41 = vpop.f32.mrb[38].mxu0  ;;  %v1624_v43 = vpop.f32.mrb[40].mxu1 }
 0x13d   : > { %v1402_v44 = vsel %vm1398_vm9, %v1396_v33, %v1400_v36  ;;  %v1530_v45 = vadd.f32 %v1529_v30, %v1486_v41  ;;  %v5109_v10 = vpop.f32.mrb[39].mxu0  ;;  %v5126_v46 = vpop.f32.mrb[41].mxu1 }
 0x13e   : > { %4664 = vst.msk [vmem:[%s6212_s26 + $0x8] sm:$0xf] %vm904_vm6, %v4838_v39  ;;  %v4839_v7 = vpack.c.bf16 %v1402_v44, %v1402_v44  ;;  %v1627_v47 = vpop.f32.mrb[42].mxu1 }
 0x13f   : > { %v5127_v48 = vpop.f32.mrb[43].mxu1 }
 0x140   : > { %4665 = vst.msk [vmem:[%s6212_s26 + $0xc] sm:$0xf] %vm904_vm6, %v4839_v7 }
 0x142   : > { %v1573_v50 = vpop.f32.mrb[40].mxu0 }
 0x143   : > { %v1580_v52 = vadd.f32 %v1573_v50, %v1527_v37  ;;  %v5120_v53 = vpop.f32.mrb[41].mxu0 }
 0x144   : > { %v1576_v54 = vpop.f32.mrb[42].mxu0  ;;  %v1733_v3 = vpop.f32.mrb[44].mxu1 }
 0x145   : > { %v1581_v56 = vadd.f32 %v1576_v54, %v1530_v45  ;;  %v5121_v51 = vpop.f32.mrb[43].mxu0  ;;  %v1631_v57 = vadd.f32 %v1624_v43, %v1580_v52  ;;  %v5138_v58 = vpop.f32.mrb[45].mxu1 }
 0x146   : > { %v1736_v60 = vpop.f32.mrb[46].mxu1 }
 0x147   : > { %v1632_v62 = vadd.f32 %v1627_v47, %v1581_v56  ;;  %v5139_v63 = vpop.f32.mrb[47].mxu1 }
 0x14a   : > { %v1684_v40 = vpop.f32.mrb[44].mxu0 }
 0x14b   : > { %v1691_v22 = vadd.f32 %v1684_v40, %v1631_v57  ;;  %v5132_v0 = vpop.f32.mrb[45].mxu0 }
 0x14c   : > { %v1687_v1 = vpop.f32.mrb[46].mxu0  ;;  %v1844_v5 = vpop.f32.mrb[48].mxu1 }
 0x14d   : > { %v1692_v55 = vadd.f32 %v1687_v1, %v1632_v62  ;;  %v5133_v6 = vpop.f32.mrb[47].mxu0  ;;  %v1740_v49 = vadd.f32 %v1733_v3, %v1691_v22  ;;  %v5150_v8 = vpop.f32.mrb[49].mxu1 }
 0x14e   : > { %v1847_v9 = vpop.f32.mrb[50].mxu1 }
 0x14f   : > { %v1741_v17 = vadd.f32 %v1736_v60, %v1692_v55  ;;  %v5151_v11 = vpop.f32.mrb[51].mxu1 }
 0x152   : > { %v1784_v12 = vpop.f32.mrb[48].mxu0 }
 0x153   : > { %v1791_v13 = vadd.f32 %v1784_v12, %v1740_v49  ;;  %v5144_v14 = vpop.f32.mrb[49].mxu0 }
 0x154   : > { %v1787_v59 = vpop.f32.mrb[50].mxu0  ;;  %v1990_v15 = vpop.f32.mrb[52].mxu1 }
 0x155   : > { %v1792_v16 = vadd.f32 %v1787_v59, %v1741_v17  ;;  %v5145_v18 = vpop.f32.mrb[51].mxu0  ;;  %v1851_v19 = vadd.f32 %v1844_v5, %v1791_v13  ;;  %v5162_v20 = vpop.f32.mrb[53].mxu1 }
 0x156   : > { %v1993_v21 = vpop.f32.mrb[54].mxu1 }
 0x157   : > { %v1852_v23 = vadd.f32 %v1847_v9, %v1792_v16  ;;  %v5163_v24 = vpop.f32.mrb[55].mxu1 }
 0x15a   : > { %v1893_v25 = vpop.f32.mrb[52].mxu0 }
 0x15b   : > { %v1900_v26 = vadd.f32 %v1893_v25, %v1851_v19  ;;  %v5156_v27 = vpop.f32.mrb[53].mxu0 }
 0x15c   : > { %v1896_v4 = vpop.f32.mrb[54].mxu0  ;;  %v2080_v28 = vpop.f32.mrb[56].mxu1 }
 0x15d   : > { %v1902_v29 = vadd.f32 %v6185_v61, %v1900_v26  ;;  %v1901_v30 = vadd.f32 %v1896_v4, %v1852_v23  ;;  %v5157_v42 = vpop.f32.mrb[55].mxu0  ;;  %v5174_v31 = vpop.f32.mrb[57].mxu1 }
 0x15e   : > { %v2083_v2 = vpop.f32.mrb[58].mxu1 }
 0x15f   : > { %vm1904_vm10 = vcmp.gt.f32.partialorder %v1902_v29, 0.0  ;;  %v1906_v32 = vmul.f32 0.1, %v1902_v29  ;;  %v1903_v33 = vadd.f32 %v6185_v61, %v1901_v30  ;;  %v5175_v34 = vpop.f32.mrb[59].mxu1 }
 0x161   : > { %v1908_v35 = vsel %vm1904_vm10, %v1902_v29, %v1906_v32  ;;  %vm1905_vm11 = vcmp.gt.f32.partialorder %v1903_v33, 0.0  ;;  %v1907_v36 = vmul.f32 0.1, %v1903_v33 }
 0x162   : > { %v4840_v37 = vpack.c.bf16 %v1908_v35, %v1908_v35  ;;  %v2033_v38 = vpop.f32.mrb[56].mxu0 }
 0x163   : > { %v1909_v39 = vsel %vm1905_vm11, %v1903_v33, %v1907_v36  ;;  %v2034_v41 = vadd.f32 %v2033_v38, %v1990_v15  ;;  %v5168_v43 = vpop.f32.mrb[57].mxu0 }
 0x164   : > { %4692 = vst.msk [vmem:[%s6212_s26 + $0x10] sm:$0xf] %vm904_vm6, %v4840_v37  ;;  %v4841_v44 = vpack.c.bf16 %v1909_v39, %v1909_v39  ;;  %v2036_v45 = vpop.f32.mrb[58].mxu0  ;;  %v2191_v10 = vpop.f32.mrb[60].mxu1 }
 0x165   : > { %v2037_v46 = vadd.f32 %v2036_v45, %v1993_v21  ;;  %v5169_v7 = vpop.f32.mrb[59].mxu0  ;;  %v2087_v47 = vadd.f32 %v2080_v28, %v2034_v41  ;;  %v5186_v48 = vpop.f32.mrb[61].mxu1 }
 0x166   : > { %4693 = vst.msk [vmem:[%s6212_s26 + $0x14] sm:$0xf] %vm904_vm6, %v4841_v44  ;;  %v2194_v50 = vpop.f32.mrb[62].mxu1 }
 0x167   : > { %v2088_v52 = vadd.f32 %v2083_v2, %v2037_v46  ;;  %v5187_v53 = vpop.f32.mrb[63].mxu1 }
 0x16a   : > { %v2131_v54 = vpop.f32.mrb[60].mxu0 }
 0x16b   : > { %v2138_v3 = vadd.f32 %v2131_v54, %v2087_v47  ;;  %v5180_v56 = vpop.f32.mrb[61].mxu0 }
 0x16c   : > { %v2134_v51 = vpop.f32.mrb[62].mxu0  ;;  %v2291_v57 = vpop.f32.mrb[64].mxu1 }
 0x16d   : > { %v2139_v58 = vadd.f32 %v2134_v51, %v2088_v52  ;;  %v5181_v60 = vpop.f32.mrb[63].mxu0  ;;  %v2198_v62 = vadd.f32 %v2191_v10, %v2138_v3  ;;  %v5198_v63 = vpop.f32.mrb[65].mxu1 }
 0x16e   : > { %v2294_v40 = vpop.f32.mrb[66].mxu1 }
 0x16f   : > { %v2199_v22 = vadd.f32 %v2194_v50, %v2139_v58  ;;  %v5199_v0 = vpop.f32.mrb[67].mxu1 }
 0x172   : > { %v2240_v1 = vpop.f32.mrb[64].mxu0 }
 0x173   : > { %v2247_v5 = vadd.f32 %v2240_v1, %v2198_v62  ;;  %v5192_v55 = vpop.f32.mrb[65].mxu0 }
 0x174   : > { %v2243_v6 = vpop.f32.mrb[66].mxu0  ;;  %v2400_v49 = vpop.f32.mrb[68].mxu1 }
 0x175   : > { %v2248_v8 = vadd.f32 %v2243_v6, %v2199_v22  ;;  %v5193_v9 = vpop.f32.mrb[67].mxu0  ;;  %v2298_v17 = vadd.f32 %v2291_v57, %v2247_v5  ;;  %v5210_v11 = vpop.f32.mrb[69].mxu1 }
 0x176   : > { %v2403_v12 = vpop.f32.mrb[70].mxu1 }
 0x177   : > { %v2299_v13 = vadd.f32 %v2294_v40, %v2248_v8  ;;  %v5211_v14 = vpop.f32.mrb[71].mxu1 }
 0x17a   : > { %v2351_v59 = vpop.f32.mrb[68].mxu0 }
 0x17b   : > { %v2358_v15 = vadd.f32 %v2351_v59, %v2298_v17  ;;  %v5204_v16 = vpop.f32.mrb[69].mxu0 }
 0x17c   : > { %v2354_v18 = vpop.f32.mrb[70].mxu0  ;;  %v2540_v19 = vpop.f32.mrb[72].mxu1 }
 0x17d   : > { %v2407_v20 = vadd.f32 %v2400_v49, %v2358_v15  ;;  %v2359_v21 = vadd.f32 %v2354_v18, %v2299_v13  ;;  %v5205_v23 = vpop.f32.mrb[71].mxu0  ;;  %v5222_v24 = vpop.f32.mrb[73].mxu1 }
 0x17e   : > { %v2543_v25 = vpop.f32.mrb[74].mxu1 }
 0x17f   : > { %v2409_v26 = vadd.f32 %v6185_v61, %v2407_v20  ;;  %v2408_v27 = vadd.f32 %v2403_v12, %v2359_v21  ;;  %v5223_v4 = vpop.f32.mrb[75].mxu1 }
 0x181   : > { %vm2411_vm12 = vcmp.gt.f32.partialorder %v2409_v26, 0.0  ;;  %v2413_v28 = vmul.f32 0.1, %v2409_v26  ;;  %v2410_v29 = vadd.f32 %v6185_v61, %v2408_v27 }
 0x182   : > { %v2497_v30 = vpop.f32.mrb[72].mxu0 }
 0x183   : > { %v2415_v42 = vsel %vm2411_vm12, %v2409_v26, %v2413_v28  ;;  %vm2412_vm13 = vcmp.gt.f32.partialorder %v2410_v29, 0.0  ;;  %v2414_v31 = vmul.f32 0.1, %v2410_v29  ;;  %v2541_v2 = vadd.f32 %v2540_v19, %v2497_v30  ;;  %v5216_v32 = vpop.f32.mrb[73].mxu0 }
 0x184   : > { %v4842_v33 = vpack.c.bf16 %v2415_v42, %v2415_v42  ;;  %v2500_v34 = vpop.f32.mrb[74].mxu0  ;;  %v2638_v35 = vpop.f32.mrb[76].mxu1 }
 0x185   : > { %v2416_v36 = vsel %vm2412_vm13, %v2410_v29, %v2414_v31  ;;  %v2544_v37 = vadd.f32 %v2543_v25, %v2500_v34  ;;  %v5217_v38 = vpop.f32.mrb[75].mxu0  ;;  %v5234_v39 = vpop.f32.mrb[77].mxu1 }
 0x186   : > { %4720 = vst.msk [vmem:[%s6212_s26 + $0x18] sm:$0xf] %vm904_vm6, %v4842_v33  ;;  %v4843_v41 = vpack.c.bf16 %v2416_v36, %v2416_v36  ;;  %v2641_v43 = vpop.f32.mrb[78].mxu1 }
 0x187   : > { %v5235_v44 = vpop.f32.mrb[79].mxu1 }
 0x188   : > { %4721 = vst.msk [vmem:[%s6212_s26 + $0x1c] sm:$0xf] %vm904_vm6, %v4843_v41 }
 0x18a   : > { %v2587_v45 = vpop.f32.mrb[76].mxu0 }
 0x18b   : > { %v2594_v10 = vadd.f32 %v2587_v45, %v2541_v2  ;;  %v5228_v46 = vpop.f32.mrb[77].mxu0 }
 0x18c   : > { %v2590_v7 = vpop.f32.mrb[78].mxu0  ;;  %v2747_v47 = vpop.f32.mrb[80].mxu1 }
 0x18d   : > { %v2595_v48 = vadd.f32 %v2590_v7, %v2544_v37  ;;  %v5229_v50 = vpop.f32.mrb[79].mxu0  ;;  %v2645_v52 = vadd.f32 %v2638_v35, %v2594_v10  ;;  %v5246_v53 = vpop.f32.mrb[81].mxu1 }
 0x18e   : > { %v2750_v54 = vpop.f32.mrb[82].mxu1 }
 0x18f   : > { %v2646_v3 = vadd.f32 %v2641_v43, %v2595_v48  ;;  %v5247_v56 = vpop.f32.mrb[83].mxu1 }
 0x192   : > { %v2698_v51 = vpop.f32.mrb[80].mxu0 }
 0x193   : > { %v2705_v57 = vadd.f32 %v2698_v51, %v2645_v52  ;;  %v5240_v58 = vpop.f32.mrb[81].mxu0 }
 0x194   : > { %v2701_v60 = vpop.f32.mrb[82].mxu0  ;;  %v2858_v62 = vpop.f32.mrb[84].mxu1 }
 0x195   : > { %v2706_v63 = vadd.f32 %v2701_v60, %v2646_v3  ;;  %v5241_v40 = vpop.f32.mrb[83].mxu0  ;;  %v2754_v22 = vadd.f32 %v2747_v47, %v2705_v57  ;;  %v5258_v0 = vpop.f32.mrb[85].mxu1 }
 0x196   : > { %v2861_v1 = vpop.f32.mrb[86].mxu1 }
 0x197   : > { %v2755_v5 = vadd.f32 %v2750_v54, %v2706_v63  ;;  %v5259_v55 = vpop.f32.mrb[87].mxu1 }
 0x19a   : > { %v2798_v6 = vpop.f32.mrb[84].mxu0 }
 0x19b   : > { %v2805_v49 = vadd.f32 %v2798_v6, %v2754_v22  ;;  %v5252_v8 = vpop.f32.mrb[85].mxu0 }
 0x19c   : > { %v2801_v9 = vpop.f32.mrb[86].mxu0  ;;  %v3004_v17 = vpop.f32.mrb[88].mxu1 }
 0x19d   : > { %v2806_v11 = vadd.f32 %v2801_v9, %v2755_v5  ;;  %v5253_v12 = vpop.f32.mrb[87].mxu0  ;;  %v2865_v13 = vadd.f32 %v2858_v62, %v2805_v49  ;;  %v5270_v14 = vpop.f32.mrb[89].mxu1 }
 0x19e   : > { %v3007_v59 = vpop.f32.mrb[90].mxu1 }
 0x19f   : > { %v2866_v15 = vadd.f32 %v2861_v1, %v2806_v11  ;;  %v5271_v16 = vpop.f32.mrb[91].mxu1 }
 0x1a2   : > { %v2907_v18 = vpop.f32.mrb[88].mxu0 }
 0x1a3   : > { %v2914_v19 = vadd.f32 %v2907_v18, %v2865_v13  ;;  %v5264_v20 = vpop.f32.mrb[89].mxu0 }
 0x1a4   : > { %v2910_v21 = vpop.f32.mrb[90].mxu0  ;;  %v3094_v23 = vpop.f32.mrb[92].mxu1 }
 0x1a5   : > { %v2916_v24 = vadd.f32 %v6185_v61, %v2914_v19  ;;  %v2915_v25 = vadd.f32 %v2910_v21, %v2866_v15  ;;  %v5265_v26 = vpop.f32.mrb[91].mxu0  ;;  %v5282_v27 = vpop.f32.mrb[93].mxu1 }
 0x1a6   : > { %v3097_v4 = vpop.f32.mrb[94].mxu1 }
 0x1a7   : > { %vm2918_vm14 = vcmp.gt.f32.partialorder %v2916_v24, 0.0  ;;  %v2920_v28 = vmul.f32 0.1, %v2916_v24  ;;  %v2917_v29 = vadd.f32 %v6185_v61, %v2915_v25  ;;  %v5283_v30 = vpop.f32.mrb[95].mxu1 }
 0x1a9   : > { %v2922_v42 = vsel %vm2918_vm14, %v2916_v24, %v2920_v28  ;;  %vm2919_vm15 = vcmp.gt.f32.partialorder %v2917_v29, 0.0  ;;  %v2921_v31 = vmul.f32 0.1, %v2917_v29 }
 0x1aa   : > { %v4844_v2 = vpack.c.bf16 %v2922_v42, %v2922_v42  ;;  %v3047_v32 = vpop.f32.mrb[92].mxu0 }
 0x1ab   : > { %v2923_v33 = vsel %vm2919_vm15, %v2917_v29, %v2921_v31  ;;  %v3048_v34 = vadd.f32 %v3047_v32, %v3004_v17  ;;  %v5276_v35 = vpop.f32.mrb[93].mxu0 }
 0x1ac   : > { %4748 = vst.msk [vmem:[%s6212_s26 + $0x20] sm:$0xf] %vm904_vm6, %v4844_v2  ;;  %v4845_v36 = vpack.c.bf16 %v2923_v33, %v2923_v33  ;;  %v3050_v37 = vpop.f32.mrb[94].mxu0  ;;  %v3205_v38 = vpop.f32.mrb[96].mxu1 }
 0x1ad   : > { %v3051_v39 = vadd.f32 %v3050_v37, %v3007_v59  ;;  %v5277_v41 = vpop.f32.mrb[95].mxu0  ;;  %v3101_v43 = vadd.f32 %v3094_v23, %v3048_v34  ;;  %v5294_v44 = vpop.f32.mrb[97].mxu1 }
 0x1ae   : > { %4749 = vst.msk [vmem:[%s6212_s26 + $0x24] sm:$0xf] %vm904_vm6, %v4845_v36  ;;  %v3208_v45 = vpop.f32.mrb[98].mxu1 }
 0x1af   : > { %v3102_v10 = vadd.f32 %v3097_v4, %v3051_v39  ;;  %v5295_v46 = vpop.f32.mrb[99].mxu1 }
 0x1b2   : > { %v3145_v7 = vpop.f32.mrb[96].mxu0 }
 0x1b3   : > { %v3152_v47 = vadd.f32 %v3145_v7, %v3101_v43  ;;  %v5288_v48 = vpop.f32.mrb[97].mxu0 }
 0x1b4   : > { %v3148_v50 = vpop.f32.mrb[98].mxu0  ;;  %v3305_v52 = vpop.f32.mrb[100].mxu1 }
 0x1b5   : > { %v3153_v53 = vadd.f32 %v3148_v50, %v3102_v10  ;;  %v5289_v54 = vpop.f32.mrb[99].mxu0  ;;  %v3212_v3 = vadd.f32 %v3205_v38, %v3152_v47  ;;  %v5306_v56 = vpop.f32.mrb[101].mxu1 }
 0x1b6   : > { %v3308_v51 = vpop.f32.mrb[102].mxu1 }
 0x1b7   : > { %v3213_v57 = vadd.f32 %v3208_v45, %v3153_v53  ;;  %v5307_v58 = vpop.f32.mrb[103].mxu1 }
 0x1ba   : > { %v3254_v60 = vpop.f32.mrb[100].mxu0 }
 0x1bb   : > { %v3261_v62 = vadd.f32 %v3254_v60, %v3212_v3  ;;  %v5300_v63 = vpop.f32.mrb[101].mxu0 }
 0x1bc   : > { %v3257_v40 = vpop.f32.mrb[102].mxu0  ;;  %v3414_v22 = vpop.f32.mrb[104].mxu1 }
 0x1bd   : > { %v3262_v0 = vadd.f32 %v3257_v40, %v3213_v57  ;;  %v5301_v1 = vpop.f32.mrb[103].mxu0  ;;  %v3312_v5 = vadd.f32 %v3305_v52, %v3261_v62  ;;  %v5318_v55 = vpop.f32.mrb[105].mxu1 }
 0x1be   : > { %v3417_v6 = vpop.f32.mrb[106].mxu1 }
 0x1bf   : > { %v3313_v49 = vadd.f32 %v3308_v51, %v3262_v0  ;;  %v5319_v8 = vpop.f32.mrb[107].mxu1 }
 0x1c2   : > { %v3365_v9 = vpop.f32.mrb[104].mxu0 }
 0x1c3   : > { %v3372_v17 = vadd.f32 %v3365_v9, %v3312_v5  ;;  %v5312_v11 = vpop.f32.mrb[105].mxu0 }
 0x1c4   : > { %v3368_v12 = vpop.f32.mrb[106].mxu0  ;;  %v3554_v13 = vpop.f32.mrb[108].mxu1 }
 0x1c5   : > { %v3421_v14 = vadd.f32 %v3414_v22, %v3372_v17  ;;  %v3373_v59 = vadd.f32 %v3368_v12, %v3313_v49  ;;  %v5313_v15 = vpop.f32.mrb[107].mxu0  ;;  %v5330_v16 = vpop.f32.mrb[109].mxu1 }
 0x1c6   : > { %v3557_v18 = vpop.f32.mrb[110].mxu1 }
 0x1c7   : > { %v3423_v19 = vadd.f32 %v6185_v61, %v3421_v14  ;;  %v3422_v20 = vadd.f32 %v3417_v6, %v3373_v59  ;;  %v5331_v21 = vpop.f32.mrb[111].mxu1 }
 0x1c9   : > { %vm3425_vm0 = vcmp.gt.f32.partialorder %v3423_v19, 0.0  ;;  %v3427_v23 = vmul.f32 0.1, %v3423_v19  ;;  %v3424_v24 = vadd.f32 %v6185_v61, %v3422_v20 }
 0x1ca   : > { %v3511_v25 = vpop.f32.mrb[108].mxu0 }
 0x1cb   : > { %v3429_v26 = vsel %vm3425_vm0, %v3423_v19, %v3427_v23  ;;  %vm3426_vm1 = vcmp.gt.f32.partialorder %v3424_v24, 0.0  ;;  %v3428_v27 = vmul.f32 0.1, %v3424_v24  ;;  %v3555_v4 = vadd.f32 %v3554_v13, %v3511_v25  ;;  %v5324_v28 = vpop.f32.mrb[109].mxu0 }
 0x1cc   : > { %v4846_v29 = vpack.c.bf16 %v3429_v26, %v3429_v26  ;;  %v3514_v30 = vpop.f32.mrb[110].mxu0  ;;  %v3652_v42 = vpop.f32.mrb[112].mxu1 }
 0x1cd   : > { %v3430_v31 = vsel %vm3426_vm1, %v3424_v24, %v3428_v27  ;;  %v3558_v2 = vadd.f32 %v3557_v18, %v3514_v30  ;;  %v5325_v32 = vpop.f32.mrb[111].mxu0  ;;  %v5342_v33 = vpop.f32.mrb[113].mxu1 }
 0x1ce   : > { %4776 = vst.msk [vmem:[%s6212_s26 + $0x28] sm:$0xf] %vm904_vm6, %v4846_v29  ;;  %v4847_v34 = vpack.c.bf16 %v3430_v31, %v3430_v31  ;;  %v3655_v35 = vpop.f32.mrb[114].mxu1 }
 0x1cf   : > { %v5343_v36 = vpop.f32.mrb[115].mxu1 }
 0x1d0   : > { %4777 = vst.msk [vmem:[%s6212_s26 + $0x2c] sm:$0xf] %vm904_vm6, %v4847_v34 }
 0x1d2   : > { %v3601_v37 = vpop.f32.mrb[112].mxu0 }
 0x1d3   : > { %v3608_v38 = vadd.f32 %v3601_v37, %v3555_v4  ;;  %v5336_v39 = vpop.f32.mrb[113].mxu0 }
 0x1d4   : > { %v3604_v41 = vpop.f32.mrb[114].mxu0  ;;  %v3761_v43 = vpop.f32.mrb[116].mxu1 }
 0x1d5   : > { %v3609_v44 = vadd.f32 %v3604_v41, %v3558_v2  ;;  %v5337_v45 = vpop.f32.mrb[115].mxu0  ;;  %v3659_v10 = vadd.f32 %v3652_v42, %v3608_v38  ;;  %v5354_v46 = vpop.f32.mrb[117].mxu1 }
 0x1d6   : > { %v3764_v7 = vpop.f32.mrb[118].mxu1 }
 0x1d7   : > { %v3660_v47 = vadd.f32 %v3655_v35, %v3609_v44  ;;  %v5355_v48 = vpop.f32.mrb[119].mxu1 }
 0x1da   : > { %v3712_v50 = vpop.f32.mrb[116].mxu0 }
 0x1db   : > { %v3719_v52 = vadd.f32 %v3712_v50, %v3659_v10  ;;  %v5348_v53 = vpop.f32.mrb[117].mxu0 }
 0x1dc   : > { %v3715_v54 = vpop.f32.mrb[118].mxu0  ;;  %v3872_v3 = vpop.f32.mrb[120].mxu1 }
 0x1dd   : > { %v3720_v56 = vadd.f32 %v3715_v54, %v3660_v47  ;;  %v5349_v51 = vpop.f32.mrb[119].mxu0  ;;  %v3768_v57 = vadd.f32 %v3761_v43, %v3719_v52  ;;  %v5366_v58 = vpop.f32.mrb[121].mxu1 }
 0x1de   : > { %v3875_v60 = vpop.f32.mrb[122].mxu1 }
 0x1df   : > { %v3769_v62 = vadd.f32 %v3764_v7, %v3720_v56  ;;  %v5367_v63 = vpop.f32.mrb[123].mxu1 }
 0x1e2   : > { %v3812_v40 = vpop.f32.mrb[120].mxu0 }
 0x1e3   : > { %v3819_v22 = vadd.f32 %v3812_v40, %v3768_v57  ;;  %v5360_v0 = vpop.f32.mrb[121].mxu0 }
 0x1e4   : > { %v3815_v1 = vpop.f32.mrb[122].mxu0  ;;  %v4018_v5 = vpop.f32.mrb[124].mxu1 }
 0x1e5   : > { %v3820_v55 = vadd.f32 %v3815_v1, %v3769_v62  ;;  %v5361_v6 = vpop.f32.mrb[123].mxu0  ;;  %v3879_v49 = vadd.f32 %v3872_v3, %v3819_v22  ;;  %v5378_v8 = vpop.f32.mrb[125].mxu1 }
 0x1e6   : > { %v4021_v9 = vpop.f32.mrb[126].mxu1 }
 0x1e7   : > { %v3880_v17 = vadd.f32 %v3875_v60, %v3820_v55  ;;  %v5379_v11 = vpop.f32.mrb[127].mxu1 }
 0x1ea   : > { %v3921_v12 = vpop.f32.mrb[124].mxu0 }
 0x1eb   : > { %v3928_v13 = vadd.f32 %v3921_v12, %v3879_v49  ;;  %v5372_v14 = vpop.f32.mrb[125].mxu0 }
 0x1ec   : > { %v3924_v59 = vpop.f32.mrb[126].mxu0  ;;  %v4108_v15 = vpop.f32.mrb[128].mxu1 }
 0x1ed   : > { %v3930_v16 = vadd.f32 %v6185_v61, %v3928_v13  ;;  %v3929_v18 = vadd.f32 %v3924_v59, %v3880_v17  ;;  %v5373_v19 = vpop.f32.mrb[127].mxu0  ;;  %v5390_v20 = vpop.f32.mrb[129].mxu1 }
 0x1ee   : > { %v4111_v21 = vpop.f32.mrb[130].mxu1 }
 0x1ef   : > { %vm3932_vm2 = vcmp.gt.f32.partialorder %v3930_v16, 0.0  ;;  %v3934_v23 = vmul.f32 0.1, %v3930_v16  ;;  %v3931_v24 = vadd.f32 %v6185_v61, %v3929_v18  ;;  %v5391_v25 = vpop.f32.mrb[131].mxu1 }
 0x1f1   : > { %v3936_v26 = vsel %vm3932_vm2, %v3930_v16, %v3934_v23  ;;  %vm3933_vm3 = vcmp.gt.f32.partialorder %v3931_v24, 0.0  ;;  %v3935_v27 = vmul.f32 0.1, %v3931_v24 }
 0x1f2   : > { %v4848_v4 = vpack.c.bf16 %v3936_v26, %v3936_v26  ;;  %v4061_v28 = vpop.f32.mrb[128].mxu0 }
 0x1f3   : > { %v3937_v29 = vsel %vm3933_vm3, %v3931_v24, %v3935_v27  ;;  %v4062_v30 = vadd.f32 %v4061_v28, %v4018_v5  ;;  %v5384_v42 = vpop.f32.mrb[129].mxu0 }
 0x1f4   : > { %4804 = vst.msk [vmem:[%s6212_s26 + $0x30] sm:$0xf] %vm904_vm6, %v4848_v4  ;;  %v4849_v31 = vpack.c.bf16 %v3937_v29, %v3937_v29  ;;  %v4064_v2 = vpop.f32.mrb[130].mxu0  ;;  %v4219_v32 = vpop.f32.mrb[132].mxu1 }
 0x1f5   : > { %v4065_v33 = vadd.f32 %v4064_v2, %v4021_v9  ;;  %v5385_v34 = vpop.f32.mrb[131].mxu0  ;;  %v4115_v35 = vadd.f32 %v4108_v15, %v4062_v30  ;;  %v5402_v36 = vpop.f32.mrb[133].mxu1  ;;  %v5520_v9 = vld [vmem:[%s6323_s4] ss:$0 sm:$0xff] }
 0x1f6   : > { %4805 = vst.msk [vmem:[%s6212_s26 + $0x34] sm:$0xf] %vm904_vm6, %v4849_v31  ;;  %v4222_v61 = vpop.f32.mrb[134].mxu1 }
 0x1f7   : > { %v4116_v37 = vadd.f32 %v4111_v21, %v4065_v33  ;;  %v5403_v38 = vpop.f32.mrb[135].mxu1 }
 0x1fa   : > { %v4159_v39 = vpop.f32.mrb[132].mxu0 }
 0x1fb   : > { %v4166_v41 = vadd.f32 %v4159_v39, %v4115_v35  ;;  %v5396_v43 = vpop.f32.mrb[133].mxu0 }
 0x1fc   : > { %v4162_v44 = vpop.f32.mrb[134].mxu0  ;;  %v4319_v45 = vpop.f32.mrb[136].mxu1 }
 0x1fd   : > { %v4167_v10 = vadd.f32 %v4162_v44, %v4116_v37  ;;  %v5397_v46 = vpop.f32.mrb[135].mxu0  ;;  %v4226_v7 = vadd.f32 %v4219_v32, %v4166_v41  ;;  %v5414_v47 = vpop.f32.mrb[137].mxu1 }
 0x1fe   : > { %v4322_v48 = vpop.f32.mrb[138].mxu1 }
 0x1ff   : > { %v4227_v50 = vadd.f32 %v4222_v61, %v4167_v10  ;;  %v5415_v52 = vpop.f32.mrb[139].mxu1 }
 0x202   : > { %v4268_v53 = vpop.f32.mrb[136].mxu0 }
 0x203   : > { %v4275_v54 = vadd.f32 %v4268_v53, %v4226_v7  ;;  %v5408_v3 = vpop.f32.mrb[137].mxu0 }
 0x204   : > { %v4271_v56 = vpop.f32.mrb[138].mxu0  ;;  %v4428_v51 = vpop.f32.mrb[140].mxu1 }
 0x205   : > { %v4276_v57 = vadd.f32 %v4271_v56, %v4227_v50  ;;  %v5409_v58 = vpop.f32.mrb[139].mxu0  ;;  %v4326_v60 = vadd.f32 %v4319_v45, %v4275_v54  ;;  %v5426_v62 = vpop.f32.mrb[141].mxu1 }
 0x206   : > { %v4431_v63 = vpop.f32.mrb[142].mxu1 }
 0x207   : > { %v4327_v40 = vadd.f32 %v4322_v48, %v4276_v57  ;;  %v5427_v22 = vpop.f32.mrb[143].mxu1 }
 0x20a   : > { %v4379_v0 = vpop.f32.mrb[140].mxu0 }
 0x20b   : > { %v4386_v1 = vadd.f32 %v4379_v0, %v4326_v60  ;;  %v5420_v5 = vpop.f32.mrb[141].mxu0 }
 0x20c   : > { %v4382_v55 = vpop.f32.mrb[142].mxu0 }
 0x20d   : > { %v4435_v6 = vadd.f32 %v4428_v51, %v4386_v1  ;;  %v4387_v49 = vadd.f32 %v4382_v55, %v4327_v40  ;;  %v5421_v8 = vpop.f32.mrb[143].mxu0 }
 0x20f   : > { %v4437_v17 = vadd.f32 %v5520_v9, %v4435_v6  ;;  %v4436_v11 = vadd.f32 %v4431_v63, %v4387_v49 }
 0x211   : > { %vm4439_vm4 = vcmp.gt.f32.partialorder %v4437_v17, 0.0  ;;  %v4441_v12 = vmul.f32 0.1, %v4437_v17  ;;  %v4438_v13 = vadd.f32 %v5520_v9, %v4436_v11 }
 0x213   : > { %v4443_v14 = vsel %vm4439_vm4, %v4437_v17, %v4441_v12  ;;  %vm4440_vm5 = vcmp.gt.f32.partialorder %v4438_v13, 0.0  ;;  %v4442_v59 = vmul.f32 0.1, %v4438_v13 }
 0x214   : > { %v4850_v15 = vpack.c.bf16 %v4443_v14, %v4443_v14 }
 0x215   : > { %v4444_v16 = vsel %vm4440_vm5, %v4438_v13, %v4442_v59 }
 0x216   : > { %4832 = vst.msk [vmem:[%s6212_s26 + $0x38] sm:$0xf] %vm904_vm6, %v4850_v15  ;;  %v4851_v18 = vpack.c.bf16 %v4444_v16, %v4444_v16 }
 0x218   : > { %4833 = vst.msk [vmem:[%s6212_s26 + $0x3c] sm:$0xf] %vm904_vm6, %v4851_v18 }
 0x219 PF: > { %s15_s22 = sadd.s32 1, %s5559_s22   ;;  %s6325_s18 = smov %s5551_s20 }
 0x21a   : > { %p12_p7 = scmp.ge.s32.totalorder %s15_s22, 6   ;;  %s6326_s19 = smov %s5555_s21 }
 0x21b   : > { %s6327_s20 = smov %s6330_s23  ;;  %s6328_s21 = smov %s6334_s24 }
 0x21c   :  { %14 = sbr.rel (!%p12_p7) target bundleno = 3 (0x3), region = 112 }

// kernel: resblock_body_forward.6
= control target key start
LH: loop header
LB: loop body
LE: loop exit
PB: predicated region body
PF: predicated region fallthrough
CT: control target
= control target key end

     0   :  { %s5593_s18 = smov 0   ;;  %s5595_s19 = smov 0   ;;  %s6319_s0 = inlined_call_operand.vmem [shape: bf16[2,16,18,4], index: 0, kind: input, shape index: {}]   ;;  %s6320_s1 = inlined_call_operand.vmem [shape: bf16[2,16,18,4], index: 1, kind: input, shape index: {}]   ;;  %s6321_s2 = inlined_call_operand.vmem [shape: bf16[2,16,18,4], index: 2, kind: input, shape index: {}]   ;;  %s6322_s3 = inlined_call_operand.vmem [shape: bf16[3,3,4,4], index: 3, kind: input, shape index: {}]   ;;  %s6323_s4 = inlined_call_operand.vmem [shape: f32[1,4], index: 4, kind: input, shape index: {}]   ;;  %s6324_s5 = inlined_call_operand.vmem [shape: bf16[2,16,16,4], index: 5, kind: output, shape index: {}]  }
   0x1   :  { %s5597_s20 = smov 0   ;;  %s5599_s21 = smov 0  }
   0x2   :  { %s5601_s22 = smov 0  }
   0x3 LB: > { %s24_s23 = sadd.s32 1, %s5551_s20  ;;  %s27_s24 = sadd.s32 1, %s5555_s21  ;;  %s5559_s22 = sphi %s5601_s22, %s15_s22   ;;  %s5555_s21 = sphi %s5599_s21, %s6328_s21   ;;  %s5551_s20 = sphi %s5597_s20, %s6327_s20   ;;  %s5547_s19 = sphi %s5595_s19, %s6326_s19   ;;  %s5543_s18 = sphi %s5593_s18, %s6325_s18  }
   0x4   : > { %p25_p0 = scmp.ge.s32.totalorder %s24_s23, 2  ;;  %p4601_p1 = scmp.ge.s32.totalorder %s5559_s22, 1 }
   0x5   : > { %p245_p2 = scmp.lt.s32.totalorder %s5559_s22, 5 }
   0x6   : > { %s6330_s23 = smov (%p25_p0, %s24_s23), 0  ;;  %s6332_s24 = smov (!%p25_p0, %s27_s24), %s5555_s21 }
   0x7   : > { %p246_p3 = pnand %p4601_p1, %p245_p2  ;;  %p29_p4 = scmp.ge.s32.totalorder %s6332_s24, 2 }
   0x8   : > { %v4612_v0 = vld [vmem:[%s6322_s3 + $0x2] sm:$0x3] (!%p246_p3)  ;;  %vm400_vm0 = vcmask (!%p246_p3), 1041408   ;;  %v349_v1 = vld [vmem:[%s6322_s3] sm:$0x3] (!%p246_p3)  ;;  %v5561_v2 = vmov (!%p246_p3), 0.0  }
   0x9   : > { %s6334_s24 = smov (%p29_p4, %s6332_s24), 0  ;;  %249 = sbr.rel (%p246_p3) target bundleno = 537 (0x219), region = 40 }
   0xa   : > { %4996 = vmatprep.subr.bf16.mxu0 (!%p246_p3), %v5561_v2  ;;  %5002 = vmatprep.subr.bf16.mxu1 (!%p246_p3), %v5561_v2  ;;  %v5636_v3 = vsel (!%p246_p3), %vm400_vm0, %v4612_v0, 0  ;;  %v5639_v4 = vsel (!%p246_p3), %vm400_vm0, %v349_v1, 0  ;;  %s4602_s29 = sshll.u32 (!%p246_p3), %s5543_s18, 3  ;;  %p304_p5 = scmp.lt.s32.totalorder (!%p246_p3), %s5547_s19, 1  ;;  %vm5562_vm1 = vmmov (!%p246_p3), 0   ;;  %vm396_vm2 = vcmask (!%p246_p3), 31744  }
   0xb   : > { %4997 = vmatpush3.bf16.msra.mxu0 (!%p246_p3), %v5636_v3  ;;  %5003 = vmatpush3.bf16.msra.mxu1 (!%p246_p3), %v5639_v4  ;;  %p306_p6 = scmp.lt.s32.totalorder (!%p246_p3), %s4602_s29, 15  ;;  %v4614_v5 = vld [vmem:[%s6322_s3 + $0x6] sm:$0x3] (!%p246_p3)  ;;  %vm383_vm3 = vsmask.f32 (!%p246_p3), 7424  ;;  %vm491_vm4 = vcmask (!%p246_p3), 1046528  }
   0xc   : > { %5004 = vmatprep.mubr.msk.bf16.mxu1 (!%p246_p3), %vm5562_vm1, %v5561_v2  ;;  %4998 = vmatprep.mubr.msk.bf16.mxu0 (!%p246_p3), %vm5562_vm1, %v5561_v2  ;;  %v5668_v7 = vsel (!%p246_p3), %vm400_vm0, %v4614_v5, 0  ;;  %v4613_v13 = vld [vmem:[%s6322_s3 + $0x4] sm:$0x3] (!%p246_p3)  ;;  %v4616_v16 = vld [vmem:[%s6322_s3 + $0xa] sm:$0x3] (!%p246_p3)  ;;  %vm904_vm6 = vcmask (!%p246_p3), 27648  }
   0xd   : > { %5008 = vmatprep.subr.bf16.mxu0 (!%p246_p3), %v5561_v2  ;;  %5014 = vmatprep.subr.bf16.mxu1 (!%p246_p3), %v5561_v2  ;;  %v5693_v17 = vsel (!%p246_p3), %vm400_vm0, %v4613_v13, 0  ;;  %v5703_v22 = vsel (!%p246_p3), %vm400_vm0, %v4616_v16, 0  ;;  %v4615_v25 = vld [vmem:[%s6322_s3 + $0x8] sm:$0x3] (!%p246_p3)  ;;  %v4618_v32 = vld [vmem:[%s6322_s3 + $0xe] sm:$0x3] (!%p246_p3) }
   0xe   : > { %v5726_v36 = vsel (!%p246_p3), %vm400_vm0, %v4615_v25, 0  ;;  %v5736_v42 = vsel (!%p246_p3), %vm400_vm0, %v4618_v32, 0  ;;  %v4617_v45 = vld [vmem:[%s6322_s3 + $0xc] sm:$0x3] (!%p246_p3)  ;;  %v4619_v56 = vld [vmem:[%s6322_s3 + $0x10] sm:$0x3] (!%p246_p3) }
   0xf   : > { %v5754_v51 = vsel (!%p246_p3), %vm400_vm0, %v4617_v45, 0  ;;  %v5772_v59 = vsel (!%p246_p3), %vm400_vm0, %v4619_v56, 0 }
  0x10   : > { %s6336_s19 = smov (!%p304_p5, %s5547_s19), 1  ;;  %s6338_s29 = smov (!%p306_p6, %s4602_s29), 15 }
  0x11   : > { %s5429_s30 = smul.u32 48, %s6336_s19  ;;  %s4610_s15 = sshll.u32 %s6336_s19, 5 }
  0x12   : > { %s5428_s6 = smul.u32 3, %s6338_s29 }
  0x14   : > { %s310_s7 = sadd.s32 %s5429_s30, %s5428_s6 }
  0x15   : > { %s4603_s10 = sshll.u32 %s310_s7, 2 }
  0x16   : > { %s5664_s13 = scalar_lea.vmem %s6319_s0, %s4603_s10  ;;  %s5674_s16 = scalar_lea.vmem %s6320_s1, %s4603_s10 }
  0x17   : > { %v5472_v6 = vld [vmem:[%s5664_s13] sm:$0xff]   ;;  %v5473_v8 = vld [vmem:[%s5664_s13 + $0x8] ss:$0 sps:$4 sm:$0x11]   ;;  %s5687_s27 = scalar_lea.vmem %s6321_s2, %s4603_s10  ;;  %v5730_v38 = vld [vmem:[%s5664_s13 + $0xc] sm:$0xff]  }
  0x18   : > { %5005 = vmatmul.mubr.msk.bf16.vlgmr.msra.gmra.mrb[0].mxu1 %vm396_vm2, %v5472_v6  ;;  %v385_v9 = vshrl.u32 %v5472_v6, 16  ;;  %v387_v10 = vshll.u32 %v5472_v6, 16  ;;  %v392_v11 = vshll.u32 %v5473_v8, 16  ;;  %v5474_v18 = vld [vmem:[%s5674_s16] sm:$0xff]   ;;  %v492_v23 = vrot.slane %v5472_v6, 1  ;;  %v5480_v61 = vld [vmem:[%s5674_s16 + $0xc] sm:$0xff]  }
  0x19   : > { %5015 = vmatpush3.bf16.msra.mxu1 %v5668_v7  ;;  %5016 = vmatprep.mubr.msk.bf16.mxu1 %vm5562_vm1, %v5561_v2  ;;  %v5475_v19 = vld [vmem:[%s5674_s16 + $0x8] ss:$0 sps:$4 sm:$0x11]   ;;  %v5699_v21 = vld [vmem:[%s5687_s27] sm:$0xff]   ;;  %v493_v24 = vrot.slane %v5473_v8, 1  ;;  %v603_v26 = vshll.u32 %v5474_v18, 16 }
  0x1a   : > { %v389_v12 = vrot.slane %v387_v10, 1  ;;  %5026 = vmatprep.subr.bf16.mxu1 %v5561_v2  ;;  %v394_v14 = vrot.slane %v392_v11, 1  ;;  %v661_v27 = vrot.slane %v5474_v18, 1  ;;  %v662_v28 = vrot.slane %v5475_v19, 1  ;;  %v5482_v16 = vld [vmem:[%s5687_s27 + $0xc] sm:$0xff]  }
  0x1b   : > { %v5717_v29 = vld [vmem:[%s5687_s27 + $0x8] ss:$0 sps:$4 sm:$0x11]   ;;  %v772_v30 = vshll.u32 %v5699_v21, 16  ;;  %v601_v31 = vshrl.u32 %v5474_v18, 16  ;;  %v494_v33 = vsel %vm491_vm4, %v492_v23, %v493_v24  ;;  %v605_v34 = vrot.slane %v603_v26, 1 }
  0x1c   : > { %v390_v15 = vor.u32 %v389_v12, %v385_v9  ;;  %v608_v35 = vshll.u32 %v5475_v19, 16  ;;  %v770_v37 = vshrl.u32 %v5699_v21, 16  ;;  %v663_v39 = vsel %vm491_vm4, %v661_v27, %v662_v28  ;;  %v5479_v49 = vld [vmem:[%s5664_s13 + $0x14] ss:$0 sps:$4 sm:$0x11]  }
  0x1d   : > { %v774_v40 = vrot.slane %v772_v30, 1  ;;  %v777_v41 = vshll.u32 %v5717_v29, 16  ;;  %v606_v43 = vor.u32 %v605_v34, %v601_v31  ;;  %v930_v46 = vshll.u32 %v5730_v38, 16  ;;  %v5481_v1 = vld [vmem:[%s5674_s16 + $0x14] ss:$0 sps:$4 sm:$0x11]  }
  0x1e   : > { %v395_v20 = vsel %vm383_vm3, %v390_v15, %v394_v14  ;;  %v610_v44 = vrot.slane %v608_v35, 1  ;;  %v928_v53 = vshrl.u32 %v5730_v38, 16  ;;  %v935_v55 = vshll.u32 %v5479_v49, 16  ;;  %v5487_v45 = vld [vmem:[%s5674_s16 + $0x20] ss:$0 sps:$4 sm:$0x11]  }
  0x1f   : > { %4999 = vmatmul.mubr.msk.bf16.vlgmr.msra.gmra.mrb[0].mxu0 %vm396_vm2, %v395_v20  ;;  %v775_v47 = vor.u32 %v774_v40, %v770_v37  ;;  %v779_v48 = vrot.slane %v777_v41, 1  ;;  %v932_v54 = vrot.slane %v930_v46, 1  ;;  %v830_v62 = vrot.slane %v5699_v21, 1  ;;  %v5856_v46 = vld [vmem:[%s5687_s27 + $0x18] sm:$0xff]  }
  0x20   : > { %5009 = vmatpush3.bf16.msra.mxu0 %v5693_v17  ;;  %5010 = vmatprep.mubr.msk.bf16.mxu0 %vm5562_vm1, %v5561_v2  ;;  %v611_v50 = vsel %vm383_vm3, %v606_v43, %v610_v44  ;;  %v937_v58 = vrot.slane %v935_v55, 1  ;;  %v831_v63 = vrot.slane %v5717_v29, 1  ;;  %v1026_v0 = vrot.slane %v5730_v38, 1  ;;  %v5484_v29 = vld [vmem:[%s5664_s13 + $0x18] sm:$0xff]  }
  0x21   : > { %5017 = vmatmul.mubr.msk.bf16.vlgmr.msra.gmra.mrb[4].mxu1 %vm396_vm2, %v5474_v18  ;;  %5020 = vmatprep.subr.bf16.mxu0 %v5561_v2  ;;  %v780_v52 = vsel %vm383_vm3, %v775_v47, %v779_v48  ;;  %v933_v57 = vor.u32 %v932_v54, %v928_v53  ;;  %v1027_v5 = vrot.slane %v5479_v49, 1  ;;  %v1131_v6 = vshll.u32 %v5480_v61, 16  ;;  %v5483_v18 = vld [vmem:[%s5687_s27 + $0x14] ss:$0 sps:$4 sm:$0x11]   ;;  %v5486_v44 = vld [vmem:[%s5674_s16 + $0x18] sm:$0xff]  }
  0x22   : > { %5027 = vmatpush3.bf16.msra.mxu1 %v5703_v22  ;;  %5028 = vmatprep.mubr.msk.bf16.mxu1 %vm5562_vm1, %v5561_v2  ;;  %v832_v8 = vsel %vm491_vm4, %v830_v62, %v831_v63  ;;  %v1136_v9 = vshll.u32 %v5481_v1, 16  ;;  %v1129_v11 = vshrl.u32 %v5480_v61, 16  ;;  %v1186_v19 = vrot.slane %v5480_v61, 1  ;;  %v5489_v53 = vld [vmem:[%s5687_s27 + $0x20] ss:$0 sps:$4 sm:$0x11]  }
  0x23   : > { %5038 = vmatprep.subr.bf16.mxu1 %v5561_v2  ;;  %v938_v60 = vsel %vm383_vm3, %v933_v57, %v937_v58  ;;  %v1028_v10 = vsel %vm491_vm4, %v1026_v0, %v1027_v5  ;;  %v1133_v12 = vrot.slane %v1131_v6, 1  ;;  %v1187_v20 = vrot.slane %v5481_v1, 1  ;;  %v5874_v0 = vld [vmem:[%s5664_s13 + $0x24] sm:$0xff]  }
  0x24   : > { %v1138_v13 = vrot.slane %v1136_v9, 1  ;;  %v1346_v23 = vrot.slane %v5482_v16, 1  ;;  %v1347_v24 = vrot.slane %v5483_v18, 1  ;;  %v1289_v26 = vshrl.u32 %v5482_v16, 16 }
  0x25   : > { %v1134_v14 = vor.u32 %v1133_v12, %v1129_v11  ;;  %v1188_v25 = vsel %vm491_vm4, %v1186_v19, %v1187_v20  ;;  %v1296_v28 = vshll.u32 %v5483_v18, 16  ;;  %v1437_v34 = vshll.u32 %v5484_v29, 16  ;;  %v5491_v9 = vld [vmem:[%s5664_s13 + $0x2c] ss:$0 sps:$4 sm:$0x11]   ;;  %v5492_v20 = vld [vmem:[%s5674_s16 + $0x24] sm:$0xff]  }
  0x26   : > { %v1348_v30 = vsel %vm491_vm4, %v1346_v23, %v1347_v24  ;;  %v1435_v37 = vshrl.u32 %v5484_v29, 16  ;;  %v1533_v47 = vrot.slane %v5484_v29, 1  ;;  %v1638_v49 = vshll.u32 %v5486_v44, 16 }
  0x27   : > { %5011 = vmatmul.mubr.msk.bf16.vlgmr.msra.gmra.mrb[4].mxu0 %vm396_vm2, %v494_v33  ;;  %v1139_v15 = vsel %vm383_vm3, %v1134_v14, %v1138_v13  ;;  %v1298_v32 = vrot.slane %v1296_v28, 1  ;;  %v5485_v33 = vld [vmem:[%s5664_s13 + $0x20] ss:$0 sps:$4 sm:$0x11]   ;;  %v1798_v54 = vshll.u32 %v5856_v46, 16  ;;  %v1636_v56 = vshrl.u32 %v5486_v44, 16 }
  0x28   : > { %5021 = vmatpush3.bf16.msra.mxu0 %v5726_v36  ;;  %5022 = vmatprep.mubr.msk.bf16.mxu0 %vm5562_vm1, %v5561_v2  ;;  %v1534_v48 = vrot.slane %v5485_v33, 1  ;;  %v1640_v57 = vrot.slane %v1638_v49, 1  ;;  %v1643_v58 = vshll.u32 %v5487_v45, 16  ;;  %v1803_v63 = vshll.u32 %v5489_v53, 16  ;;  %v5496_v49 = vld [vmem:[%s5664_s13 + $0x30] sm:$0xff]  }
  0x29   : > { %5029 = vmatmul.mubr.msk.bf16.vlgmr.msra.gmra.mrb[8].mxu1 %vm396_vm2, %v663_v39  ;;  %5032 = vmatprep.subr.bf16.mxu0 %v5561_v2  ;;  %v1442_v39 = vshll.u32 %v5485_v33, 16  ;;  %v1800_v62 = vrot.slane %v1798_v54, 1  ;;  %v1942_v13 = vshrl.u32 %v5874_v0, 16  ;;  %v1854_v23 = vrot.slane %v5489_v53, 1 }
  0x2a   : > { %5039 = vmatpush3.bf16.msra.mxu1 %v5736_v42  ;;  %5040 = vmatprep.mubr.msk.bf16.mxu1 %vm5562_vm1, %v5561_v2  ;;  %v1535_v55 = vsel %vm491_vm4, %v1533_v47, %v1534_v48  ;;  %v1641_v1 = vor.u32 %v1640_v57, %v1636_v56  ;;  %v1645_v5 = vrot.slane %v1643_v58, 1  ;;  %v2040_v24 = vrot.slane %v5874_v0, 1  ;;  %v5497_v54 = vld [vmem:[%s5664_s13 + $0x38] ss:$0 sps:$4 sm:$0x11]  }
  0x2b   : > { %5050 = vmatprep.subr.bf16.mxu1 %v5561_v2  ;;  %v1444_v41 = vrot.slane %v1442_v39, 1  ;;  %v2200_v39 = vrot.slane %v5492_v20, 1  ;;  %v2449_v57 = vshrl.u32 %v5496_v49, 16 }
  0x2c   : > { %v1646_v11 = vsel %vm383_vm3, %v1641_v1, %v1645_v5  ;;  %v5499_v1 = vld [vmem:[%s5674_s16 + $0x38] ss:$0 sps:$4 sm:$0x11]   ;;  %v5982_v5 = vld [vmem:[%s5687_s27 + $0x30] sm:$0xff]  }
  0x2f   : > { %5023 = vmatmul.mubr.msk.bf16.vlgmr.msra.gmra.mrb[8].mxu0 %vm396_vm2, %v611_v50  ;;  %v1693_v50 = vrot.slane %v5486_v44, 1 }
  0x30   : > { %5033 = vmatpush3.bf16.msra.mxu0 %v5754_v51  ;;  %5034 = vmatprep.mubr.msk.bf16.mxu0 %vm5562_vm1, %v5561_v2 }
  0x31   : > { %5041 = vmatmul.mubr.msk.bf16.vlgmr.msra.gmra.mrb[12].mxu1 %vm396_vm2, %v780_v52  ;;  %5044 = vmatprep.subr.bf16.mxu0 %v5561_v2  ;;  %v1694_v52 = vrot.slane %v5487_v45, 1 }
  0x32   : > { %5051 = vmatpush3.bf16.msra.mxu1 %v5636_v3  ;;  %5052 = vmatprep.mubr.msk.bf16.mxu1 %vm5562_vm1, %v5561_v2 }
  0x33   : > { %5062 = vmatprep.subr.bf16.mxu1 %v5561_v2 }
  0x37   : > { %5035 = vmatmul.mubr.msk.bf16.vlgmr.msra.gmra.mrb[12].mxu0 %vm396_vm2, %v5699_v21  ;;  %v1291_v21 = vshll.u32 %v5482_v16, 16 }
  0x38   : > { %5045 = vmatpush3.bf16.msra.mxu0 %v5772_v59  ;;  %5046 = vmatprep.mubr.msk.bf16.mxu0 %vm5562_vm1, %v5561_v2 }
  0x39   : > { %5053 = vmatmul.mubr.msk.bf16.vlgmr.msra.gmra.mrb[16].mxu1 %vm396_vm2, %v938_v60  ;;  %5056 = vmatprep.subr.bf16.mxu0 %v5561_v2  ;;  %v1293_v27 = vrot.slane %v1291_v21, 1  ;;  %v1695_v60 = vsel %vm491_vm4, %v1693_v50, %v1694_v52  ;;  %v1853_v21 = vrot.slane %v5856_v46, 1 }
  0x3a   : > { %5063 = vmatpush3.bf16.msra.mxu1 %v5693_v17  ;;  %5064 = vmatprep.mubr.msk.bf16.mxu1 %vm5562_vm1, %v5561_v2 }
  0x3b   : > { %5074 = vmatprep.subr.bf16.mxu1 %v5561_v2  ;;  %v1294_v31 = vor.u32 %v1293_v27, %v1289_v26  ;;  %v5493_v26 = vld [vmem:[%s5674_s16 + $0x2c] ss:$0 sps:$4 sm:$0x11]   ;;  %v2145_v27 = vshll.u32 %v5492_v20, 16  ;;  %v1855_v28 = vsel %vm491_vm4, %v1853_v21, %v1854_v23 }
  0x3d   : > { %v1299_v35 = vsel %vm383_vm3, %v1294_v31, %v1298_v32  ;;  %v2147_v31 = vrot.slane %v2145_v27, 1  ;;  %v2150_v32 = vshll.u32 %v5493_v26, 16 }
  0x3f   : > { %5047 = vmatmul.mubr.msk.bf16.vlgmr.msra.gmra.mrb[16].mxu0 %vm396_vm2, %v832_v8  ;;  %v1805_v8 = vrot.slane %v1803_v63, 1 }
  0x40   : > { %5057 = vmatpush3.bf16.msra.mxu0 %v5639_v4  ;;  %5058 = vmatprep.mubr.msk.bf16.mxu0 %vm5562_vm1, %v5561_v2 }
  0x41   : > { %5065 = vmatmul.mubr.msk.bf16.vlgmr.msra.gmra.mrb[20].mxu1 %vm396_vm2, %v1028_v10  ;;  %5068 = vmatprep.subr.bf16.mxu0 %v5561_v2  ;;  %v1944_v10 = vshll.u32 %v5874_v0, 16 }
  0x42   : > { %5075 = vmatpush3.bf16.msra.mxu1 %v5726_v36  ;;  %5076 = vmatprep.mubr.msk.bf16.mxu1 %vm5562_vm1, %v5561_v2 }
  0x43   : > { %5086 = vmatprep.subr.bf16.mxu1 %v5561_v2  ;;  %v1946_v14 = vrot.slane %v1944_v10, 1 }
  0x47   : > { %5059 = vmatmul.mubr.msk.bf16.vlgmr.msra.gmra.mrb[20].mxu0 %vm396_vm2, %v5730_v38  ;;  %v1439_v38 = vrot.slane %v1437_v34, 1  ;;  %v2152_v34 = vrot.slane %v2150_v32, 1 }
  0x48   : > { %5069 = vmatpush3.bf16.msra.mxu0 %v5668_v7  ;;  %5070 = vmatprep.mubr.msk.bf16.mxu0 %vm5562_vm1, %v5561_v2 }
  0x49   : > { %5077 = vmatmul.mubr.msk.bf16.vlgmr.msra.gmra.mrb[24].mxu1 %vm396_vm2, %v1139_v15  ;;  %5080 = vmatprep.subr.bf16.mxu0 %v5561_v2  ;;  %v1440_v40 = vor.u32 %v1439_v38, %v1435_v37  ;;  %v1949_v15 = vshll.u32 %v5491_v9, 16  ;;  %v5494_v37 = vld [vmem:[%s5687_s27 + $0x24] sm:$0xff]   ;;  %v5495_v38 = vld [vmem:[%s5687_s27 + $0x2c] ss:$0 sps:$4 sm:$0x11]  }
  0x4a   : > { %5087 = vmatpush3.bf16.msra.mxu1 %v5754_v51  ;;  %5088 = vmatprep.mubr.msk.bf16.mxu1 %vm5562_vm1, %v5561_v2  ;;  %v2310_v48 = vshll.u32 %v5495_v38, 16 }
  0x4b   : > { %5098 = vmatprep.subr.bf16.mxu1 %v5561_v2  ;;  %v1445_v43 = vsel %vm383_vm3, %v1440_v40, %v1444_v41  ;;  %v1951_v18 = vrot.slane %v1949_v15, 1  ;;  %v2201_v40 = vrot.slane %v5493_v26, 1  ;;  %v2305_v41 = vshll.u32 %v5494_v37, 16 }
  0x4c   : > { %v2312_v53 = vrot.slane %v2310_v48, 1 }
  0x4d   : > { %v2202_v45 = vsel %vm491_vm4, %v2200_v39, %v2201_v40  ;;  %v2307_v47 = vrot.slane %v2305_v41, 1  ;;  %v5504_v40 = vld [vmem:[%s5674_s16 + $0x3c] sm:$0xff]   ;;  %v2867_v41 = vrot.slane %v5982_v5, 1 }
  0x4f   : > { %5071 = vmatmul.mubr.msk.bf16.vlgmr.msra.gmra.mrb[24].mxu0 %vm396_vm2, %v5480_v61  ;;  %v1796_v61 = vshrl.u32 %v5856_v46, 16 }
  0x50   : > { %5081 = vmatpush3.bf16.msra.mxu0 %v5703_v22  ;;  %5082 = vmatprep.mubr.msk.bf16.mxu0 %vm5562_vm1, %v5561_v2 }
  0x51   : > { %5089 = vmatmul.mubr.msk.bf16.vlgmr.msra.gmra.mrb[28].mxu1 %vm396_vm2, %v5482_v16  ;;  %5092 = vmatprep.subr.bf16.mxu0 %v5561_v2  ;;  %v1801_v6 = vor.u32 %v1800_v62, %v1796_v61  ;;  %v1947_v16 = vor.u32 %v1946_v14, %v1942_v13  ;;  %v2812_v13 = vshll.u32 %v5982_v5, 16 }
  0x52   : > { %5099 = vmatpush3.bf16.msra.mxu1 %v5772_v59  ;;  %5100 = vmatprep.mubr.msk.bf16.mxu1 %vm5562_vm1, %v5561_v2 }
  0x53   : > { %5110 = vmatprep.subr.bf16.mxu1 %v5561_v2  ;;  %v1806_v12 = vsel %vm383_vm3, %v1801_v6, %v1805_v8  ;;  %v1952_v19 = vsel %vm383_vm3, %v1947_v16, %v1951_v18  ;;  %v2547_v6 = vrot.slane %v5496_v49, 1  ;;  %v2548_v8 = vrot.slane %v5497_v54, 1 }
  0x54   : > { %v2657_v18 = vshll.u32 %v5499_v1, 16  ;;  %v2814_v21 = vrot.slane %v2812_v13, 1  ;;  %v5509_v13 = vld [vmem:[%s5664_s13 + $0x50] ss:$0 sps:$4 sm:$0x11]  }
  0x55   : > { %v2549_v14 = vsel %vm491_vm4, %v2547_v6, %v2548_v8 }
  0x56   : > { %v2659_v26 = vrot.slane %v2657_v18, 1 }
  0x57   : > { %5083 = vmatmul.mubr.msk.bf16.vlgmr.msra.gmra.mrb[28].mxu0 %vm396_vm2, %v1188_v25  ;;  %v2041_v25 = vrot.slane %v5491_v9, 1 }
  0x58   : > { %5093 = vmatpush3.bf16.msra.mxu0 %v5736_v42  ;;  %5094 = vmatprep.mubr.msk.bf16.mxu0 %vm5562_vm1, %v5561_v2 }
  0x59   : > { %5101 = vmatmul.mubr.msk.bf16.vlgmr.msra.gmra.mrb[32].mxu1 %vm396_vm2, %v1348_v30  ;;  %5104 = vmatprep.subr.bf16.mxu0 %v5561_v2  ;;  %v2143_v30 = vshrl.u32 %v5492_v20, 16 }
  0x5a   : > { %5111 = vmatpush3.bf16.msra.mxu1 %v5639_v4  ;;  %5112 = vmatprep.mubr.msk.bf16.mxu1 %vm5562_vm1, %v5561_v2 }
  0x5b   : > { %5122 = vmatprep.subr.bf16.mxu1 %v5561_v2  ;;  %v2148_v33 = vor.u32 %v2147_v31, %v2143_v30 }
  0x5f   : > { %5095 = vmatmul.mubr.msk.bf16.vlgmr.msra.gmra.mrb[32].mxu0 %vm396_vm2, %v1299_v35  ;;  %v2153_v35 = vsel %vm383_vm3, %v2148_v33, %v2152_v34 }
  0x60   : > { %5105 = vmatpush3.bf16.msra.mxu0 %v5636_v3  ;;  %5106 = vmatprep.mubr.msk.bf16.mxu0 %vm5562_vm1, %v5561_v2 }
  0x61   : > { %5113 = vmatmul.mubr.msk.bf16.vlgmr.msra.gmra.mrb[36].mxu1 %vm396_vm2, %v5484_v29  ;;  %5116 = vmatprep.subr.bf16.mxu0 %v5561_v2  ;;  %v2042_v29 = vsel %vm491_vm4, %v2040_v24, %v2041_v25  ;;  %v6000_v24 = vld [vmem:[%s5664_s13 + $0x3c] sm:$0xff]  }
  0x62   : > { %5123 = vmatpush3.bf16.msra.mxu1 %v5668_v7  ;;  %5124 = vmatprep.mubr.msk.bf16.mxu1 %vm5562_vm1, %v5561_v2  ;;  %v2958_v30 = vshll.u32 %v6000_v24, 16  ;;  %v2956_v33 = vshrl.u32 %v6000_v24, 16 }
  0x63   : > { %5134 = vmatprep.subr.bf16.mxu1 %v5561_v2 }
  0x64   : > { %v2960_v34 = vrot.slane %v2958_v30, 1 }
  0x67   : > { %5107 = vmatmul.mubr.msk.bf16.vlgmr.msra.gmra.mrb[36].mxu0 %vm396_vm2, %v1445_v43  ;;  %v2360_v43 = vrot.slane %v5494_v37, 1 }
  0x68   : > { %5117 = vmatpush3.bf16.msra.mxu0 %v5693_v17  ;;  %5118 = vmatprep.mubr.msk.bf16.mxu0 %vm5562_vm1, %v5561_v2 }
  0x69   : > { %5125 = vmatmul.mubr.msk.bf16.vlgmr.msra.gmra.mrb[40].mxu1 %vm396_vm2, %v5486_v44  ;;  %5128 = vmatprep.subr.bf16.mxu0 %v5561_v2  ;;  %v2361_v44 = vrot.slane %v5495_v38, 1 }
  0x6a   : > { %5135 = vmatpush3.bf16.msra.mxu1 %v5703_v22  ;;  %5136 = vmatprep.mubr.msk.bf16.mxu1 %vm5562_vm1, %v5561_v2 }
  0x6b   : > { %5146 = vmatprep.subr.bf16.mxu1 %v5561_v2  ;;  %v2362_v50 = vsel %vm491_vm4, %v2360_v43, %v2361_v44  ;;  %v3054_v44 = vrot.slane %v6000_v24, 1 }
  0x6f   : > { %5119 = vmatmul.mubr.msk.bf16.vlgmr.msra.gmra.mrb[40].mxu0 %vm396_vm2, %v1535_v55  ;;  %v2451_v55 = vshll.u32 %v5496_v49, 16 }
  0x70   : > { %5129 = vmatpush3.bf16.msra.mxu0 %v5726_v36  ;;  %5130 = vmatprep.mubr.msk.bf16.mxu0 %vm5562_vm1, %v5561_v2 }
  0x71   : > { %5137 = vmatmul.mubr.msk.bf16.vlgmr.msra.gmra.mrb[44].mxu1 %vm396_vm2, %v1695_v60  ;;  %5140 = vmatprep.subr.bf16.mxu0 %v5561_v2  ;;  %v2453_v58 = vrot.slane %v2451_v55, 1  ;;  %v2456_v60 = vshll.u32 %v5497_v54, 16 }
  0x72   : > { %5147 = vmatpush3.bf16.msra.mxu1 %v5736_v42  ;;  %5148 = vmatprep.mubr.msk.bf16.mxu1 %vm5562_vm1, %v5561_v2 }
  0x73   : > { %5158 = vmatprep.subr.bf16.mxu1 %v5561_v2  ;;  %v2454_v61 = vor.u32 %v2453_v58, %v2449_v57  ;;  %v2458_v62 = vrot.slane %v2456_v60, 1  ;;  %v5506_v57 = vld [vmem:[%s5687_s27 + $0x3c] sm:$0xff]   ;;  %v5507_v58 = vld [vmem:[%s5687_s27 + $0x44] ss:$0 sps:$4 sm:$0x11]   ;;  %v3214_v60 = vrot.slane %v5504_v40, 1 }
  0x74   : > { %v3324_v8 = vshll.u32 %v5507_v58, 16 }
  0x75   : > { %v2459_v63 = vsel %vm383_vm3, %v2454_v61, %v2458_v62  ;;  %v3319_v62 = vshll.u32 %v5506_v57, 16 }
  0x77   : > { %5131 = vmatmul.mubr.msk.bf16.vlgmr.msra.gmra.mrb[44].mxu0 %vm396_vm2, %v1646_v11  ;;  %v2708_v11 = vrot.slane %v5499_v1, 1  ;;  %v3321_v6 = vrot.slane %v3319_v62, 1 }
  0x78   : > { %5141 = vmatpush3.bf16.msra.mxu0 %v5754_v51  ;;  %5142 = vmatprep.mubr.msk.bf16.mxu0 %vm5562_vm1, %v5561_v2 }
  0x79   : > { %5149 = vmatmul.mubr.msk.bf16.vlgmr.msra.gmra.mrb[48].mxu1 %vm396_vm2, %v1806_v12  ;;  %5152 = vmatprep.subr.bf16.mxu0 %v5561_v2  ;;  %v5501_v12 = vld [vmem:[%s5687_s27 + $0x38] ss:$0 sps:$4 sm:$0x11]  }
  0x7a   : > { %5159 = vmatpush3.bf16.msra.mxu1 %v5636_v3  ;;  %5160 = vmatprep.mubr.msk.bf16.mxu1 %vm5562_vm1, %v5561_v2  ;;  %v2817_v23 = vshll.u32 %v5501_v12, 16  ;;  %v2868_v43 = vrot.slane %v5501_v12, 1  ;;  %v3326_v12 = vrot.slane %v3324_v8, 1 }
  0x7b   : > { %5170 = vmatprep.subr.bf16.mxu1 %v5561_v2 }
  0x7c   : > { %v2869_v48 = vsel %vm491_vm4, %v2867_v41, %v2868_v43 }
  0x7f   : > { %5143 = vmatmul.mubr.msk.bf16.vlgmr.msra.gmra.mrb[48].mxu0 %vm396_vm2, %v5856_v46  ;;  %v2303_v46 = vshrl.u32 %v5494_v37, 16 }
  0x80   : > { %5153 = vmatpush3.bf16.msra.mxu0 %v5772_v59  ;;  %5154 = vmatprep.mubr.msk.bf16.mxu0 %vm5562_vm1, %v5561_v2 }
  0x81   : > { %5161 = vmatmul.mubr.msk.bf16.vlgmr.msra.gmra.mrb[52].mxu1 %vm396_vm2, %v1952_v19  ;;  %5164 = vmatprep.subr.bf16.mxu0 %v5561_v2  ;;  %v2308_v52 = vor.u32 %v2307_v47, %v2303_v46  ;;  %v5505_v46 = vld [vmem:[%s5674_s16 + $0x44] ss:$0 sps:$4 sm:$0x11]   ;;  %v3159_v47 = vshll.u32 %v5504_v40, 16 }
  0x82   : > { %5171 = vmatpush3.bf16.msra.mxu1 %v5693_v17  ;;  %5172 = vmatprep.mubr.msk.bf16.mxu1 %vm5562_vm1, %v5561_v2  ;;  %v3215_v61 = vrot.slane %v5505_v46, 1 }
  0x83   : > { %5182 = vmatprep.subr.bf16.mxu1 %v5561_v2  ;;  %v2313_v56 = vsel %vm383_vm3, %v2308_v52, %v2312_v53  ;;  %v3161_v52 = vrot.slane %v3159_v47, 1  ;;  %v3164_v53 = vshll.u32 %v5505_v46, 16 }
  0x84   : > { %v3216_v1 = vsel %vm491_vm4, %v3214_v60, %v3215_v61 }
  0x85   : > { %v3166_v55 = vrot.slane %v3164_v53, 1 }
  0x87   : > { %5155 = vmatmul.mubr.msk.bf16.vlgmr.msra.gmra.mrb[52].mxu0 %vm396_vm2, %v1855_v28  ;;  %v2819_v28 = vrot.slane %v2817_v23, 1 }
  0x88   : > { %5165 = vmatpush3.bf16.msra.mxu0 %v5639_v4  ;;  %5166 = vmatprep.mubr.msk.bf16.mxu0 %vm5562_vm1, %v5561_v2 }
  0x89   : > { %5173 = vmatmul.mubr.msk.bf16.vlgmr.msra.gmra.mrb[56].mxu1 %vm396_vm2, %v2042_v29  ;;  %5176 = vmatprep.subr.bf16.mxu0 %v5561_v2  ;;  %v5503_v29 = vld [vmem:[%s5664_s13 + $0x44] ss:$0 sps:$4 sm:$0x11]  }
  0x8a   : > { %5183 = vmatpush3.bf16.msra.mxu1 %v5726_v36  ;;  %5184 = vmatprep.mubr.msk.bf16.mxu1 %vm5562_vm1, %v5561_v2 }
  0x8b   : > { %5194 = vmatprep.subr.bf16.mxu1 %v5561_v2 }
  0x8f   : > { %5167 = vmatmul.mubr.msk.bf16.vlgmr.msra.gmra.mrb[56].mxu0 %vm396_vm2, %v5874_v0  ;;  %v5498_v0 = vld [vmem:[%s5674_s16 + $0x30] sm:$0xff]  }
  0x90   : > { %5177 = vmatpush3.bf16.msra.mxu0 %v5668_v7  ;;  %5178 = vmatprep.mubr.msk.bf16.mxu0 %vm5562_vm1, %v5561_v2  ;;  %v2652_v9 = vshll.u32 %v5498_v0, 16  ;;  %v2707_v10 = vrot.slane %v5498_v0, 1  ;;  %v2650_v15 = vshrl.u32 %v5498_v0, 16 }
  0x91   : > { %5185 = vmatmul.mubr.msk.bf16.vlgmr.msra.gmra.mrb[60].mxu1 %vm396_vm2, %v2153_v35  ;;  %5188 = vmatprep.subr.bf16.mxu0 %v5561_v2  ;;  %v2963_v35 = vshll.u32 %v5503_v29, 16 }
  0x92   : > { %5195 = vmatpush3.bf16.msra.mxu1 %v5754_v51  ;;  %5196 = vmatprep.mubr.msk.bf16.mxu1 %vm5562_vm1, %v5561_v2  ;;  %v2654_v16 = vrot.slane %v2652_v9, 1  ;;  %v2709_v19 = vsel %vm491_vm4, %v2707_v10, %v2708_v11  ;;  %v6081_v9 = vld [vmem:[%s5664_s13 + $0x48] sm:$0xff]  }
  0x93   : > { %5206 = vmatprep.subr.bf16.mxu1 %v5561_v2  ;;  %v2965_v38 = vrot.slane %v2963_v35, 1  ;;  %v3561_v43 = vrot.slane %v6081_v9, 1 }
  0x94   : > { %v2655_v25 = vor.u32 %v2654_v16, %v2650_v15 }
  0x96   : > { %v2660_v31 = vsel %vm383_vm3, %v2655_v25, %v2659_v26 }
  0x97   : > { %5179 = vmatmul.mubr.msk.bf16.vlgmr.msra.gmra.mrb[60].mxu0 %vm396_vm2, %v5492_v20  ;;  %v2810_v20 = vshrl.u32 %v5982_v5, 16 }
  0x98   : > { %5189 = vmatpush3.bf16.msra.mxu0 %v5703_v22  ;;  %5190 = vmatprep.mubr.msk.bf16.mxu0 %vm5562_vm1, %v5561_v2 }
  0x99   : > { %5197 = vmatmul.mubr.msk.bf16.vlgmr.msra.gmra.mrb[64].mxu1 %vm396_vm2, %v5494_v37  ;;  %5200 = vmatprep.subr.bf16.mxu0 %v5561_v2  ;;  %v2815_v27 = vor.u32 %v2814_v21, %v2810_v20  ;;  %v2961_v37 = vor.u32 %v2960_v34, %v2956_v33  ;;  %v3470_v21 = vshll.u32 %v5509_v13, 16 }
  0x9a   : > { %5207 = vmatpush3.bf16.msra.mxu1 %v5772_v59  ;;  %5208 = vmatprep.mubr.msk.bf16.mxu1 %vm5562_vm1, %v5561_v2 }
  0x9b   : > { %5218 = vmatprep.subr.bf16.mxu1 %v5561_v2  ;;  %v2820_v32 = vsel %vm383_vm3, %v2815_v27, %v2819_v28  ;;  %v2966_v39 = vsel %vm383_vm3, %v2961_v37, %v2965_v38  ;;  %v3472_v26 = vrot.slane %v3470_v21, 1  ;;  %v5510_v37 = vld [vmem:[%s5674_s16 + $0x48] sm:$0xff]  }
  0x9c   : > { %v3721_v46 = vrot.slane %v5510_v37, 1 }
  0x9f   : > { %5191 = vmatmul.mubr.msk.bf16.vlgmr.msra.gmra.mrb[64].mxu0 %vm396_vm2, %v2202_v45  ;;  %v3055_v45 = vrot.slane %v5503_v29, 1 }
  0xa0   : > { %5201 = vmatpush3.bf16.msra.mxu0 %v5736_v42  ;;  %5202 = vmatprep.mubr.msk.bf16.mxu0 %vm5562_vm1, %v5561_v2 }
  0xa1   : > { %5209 = vmatmul.mubr.msk.bf16.vlgmr.msra.gmra.mrb[68].mxu1 %vm396_vm2, %v2362_v50  ;;  %5212 = vmatprep.subr.bf16.mxu0 %v5561_v2  ;;  %v3157_v50 = vshrl.u32 %v5504_v40, 16 }
  0xa2   : > { %5219 = vmatpush3.bf16.msra.mxu1 %v5639_v4  ;;  %5220 = vmatprep.mubr.msk.bf16.mxu1 %vm5562_vm1, %v5561_v2 }
  0xa3   : > { %5230 = vmatprep.subr.bf16.mxu1 %v5561_v2  ;;  %v3162_v54 = vor.u32 %v3161_v52, %v3157_v50 }
  0xa7   : > { %5203 = vmatmul.mubr.msk.bf16.vlgmr.msra.gmra.mrb[68].mxu0 %vm396_vm2, %v2313_v56  ;;  %v3167_v56 = vsel %vm383_vm3, %v3162_v54, %v3166_v55 }
  0xa8   : > { %5213 = vmatpush3.bf16.msra.mxu0 %v5636_v3  ;;  %5214 = vmatprep.mubr.msk.bf16.mxu0 %vm5562_vm1, %v5561_v2 }
  0xa9   : > { %5221 = vmatmul.mubr.msk.bf16.vlgmr.msra.gmra.mrb[72].mxu1 %vm396_vm2, %v5496_v49  ;;  %5224 = vmatprep.subr.bf16.mxu0 %v5561_v2  ;;  %v3056_v49 = vsel %vm491_vm4, %v3054_v44, %v3055_v45  ;;  %v3562_v44 = vrot.slane %v5509_v13, 1  ;;  %v3666_v45 = vshll.u32 %v5510_v37, 16 }
  0xaa   : > { %5231 = vmatpush3.bf16.msra.mxu1 %v5668_v7  ;;  %5232 = vmatprep.mubr.msk.bf16.mxu1 %vm5562_vm1, %v5561_v2 }
  0xab   : > { %5242 = vmatprep.subr.bf16.mxu1 %v5561_v2  ;;  %v3563_v55 = vsel %vm491_vm4, %v3561_v43, %v3562_v44 }
  0xaf   : > { %5215 = vmatmul.mubr.msk.bf16.vlgmr.msra.gmra.mrb[72].mxu0 %vm396_vm2, %v2459_v63  ;;  %v3374_v63 = vrot.slane %v5506_v57, 1 }
  0xb0   : > { %5225 = vmatpush3.bf16.msra.mxu0 %v5693_v17  ;;  %5226 = vmatprep.mubr.msk.bf16.mxu0 %vm5562_vm1, %v5561_v2 }
  0xb1   : > { %5233 = vmatmul.mubr.msk.bf16.vlgmr.msra.gmra.mrb[76].mxu1 %vm396_vm2, %v5498_v0  ;;  %5236 = vmatprep.subr.bf16.mxu0 %v5561_v2  ;;  %v3375_v0 = vrot.slane %v5507_v58, 1  ;;  %v3668_v58 = vrot.slane %v3666_v45, 1 }
  0xb2   : > { %5243 = vmatpush3.bf16.msra.mxu1 %v5703_v22  ;;  %5244 = vmatprep.mubr.msk.bf16.mxu1 %vm5562_vm1, %v5561_v2 }
  0xb3   : > { %5254 = vmatprep.subr.bf16.mxu1 %v5561_v2  ;;  %v3376_v10 = vsel %vm491_vm4, %v3374_v63, %v3375_v0 }
  0xb7   : > { %5227 = vmatmul.mubr.msk.bf16.vlgmr.msra.gmra.mrb[76].mxu0 %vm396_vm2, %v2549_v14  ;;  %v3465_v14 = vshll.u32 %v6081_v9, 16 }
  0xb8   : > { %5237 = vmatpush3.bf16.msra.mxu0 %v5726_v36  ;;  %5238 = vmatprep.mubr.msk.bf16.mxu0 %vm5562_vm1, %v5561_v2 }
  0xb9   : > { %5245 = vmatmul.mubr.msk.bf16.vlgmr.msra.gmra.mrb[80].mxu1 %vm396_vm2, %v2709_v19  ;;  %5248 = vmatprep.subr.bf16.mxu0 %v5561_v2  ;;  %v3463_v19 = vshrl.u32 %v6081_v9, 16  ;;  %v3467_v20 = vrot.slane %v3465_v14, 1 }
  0xba   : > { %5255 = vmatpush3.bf16.msra.mxu1 %v5736_v42  ;;  %5256 = vmatprep.mubr.msk.bf16.mxu1 %vm5562_vm1, %v5561_v2 }
  0xbb   : > { %5266 = vmatprep.subr.bf16.mxu1 %v5561_v2  ;;  %v3468_v25 = vor.u32 %v3467_v20, %v3463_v19  ;;  %v6147_v19 = vld [vmem:[%s5664_s13 + $0x5c] ss:$0 sps:$4 sm:$0x11]  }
  0xbf   : > { %5239 = vmatmul.mubr.msk.bf16.vlgmr.msra.gmra.mrb[80].mxu0 %vm396_vm2, %v2660_v31  ;;  %v3473_v31 = vsel %vm383_vm3, %v3468_v25, %v3472_v26 }
  0xc0   : > { %5249 = vmatpush3.bf16.msra.mxu0 %v5754_v51  ;;  %5250 = vmatprep.mubr.msk.bf16.mxu0 %vm5562_vm1, %v5561_v2 }
  0xc1   : > { %5257 = vmatmul.mubr.msk.bf16.vlgmr.msra.gmra.mrb[84].mxu1 %vm396_vm2, %v2820_v32  ;;  %5260 = vmatprep.subr.bf16.mxu0 %v5561_v2 }
  0xc2   : > { %5267 = vmatpush3.bf16.msra.mxu1 %v5636_v3  ;;  %5268 = vmatprep.mubr.msk.bf16.mxu1 %vm5562_vm1, %v5561_v2 }
  0xc3   : > { %5278 = vmatprep.subr.bf16.mxu1 %v5561_v2 }
  0xc7   : > { %5251 = vmatmul.mubr.msk.bf16.vlgmr.msra.gmra.mrb[84].mxu0 %vm396_vm2, %v5982_v5  ;;  %v3317_v5 = vshrl.u32 %v5506_v57, 16 }
  0xc8   : > { %5261 = vmatpush3.bf16.msra.mxu0 %v5772_v59  ;;  %5262 = vmatprep.mubr.msk.bf16.mxu0 %vm5562_vm1, %v5561_v2 }
  0xc9   : > { %5269 = vmatmul.mubr.msk.bf16.vlgmr.msra.gmra.mrb[88].mxu1 %vm396_vm2, %v2966_v39  ;;  %5272 = vmatprep.subr.bf16.mxu0 %v5561_v2  ;;  %v3322_v11 = vor.u32 %v3321_v6, %v3317_v5  ;;  %v5511_v39 = vld [vmem:[%s5674_s16 + $0x50] ss:$0 sps:$4 sm:$0x11]  }
  0xca   : > { %5279 = vmatpush3.bf16.msra.mxu1 %v5693_v17  ;;  %5280 = vmatprep.mubr.msk.bf16.mxu1 %vm5562_vm1, %v5561_v2  ;;  %v3671_v60 = vshll.u32 %v5511_v39, 16 }
  0xcb   : > { %5290 = vmatprep.subr.bf16.mxu1 %v5561_v2  ;;  %v3327_v16 = vsel %vm383_vm3, %v3322_v11, %v3326_v12 }
  0xcc   : > { %v3673_v14 = vrot.slane %v3671_v60, 1 }
  0xcf   : > { %5263 = vmatmul.mubr.msk.bf16.vlgmr.msra.gmra.mrb[88].mxu0 %vm396_vm2, %v2869_v48  ;;  %v3722_v48 = vrot.slane %v5511_v39, 1 }
  0xd0   : > { %5273 = vmatpush3.bf16.msra.mxu0 %v5639_v4  ;;  %5274 = vmatprep.mubr.msk.bf16.mxu0 %vm5562_vm1, %v5561_v2 }
  0xd1   : > { %5281 = vmatmul.mubr.msk.bf16.vlgmr.msra.gmra.mrb[92].mxu1 %vm396_vm2, %v3056_v49  ;;  %5284 = vmatprep.subr.bf16.mxu0 %v5561_v2  ;;  %v6126_v49 = vld [vmem:[%s5687_s27 + $0x50] ss:$0 sps:$4 sm:$0x11]   ;;  %v3723_v5 = vsel %vm491_vm4, %v3721_v46, %v3722_v48 }
  0xd2   : > { %5291 = vmatpush3.bf16.msra.mxu1 %v5726_v36  ;;  %5292 = vmatprep.mubr.msk.bf16.mxu1 %vm5562_vm1, %v5561_v2  ;;  %v3882_v60 = vrot.slane %v6126_v49, 1 }
  0xd3   : > { %5302 = vmatprep.subr.bf16.mxu1 %v5561_v2 }
  0xd7   : > { %5275 = vmatmul.mubr.msk.bf16.vlgmr.msra.gmra.mrb[92].mxu0 %vm396_vm2, %v6000_v24 }
  0xd8   : > { %5285 = vmatpush3.bf16.msra.mxu0 %v5668_v7  ;;  %5286 = vmatprep.mubr.msk.bf16.mxu0 %vm5562_vm1, %v5561_v2 }
  0xd9   : > { %5293 = vmatmul.mubr.msk.bf16.vlgmr.msra.gmra.mrb[96].mxu1 %vm396_vm2, %v3167_v56  ;;  %5296 = vmatprep.subr.bf16.mxu0 %v5561_v2 }
  0xda   : > { %5303 = vmatpush3.bf16.msra.mxu1 %v5754_v51  ;;  %5304 = vmatprep.mubr.msk.bf16.mxu1 %vm5562_vm1, %v5561_v2 }
  0xdb   : > { %5314 = vmatprep.subr.bf16.mxu1 %v5561_v2 }
  0xdf   : > { %5287 = vmatmul.mubr.msk.bf16.vlgmr.msra.gmra.mrb[96].mxu0 %vm396_vm2, %v5504_v40  ;;  %v6113_v40 = vld [vmem:[%s5687_s27 + $0x48] sm:$0xff]  }
  0xe0   : > { %5297 = vmatpush3.bf16.msra.mxu0 %v5703_v22  ;;  %5298 = vmatprep.mubr.msk.bf16.mxu0 %vm5562_vm1, %v5561_v2  ;;  %v3826_v50 = vshll.u32 %v6113_v40, 16  ;;  %v3824_v6 = vshrl.u32 %v6113_v40, 16 }
  0xe1   : > { %5305 = vmatmul.mubr.msk.bf16.vlgmr.msra.gmra.mrb[100].mxu1 %vm396_vm2, %v5506_v57  ;;  %5308 = vmatprep.subr.bf16.mxu0 %v5561_v2  ;;  %v3664_v57 = vshrl.u32 %v5510_v37, 16 }
  0xe2   : > { %5315 = vmatpush3.bf16.msra.mxu1 %v5772_v59  ;;  %5316 = vmatprep.mubr.msk.bf16.mxu1 %vm5562_vm1, %v5561_v2  ;;  %v3828_v8 = vrot.slane %v3826_v50, 1 }
  0xe3   : > { %5326 = vmatprep.subr.bf16.mxu1 %v5561_v2  ;;  %v3669_v13 = vor.u32 %v3668_v58, %v3664_v57  ;;  %v3881_v58 = vrot.slane %v6113_v40, 1 }
  0xe5   : > { %v3674_v25 = vsel %vm383_vm3, %v3669_v13, %v3673_v14 }
  0xe7   : > { %5299 = vmatmul.mubr.msk.bf16.vlgmr.msra.gmra.mrb[100].mxu0 %vm396_vm2, %v3216_v1 }
  0xe8   : > { %5309 = vmatpush3.bf16.msra.mxu0 %v5736_v42  ;;  %5310 = vmatprep.mubr.msk.bf16.mxu0 %vm5562_vm1, %v5561_v2 }
  0xe9   : > { %5317 = vmatmul.mubr.msk.bf16.vlgmr.msra.gmra.mrb[104].mxu1 %vm396_vm2, %v3376_v10  ;;  %5320 = vmatprep.subr.bf16.mxu0 %v5561_v2  ;;  %v6135_v10 = vld [vmem:[%s5664_s13 + $0x54] sm:$0xff]   ;;  %s4609_s13 = sshll.u32 %s6338_s29, 1 }
  0xea   : > { %5327 = vmatpush3.bf16.msra.mxu1 %v5639_v4  ;;  %5328 = vmatprep.mubr.msk.bf16.mxu1 %vm5562_vm1, %v5561_v2  ;;  %v3972_v20 = vshll.u32 %v6135_v10, 16  ;;  %s343_s19 = sadd.s32 %s4610_s15, %s4609_s13 }
  0xeb   : > { %v484_v15 = vpop.f32.mrb[0].mxu1  ;;  %5338 = vmatprep.subr.bf16.mxu1 %v5561_v2  ;;  %s4611_s29 = sshll.u32 %s343_s19, 2 }
  0xec   : > { %v5006_v18 = vpop.f32.mrb[1].mxu1  ;;  %s6212_s26 = scalar_lea.vmem %s6324_s5, %s4611_s29 }
  0xed   : > { %v487_v23 = vpop.f32.mrb[2].mxu1 }
  0xee   : > { %v5007_v24 = vpop.f32.mrb[3].mxu1 }
  0xef   : > { %5311 = vmatmul.mubr.msk.bf16.vlgmr.msra.gmra.mrb[104].mxu0 %vm396_vm2, %v3327_v16  ;;  %v3829_v16 = vor.u32 %v3828_v8, %v3824_v6  ;;  %v3883_v8 = vsel %vm491_vm4, %v3881_v58, %v3882_v60 }
  0xf0   : > { %5321 = vmatpush3.bf16.msra.mxu0 %v5636_v3  ;;  %5322 = vmatprep.mubr.msk.bf16.mxu0 %vm5562_vm1, %v5561_v2 }
  0xf1   : > { %5329 = vmatmul.mubr.msk.bf16.vlgmr.msra.gmra.mrb[108].mxu1 %vm396_vm2, %v6081_v9  ;;  %5332 = vmatprep.subr.bf16.mxu0 %v5561_v2  ;;  %v3831_v9 = vshll.u32 %v6126_v49, 16  ;;  %v6195_v49 = vld [vmem:[%s5674_s16 + $0x5c] ss:$0 sps:$4 sm:$0x11]  }
  0xf2   : > { %v438_v27 = vpop.f32.mrb[0].mxu0  ;;  %5339 = vmatpush3.bf16.msra.mxu1 %v5668_v7  ;;  %5340 = vmatprep.mubr.msk.bf16.mxu1 %vm5562_vm1, %v5561_v2  ;;  %v4229_v60 = vrot.slane %v6195_v49, 1 }
  0xf3   : > { %v485_v28 = vadd.f32 %v484_v15, %v438_v27  ;;  %v5000_v29 = vpop.f32.mrb[1].mxu0  ;;  %5350 = vmatprep.subr.bf16.mxu1 %v5561_v2  ;;  %v3833_v18 = vrot.slane %v3831_v9, 1 }
  0xf4   : > { %v441_v30 = vpop.f32.mrb[2].mxu0  ;;  %v589_v32 = vpop.f32.mrb[4].mxu1 }
  0xf5   : > { %v488_v33 = vadd.f32 %v487_v23, %v441_v30  ;;  %v5001_v34 = vpop.f32.mrb[3].mxu0  ;;  %v5018_v35 = vpop.f32.mrb[5].mxu1 }
  0xf6   : > { %v592_v38 = vpop.f32.mrb[6].mxu1  ;;  %v3974_v34 = vrot.slane %v3972_v20, 1  ;;  %v3977_v35 = vshll.u32 %v6147_v19, 16 }
  0xf7   : > { %5323 = vmatmul.mubr.msk.bf16.vlgmr.msra.gmra.mrb[108].mxu0 %vm396_vm2, %v3473_v31  ;;  %v5019_v41 = vpop.f32.mrb[7].mxu1 }
  0xf8   : > { %5333 = vmatpush3.bf16.msra.mxu0 %v5693_v17  ;;  %5334 = vmatprep.mubr.msk.bf16.mxu0 %vm5562_vm1, %v5561_v2  ;;  %v3979_v43 = vrot.slane %v3977_v35, 1 }
  0xf9   : > { %5341 = vmatmul.mubr.msk.bf16.vlgmr.msra.gmra.mrb[112].mxu1 %vm396_vm2, %v5510_v37  ;;  %5344 = vmatprep.subr.bf16.mxu0 %v5561_v2 }
  0xfa   : > { %v535_v47 = vpop.f32.mrb[4].mxu0  ;;  %5351 = vmatpush3.bf16.msra.mxu1 %v5703_v22  ;;  %5352 = vmatprep.mubr.msk.bf16.mxu1 %vm5562_vm1, %v5561_v2 }
  0xfb   : > { %v542_v52 = vadd.f32 %v535_v47, %v485_v28  ;;  %v5012_v53 = vpop.f32.mrb[5].mxu0  ;;  %5362 = vmatprep.subr.bf16.mxu1 %v5561_v2 }
  0xfc   : > { %v538_v54 = vpop.f32.mrb[6].mxu0  ;;  %v704_v56 = vpop.f32.mrb[8].mxu1 }
  0xfd   : > { %v543_v61 = vadd.f32 %v538_v54, %v488_v33  ;;  %v5013_v62 = vpop.f32.mrb[7].mxu0  ;;  %v596_v63 = vadd.f32 %v589_v32, %v542_v52  ;;  %v5030_v0 = vpop.f32.mrb[9].mxu1  ;;  %v3834_v32 = vsel %vm383_vm3, %v3829_v16, %v3833_v18  ;;  %v3970_v33 = vshrl.u32 %v6135_v10, 16 }
  0xfe   : > { %v707_v1 = vpop.f32.mrb[10].mxu1  ;;  %v4068_v62 = vrot.slane %v6135_v10, 1 }
  0xff   : > { %5335 = vmatmul.mubr.msk.bf16.vlgmr.msra.gmra.mrb[112].mxu0 %vm396_vm2, %v3563_v55  ;;  %v597_v11 = vadd.f32 %v592_v38, %v543_v61  ;;  %v5031_v12 = vpop.f32.mrb[11].mxu1  ;;  %v3975_v41 = vor.u32 %v3974_v34, %v3970_v33  ;;  %v6171_v55 = vld [vmem:[%s5674_s16 + $0x54] sm:$0xff]   ;;  %v6185_v61 = vld [vmem:[%s6323_s4] ss:$0 sm:$0xff] }
 0x100   : > { %5345 = vmatpush3.bf16.msra.mxu0 %v5726_v36  ;;  %5346 = vmatprep.mubr.msk.bf16.mxu0 %vm5562_vm1, %v5561_v2  ;;  %v4173_v0 = vshll.u32 %v6171_v55, 16  ;;  %v4171_v16 = vshrl.u32 %v6171_v55, 16  ;;  %v4228_v58 = vrot.slane %v6171_v55, 1 }
 0x101   : > { %5353 = vmatmul.mubr.msk.bf16.vlgmr.msra.gmra.mrb[116].mxu1 %vm396_vm2, %v3723_v5  ;;  %5356 = vmatprep.subr.bf16.mxu0 %v5561_v2 }
 0x102   : > { %v652_v15 = vpop.f32.mrb[8].mxu0  ;;  %5363 = vmatpush3.bf16.msra.mxu1 %v5736_v42  ;;  %5364 = vmatprep.mubr.msk.bf16.mxu1 %vm5562_vm1, %v5561_v2  ;;  %v4175_v18 = vrot.slane %v4173_v0, 1 }
 0x103   : > { %v659_v21 = vadd.f32 %v652_v15, %v596_v63  ;;  %v5024_v23 = vpop.f32.mrb[9].mxu0  ;;  %5374 = vmatprep.subr.bf16.mxu1 %v5561_v2 }
 0x104   : > { %v655_v24 = vpop.f32.mrb[10].mxu0  ;;  %v821_v26 = vpop.f32.mrb[12].mxu1 }
 0x105   : > { %v660_v27 = vadd.f32 %v655_v24, %v597_v11  ;;  %v5025_v28 = vpop.f32.mrb[11].mxu0  ;;  %v711_v29 = vadd.f32 %v704_v56, %v659_v21  ;;  %v5042_v30 = vpop.f32.mrb[13].mxu1 }
 0x106   : > { %v824_v31 = vpop.f32.mrb[14].mxu1 }
 0x107   : > { %5347 = vmatmul.mubr.msk.bf16.vlgmr.msra.gmra.mrb[116].mxu0 %vm396_vm2, %v3674_v25  ;;  %v712_v37 = vadd.f32 %v707_v1, %v660_v27  ;;  %v5043_v38 = vpop.f32.mrb[15].mxu1 }
 0x108   : > { %5357 = vmatpush3.bf16.msra.mxu0 %v5754_v51  ;;  %5358 = vmatprep.mubr.msk.bf16.mxu0 %vm5562_vm1, %v5561_v2 }
 0x109   : > { %5365 = vmatmul.mubr.msk.bf16.vlgmr.msra.gmra.mrb[120].mxu1 %vm396_vm2, %v3834_v32  ;;  %5368 = vmatprep.subr.bf16.mxu0 %v5561_v2 }
 0x10a   : > { %v758_v39 = vpop.f32.mrb[12].mxu0  ;;  %5375 = vmatpush3.bf16.msra.mxu1 %v5636_v3  ;;  %5376 = vmatprep.mubr.msk.bf16.mxu1 %vm5562_vm1, %v5561_v2  ;;  %v3980_v3 = vsel %vm383_vm3, %v3975_v41, %v3979_v43 }
 0x10b   : > { %v765_v44 = vadd.f32 %v758_v39, %v711_v29  ;;  %v5036_v45 = vpop.f32.mrb[13].mxu0  ;;  %5386 = vmatprep.subr.bf16.mxu1 %v5561_v2 }
 0x10c   : > { %v761_v46 = vpop.f32.mrb[14].mxu0  ;;  %v6165_v47 = vpop.f32.mrb[16].mxu1 }
 0x10d   : > { %v766_v48 = vadd.f32 %v761_v46, %v712_v37  ;;  %v5037_v50 = vpop.f32.mrb[15].mxu0  ;;  %v828_v52 = vadd.f32 %v821_v26, %v765_v44  ;;  %v5054_v53 = vpop.f32.mrb[17].mxu1 }
 0x10e   : > { %v6167_v54 = vpop.f32.mrb[18].mxu1 }
 0x10f   : > { %5359 = vmatmul.mubr.msk.bf16.vlgmr.msra.gmra.mrb[120].mxu0 %vm396_vm2, %v6113_v40  ;;  %v829_v56 = vadd.f32 %v824_v31, %v766_v48  ;;  %v5055_v57 = vpop.f32.mrb[19].mxu1  ;;  %v4069_v40 = vrot.slane %v6147_v19, 1  ;;  %v4178_v19 = vshll.u32 %v6195_v49, 16 }
 0x110   : > { %5369 = vmatpush3.bf16.msra.mxu0 %v5772_v59  ;;  %5370 = vmatprep.mubr.msk.bf16.mxu0 %vm5562_vm1, %v5561_v2 }
 0x111   : > { %5377 = vmatmul.mubr.msk.bf16.vlgmr.msra.gmra.mrb[124].mxu1 %vm396_vm2, %v3980_v3  ;;  %5380 = vmatprep.subr.bf16.mxu0 %v5561_v2  ;;  %v4070_v15 = vsel %vm491_vm4, %v4068_v62, %v4069_v40  ;;  %v4180_v28 = vrot.slane %v4178_v19, 1 }
 0x112   : > { %v873_v63 = vpop.f32.mrb[16].mxu0  ;;  %5387 = vmatpush3.bf16.msra.mxu1 %v5693_v17  ;;  %5388 = vmatprep.mubr.msk.bf16.mxu1 %vm5562_vm1, %v5561_v2 }
 0x113   : > { %v880_v1 = vadd.f32 %v873_v63, %v828_v52  ;;  %v5048_v5 = vpop.f32.mrb[17].mxu0  ;;  %5398 = vmatprep.subr.bf16.mxu1 %v5561_v2 }
 0x114   : > { %v876_v6 = vpop.f32.mrb[18].mxu0  ;;  %v1066_v9 = vpop.f32.mrb[20].mxu1 }
 0x115   : > { %v888_v17 = vadd.f32 %v6185_v61, %v880_v1  ;;  %v881_v11 = vadd.f32 %v876_v6, %v829_v56  ;;  %v5049_v12 = vpop.f32.mrb[19].mxu0  ;;  %v5066_v13 = vpop.f32.mrb[21].mxu1  ;;  %v5519_v56 = vld [vmem:[%s5687_s27 + $0x5c] ss:$0 sps:$4 sm:$0x11]  }
 0x116   : > { %v1069_v14 = vpop.f32.mrb[22].mxu1 }
 0x117   : > { %vm890_vm5 = vcmp.gt.f32.partialorder %v888_v17, 0.0  ;;  %v892_v20 = vmul.f32 0.1, %v888_v17  ;;  %v889_v21 = vadd.f32 %v6185_v61, %v881_v11  ;;  %5371 = vmatmul.mubr.msk.bf16.vlgmr.msra.gmra.mrb[124].mxu0 %vm396_vm2, %v3883_v8  ;;  %v5067_v23 = vpop.f32.mrb[23].mxu1 }
 0x118   : > { %5381 = vmatpush3.bf16.msra.mxu0 %v5639_v4  ;;  %5382 = vmatprep.mubr.msk.bf16.mxu0 %vm5562_vm1, %v5561_v2  ;;  %v4176_v4 = vor.u32 %v4175_v18, %v4171_v16 }
 0x119   : > { %v894_v24 = vsel %vm890_vm5, %v888_v17, %v892_v20  ;;  %vm891_vm7 = vcmp.gt.f32.partialorder %v889_v21, 0.0  ;;  %v893_v25 = vmul.f32 0.1, %v889_v21  ;;  %5389 = vmatmul.mubr.msk.bf16.vlgmr.msra.gmra.mrb[128].mxu1 %vm396_vm2, %v4070_v15  ;;  %5392 = vmatprep.subr.bf16.mxu0 %v5561_v2 }
 0x11a   : > { %v4836_v26 = vpack.c.bf16 %v894_v24, %v894_v24  ;;  %v1019_v27 = vpop.f32.mrb[20].mxu0  ;;  %5399 = vmatpush3.bf16.msra.mxu1 %v5726_v36  ;;  %5400 = vmatprep.mubr.msk.bf16.mxu1 %vm5562_vm1, %v5561_v2  ;;  %v4181_v41 = vsel %vm383_vm3, %v4176_v4, %v4180_v28 }
 0x11b   : > { %v895_v29 = vsel %vm891_vm7, %v889_v21, %v893_v25  ;;  %v1020_v30 = vadd.f32 %v1019_v27, %v6165_v47  ;;  %v5060_v31 = vpop.f32.mrb[21].mxu0  ;;  %5410 = vmatprep.subr.bf16.mxu1 %v5561_v2 }
 0x11c   : > { %905 = vst.msk [vmem:[%s6212_s26] sm:$0xf] %vm904_vm6, %v4836_v26  ;;  %v4837_v32 = vpack.c.bf16 %v895_v29, %v895_v29  ;;  %v1022_v33 = vpop.f32.mrb[22].mxu0  ;;  %v1177_v34 = vpop.f32.mrb[24].mxu1 }
 0x11d   : > { %v1023_v35 = vadd.f32 %v1022_v33, %v6167_v54  ;;  %v5061_v36 = vpop.f32.mrb[23].mxu0  ;;  %v1073_v37 = vadd.f32 %v1066_v9, %v1020_v30  ;;  %v5078_v38 = vpop.f32.mrb[25].mxu1  ;;  %v5518_v54 = vld [vmem:[%s5687_s27 + $0x54] sm:$0xff]   ;;  %v4338_v9 = vshll.u32 %v5519_v56, 16 }
 0x11e   : > { %906 = vst.msk [vmem:[%s6212_s26 + $0x4] sm:$0xf] %vm904_vm6, %v4837_v32  ;;  %v1180_v39 = vpop.f32.mrb[26].mxu1  ;;  %v4333_v62 = vshll.u32 %v5518_v54, 16  ;;  %v4388_v40 = vrot.slane %v5518_v54, 1  ;;  %v4331_v49 = vshrl.u32 %v5518_v54, 16 }
 0x11f   : > { %5383 = vmatmul.mubr.msk.bf16.vlgmr.msra.gmra.mrb[128].mxu0 %vm396_vm2, %v6135_v10  ;;  %v1074_v43 = vadd.f32 %v1069_v14, %v1023_v35  ;;  %v5079_v44 = vpop.f32.mrb[27].mxu1  ;;  %v4340_v19 = vrot.slane %v4338_v9, 1 }
 0x120   : > { %5393 = vmatpush3.bf16.msra.mxu0 %v5668_v7  ;;  %5394 = vmatprep.mubr.msk.bf16.mxu0 %vm5562_vm1, %v5561_v2  ;;  %v4335_v8 = vrot.slane %v4333_v62, 1 }
 0x121   : > { %5401 = vmatmul.mubr.msk.bf16.vlgmr.msra.gmra.mrb[132].mxu1 %vm396_vm2, %v4181_v41  ;;  %5404 = vmatprep.subr.bf16.mxu0 %v5561_v2 }
 0x122   : > { %v1117_v45 = vpop.f32.mrb[24].mxu0  ;;  %5411 = vmatpush3.bf16.msra.mxu1 %v5754_v51  ;;  %5412 = vmatprep.mubr.msk.bf16.mxu1 %vm5562_vm1, %v5561_v2  ;;  %v4336_v18 = vor.u32 %v4335_v8, %v4331_v49 }
 0x123   : > { %v1124_v10 = vadd.f32 %v1117_v45, %v1073_v37  ;;  %v5072_v46 = vpop.f32.mrb[25].mxu0  ;;  %5422 = vmatprep.subr.bf16.mxu1 %v5561_v2 }
 0x124   : > { %v1120_v7 = vpop.f32.mrb[26].mxu0  ;;  %v1277_v47 = vpop.f32.mrb[28].mxu1  ;;  %v4341_v25 = vsel %vm383_vm3, %v4336_v18, %v4340_v19 }
 0x125   : > { %v1125_v48 = vadd.f32 %v1120_v7, %v1074_v43  ;;  %v5073_v50 = vpop.f32.mrb[27].mxu0  ;;  %v1184_v52 = vadd.f32 %v1177_v34, %v1124_v10  ;;  %v5090_v53 = vpop.f32.mrb[29].mxu1 }
 0x126   : > { %v1280_v3 = vpop.f32.mrb[30].mxu1 }
 0x127   : > { %5395 = vmatmul.mubr.msk.bf16.vlgmr.msra.gmra.mrb[132].mxu0 %vm396_vm2, %v6171_v55  ;;  %v1185_v51 = vadd.f32 %v1180_v39, %v1125_v48  ;;  %v5091_v57 = vpop.f32.mrb[31].mxu1  ;;  %v4230_v55 = vsel %vm491_vm4, %v4228_v58, %v4229_v60 }
 0x128   : > { %5405 = vmatpush3.bf16.msra.mxu0 %v5703_v22  ;;  %5406 = vmatprep.mubr.msk.bf16.mxu0 %vm5562_vm1, %v5561_v2  ;;  %v4389_v22 = vrot.slane %v5519_v56, 1 }
 0x129   : > { %5413 = vmatmul.mubr.msk.bf16.vlgmr.msra.gmra.mrb[136].mxu1 %vm396_vm2, %v5518_v54  ;;  %5416 = vmatprep.subr.bf16.mxu0 %v5561_v2 }
 0x12a   : > { %v1226_v63 = vpop.f32.mrb[28].mxu0  ;;  %5423 = vmatpush3.bf16.msra.mxu1 %v5772_v59  ;;  %5424 = vmatprep.mubr.msk.bf16.mxu1 %vm5562_vm1, %v5561_v2  ;;  %v4390_v59 = vsel %vm491_vm4, %v4388_v40, %v4389_v22 }
 0x12b   : > { %v1233_v0 = vadd.f32 %v1226_v63, %v1184_v52  ;;  %v5084_v1 = vpop.f32.mrb[29].mxu0 }
 0x12c   : > { %v1229_v5 = vpop.f32.mrb[30].mxu0  ;;  %v1386_v6 = vpop.f32.mrb[32].mxu1 }
 0x12d   : > { %v1234_v17 = vadd.f32 %v1229_v5, %v1185_v51  ;;  %v5085_v11 = vpop.f32.mrb[31].mxu0  ;;  %v1284_v12 = vadd.f32 %v1277_v47, %v1233_v0  ;;  %v5102_v13 = vpop.f32.mrb[33].mxu1 }
 0x12e   : > { %v1389_v14 = vpop.f32.mrb[34].mxu1 }
 0x12f   : > { %5407 = vmatmul.mubr.msk.bf16.vlgmr.msra.gmra.mrb[136].mxu0 %vm396_vm2, %v4230_v55  ;;  %v1285_v15 = vadd.f32 %v1280_v3, %v1234_v17  ;;  %v5103_v16 = vpop.f32.mrb[35].mxu1 }
 0x130   : > { %5417 = vmatpush3.bf16.msra.mxu0 %v5736_v42  ;;  %5418 = vmatprep.mubr.msk.bf16.mxu0 %vm5562_vm1, %v5561_v2 }
 0x131   : > { %5425 = vmatmul.mubr.msk.bf16.vlgmr.msra.gmra.mrb[140].mxu1 %vm396_vm2, %v4390_v59 }
 0x132   : > { %v1337_v20 = vpop.f32.mrb[32].mxu0 }
 0x133   : > { %v1344_v21 = vadd.f32 %v1337_v20, %v1284_v12  ;;  %v5096_v23 = vpop.f32.mrb[33].mxu0 }
 0x134   : > { %v1340_v24 = vpop.f32.mrb[34].mxu0  ;;  %v1526_v26 = vpop.f32.mrb[36].mxu1 }
 0x135   : > { %v1393_v27 = vadd.f32 %v1386_v6, %v1344_v21  ;;  %v1345_v4 = vadd.f32 %v1340_v24, %v1285_v15  ;;  %v5097_v28 = vpop.f32.mrb[35].mxu0  ;;  %v5114_v29 = vpop.f32.mrb[37].mxu1 }
 0x136   : > { %v1529_v30 = vpop.f32.mrb[38].mxu1 }
 0x137   : > { %v1395_v42 = vadd.f32 %v6185_v61, %v1393_v27  ;;  %v1394_v31 = vadd.f32 %v1389_v14, %v1345_v4  ;;  %5419 = vmatmul.mubr.msk.bf16.vlgmr.msra.gmra.mrb[140].mxu0 %vm396_vm2, %v4341_v25  ;;  %v5115_v2 = vpop.f32.mrb[39].mxu1 }
 0x139   : > { %vm1397_vm8 = vcmp.gt.f32.partialorder %v1395_v42, 0.0  ;;  %v1399_v32 = vmul.f32 0.1, %v1395_v42  ;;  %v1396_v33 = vadd.f32 %v6185_v61, %v1394_v31 }
 0x13a   : > { %v1483_v34 = vpop.f32.mrb[36].mxu0 }
 0x13b   : > { %v1401_v35 = vsel %vm1397_vm8, %v1395_v42, %v1399_v32  ;;  %vm1398_vm9 = vcmp.gt.f32.partialorder %v1396_v33, 0.0  ;;  %v1400_v36 = vmul.f32 0.1, %v1396_v33  ;;  %v1527_v37 = vadd.f32 %v1526_v26, %v1483_v34  ;;  %v5108_v38 = vpop.f32.mrb[37].mxu0 }
 0x13c   : > { %v4838_v39 = vpack.c.bf16 %v1401_v35, %v1401_v35  ;;  %v1486_v41 = vpop.f32.mrb[38].mxu0  ;;  %v1624_v43 = vpop.f32.mrb[40].mxu1 }
 0x13d   : > { %v1402_v44 = vsel %vm1398_vm9, %v1396_v33, %v1400_v36  ;;  %v1530_v45 = vadd.f32 %v1529_v30, %v1486_v41  ;;  %v5109_v10 = vpop.f32.mrb[39].mxu0  ;;  %v5126_v46 = vpop.f32.mrb[41].mxu1 }
 0x13e   : > { %4664 = vst.msk [vmem:[%s6212_s26 + $0x8] sm:$0xf] %vm904_vm6, %v4838_v39  ;;  %v4839_v7 = vpack.c.bf16 %v1402_v44, %v1402_v44  ;;  %v1627_v47 = vpop.f32.mrb[42].mxu1 }
 0x13f   : > { %v5127_v48 = vpop.f32.mrb[43].mxu1 }
 0x140   : > { %4665 = vst.msk [vmem:[%s6212_s26 + $0xc] sm:$0xf] %vm904_vm6, %v4839_v7 }
 0x142   : > { %v1573_v50 = vpop.f32.mrb[40].mxu0 }
 0x143   : > { %v1580_v52 = vadd.f32 %v1573_v50, %v1527_v37  ;;  %v5120_v53 = vpop.f32.mrb[41].mxu0 }
 0x144   : > { %v1576_v54 = vpop.f32.mrb[42].mxu0  ;;  %v1733_v3 = vpop.f32.mrb[44].mxu1 }
 0x145   : > { %v1581_v56 = vadd.f32 %v1576_v54, %v1530_v45  ;;  %v5121_v51 = vpop.f32.mrb[43].mxu0  ;;  %v1631_v57 = vadd.f32 %v1624_v43, %v1580_v52  ;;  %v5138_v58 = vpop.f32.mrb[45].mxu1 }
 0x146   : > { %v1736_v60 = vpop.f32.mrb[46].mxu1 }
 0x147   : > { %v1632_v62 = vadd.f32 %v1627_v47, %v1581_v56  ;;  %v5139_v63 = vpop.f32.mrb[47].mxu1 }
 0x14a   : > { %v1684_v40 = vpop.f32.mrb[44].mxu0 }
 0x14b   : > { %v1691_v22 = vadd.f32 %v1684_v40, %v1631_v57  ;;  %v5132_v0 = vpop.f32.mrb[45].mxu0 }
 0x14c   : > { %v1687_v1 = vpop.f32.mrb[46].mxu0  ;;  %v1844_v5 = vpop.f32.mrb[48].mxu1 }
 0x14d   : > { %v1692_v55 = vadd.f32 %v1687_v1, %v1632_v62  ;;  %v5133_v6 = vpop.f32.mrb[47].mxu0  ;;  %v1740_v49 = vadd.f32 %v1733_v3, %v1691_v22  ;;  %v5150_v8 = vpop.f32.mrb[49].mxu1 }
 0x14e   : > { %v1847_v9 = vpop.f32.mrb[50].mxu1 }
 0x14f   : > { %v1741_v17 = vadd.f32 %v1736_v60, %v1692_v55  ;;  %v5151_v11 = vpop.f32.mrb[51].mxu1 }
 0x152   : > { %v1784_v12 = vpop.f32.mrb[48].mxu0 }
 0x153   : > { %v1791_v13 = vadd.f32 %v1784_v12, %v1740_v49  ;;  %v5144_v14 = vpop.f32.mrb[49].mxu0 }
 0x154   : > { %v1787_v59 = vpop.f32.mrb[50].mxu0  ;;  %v1990_v15 = vpop.f32.mrb[52].mxu1 }
 0x155   : > { %v1792_v16 = vadd.f32 %v1787_v59, %v1741_v17  ;;  %v5145_v18 = vpop.f32.mrb[51].mxu0  ;;  %v1851_v19 = vadd.f32 %v1844_v5, %v1791_v13  ;;  %v5162_v20 = vpop.f32.mrb[53].mxu1 }
 0x156   : > { %v1993_v21 = vpop.f32.mrb[54].mxu1 }
 0x157   : > { %v1852_v23 = vadd.f32 %v1847_v9, %v1792_v16  ;;  %v5163_v24 = vpop.f32.mrb[55].mxu1 }
 0x15a   : > { %v1893_v25 = vpop.f32.mrb[52].mxu0 }
 0x15b   : > { %v1900_v26 = vadd.f32 %v1893_v25, %v1851_v19  ;;  %v5156_v27 = vpop.f32.mrb[53].mxu0 }
 0x15c   : > { %v1896_v4 = vpop.f32.mrb[54].mxu0  ;;  %v2080_v28 = vpop.f32.mrb[56].mxu1 }
 0x15d   : > { %v1902_v29 = vadd.f32 %v6185_v61, %v1900_v26  ;;  %v1901_v30 = vadd.f32 %v1896_v4, %v1852_v23  ;;  %v5157_v42 = vpop.f32.mrb[55].mxu0  ;;  %v5174_v31 = vpop.f32.mrb[57].mxu1 }
 0x15e   : > { %v2083_v2 = vpop.f32.mrb[58].mxu1 }
 0x15f   : > { %vm1904_vm10 = vcmp.gt.f32.partialorder %v1902_v29, 0.0  ;;  %v1906_v32 = vmul.f32 0.1, %v1902_v29  ;;  %v1903_v33 = vadd.f32 %v6185_v61, %v1901_v30  ;;  %v5175_v34 = vpop.f32.mrb[59].mxu1 }
 0x161   : > { %v1908_v35 = vsel %vm1904_vm10, %v1902_v29, %v1906_v32  ;;  %vm1905_vm11 = vcmp.gt.f32.partialorder %v1903_v33, 0.0  ;;  %v1907_v36 = vmul.f32 0.1, %v1903_v33 }
 0x162   : > { %v4840_v37 = vpack.c.bf16 %v1908_v35, %v1908_v35  ;;  %v2033_v38 = vpop.f32.mrb[56].mxu0 }
 0x163   : > { %v1909_v39 = vsel %vm1905_vm11, %v1903_v33, %v1907_v36  ;;  %v2034_v41 = vadd.f32 %v2033_v38, %v1990_v15  ;;  %v5168_v43 = vpop.f32.mrb[57].mxu0 }
 0x164   : > { %4692 = vst.msk [vmem:[%s6212_s26 + $0x10] sm:$0xf] %vm904_vm6, %v4840_v37  ;;  %v4841_v44 = vpack.c.bf16 %v1909_v39, %v1909_v39  ;;  %v2036_v45 = vpop.f32.mrb[58].mxu0  ;;  %v2191_v10 = vpop.f32.mrb[60].mxu1 }
 0x165   : > { %v2037_v46 = vadd.f32 %v2036_v45, %v1993_v21  ;;  %v5169_v7 = vpop.f32.mrb[59].mxu0  ;;  %v2087_v47 = vadd.f32 %v2080_v28, %v2034_v41  ;;  %v5186_v48 = vpop.f32.mrb[61].mxu1 }
 0x166   : > { %4693 = vst.msk [vmem:[%s6212_s26 + $0x14] sm:$0xf] %vm904_vm6, %v4841_v44  ;;  %v2194_v50 = vpop.f32.mrb[62].mxu1 }
 0x167   : > { %v2088_v52 = vadd.f32 %v2083_v2, %v2037_v46  ;;  %v5187_v53 = vpop.f32.mrb[63].mxu1 }
 0x16a   : > { %v2131_v54 = vpop.f32.mrb[60].mxu0 }
 0x16b   : > { %v2138_v3 = vadd.f32 %v2131_v54, %v2087_v47  ;;  %v5180_v56 = vpop.f32.mrb[61].mxu0 }
 0x16c   : > { %v2134_v51 = vpop.f32.mrb[62].mxu0  ;;  %v2291_v57 = vpop.f32.mrb[64].mxu1 }
 0x16d   : > { %v2139_v58 = vadd.f32 %v2134_v51, %v2088_v52  ;;  %v5181_v60 = vpop.f32.mrb[63].mxu0  ;;  %v2198_v62 = vadd.f32 %v2191_v10, %v2138_v3  ;;  %v5198_v63 = vpop.f32.mrb[65].mxu1 }
 0x16e   : > { %v2294_v40 = vpop.f32.mrb[66].mxu1 }
 0x16f   : > { %v2199_v22 = vadd.f32 %v2194_v50, %v2139_v58  ;;  %v5199_v0 = vpop.f32.mrb[67].mxu1 }
 0x172   : > { %v2240_v1 = vpop.f32.mrb[64].mxu0 }
 0x173   : > { %v2247_v5 = vadd.f32 %v2240_v1, %v2198_v62  ;;  %v5192_v55 = vpop.f32.mrb[65].mxu0 }
 0x174   : > { %v2243_v6 = vpop.f32.mrb[66].mxu0  ;;  %v2400_v49 = vpop.f32.mrb[68].mxu1 }
 0x175   : > { %v2248_v8 = vadd.f32 %v2243_v6, %v2199_v22  ;;  %v5193_v9 = vpop.f32.mrb[67].mxu0  ;;  %v2298_v17 = vadd.f32 %v2291_v57, %v2247_v5  ;;  %v5210_v11 = vpop.f32.mrb[69].mxu1 }
 0x176   : > { %v2403_v12 = vpop.f32.mrb[70].mxu1 }
 0x177   : > { %v2299_v13 = vadd.f32 %v2294_v40, %v2248_v8  ;;  %v5211_v14 = vpop.f32.mrb[71].mxu1 }
 0x17a   : > { %v2351_v59 = vpop.f32.mrb[68].mxu0 }
 0x17b   : > { %v2358_v15 = vadd.f32 %v2351_v59, %v2298_v17  ;;  %v5204_v16 = vpop.f32.mrb[69].mxu0 }
 0x17c   : > { %v2354_v18 = vpop.f32.mrb[70].mxu0  ;;  %v2540_v19 = vpop.f32.mrb[72].mxu1 }
 0x17d   : > { %v2407_v20 = vadd.f32 %v2400_v49, %v2358_v15  ;;  %v2359_v21 = vadd.f32 %v2354_v18, %v2299_v13  ;;  %v5205_v23 = vpop.f32.mrb[71].mxu0  ;;  %v5222_v24 = vpop.f32.mrb[73].mxu1 }
 0x17e   : > { %v2543_v25 = vpop.f32.mrb[74].mxu1 }
 0x17f   : > { %v2409_v26 = vadd.f32 %v6185_v61, %v2407_v20  ;;  %v2408_v27 = vadd.f32 %v2403_v12, %v2359_v21  ;;  %v5223_v4 = vpop.f32.mrb[75].mxu1 }
 0x181   : > { %vm2411_vm12 = vcmp.gt.f32.partialorder %v2409_v26, 0.0  ;;  %v2413_v28 = vmul.f32 0.1, %v2409_v26  ;;  %v2410_v29 = vadd.f32 %v6185_v61, %v2408_v27 }
 0x182   : > { %v2497_v30 = vpop.f32.mrb[72].mxu0 }
 0x183   : > { %v2415_v42 = vsel %vm2411_vm12, %v2409_v26, %v2413_v28  ;;  %vm2412_vm13 = vcmp.gt.f32.partialorder %v2410_v29, 0.0  ;;  %v2414_v31 = vmul.f32 0.1, %v2410_v29  ;;  %v2541_v2 = vadd.f32 %v2540_v19, %v2497_v30  ;;  %v5216_v32 = vpop.f32.mrb[73].mxu0 }
 0x184   : > { %v4842_v33 = vpack.c.bf16 %v2415_v42, %v2415_v42  ;;  %v2500_v34 = vpop.f32.mrb[74].mxu0  ;;  %v2638_v35 = vpop.f32.mrb[76].mxu1 }
 0x185   : > { %v2416_v36 = vsel %vm2412_vm13, %v2410_v29, %v2414_v31  ;;  %v2544_v37 = vadd.f32 %v2543_v25, %v2500_v34  ;;  %v5217_v38 = vpop.f32.mrb[75].mxu0  ;;  %v5234_v39 = vpop.f32.mrb[77].mxu1 }
 0x186   : > { %4720 = vst.msk [vmem:[%s6212_s26 + $0x18] sm:$0xf] %vm904_vm6, %v4842_v33  ;;  %v4843_v41 = vpack.c.bf16 %v2416_v36, %v2416_v36  ;;  %v2641_v43 = vpop.f32.mrb[78].mxu1 }
 0x187   : > { %v5235_v44 = vpop.f32.mrb[79].mxu1 }
 0x188   : > { %4721 = vst.msk [vmem:[%s6212_s26 + $0x1c] sm:$0xf] %vm904_vm6, %v4843_v41 }
 0x18a   : > { %v2587_v45 = vpop.f32.mrb[76].mxu0 }
 0x18b   : > { %v2594_v10 = vadd.f32 %v2587_v45, %v2541_v2  ;;  %v5228_v46 = vpop.f32.mrb[77].mxu0 }
 0x18c   : > { %v2590_v7 = vpop.f32.mrb[78].mxu0  ;;  %v2747_v47 = vpop.f32.mrb[80].mxu1 }
 0x18d   : > { %v2595_v48 = vadd.f32 %v2590_v7, %v2544_v37  ;;  %v5229_v50 = vpop.f32.mrb[79].mxu0  ;;  %v2645_v52 = vadd.f32 %v2638_v35, %v2594_v10  ;;  %v5246_v53 = vpop.f32.mrb[81].mxu1 }
 0x18e   : > { %v2750_v54 = vpop.f32.mrb[82].mxu1 }
 0x18f   : > { %v2646_v3 = vadd.f32 %v2641_v43, %v2595_v48  ;;  %v5247_v56 = vpop.f32.mrb[83].mxu1 }
 0x192   : > { %v2698_v51 = vpop.f32.mrb[80].mxu0 }
 0x193   : > { %v2705_v57 = vadd.f32 %v2698_v51, %v2645_v52  ;;  %v5240_v58 = vpop.f32.mrb[81].mxu0 }
 0x194   : > { %v2701_v60 = vpop.f32.mrb[82].mxu0  ;;  %v2858_v62 = vpop.f32.mrb[84].mxu1 }
 0x195   : > { %v2706_v63 = vadd.f32 %v2701_v60, %v2646_v3  ;;  %v5241_v40 = vpop.f32.mrb[83].mxu0  ;;  %v2754_v22 = vadd.f32 %v2747_v47, %v2705_v57  ;;  %v5258_v0 = vpop.f32.mrb[85].mxu1 }
 0x196   : > { %v2861_v1 = vpop.f32.mrb[86].mxu1 }
 0x197   : > { %v2755_v5 = vadd.f32 %v2750_v54, %v2706_v63  ;;  %v5259_v55 = vpop.f32.mrb[87].mxu1 }
 0x19a   : > { %v2798_v6 = vpop.f32.mrb[84].mxu0 }
 0x19b   : > { %v2805_v49 = vadd.f32 %v2798_v6, %v2754_v22  ;;  %v5252_v8 = vpop.f32.mrb[85].mxu0 }
 0x19c   : > { %v2801_v9 = vpop.f32.mrb[86].mxu0  ;;  %v3004_v17 = vpop.f32.mrb[88].mxu1 }
 0x19d   : > { %v2806_v11 = vadd.f32 %v2801_v9, %v2755_v5  ;;  %v5253_v12 = vpop.f32.mrb[87].mxu0  ;;  %v2865_v13 = vadd.f32 %v2858_v62, %v2805_v49  ;;  %v5270_v14 = vpop.f32.mrb[89].mxu1 }
 0x19e   : > { %v3007_v59 = vpop.f32.mrb[90].mxu1 }
 0x19f   : > { %v2866_v15 = vadd.f32 %v2861_v1, %v2806_v11  ;;  %v5271_v16 = vpop.f32.mrb[91].mxu1 }
 0x1a2   : > { %v2907_v18 = vpop.f32.mrb[88].mxu0 }
 0x1a3   : > { %v2914_v19 = vadd.f32 %v2907_v18, %v2865_v13  ;;  %v5264_v20 = vpop.f32.mrb[89].mxu0 }
 0x1a4   : > { %v2910_v21 = vpop.f32.mrb[90].mxu0  ;;  %v3094_v23 = vpop.f32.mrb[92].mxu1 }
 0x1a5   : > { %v2916_v24 = vadd.f32 %v6185_v61, %v2914_v19  ;;  %v2915_v25 = vadd.f32 %v2910_v21, %v2866_v15  ;;  %v5265_v26 = vpop.f32.mrb[91].mxu0  ;;  %v5282_v27 = vpop.f32.mrb[93].mxu1 }
 0x1a6   : > { %v3097_v4 = vpop.f32.mrb[94].mxu1 }
 0x1a7   : > { %vm2918_vm14 = vcmp.gt.f32.partialorder %v2916_v24, 0.0  ;;  %v2920_v28 = vmul.f32 0.1, %v2916_v24  ;;  %v2917_v29 = vadd.f32 %v6185_v61, %v2915_v25  ;;  %v5283_v30 = vpop.f32.mrb[95].mxu1 }
 0x1a9   : > { %v2922_v42 = vsel %vm2918_vm14, %v2916_v24, %v2920_v28  ;;  %vm2919_vm15 = vcmp.gt.f32.partialorder %v2917_v29, 0.0  ;;  %v2921_v31 = vmul.f32 0.1, %v2917_v29 }
 0x1aa   : > { %v4844_v2 = vpack.c.bf16 %v2922_v42, %v2922_v42  ;;  %v3047_v32 = vpop.f32.mrb[92].mxu0 }
 0x1ab   : > { %v2923_v33 = vsel %vm2919_vm15, %v2917_v29, %v2921_v31  ;;  %v3048_v34 = vadd.f32 %v3047_v32, %v3004_v17  ;;  %v5276_v35 = vpop.f32.mrb[93].mxu0 }
 0x1ac   : > { %4748 = vst.msk [vmem:[%s6212_s26 + $0x20] sm:$0xf] %vm904_vm6, %v4844_v2  ;;  %v4845_v36 = vpack.c.bf16 %v2923_v33, %v2923_v33  ;;  %v3050_v37 = vpop.f32.mrb[94].mxu0  ;;  %v3205_v38 = vpop.f32.mrb[96].mxu1 }
 0x1ad   : > { %v3051_v39 = vadd.f32 %v3050_v37, %v3007_v59  ;;  %v5277_v41 = vpop.f32.mrb[95].mxu0  ;;  %v3101_v43 = vadd.f32 %v3094_v23, %v3048_v34  ;;  %v5294_v44 = vpop.f32.mrb[97].mxu1 }
 0x1ae   : > { %4749 = vst.msk [vmem:[%s6212_s26 + $0x24] sm:$0xf] %vm904_vm6, %v4845_v36  ;;  %v3208_v45 = vpop.f32.mrb[98].mxu1 }
 0x1af   : > { %v3102_v10 = vadd.f32 %v3097_v4, %v3051_v39  ;;  %v5295_v46 = vpop.f32.mrb[99].mxu1 }
 0x1b2   : > { %v3145_v7 = vpop.f32.mrb[96].mxu0 }
 0x1b3   : > { %v3152_v47 = vadd.f32 %v3145_v7, %v3101_v43  ;;  %v5288_v48 = vpop.f32.mrb[97].mxu0 }
 0x1b4   : > { %v3148_v50 = vpop.f32.mrb[98].mxu0  ;;  %v3305_v52 = vpop.f32.mrb[100].mxu1 }
 0x1b5   : > { %v3153_v53 = vadd.f32 %v3148_v50, %v3102_v10  ;;  %v5289_v54 = vpop.f32.mrb[99].mxu0  ;;  %v3212_v3 = vadd.f32 %v3205_v38, %v3152_v47  ;;  %v5306_v56 = vpop.f32.mrb[101].mxu1 }
 0x1b6   : > { %v3308_v51 = vpop.f32.mrb[102].mxu1 }
 0x1b7   : > { %v3213_v57 = vadd.f32 %v3208_v45, %v3153_v53  ;;  %v5307_v58 = vpop.f32.mrb[103].mxu1 }
 0x1ba   : > { %v3254_v60 = vpop.f32.mrb[100].mxu0 }
 0x1bb   : > { %v3261_v62 = vadd.f32 %v3254_v60, %v3212_v3  ;;  %v5300_v63 = vpop.f32.mrb[101].mxu0 }
 0x1bc   : > { %v3257_v40 = vpop.f32.mrb[102].mxu0  ;;  %v3414_v22 = vpop.f32.mrb[104].mxu1 }
 0x1bd   : > { %v3262_v0 = vadd.f32 %v3257_v40, %v3213_v57  ;;  %v5301_v1 = vpop.f32.mrb[103].mxu0  ;;  %v3312_v5 = vadd.f32 %v3305_v52, %v3261_v62  ;;  %v5318_v55 = vpop.f32.mrb[105].mxu1 }
 0x1be   : > { %v3417_v6 = vpop.f32.mrb[106].mxu1 }
 0x1bf   : > { %v3313_v49 = vadd.f32 %v3308_v51, %v3262_v0  ;;  %v5319_v8 = vpop.f32.mrb[107].mxu1 }
 0x1c2   : > { %v3365_v9 = vpop.f32.mrb[104].mxu0 }
 0x1c3   : > { %v3372_v17 = vadd.f32 %v3365_v9, %v3312_v5  ;;  %v5312_v11 = vpop.f32.mrb[105].mxu0 }
 0x1c4   : > { %v3368_v12 = vpop.f32.mrb[106].mxu0  ;;  %v3554_v13 = vpop.f32.mrb[108].mxu1 }
 0x1c5   : > { %v3421_v14 = vadd.f32 %v3414_v22, %v3372_v17  ;;  %v3373_v59 = vadd.f32 %v3368_v12, %v3313_v49  ;;  %v5313_v15 = vpop.f32.mrb[107].mxu0  ;;  %v5330_v16 = vpop.f32.mrb[109].mxu1 }
 0x1c6   : > { %v3557_v18 = vpop.f32.mrb[110].mxu1 }
 0x1c7   : > { %v3423_v19 = vadd.f32 %v6185_v61, %v3421_v14  ;;  %v3422_v20 = vadd.f32 %v3417_v6, %v3373_v59  ;;  %v5331_v21 = vpop.f32.mrb[111].mxu1 }
 0x1c9   : > { %vm3425_vm0 = vcmp.gt.f32.partialorder %v3423_v19, 0.0  ;;  %v3427_v23 = vmul.f32 0.1, %v3423_v19  ;;  %v3424_v24 = vadd.f32 %v6185_v61, %v3422_v20 }
 0x1ca   : > { %v3511_v25 = vpop.f32.mrb[108].mxu0 }
 0x1cb   : > { %v3429_v26 = vsel %vm3425_vm0, %v3423_v19, %v3427_v23  ;;  %vm3426_vm1 = vcmp.gt.f32.partialorder %v3424_v24, 0.0  ;;  %v3428_v27 = vmul.f32 0.1, %v3424_v24  ;;  %v3555_v4 = vadd.f32 %v3554_v13, %v3511_v25  ;;  %v5324_v28 = vpop.f32.mrb[109].mxu0 }
 0x1cc   : > { %v4846_v29 = vpack.c.bf16 %v3429_v26, %v3429_v26  ;;  %v3514_v30 = vpop.f32.mrb[110].mxu0  ;;  %v3652_v42 = vpop.f32.mrb[112].mxu1 }
 0x1cd   : > { %v3430_v31 = vsel %vm3426_vm1, %v3424_v24, %v3428_v27  ;;  %v3558_v2 = vadd.f32 %v3557_v18, %v3514_v30  ;;  %v5325_v32 = vpop.f32.mrb[111].mxu0  ;;  %v5342_v33 = vpop.f32.mrb[113].mxu1 }
 0x1ce   : > { %4776 = vst.msk [vmem:[%s6212_s26 + $0x28] sm:$0xf] %vm904_vm6, %v4846_v29  ;;  %v4847_v34 = vpack.c.bf16 %v3430_v31, %v3430_v31  ;;  %v3655_v35 = vpop.f32.mrb[114].mxu1 }
 0x1cf   : > { %v5343_v36 = vpop.f32.mrb[115].mxu1 }
 0x1d0   : > { %4777 = vst.msk [vmem:[%s6212_s26 + $0x2c] sm:$0xf] %vm904_vm6, %v4847_v34 }
 0x1d2   : > { %v3601_v37 = vpop.f32.mrb[112].mxu0 }
 0x1d3   : > { %v3608_v38 = vadd.f32 %v3601_v37, %v3555_v4  ;;  %v5336_v39 = vpop.f32.mrb[113].mxu0 }
 0x1d4   : > { %v3604_v41 = vpop.f32.mrb[114].mxu0  ;;  %v3761_v43 = vpop.f32.mrb[116].mxu1 }
 0x1d5   : > { %v3609_v44 = vadd.f32 %v3604_v41, %v3558_v2  ;;  %v5337_v45 = vpop.f32.mrb[115].mxu0  ;;  %v3659_v10 = vadd.f32 %v3652_v42, %v3608_v38  ;;  %v5354_v46 = vpop.f32.mrb[117].mxu1 }
 0x1d6   : > { %v3764_v7 = vpop.f32.mrb[118].mxu1 }
 0x1d7   : > { %v3660_v47 = vadd.f32 %v3655_v35, %v3609_v44  ;;  %v5355_v48 = vpop.f32.mrb[119].mxu1 }
 0x1da   : > { %v3712_v50 = vpop.f32.mrb[116].mxu0 }
 0x1db   : > { %v3719_v52 = vadd.f32 %v3712_v50, %v3659_v10  ;;  %v5348_v53 = vpop.f32.mrb[117].mxu0 }
 0x1dc   : > { %v3715_v54 = vpop.f32.mrb[118].mxu0  ;;  %v3872_v3 = vpop.f32.mrb[120].mxu1 }
 0x1dd   : > { %v3720_v56 = vadd.f32 %v3715_v54, %v3660_v47  ;;  %v5349_v51 = vpop.f32.mrb[119].mxu0  ;;  %v3768_v57 = vadd.f32 %v3761_v43, %v3719_v52  ;;  %v5366_v58 = vpop.f32.mrb[121].mxu1 }
 0x1de   : > { %v3875_v60 = vpop.f32.mrb[122].mxu1 }
 0x1df   : > { %v3769_v62 = vadd.f32 %v3764_v7, %v3720_v56  ;;  %v5367_v63 = vpop.f32.mrb[123].mxu1 }
 0x1e2   : > { %v3812_v40 = vpop.f32.mrb[120].mxu0 }
 0x1e3   : > { %v3819_v22 = vadd.f32 %v3812_v40, %v3768_v57  ;;  %v5360_v0 = vpop.f32.mrb[121].mxu0 }
 0x1e4   : > { %v3815_v1 = vpop.f32.mrb[122].mxu0  ;;  %v4018_v5 = vpop.f32.mrb[124].mxu1 }
 0x1e5   : > { %v3820_v55 = vadd.f32 %v3815_v1, %v3769_v62  ;;  %v5361_v6 = vpop.f32.mrb[123].mxu0  ;;  %v3879_v49 = vadd.f32 %v3872_v3, %v3819_v22  ;;  %v5378_v8 = vpop.f32.mrb[125].mxu1 }
 0x1e6   : > { %v4021_v9 = vpop.f32.mrb[126].mxu1 }
 0x1e7   : > { %v3880_v17 = vadd.f32 %v3875_v60, %v3820_v55  ;;  %v5379_v11 = vpop.f32.mrb[127].mxu1 }
 0x1ea   : > { %v3921_v12 = vpop.f32.mrb[124].mxu0 }
 0x1eb   : > { %v3928_v13 = vadd.f32 %v3921_v12, %v3879_v49  ;;  %v5372_v14 = vpop.f32.mrb[125].mxu0 }
 0x1ec   : > { %v3924_v59 = vpop.f32.mrb[126].mxu0  ;;  %v4108_v15 = vpop.f32.mrb[128].mxu1 }
 0x1ed   : > { %v3930_v16 = vadd.f32 %v6185_v61, %v3928_v13  ;;  %v3929_v18 = vadd.f32 %v3924_v59, %v3880_v17  ;;  %v5373_v19 = vpop.f32.mrb[127].mxu0  ;;  %v5390_v20 = vpop.f32.mrb[129].mxu1 }
 0x1ee   : > { %v4111_v21 = vpop.f32.mrb[130].mxu1 }
 0x1ef   : > { %vm3932_vm2 = vcmp.gt.f32.partialorder %v3930_v16, 0.0  ;;  %v3934_v23 = vmul.f32 0.1, %v3930_v16  ;;  %v3931_v24 = vadd.f32 %v6185_v61, %v3929_v18  ;;  %v5391_v25 = vpop.f32.mrb[131].mxu1 }
 0x1f1   : > { %v3936_v26 = vsel %vm3932_vm2, %v3930_v16, %v3934_v23  ;;  %vm3933_vm3 = vcmp.gt.f32.partialorder %v3931_v24, 0.0  ;;  %v3935_v27 = vmul.f32 0.1, %v3931_v24 }
 0x1f2   : > { %v4848_v4 = vpack.c.bf16 %v3936_v26, %v3936_v26  ;;  %v4061_v28 = vpop.f32.mrb[128].mxu0 }
 0x1f3   : > { %v3937_v29 = vsel %vm3933_vm3, %v3931_v24, %v3935_v27  ;;  %v4062_v30 = vadd.f32 %v4061_v28, %v4018_v5  ;;  %v5384_v42 = vpop.f32.mrb[129].mxu0 }
 0x1f4   : > { %4804 = vst.msk [vmem:[%s6212_s26 + $0x30] sm:$0xf] %vm904_vm6, %v4848_v4  ;;  %v4849_v31 = vpack.c.bf16 %v3937_v29, %v3937_v29  ;;  %v4064_v2 = vpop.f32.mrb[130].mxu0  ;;  %v4219_v32 = vpop.f32.mrb[132].mxu1 }
 0x1f5   : > { %v4065_v33 = vadd.f32 %v4064_v2, %v4021_v9  ;;  %v5385_v34 = vpop.f32.mrb[131].mxu0  ;;  %v4115_v35 = vadd.f32 %v4108_v15, %v4062_v30  ;;  %v5402_v36 = vpop.f32.mrb[133].mxu1  ;;  %v5520_v9 = vld [vmem:[%s6323_s4] ss:$0 sm:$0xff] }
 0x1f6   : > { %4805 = vst.msk [vmem:[%s6212_s26 + $0x34] sm:$0xf] %vm904_vm6, %v4849_v31  ;;  %v4222_v61 = vpop.f32.mrb[134].mxu1 }
 0x1f7   : > { %v4116_v37 = vadd.f32 %v4111_v21, %v4065_v33  ;;  %v5403_v38 = vpop.f32.mrb[135].mxu1 }
 0x1fa   : > { %v4159_v39 = vpop.f32.mrb[132].mxu0 }
 0x1fb   : > { %v4166_v41 = vadd.f32 %v4159_v39, %v4115_v35  ;;  %v5396_v43 = vpop.f32.mrb[133].mxu0 }
 0x1fc   : > { %v4162_v44 = vpop.f32.mrb[134].mxu0  ;;  %v4319_v45 = vpop.f32.mrb[136].mxu1 }
 0x1fd   : > { %v4167_v10 = vadd.f32 %v4162_v44, %v4116_v37  ;;  %v5397_v46 = vpop.f32.mrb[135].mxu0  ;;  %v4226_v7 = vadd.f32 %v4219_v32, %v4166_v41  ;;  %v5414_v47 = vpop.f32.mrb[137].mxu1 }
 0x1fe   : > { %v4322_v48 = vpop.f32.mrb[138].mxu1 }
 0x1ff   : > { %v4227_v50 = vadd.f32 %v4222_v61, %v4167_v10  ;;  %v5415_v52 = vpop.f32.mrb[139].mxu1 }
 0x202   : > { %v4268_v53 = vpop.f32.mrb[136].mxu0 }
 0x203   : > { %v4275_v54 = vadd.f32 %v4268_v53, %v4226_v7  ;;  %v5408_v3 = vpop.f32.mrb[137].mxu0 }
 0x204   : > { %v4271_v56 = vpop.f32.mrb[138].mxu0  ;;  %v4428_v51 = vpop.f32.mrb[140].mxu1 }
 0x205   : > { %v4276_v57 = vadd.f32 %v4271_v56, %v4227_v50  ;;  %v5409_v58 = vpop.f32.mrb[139].mxu0  ;;  %v4326_v60 = vadd.f32 %v4319_v45, %v4275_v54  ;;  %v5426_v62 = vpop.f32.mrb[141].mxu1 }
 0x206   : > { %v4431_v63 = vpop.f32.mrb[142].mxu1 }
 0x207   : > { %v4327_v40 = vadd.f32 %v4322_v48, %v4276_v57  ;;  %v5427_v22 = vpop.f32.mrb[143].mxu1 }
 0x20a   : > { %v4379_v0 = vpop.f32.mrb[140].mxu0 }
 0x20b   : > { %v4386_v1 = vadd.f32 %v4379_v0, %v4326_v60  ;;  %v5420_v5 = vpop.f32.mrb[141].mxu0 }
 0x20c   : > { %v4382_v55 = vpop.f32.mrb[142].mxu0 }
 0x20d   : > { %v4435_v6 = vadd.f32 %v4428_v51, %v4386_v1  ;;  %v4387_v49 = vadd.f32 %v4382_v55, %v4327_v40  ;;  %v5421_v8 = vpop.f32.mrb[143].mxu0 }
 0x20f   : > { %v4437_v17 = vadd.f32 %v5520_v9, %v4435_v6  ;;  %v4436_v11 = vadd.f32 %v4431_v63, %v4387_v49 }
 0x211   : > { %vm4439_vm4 = vcmp.gt.f32.partialorder %v4437_v17, 0.0  ;;  %v4441_v12 = vmul.f32 0.1, %v4437_v17  ;;  %v4438_v13 = vadd.f32 %v5520_v9, %v4436_v11 }
 0x213   : > { %v4443_v14 = vsel %vm4439_vm4, %v4437_v17, %v4441_v12  ;;  %vm4440_vm5 = vcmp.gt.f32.partialorder %v4438_v13, 0.0  ;;  %v4442_v59 = vmul.f32 0.1, %v4438_v13 }
 0x214   : > { %v4850_v15 = vpack.c.bf16 %v4443_v14, %v4443_v14 }
 0x215   : > { %v4444_v16 = vsel %vm4440_vm5, %v4438_v13, %v4442_v59 }
 0x216   : > { %4832 = vst.msk [vmem:[%s6212_s26 + $0x38] sm:$0xf] %vm904_vm6, %v4850_v15  ;;  %v4851_v18 = vpack.c.bf16 %v4444_v16, %v4444_v16 }
 0x218   : > { %4833 = vst.msk [vmem:[%s6212_s26 + $0x3c] sm:$0xf] %vm904_vm6, %v4851_v18 }
 0x219 PF: > { %s15_s22 = sadd.s32 1, %s5559_s22   ;;  %s6325_s18 = smov %s5551_s20 }
 0x21a   : > { %p12_p7 = scmp.ge.s32.totalorder %s15_s22, 6   ;;  %s6326_s19 = smov %s5555_s21 }
 0x21b   : > { %s6327_s20 = smov %s6330_s23  ;;  %s6328_s21 = smov %s6334_s24 }
 0x21c   :  { %14 = sbr.rel (!%p12_p7) target bundleno = 3 (0x3), region = 112 }

</bundles_post_ra>
